<compile_context>
chip_gen: v5e
topology: v5e:2x2
jax: 0.10.0
libtpu: 0.0.40
codegen_flags: <defaults>
</compile_context>

<pallas_src>
import math
import jax
import jax.numpy as jnp
from jax.experimental import pallas as pl
from jax.experimental.pallas import tpu as pltpu

# ---- model config (DistilBertConfig(hidden=384, heads=6, inter=768, layers=3)) ----
HIDDEN = 384
HEADS = 6
HEAD_DIM = HIDDEN // HEADS          # 64
PAIRS = HEADS // 2                  # heads processed two-at-a-time
PAIR_W = 2 * HEAD_DIM               # 128 (one full lane width per head pair)
INTERMEDIATE = 768
LAYERS = 3
VOCAB = 1000                        # synthetic (real config is 30522; ids stay < VOCAB)
MAX_POS = 512
EPS = 1e-12                         # DistilBERT LayerNorm eps
MASK_BIAS = -1e9                    # finite additive mask fill (avoids -inf/NaN of f32-min add)
CLS_HID = 128                       # classifier hidden width
CLS_PAD = 128                       # logits padded to a full lane width (real classes = 2)

assert HEADS % 2 == 0


def _layer_norm(x, gamma, beta):
    mean = jnp.mean(x, axis=-1, keepdims=True)
    var = jnp.mean(jnp.square(x - mean), axis=-1, keepdims=True)
    return (x - mean) * jax.lax.rsqrt(var + EPS) * gamma + beta


def _gelu_exact(x):
    # transformers' "gelu" == exact erf GELU
    return x * 0.5 * (1.0 + jax.lax.erf(x / math.sqrt(2.0)))


def _softmax_lastdim(s):
    m = jnp.max(s, axis=-1, keepdims=True)
    e = jnp.exp(s - m)
    return e * pl.reciprocal(jnp.sum(e, axis=-1, keepdims=True), approx=True)


# -------------------------- fused Pallas kernel --------------------------

def fused_encoder_kernel(emb_ref, bias_ref, eg_ref, eb_ref,
                         qkvw_ref, qkvb_ref, ow_ref, ob_ref, l1g_ref, l1b_ref,
                         w1_ref, b1_ref, w2_ref, b2_ref, l2g_ref, l2b_ref,
                         cw1_ref, cb1_ref, cw2_ref, cb2_ref,
                         logits_ref, x_scratch):
    """grid = (batch_tiles, LAYERS).  One DistilBERT TransformerBlock per layer step, with the
    embedding LayerNorm at l==0 and the classifier head at l==LAYERS-1.  Per-layer weights are
    resident (LAYERS, ...) VMEM blocks indexed at [l]."""
    l = pl.program_id(1)

    # ---- prologue: embedding LayerNorm into the resident activation scratch ----
    @pl.when(l == 0)
    def _():
        x_scratch[...] = _layer_norm(emb_ref[...], eg_ref[...], eb_ref[...])

    x = x_scratch[...]                                  # (Bt, S, H) f32
    Bt, S, H = x.shape
    xf = x.reshape(Bt * S, H)
    xb = xf.astype(jnp.bfloat16)

    # ---- fused QKV projection: one (Bt*S,384) @ (384,1152) bf16 MXU pass ----
    # 1/sqrt(head_dim) is already folded into the Q columns of qkv_w / qkv_b.
    qkv = jnp.dot(xb, qkvw_ref[l], preferred_element_type=jnp.float32) + qkvb_ref[l]
    q3 = qkv[:, :HIDDEN].reshape(Bt, S, HIDDEN)          # 128-aligned slices of the 1152 lanes
    k3 = qkv[:, HIDDEN:2 * HIDDEN].reshape(Bt, S, HIDDEN)
    v3 = qkv[:, 2 * HIDDEN:].reshape(Bt, S, HIDDEN)

    bias = bias_ref[...]                                 # (Bt, 1, Sk) additive, precomputed

    # ---- attention: head PAIRS on 128-lane-aligned slices ----
    # Within a pair, head "even" lives in lanes [0,64), head "odd" in [64,128).
    lane = jax.lax.broadcasted_iota(jnp.int32, (1, 1, PAIR_W), 2)
    even_lane = lane < HEAD_DIM

    ctx_pairs = []
    for p in range(PAIRS):                               # static loop over 3 aligned pairs
        sl = slice(p * PAIR_W, (p + 1) * PAIR_W)         # 0/128/256: whole-vreg slices
        q_pair = q3[:, :, sl]
        k_pair = k3[:, :, sl]
        v_pair = v3[:, :, sl]
        # Zero the other head's lanes of Q so the 128-wide contraction reduces to the
        # correct per-head 64-wide dot (zeros contribute nothing).
        q_e = jnp.where(even_lane, q_pair, 0.0)
        q_o = jnp.where(even_lane, 0.0, q_pair)
        s_e = jnp.einsum('bqd,bkd->bqk', q_e, k_pair,
                         preferred_element_type=jnp.float32) + bias
        s_o = jnp.einsum('bqd,bkd->bqk', q_o, k_pair,
                         preferred_element_type=jnp.float32) + bias
        p_e = _softmax_lastdim(s_e)
        p_o = _softmax_lastdim(s_o)
        c_e = jnp.einsum('bqk,bkd->bqd', p_e, v_pair, preferred_element_type=jnp.float32)
        c_o = jnp.einsum('bqk,bkd->bqd', p_o, v_pair, preferred_element_type=jnp.float32)
        # Keep the valid half of each context (even head -> lanes [0,64), odd -> [64,128)).
        ctx_pairs.append(jnp.where(even_lane, c_e, c_o))
    ctx = jnp.concatenate(ctx_pairs, axis=-1).reshape(Bt * S, HIDDEN)   # 3-way aligned concat

    attn = jnp.dot(ctx.astype(jnp.bfloat16), ow_ref[l],
                   preferred_element_type=jnp.float32) + ob_ref[l]
    sa = _layer_norm(attn + xf, l1g_ref[l], l1b_ref[l])                 # sa_layer_norm (f32)

    # ---- FFN (GELU) ----
    h1 = jnp.dot(sa.astype(jnp.bfloat16), w1_ref[l],
                 preferred_element_type=jnp.float32) + b1_ref[l]
    h1 = _gelu_exact(h1)
    ffn = jnp.dot(h1.astype(jnp.bfloat16), w2_ref[l],
                  preferred_element_type=jnp.float32) + b2_ref[l]
    out = _layer_norm(ffn + sa, l2g_ref[l], l2b_ref[l])                 # output_layer_norm (f32)

    out3 = out.reshape(Bt, S, H)
    x_scratch[...] = out3                                               # feed next layer

    # ---- epilogue: classifier head on CLS token (bf16 matmuls, f32 accumulate) ----
    @pl.when(l == pl.num_programs(1) - 1)
    def _():
        cls = out3[:, 0, :]                                             # last_hidden_state[:, 0, :]
        hcls = jnp.dot(cls.astype(jnp.bfloat16), cw1_ref[...],
                       preferred_element_type=jnp.float32) + cb1_ref[...]
        hcls = jnp.maximum(hcls, 0.0)                                   # ReLU; Dropout = identity
        logits_ref[...] = jnp.dot(hcls.astype(jnp.bfloat16), cw2_ref[...],
                                  preferred_element_type=jnp.float32) + cb2_ref[...]


# -------------------------- pallas_call wrapper --------------------------

def _pick_b_tile(batch, seq):
    """Largest divisor of `batch` with b_tile*seq <= ~256 rows: fills the MXU M dimension on
    v6e/v7x (2x256) and leaves >=2 grid steps on the 'parallel' axis for v7x megacore once the
    batch is large enough.  At the demo shape it degenerates to the full batch."""
    best = 1
    for bt in range(1, batch + 1):
        if batch % bt == 0 and (bt * seq <= 256 or bt == 1):
            best = bt
    return best


def tiny_bert_classifier(params, html_input_ids, html_attention_mask):
    B, S = html_input_ids.shape
    # Embeddings (gather is glue in the wrapper; everything else is in the fused kernel).
    word = params['word_emb'][html_input_ids]                        # (B, S, H)
    pos = params['pos_emb'][jnp.arange(S)][None, :, :]               # (1, S, H)
    emb = (word + pos).astype(jnp.float32)
    # Additive attention bias precomputed once (finite fill, same effect as masked_fill after
    # softmax for any row with at least one unmasked key — always true with a CLS token).
    attn_bias = jnp.where(html_attention_mask == 0, MASK_BIAS, 0.0).astype(
        jnp.float32).reshape(B, 1, S)

    b_tile = _pick_b_tile(B, S)
    assert B % b_tile == 0
    grid = (B // b_tile, LAYERS)                                     # (parallel, arbitrary)

    def bmap3(bi, li):  # batch-tiled 3-D activations / bias
        return (bi, 0, 0)

    def cmap3(bi, li):  # constants / resident stacked weights (never re-DMA'd)
        return (0, 0, 0)

    def cmap2(bi, li):
        return (0, 0)

    in_specs = [
        pl.BlockSpec((b_tile, S, HIDDEN), bmap3),                    # emb
        pl.BlockSpec((b_tile, 1, S), bmap3),                         # additive attention bias
        pl.BlockSpec((1, 1, HIDDEN), cmap3),                         # emb LN gamma
        pl.BlockSpec((1, 1, HIDDEN), cmap3),                         # emb LN beta
        # per-layer weights: full (LAYERS, ...) blocks, resident in VMEM, indexed [l] in-kernel
        pl.BlockSpec((LAYERS, HIDDEN, 3 * HIDDEN), cmap3),           # qkv_w (bf16, Q pre-scaled)
        pl.BlockSpec((LAYERS, 1, 3 * HIDDEN), cmap3),                # qkv_b
        pl.BlockSpec((LAYERS, HIDDEN, HIDDEN), cmap3),               # out-proj w (bf16)
        pl.BlockSpec((LAYERS, 1, HIDDEN), cmap3),                    # out-proj b
        pl.BlockSpec((LAYERS, 1, HIDDEN), cmap3),                    # sa LN gamma
        pl.BlockSpec((LAYERS, 1, HIDDEN), cmap3),                    # sa LN beta
        pl.BlockSpec((LAYERS, HIDDEN, INTERMEDIATE), cmap3),         # ffn w1 (bf16)
        pl.BlockSpec((LAYERS, 1, INTERMEDIATE), cmap3),              # ffn b1
        pl.BlockSpec((LAYERS, INTERMEDIATE, HIDDEN), cmap3),         # ffn w2 (bf16)
        pl.BlockSpec((LAYERS, 1, HIDDEN), cmap3),                    # ffn b2
        pl.BlockSpec((LAYERS, 1, HIDDEN), cmap3),                    # out LN gamma
        pl.BlockSpec((LAYERS, 1, HIDDEN), cmap3),                    # out LN beta
        pl.BlockSpec((HIDDEN, CLS_HID), cmap2),                      # classifier w1 (bf16)
        pl.BlockSpec((1, CLS_HID), cmap2),                           # classifier b1
        pl.BlockSpec((CLS_HID, CLS_PAD), cmap2),                     # classifier w2 (bf16, padded)
        pl.BlockSpec((1, CLS_PAD), cmap2),                           # classifier b2 (zero-padded)
    ]
    out_spec = pl.BlockSpec((b_tile, CLS_PAD), lambda bi, li: (bi, 0))

    logits_pad = pl.pallas_call(
        fused_encoder_kernel,
        out_shape=jax.ShapeDtypeStruct((B, CLS_PAD), jnp.float32),
        grid_spec=pltpu.PrefetchScalarGridSpec(
            num_scalar_prefetch=0,
            grid=grid,
            in_specs=in_specs,
            out_specs=out_spec,
            scratch_shapes=[pltpu.VMEM((b_tile, S, HIDDEN), jnp.float32)],
        ),
        compiler_params=pltpu.CompilerParams(
            dimension_semantics=("parallel", "arbitrary"),
            # Resident bf16 weights (~7 MiB, <=2x buffered) + activations stay well under
            # 32 MiB, which is safe on v5e/v6e (128 MiB physical) and v7x (64 MiB physical,
            # 32 MiB scoped default).  When scaling b_tile*S, keep the f32 temporaries
            # (qkv Bt*S x 1152, h1 Bt*S x 768, per-pair Bt x S x S scores) inside this budget.
            vmem_limit_bytes=32 * 1024 * 1024,
        ),
    )(emb, attn_bias, params['emb_ln_g'], params['emb_ln_b'],
      params['qkv_w'], params['qkv_b'], params['ow'], params['ob'],
      params['ln1g'], params['ln1b'], params['w1'], params['b1'],
      params['w2'], params['b2'], params['ln2g'], params['ln2b'],
      params['cls_w1'], params['cls_b1'], params['cls_w2p'], params['cls_b2p'])

    return logits_pad[:, :2]                                         # (B, 2)


# -------------------------- parameters --------------------------

def init_params(key):
    keys = iter(jax.random.split(key, 32))

    def rnd(shape):
        return jax.random.normal(next(keys), shape, jnp.float32) * 0.02

    q_scale = 1.0 / math.sqrt(HEAD_DIM)
    qkv_w = rnd((LAYERS, HIDDEN, 3 * HIDDEN))            # [Wq | Wk | Wv]
    qkv_w = qkv_w.at[:, :, :HIDDEN].multiply(q_scale)    # fold 1/sqrt(d) into Q columns
    qkv_b = rnd((LAYERS, 1, 3 * HIDDEN))
    qkv_b = qkv_b.at[:, :, :HIDDEN].multiply(q_scale)

    p = {
        'word_emb': rnd((VOCAB, HIDDEN)),
        'pos_emb': rnd((MAX_POS, HIDDEN)),
        'emb_ln_g': jnp.ones((1, 1, HIDDEN), jnp.float32),
        'emb_ln_b': jnp.zeros((1, 1, HIDDEN), jnp.float32),
        # per-layer weights stacked on a leading LAYERS dim; matmul weights in bf16.
        'qkv_w': qkv_w.astype(jnp.bfloat16),
        'qkv_b': qkv_b,
        'ow': rnd((LAYERS, HIDDEN, HIDDEN)).astype(jnp.bfloat16),
        'ob': rnd((LAYERS, 1, HIDDEN)),
        'ln1g': jnp.ones((LAYERS, 1, HIDDEN), jnp.float32),
        'ln1b': jnp.zeros((LAYERS, 1, HIDDEN), jnp.float32),
        'w1': rnd((LAYERS, HIDDEN, INTERMEDIATE)).astype(jnp.bfloat16),
        'b1': rnd((LAYERS, 1, INTERMEDIATE)),
        'w2': rnd((LAYERS, INTERMEDIATE, HIDDEN)).astype(jnp.bfloat16),
        'b2': rnd((LAYERS, 1, HIDDEN)),
        'ln2g': jnp.ones((LAYERS, 1, HIDDEN), jnp.float32),
        'ln2b': jnp.zeros((LAYERS, 1, HIDDEN), jnp.float32),
    }
    # classifier: Linear(384,128) -> ReLU -> Dropout(eval=id) -> Linear(128,2)
    p['cls_w1'] = rnd((HIDDEN, CLS_HID)).astype(jnp.bfloat16)
    p['cls_b1'] = rnd((1, CLS_HID))
    cw2 = rnd((CLS_HID, 2))
    cb2 = rnd((1, 2))
    p['cls_w2p'] = jnp.pad(cw2, ((0, 0), (0, CLS_PAD - 2))).astype(jnp.bfloat16)  # pad to 128 lanes
    p['cls_b2p'] = jnp.pad(cb2, ((0, 0), (0, CLS_PAD - 2)))
    return p


if __name__ == "__main__":
    key = jax.random.PRNGKey(0)
    pkey, ikey = jax.random.split(key)
    params = init_params(pkey)

    B, S = 2, 8
    html_input_ids = jax.random.randint(ikey, (B, S), 0, VOCAB, dtype=jnp.int32)
    html_attention_mask = jnp.array([[1, 1, 1, 1, 1, 1, 1, 1],
                                     [1, 1, 1, 1, 1, 0, 0, 0]], dtype=jnp.int32)

    logits = tiny_bert_classifier(params, html_input_ids, html_attention_mask)
    logits = jax.block_until_ready(logits)
    assert logits.shape == (B, 2) and logits.dtype == jnp.float32
    assert bool(jnp.all(jnp.isfinite(logits)))
    print("KERNEL_OK")
</pallas_src>

<mosaic_0001>
module attributes {stable_mosaic.version = 11 : i64} {
  func.func @fused_encoder_kernel(%arg0: i32, %arg1: i32, %arg2: memref<2x8x384xf32, #tpu.memory_space<vmem>>, %arg3: memref<2x1x8xf32, #tpu.memory_space<vmem>>, %arg4: memref<1x1x384xf32, #tpu.memory_space<vmem>>, %arg5: memref<1x1x384xf32, #tpu.memory_space<vmem>>, %arg6: memref<3x384x1152xbf16, #tpu.memory_space<vmem>>, %arg7: memref<3x1x1152xf32, #tpu.memory_space<vmem>>, %arg8: memref<3x384x384xbf16, #tpu.memory_space<vmem>>, %arg9: memref<3x1x384xf32, #tpu.memory_space<vmem>>, %arg10: memref<3x1x384xf32, #tpu.memory_space<vmem>>, %arg11: memref<3x1x384xf32, #tpu.memory_space<vmem>>, %arg12: memref<3x384x768xbf16, #tpu.memory_space<vmem>>, %arg13: memref<3x1x768xf32, #tpu.memory_space<vmem>>, %arg14: memref<3x768x384xbf16, #tpu.memory_space<vmem>>, %arg15: memref<3x1x384xf32, #tpu.memory_space<vmem>>, %arg16: memref<3x1x384xf32, #tpu.memory_space<vmem>>, %arg17: memref<3x1x384xf32, #tpu.memory_space<vmem>>, %arg18: memref<384x128xbf16, #tpu.memory_space<vmem>>, %arg19: memref<1x128xf32, #tpu.memory_space<vmem>>, %arg20: memref<128x128xbf16, #tpu.memory_space<vmem>>, %arg21: memref<1x128xf32, #tpu.memory_space<vmem>>, %arg22: memref<2x128xf32, #tpu.memory_space<vmem>>, %arg23: memref<2x8x384xf32, #tpu.memory_space<vmem>>) attributes {dimension_semantics = [#tpu.dimension_semantics<parallel>, #tpu.dimension_semantics<arbitrary>], iteration_bounds = array<i64: 1, 3>, scalar_prefetch = 0 : i64, scratch_operands = 1 : i64, tpu.core_type = #tpu.core_type<tc>, window_params = [{transform_indices = @transform_0, window_bounds = array<i64: 2, 8, 384>}, {transform_indices = @transform_1, window_bounds = array<i64: 2, 1, 8>}, {pipeline_mode = #tpu.pipeline_mode<synchronous>, transform_indices = @transform_2, window_bounds = array<i64: 1, 1, 384>}, {pipeline_mode = #tpu.pipeline_mode<synchronous>, transform_indices = @transform_3, window_bounds = array<i64: 1, 1, 384>}, {pipeline_mode = #tpu.pipeline_mode<synchronous>, transform_indices = @transform_4, window_bounds = array<i64: 3, 384, 1152>}, {pipeline_mode = #tpu.pipeline_mode<synchronous>, transform_indices = @transform_5, window_bounds = array<i64: 3, 1, 1152>}, {pipeline_mode = #tpu.pipeline_mode<synchronous>, transform_indices = @transform_6, window_bounds = array<i64: 3, 384, 384>}, {pipeline_mode = #tpu.pipeline_mode<synchronous>, transform_indices = @transform_7, window_bounds = array<i64: 3, 1, 384>}, {pipeline_mode = #tpu.pipeline_mode<synchronous>, transform_indices = @transform_8, window_bounds = array<i64: 3, 1, 384>}, {pipeline_mode = #tpu.pipeline_mode<synchronous>, transform_indices = @transform_9, window_bounds = array<i64: 3, 1, 384>}, {pipeline_mode = #tpu.pipeline_mode<synchronous>, transform_indices = @transform_10, window_bounds = array<i64: 3, 384, 768>}, {pipeline_mode = #tpu.pipeline_mode<synchronous>, transform_indices = @transform_11, window_bounds = array<i64: 3, 1, 768>}, {pipeline_mode = #tpu.pipeline_mode<synchronous>, transform_indices = @transform_12, window_bounds = array<i64: 3, 768, 384>}, {pipeline_mode = #tpu.pipeline_mode<synchronous>, transform_indices = @transform_13, window_bounds = array<i64: 3, 1, 384>}, {pipeline_mode = #tpu.pipeline_mode<synchronous>, transform_indices = @transform_14, window_bounds = array<i64: 3, 1, 384>}, {pipeline_mode = #tpu.pipeline_mode<synchronous>, transform_indices = @transform_15, window_bounds = array<i64: 3, 1, 384>}, {pipeline_mode = #tpu.pipeline_mode<synchronous>, transform_indices = @transform_16, window_bounds = array<i64: 384, 128>}, {pipeline_mode = #tpu.pipeline_mode<synchronous>, transform_indices = @transform_17, window_bounds = array<i64: 1, 128>}, {pipeline_mode = #tpu.pipeline_mode<synchronous>, transform_indices = @transform_18, window_bounds = array<i64: 128, 128>}, {pipeline_mode = #tpu.pipeline_mode<synchronous>, transform_indices = @transform_19, window_bounds = array<i64: 1, 128>}, {transform_indices = @transform_20, window_bounds = array<i64: 2, 128>}]} {
    %c0_i32 = arith.constant 0 : i32
    %0 = arith.cmpi eq, %arg1, %c0_i32 : i32
    %1 = arith.extui %0 : i1 to i32
    %c0_i32_0 = arith.constant 0 : i32
    %2 = arith.cmpi ne, %1, %c0_i32_0 : i32
    scf.if %2 {
      %c0_80 = arith.constant 0 : index
      %c0_81 = arith.constant 0 : index
      %c0_82 = arith.constant 0 : index
      %254 = vector.load %arg2[%c0_80, %c0_81, %c0_82] : memref<2x8x384xf32, #tpu.memory_space<vmem>>, vector<2x8x384xf32>
      %c0_83 = arith.constant 0 : index
      %c0_84 = arith.constant 0 : index
      %c0_85 = arith.constant 0 : index
      %255 = vector.load %arg4[%c0_83, %c0_84, %c0_85] : memref<1x1x384xf32, #tpu.memory_space<vmem>>, vector<1x1x384xf32>
      %c0_86 = arith.constant 0 : index
      %c0_87 = arith.constant 0 : index
      %c0_88 = arith.constant 0 : index
      %256 = vector.load %arg5[%c0_86, %c0_87, %c0_88] : memref<1x1x384xf32, #tpu.memory_space<vmem>>, vector<1x1x384xf32>
      %cst_89 = arith.constant dense<0.000000e+00> : vector<2x8xf32>
      %257 = vector.multi_reduction <add>, %254, %cst_89 [2] : vector<2x8x384xf32> to vector<2x8xf32>
      %258 = vector.shape_cast %257 : vector<2x8xf32> to vector<2x8x1xf32>
      %cst_90 = arith.constant 3.840000e+02 : f32
      %259 = vector.broadcast %cst_90 : f32 to vector<2x8x1xf32>
      %260 = arith.divf %258, %259 : vector<2x8x1xf32>
      %261 = vector.broadcast %260 : vector<2x8x1xf32> to vector<2x8x384xf32>
      %262 = arith.subf %254, %261 : vector<2x8x384xf32>
      %263 = arith.mulf %262, %262 : vector<2x8x384xf32>
      %cst_91 = arith.constant dense<0.000000e+00> : vector<2x8xf32>
      %264 = vector.multi_reduction <add>, %263, %cst_91 [2] : vector<2x8x384xf32> to vector<2x8xf32>
      %265 = vector.shape_cast %264 : vector<2x8xf32> to vector<2x8x1xf32>
      %cst_92 = arith.constant 3.840000e+02 : f32
      %266 = vector.broadcast %cst_92 : f32 to vector<2x8x1xf32>
      %267 = arith.divf %265, %266 : vector<2x8x1xf32>
      %268 = vector.broadcast %260 : vector<2x8x1xf32> to vector<2x8x384xf32>
      %269 = arith.subf %254, %268 : vector<2x8x384xf32>
      %cst_93 = arith.constant 9.99999996E-13 : f32
      %270 = vector.broadcast %cst_93 : f32 to vector<2x8x1xf32>
      %271 = arith.addf %267, %270 : vector<2x8x1xf32>
      %272 = math.rsqrt %271 : vector<2x8x1xf32>
      %273 = vector.broadcast %272 : vector<2x8x1xf32> to vector<2x8x384xf32>
      %274 = arith.mulf %269, %273 : vector<2x8x384xf32>
      %275 = vector.broadcast %255 : vector<1x1x384xf32> to vector<2x8x384xf32>
      %276 = arith.mulf %274, %275 : vector<2x8x384xf32>
      %277 = vector.broadcast %256 : vector<1x1x384xf32> to vector<2x8x384xf32>
      %278 = arith.addf %276, %277 : vector<2x8x384xf32>
      %c0_94 = arith.constant 0 : index
      %c0_95 = arith.constant 0 : index
      %c0_96 = arith.constant 0 : index
      %279 = vector.load %arg23[%c0_94, %c0_95, %c0_96] : memref<2x8x384xf32, #tpu.memory_space<vmem>>, vector<2x8x384xf32>
      tpu.vector_store %arg23[%c0_94, %c0_95, %c0_96], %278 {strides = array<i32>} : memref<2x8x384xf32, #tpu.memory_space<vmem>>, vector<2x8x384xf32>,
    } else {
    }
    %c0 = arith.constant 0 : index
    %c0_1 = arith.constant 0 : index
    %c0_2 = arith.constant 0 : index
    %3 = vector.load %arg23[%c0, %c0_1, %c0_2] : memref<2x8x384xf32, #tpu.memory_space<vmem>>, vector<2x8x384xf32>
    %4 = vector.shape_cast %3 : vector<2x8x384xf32> to vector<16x384xf32>
    %5 = arith.truncf %4 : vector<16x384xf32> to vector<16x384xbf16>
    %6 = arith.index_cast %arg1 : i32 to index
    %c0_3 = arith.constant 0 : index
    %c0_4 = arith.constant 0 : index
    %7 = vector.load %arg6[%6, %c0_3, %c0_4] : memref<3x384x1152xbf16, #tpu.memory_space<vmem>>, vector<1x384x1152xbf16>
    %8 = vector.shape_cast %7 : vector<1x384x1152xbf16> to vector<384x1152xbf16>
    %cst = arith.constant dense<0.000000e+00> : vector<16x1152xf32>
    %9 = tpu.matmul %5, %8, %cst {dimension_numbers = #tpu.dot_dimension_numbers<[1], [0], [0], [1], [0, 0, 1, 1], [], []>} : vector<16x384xbf16>, vector<384x1152xbf16>, vector<16x1152xf32> -> vector<16x1152xf32>
    %10 = arith.index_cast %arg1 : i32 to index
    %c0_5 = arith.constant 0 : index
    %c0_6 = arith.constant 0 : index
    %11 = vector.load %arg7[%10, %c0_5, %c0_6] : memref<3x1x1152xf32, #tpu.memory_space<vmem>>, vector<1x1x1152xf32>
    %12 = vector.shape_cast %11 : vector<1x1x1152xf32> to vector<1x1152xf32>
    %13 = vector.broadcast %12 : vector<1x1152xf32> to vector<16x1152xf32>
    %14 = arith.addf %9, %13 : vector<16x1152xf32>
    %15 = vector.extract_strided_slice %14 {offsets = [0, 0], sizes = [16, 384], strides = [1, 1]} : vector<16x1152xf32> to vector<16x384xf32>
    %16 = vector.shape_cast %15 : vector<16x384xf32> to vector<2x8x384xf32>
    %17 = vector.extract_strided_slice %14 {offsets = [0, 384], sizes = [16, 384], strides = [1, 1]} : vector<16x1152xf32> to vector<16x384xf32>
    %18 = vector.shape_cast %17 : vector<16x384xf32> to vector<2x8x384xf32>
    %19 = vector.extract_strided_slice %14 {offsets = [0, 768], sizes = [16, 384], strides = [1, 1]} : vector<16x1152xf32> to vector<16x384xf32>
    %20 = vector.shape_cast %19 : vector<16x384xf32> to vector<2x8x384xf32>
    %c0_7 = arith.constant 0 : index
    %c0_8 = arith.constant 0 : index
    %c0_9 = arith.constant 0 : index
    %21 = vector.load %arg3[%c0_7, %c0_8, %c0_9] : memref<2x1x8xf32, #tpu.memory_space<vmem>>, vector<2x1x8xf32>
    %22 = tpu.iota {dimensions = array<i32: 2>} : vector<1x1x128xi32>
    %c64_i32 = arith.constant 64 : i32
    %23 = vector.broadcast %c64_i32 : i32 to vector<1x1x128xi32>
    %24 = arith.cmpi slt, %22, %23 : vector<1x1x128xi32>
    %25 = vector.extract_strided_slice %16 {offsets = [0, 0, 0], sizes = [2, 8, 128], strides = [1, 1, 1]} : vector<2x8x384xf32> to vector<2x8x128xf32>
    %26 = vector.extract_strided_slice %18 {offsets = [0, 0, 0], sizes = [2, 8, 128], strides = [1, 1, 1]} : vector<2x8x384xf32> to vector<2x8x128xf32>
    %27 = vector.extract_strided_slice %20 {offsets = [0, 0, 0], sizes = [2, 8, 128], strides = [1, 1, 1]} : vector<2x8x384xf32> to vector<2x8x128xf32>
    %cst_10 = arith.constant 0.000000e+00 : f32
    %28 = vector.shape_cast %24 : vector<1x1x128xi1> to vector<1x1x128xi1>
    %29 = vector.broadcast %28 : vector<1x1x128xi1> to vector<2x8x128xi1>
    %30 = vector.broadcast %cst_10 : f32 to vector<2x8x128xf32>
    %31 = arith.select %29, %25, %30 : vector<2x8x128xi1>, vector<2x8x128xf32>
    %cst_11 = arith.constant 0.000000e+00 : f32
    %32 = vector.shape_cast %24 : vector<1x1x128xi1> to vector<1x1x128xi1>
    %33 = vector.broadcast %32 : vector<1x1x128xi1> to vector<2x8x128xi1>
    %34 = vector.broadcast %cst_11 : f32 to vector<2x8x128xf32>
    %35 = arith.select %33, %34, %25 : vector<2x8x128xi1>, vector<2x8x128xf32>
    "tpu.trace_start"() <{level = 10 : i32, message = "bqd,bkd->bqk"}> : () -> ()
    %cst_12 = arith.constant dense<0.000000e+00> : vector<2x8x8xf32>
    %36 = tpu.matmul %31, %26, %cst_12 {dimension_numbers = #tpu.dot_dimension_numbers<[2], [2], [1], [1], [0, 0, 0, 1, 1, 1], [0], [0]>} : vector<2x8x128xf32>, vector<2x8x128xf32>, vector<2x8x8xf32> -> vector<2x8x8xf32>
    "tpu.trace_stop"() : () -> ()
    %37 = vector.broadcast %21 : vector<2x1x8xf32> to vector<2x8x8xf32>
    %38 = arith.addf %36, %37 : vector<2x8x8xf32>
    "tpu.trace_start"() <{level = 10 : i32, message = "bqd,bkd->bqk"}> : () -> ()
    %cst_13 = arith.constant dense<0.000000e+00> : vector<2x8x8xf32>
    %39 = tpu.matmul %35, %26, %cst_13 {dimension_numbers = #tpu.dot_dimension_numbers<[2], [2], [1], [1], [0, 0, 0, 1, 1, 1], [0], [0]>} : vector<2x8x128xf32>, vector<2x8x128xf32>, vector<2x8x8xf32> -> vector<2x8x8xf32>
    "tpu.trace_stop"() : () -> ()
    %40 = vector.broadcast %21 : vector<2x1x8xf32> to vector<2x8x8xf32>
    %41 = arith.addf %39, %40 : vector<2x8x8xf32>
    %cst_14 = arith.constant dense<0xFF800000> : vector<2x8xf32>
    %42 = vector.multi_reduction <maximumf>, %38, %cst_14 [2] : vector<2x8x8xf32> to vector<2x8xf32>
    %43 = vector.shape_cast %42 : vector<2x8xf32> to vector<2x8x1xf32>
    %44 = vector.broadcast %43 : vector<2x8x1xf32> to vector<2x8x8xf32>
    %45 = arith.subf %38, %44 : vector<2x8x8xf32>
    %46 = math.exp %45 : vector<2x8x8xf32>
    %cst_15 = arith.constant dense<0.000000e+00> : vector<2x8xf32>
    %47 = vector.multi_reduction <add>, %46, %cst_15 [2] : vector<2x8x8xf32> to vector<2x8xf32>
    %48 = vector.shape_cast %47 : vector<2x8xf32> to vector<2x8x1xf32>
    %49 = tpu.reciprocal %48 {approx = true} : vector<2x8x1xf32> -> vector<2x8x1xf32>
    %50 = vector.broadcast %49 : vector<2x8x1xf32> to vector<2x8x8xf32>
    %51 = arith.mulf %46, %50 : vector<2x8x8xf32>
    %cst_16 = arith.constant dense<0xFF800000> : vector<2x8xf32>
    %52 = vector.multi_reduction <maximumf>, %41, %cst_16 [2] : vector<2x8x8xf32> to vector<2x8xf32>
    %53 = vector.shape_cast %52 : vector<2x8xf32> to vector<2x8x1xf32>
    %54 = vector.broadcast %53 : vector<2x8x1xf32> to vector<2x8x8xf32>
    %55 = arith.subf %41, %54 : vector<2x8x8xf32>
    %56 = math.exp %55 : vector<2x8x8xf32>
    %cst_17 = arith.constant dense<0.000000e+00> : vector<2x8xf32>
    %57 = vector.multi_reduction <add>, %56, %cst_17 [2] : vector<2x8x8xf32> to vector<2x8xf32>
    %58 = vector.shape_cast %57 : vector<2x8xf32> to vector<2x8x1xf32>
    %59 = tpu.reciprocal %58 {approx = true} : vector<2x8x1xf32> -> vector<2x8x1xf32>
    %60 = vector.broadcast %59 : vector<2x8x1xf32> to vector<2x8x8xf32>
    %61 = arith.mulf %56, %60 : vector<2x8x8xf32>
    "tpu.trace_start"() <{level = 10 : i32, message = "bqk,bkd->bqd"}> : () -> ()
    %cst_18 = arith.constant dense<0.000000e+00> : vector<2x8x128xf32>
    %62 = tpu.matmul %51, %27, %cst_18 {dimension_numbers = #tpu.dot_dimension_numbers<[2], [1], [1], [2], [0, 0, 0, 1, 1, 2], [0], [0]>} : vector<2x8x8xf32>, vector<2x8x128xf32>, vector<2x8x128xf32> -> vector<2x8x128xf32>
    %cst_19 = arith.constant dense<0.000000e+00> : vector<2x8x128xf32>
    %63 = tpu.matmul %61, %27, %cst_19 {dimension_numbers = #tpu.dot_dimension_numbers<[2], [1], [1], [2], [0, 0, 0, 1, 1, 2], [0], [0]>} : vector<2x8x8xf32>, vector<2x8x128xf32>, vector<2x8x128xf32> -> vector<2x8x128xf32>
    "tpu.trace_stop"() : () -> ()
    %64 = vector.shape_cast %24 : vector<1x1x128xi1> to vector<1x1x128xi1>
    %65 = vector.broadcast %64 : vector<1x1x128xi1> to vector<2x8x128xi1>
    %66 = arith.select %65, %62, %63 : vector<2x8x128xi1>, vector<2x8x128xf32>
    %67 = vector.extract_strided_slice %16 {offsets = [0, 0, 128], sizes = [2, 8, 128], strides = [1, 1, 1]} : vector<2x8x384xf32> to vector<2x8x128xf32>
    %68 = vector.extract_strided_slice %18 {offsets = [0, 0, 128], sizes = [2, 8, 128], strides = [1, 1, 1]} : vector<2x8x384xf32> to vector<2x8x128xf32>
    %69 = vector.extract_strided_slice %20 {offsets = [0, 0, 128], sizes = [2, 8, 128], strides = [1, 1, 1]} : vector<2x8x384xf32> to vector<2x8x128xf32>
    %cst_20 = arith.constant 0.000000e+00 : f32
    %70 = vector.shape_cast %24 : vector<1x1x128xi1> to vector<1x1x128xi1>
    %71 = vector.broadcast %70 : vector<1x1x128xi1> to vector<2x8x128xi1>
    %72 = vector.broadcast %cst_20 : f32 to vector<2x8x128xf32>
    %73 = arith.select %71, %67, %72 : vector<2x8x128xi1>, vector<2x8x128xf32>
    %cst_21 = arith.constant 0.000000e+00 : f32
    %74 = vector.shape_cast %24 : vector<1x1x128xi1> to vector<1x1x128xi1>
    %75 = vector.broadcast %74 : vector<1x1x128xi1> to vector<2x8x128xi1>
    %76 = vector.broadcast %cst_21 : f32 to vector<2x8x128xf32>
    %77 = arith.select %75, %76, %67 : vector<2x8x128xi1>, vector<2x8x128xf32>
    "tpu.trace_start"() <{level = 10 : i32, message = "bqd,bkd->bqk"}> : () -> ()
    %cst_22 = arith.constant dense<0.000000e+00> : vector<2x8x8xf32>
    %78 = tpu.matmul %73, %68, %cst_22 {dimension_numbers = #tpu.dot_dimension_numbers<[2], [2], [1], [1], [0, 0, 0, 1, 1, 1], [0], [0]>} : vector<2x8x128xf32>, vector<2x8x128xf32>, vector<2x8x8xf32> -> vector<2x8x8xf32>
    "tpu.trace_stop"() : () -> ()
    %79 = vector.broadcast %21 : vector<2x1x8xf32> to vector<2x8x8xf32>
    %80 = arith.addf %78, %79 : vector<2x8x8xf32>
    "tpu.trace_start"() <{level = 10 : i32, message = "bqd,bkd->bqk"}> : () -> ()
    %cst_23 = arith.constant dense<0.000000e+00> : vector<2x8x8xf32>
    %81 = tpu.matmul %77, %68, %cst_23 {dimension_numbers = #tpu.dot_dimension_numbers<[2], [2], [1], [1], [0, 0, 0, 1, 1, 1], [0], [0]>} : vector<2x8x128xf32>, vector<2x8x128xf32>, vector<2x8x8xf32> -> vector<2x8x8xf32>
    "tpu.trace_stop"() : () -> ()
    %82 = vector.broadcast %21 : vector<2x1x8xf32> to vector<2x8x8xf32>
    %83 = arith.addf %81, %82 : vector<2x8x8xf32>
    %cst_24 = arith.constant dense<0xFF800000> : vector<2x8xf32>
    %84 = vector.multi_reduction <maximumf>, %80, %cst_24 [2] : vector<2x8x8xf32> to vector<2x8xf32>
    %85 = vector.shape_cast %84 : vector<2x8xf32> to vector<2x8x1xf32>
    %86 = vector.broadcast %85 : vector<2x8x1xf32> to vector<2x8x8xf32>
    %87 = arith.subf %80, %86 : vector<2x8x8xf32>
    %88 = math.exp %87 : vector<2x8x8xf32>
    %cst_25 = arith.constant dense<0.000000e+00> : vector<2x8xf32>
    %89 = vector.multi_reduction <add>, %88, %cst_25 [2] : vector<2x8x8xf32> to vector<2x8xf32>
    %90 = vector.shape_cast %89 : vector<2x8xf32> to vector<2x8x1xf32>
    %91 = tpu.reciprocal %90 {approx = true} : vector<2x8x1xf32> -> vector<2x8x1xf32>
    %92 = vector.broadcast %91 : vector<2x8x1xf32> to vector<2x8x8xf32>
    %93 = arith.mulf %88, %92 : vector<2x8x8xf32>
    %cst_26 = arith.constant dense<0xFF800000> : vector<2x8xf32>
    %94 = vector.multi_reduction <maximumf>, %83, %cst_26 [2] : vector<2x8x8xf32> to vector<2x8xf32>
    %95 = vector.shape_cast %94 : vector<2x8xf32> to vector<2x8x1xf32>
    %96 = vector.broadcast %95 : vector<2x8x1xf32> to vector<2x8x8xf32>
    %97 = arith.subf %83, %96 : vector<2x8x8xf32>
    %98 = math.exp %97 : vector<2x8x8xf32>
    %cst_27 = arith.constant dense<0.000000e+00> : vector<2x8xf32>
    %99 = vector.multi_reduction <add>, %98, %cst_27 [2] : vector<2x8x8xf32> to vector<2x8xf32>
    %100 = vector.shape_cast %99 : vector<2x8xf32> to vector<2x8x1xf32>
    %101 = tpu.reciprocal %100 {approx = true} : vector<2x8x1xf32> -> vector<2x8x1xf32>
    %102 = vector.broadcast %101 : vector<2x8x1xf32> to vector<2x8x8xf32>
    %103 = arith.mulf %98, %102 : vector<2x8x8xf32>
    "tpu.trace_start"() <{level = 10 : i32, message = "bqk,bkd->bqd"}> : () -> ()
    %cst_28 = arith.constant dense<0.000000e+00> : vector<2x8x128xf32>
    %104 = tpu.matmul %93, %69, %cst_28 {dimension_numbers = #tpu.dot_dimension_numbers<[2], [1], [1], [2], [0, 0, 0, 1, 1, 2], [0], [0]>} : vector<2x8x8xf32>, vector<2x8x128xf32>, vector<2x8x128xf32> -> vector<2x8x128xf32>
    %cst_29 = arith.constant dense<0.000000e+00> : vector<2x8x128xf32>
    %105 = tpu.matmul %103, %69, %cst_29 {dimension_numbers = #tpu.dot_dimension_numbers<[2], [1], [1], [2], [0, 0, 0, 1, 1, 2], [0], [0]>} : vector<2x8x8xf32>, vector<2x8x128xf32>, vector<2x8x128xf32> -> vector<2x8x128xf32>
    "tpu.trace_stop"() : () -> ()
    %106 = vector.shape_cast %24 : vector<1x1x128xi1> to vector<1x1x128xi1>
    %107 = vector.broadcast %106 : vector<1x1x128xi1> to vector<2x8x128xi1>
    %108 = arith.select %107, %104, %105 : vector<2x8x128xi1>, vector<2x8x128xf32>
    %109 = vector.extract_strided_slice %16 {offsets = [0, 0, 256], sizes = [2, 8, 128], strides = [1, 1, 1]} : vector<2x8x384xf32> to vector<2x8x128xf32>
    %110 = vector.extract_strided_slice %18 {offsets = [0, 0, 256], sizes = [2, 8, 128], strides = [1, 1, 1]} : vector<2x8x384xf32> to vector<2x8x128xf32>
    %111 = vector.extract_strided_slice %20 {offsets = [0, 0, 256], sizes = [2, 8, 128], strides = [1, 1, 1]} : vector<2x8x384xf32> to vector<2x8x128xf32>
    %cst_30 = arith.constant 0.000000e+00 : f32
    %112 = vector.shape_cast %24 : vector<1x1x128xi1> to vector<1x1x128xi1>
    %113 = vector.broadcast %112 : vector<1x1x128xi1> to vector<2x8x128xi1>
    %114 = vector.broadcast %cst_30 : f32 to vector<2x8x128xf32>
    %115 = arith.select %113, %109, %114 : vector<2x8x128xi1>, vector<2x8x128xf32>
    %cst_31 = arith.constant 0.000000e+00 : f32
    %116 = vector.shape_cast %24 : vector<1x1x128xi1> to vector<1x1x128xi1>
    %117 = vector.broadcast %116 : vector<1x1x128xi1> to vector<2x8x128xi1>
    %118 = vector.broadcast %cst_31 : f32 to vector<2x8x128xf32>
    %119 = arith.select %117, %118, %109 : vector<2x8x128xi1>, vector<2x8x128xf32>
    "tpu.trace_start"() <{level = 10 : i32, message = "bqd,bkd->bqk"}> : () -> ()
    %cst_32 = arith.constant dense<0.000000e+00> : vector<2x8x8xf32>
    %120 = tpu.matmul %115, %110, %cst_32 {dimension_numbers = #tpu.dot_dimension_numbers<[2], [2], [1], [1], [0, 0, 0, 1, 1, 1], [0], [0]>} : vector<2x8x128xf32>, vector<2x8x128xf32>, vector<2x8x8xf32> -> vector<2x8x8xf32>
    "tpu.trace_stop"() : () -> ()
    %121 = vector.broadcast %21 : vector<2x1x8xf32> to vector<2x8x8xf32>
    %122 = arith.addf %120, %121 : vector<2x8x8xf32>
    "tpu.trace_start"() <{level = 10 : i32, message = "bqd,bkd->bqk"}> : () -> ()
    %cst_33 = arith.constant dense<0.000000e+00> : vector<2x8x8xf32>
    %123 = tpu.matmul %119, %110, %cst_33 {dimension_numbers = #tpu.dot_dimension_numbers<[2], [2], [1], [1], [0, 0, 0, 1, 1, 1], [0], [0]>} : vector<2x8x128xf32>, vector<2x8x128xf32>, vector<2x8x8xf32> -> vector<2x8x8xf32>
    "tpu.trace_stop"() : () -> ()
    %124 = vector.broadcast %21 : vector<2x1x8xf32> to vector<2x8x8xf32>
    %125 = arith.addf %123, %124 : vector<2x8x8xf32>
    %cst_34 = arith.constant dense<0xFF800000> : vector<2x8xf32>
    %126 = vector.multi_reduction <maximumf>, %122, %cst_34 [2] : vector<2x8x8xf32> to vector<2x8xf32>
    %127 = vector.shape_cast %126 : vector<2x8xf32> to vector<2x8x1xf32>
    %128 = vector.broadcast %127 : vector<2x8x1xf32> to vector<2x8x8xf32>
    %129 = arith.subf %122, %128 : vector<2x8x8xf32>
    %130 = math.exp %129 : vector<2x8x8xf32>
    %cst_35 = arith.constant dense<0.000000e+00> : vector<2x8xf32>
    %131 = vector.multi_reduction <add>, %130, %cst_35 [2] : vector<2x8x8xf32> to vector<2x8xf32>
    %132 = vector.shape_cast %131 : vector<2x8xf32> to vector<2x8x1xf32>
    %133 = tpu.reciprocal %132 {approx = true} : vector<2x8x1xf32> -> vector<2x8x1xf32>
    %134 = vector.broadcast %133 : vector<2x8x1xf32> to vector<2x8x8xf32>
    %135 = arith.mulf %130, %134 : vector<2x8x8xf32>
    %cst_36 = arith.constant dense<0xFF800000> : vector<2x8xf32>
    %136 = vector.multi_reduction <maximumf>, %125, %cst_36 [2] : vector<2x8x8xf32> to vector<2x8xf32>
    %137 = vector.shape_cast %136 : vector<2x8xf32> to vector<2x8x1xf32>
    %138 = vector.broadcast %137 : vector<2x8x1xf32> to vector<2x8x8xf32>
    %139 = arith.subf %125, %138 : vector<2x8x8xf32>
    %140 = math.exp %139 : vector<2x8x8xf32>
    %cst_37 = arith.constant dense<0.000000e+00> : vector<2x8xf32>
    %141 = vector.multi_reduction <add>, %140, %cst_37 [2] : vector<2x8x8xf32> to vector<2x8xf32>
    %142 = vector.shape_cast %141 : vector<2x8xf32> to vector<2x8x1xf32>
    %143 = tpu.reciprocal %142 {approx = true} : vector<2x8x1xf32> -> vector<2x8x1xf32>
    %144 = vector.broadcast %143 : vector<2x8x1xf32> to vector<2x8x8xf32>
    %145 = arith.mulf %140, %144 : vector<2x8x8xf32>
    "tpu.trace_start"() <{level = 10 : i32, message = "bqk,bkd->bqd"}> : () -> ()
    %cst_38 = arith.constant dense<0.000000e+00> : vector<2x8x128xf32>
    %146 = tpu.matmul %135, %111, %cst_38 {dimension_numbers = #tpu.dot_dimension_numbers<[2], [1], [1], [2], [0, 0, 0, 1, 1, 2], [0], [0]>} : vector<2x8x8xf32>, vector<2x8x128xf32>, vector<2x8x128xf32> -> vector<2x8x128xf32>
    %cst_39 = arith.constant dense<0.000000e+00> : vector<2x8x128xf32>
    %147 = tpu.matmul %145, %111, %cst_39 {dimension_numbers = #tpu.dot_dimension_numbers<[2], [1], [1], [2], [0, 0, 0, 1, 1, 2], [0], [0]>} : vector<2x8x8xf32>, vector<2x8x128xf32>, vector<2x8x128xf32> -> vector<2x8x128xf32>
    "tpu.trace_stop"() : () -> ()
    %148 = vector.shape_cast %24 : vector<1x1x128xi1> to vector<1x1x128xi1>
    %149 = vector.broadcast %148 : vector<1x1x128xi1> to vector<2x8x128xi1>
    %150 = arith.select %149, %146, %147 : vector<2x8x128xi1>, vector<2x8x128xf32>
    %151 = tpu.concatenate %66, %108, %150 in 2 : vector<2x8x128xf32>, vector<2x8x128xf32>, vector<2x8x128xf32> -> vector<2x8x384xf32>
    %152 = vector.shape_cast %151 : vector<2x8x384xf32> to vector<16x384xf32>
    %153 = arith.truncf %152 : vector<16x384xf32> to vector<16x384xbf16>
    %154 = arith.index_cast %arg1 : i32 to index
    %c0_40 = arith.constant 0 : index
    %c0_41 = arith.constant 0 : index
    %155 = vector.load %arg8[%154, %c0_40, %c0_41] : memref<3x384x384xbf16, #tpu.memory_space<vmem>>, vector<1x384x384xbf16>
    %156 = vector.shape_cast %155 : vector<1x384x384xbf16> to vector<384x384xbf16>
    %cst_42 = arith.constant dense<0.000000e+00> : vector<16x384xf32>
    %157 = tpu.matmul %153, %156, %cst_42 {dimension_numbers = #tpu.dot_dimension_numbers<[1], [0], [0], [1], [0, 0, 1, 1], [], []>} : vector<16x384xbf16>, vector<384x384xbf16>, vector<16x384xf32> -> vector<16x384xf32>
    %158 = arith.index_cast %arg1 : i32 to index
    %c0_43 = arith.constant 0 : index
    %c0_44 = arith.constant 0 : index
    %159 = vector.load %arg9[%158, %c0_43, %c0_44] : memref<3x1x384xf32, #tpu.memory_space<vmem>>, vector<1x1x384xf32>
    %160 = vector.shape_cast %159 : vector<1x1x384xf32> to vector<1x384xf32>
    %161 = vector.broadcast %160 : vector<1x384xf32> to vector<16x384xf32>
    %162 = arith.addf %157, %161 : vector<16x384xf32>
    %163 = arith.addf %162, %4 : vector<16x384xf32>
    %164 = arith.index_cast %arg1 : i32 to index
    %c0_45 = arith.constant 0 : index
    %c0_46 = arith.constant 0 : index
    %165 = vector.load %arg10[%164, %c0_45, %c0_46] : memref<3x1x384xf32, #tpu.memory_space<vmem>>, vector<1x1x384xf32>
    %166 = vector.shape_cast %165 : vector<1x1x384xf32> to vector<1x384xf32>
    %167 = arith.index_cast %arg1 : i32 to index
    %c0_47 = arith.constant 0 : index
    %c0_48 = arith.constant 0 : index
    %168 = vector.load %arg11[%167, %c0_47, %c0_48] : memref<3x1x384xf32, #tpu.memory_space<vmem>>, vector<1x1x384xf32>
    %169 = vector.shape_cast %168 : vector<1x1x384xf32> to vector<1x384xf32>
    %cst_49 = arith.constant dense<0.000000e+00> : vector<16xf32>
    %170 = vector.multi_reduction <add>, %163, %cst_49 [1] : vector<16x384xf32> to vector<16xf32>
    %171 = vector.shape_cast %170 : vector<16xf32> to vector<16x1xf32>
    %cst_50 = arith.constant 3.840000e+02 : f32
    %172 = vector.broadcast %cst_50 : f32 to vector<16x1xf32>
    %173 = arith.divf %171, %172 : vector<16x1xf32>
    %174 = vector.broadcast %173 : vector<16x1xf32> to vector<16x384xf32>
    %175 = arith.subf %163, %174 : vector<16x384xf32>
    %176 = arith.mulf %175, %175 : vector<16x384xf32>
    %cst_51 = arith.constant dense<0.000000e+00> : vector<16xf32>
    %177 = vector.multi_reduction <add>, %176, %cst_51 [1] : vector<16x384xf32> to vector<16xf32>
    %178 = vector.shape_cast %177 : vector<16xf32> to vector<16x1xf32>
    %cst_52 = arith.constant 3.840000e+02 : f32
    %179 = vector.broadcast %cst_52 : f32 to vector<16x1xf32>
    %180 = arith.divf %178, %179 : vector<16x1xf32>
    %181 = vector.broadcast %173 : vector<16x1xf32> to vector<16x384xf32>
    %182 = arith.subf %163, %181 : vector<16x384xf32>
    %cst_53 = arith.constant 9.99999996E-13 : f32
    %183 = vector.broadcast %cst_53 : f32 to vector<16x1xf32>
    %184 = arith.addf %180, %183 : vector<16x1xf32>
    %185 = math.rsqrt %184 : vector<16x1xf32>
    %186 = vector.broadcast %185 : vector<16x1xf32> to vector<16x384xf32>
    %187 = arith.mulf %182, %186 : vector<16x384xf32>
    %188 = vector.broadcast %166 : vector<1x384xf32> to vector<16x384xf32>
    %189 = arith.mulf %187, %188 : vector<16x384xf32>
    %190 = vector.broadcast %169 : vector<1x384xf32> to vector<16x384xf32>
    %191 = arith.addf %189, %190 : vector<16x384xf32>
    %192 = arith.truncf %191 : vector<16x384xf32> to vector<16x384xbf16>
    %193 = arith.index_cast %arg1 : i32 to index
    %c0_54 = arith.constant 0 : index
    %c0_55 = arith.constant 0 : index
    %194 = vector.load %arg12[%193, %c0_54, %c0_55] : memref<3x384x768xbf16, #tpu.memory_space<vmem>>, vector<1x384x768xbf16>
    %195 = vector.shape_cast %194 : vector<1x384x768xbf16> to vector<384x768xbf16>
    %cst_56 = arith.constant dense<0.000000e+00> : vector<16x768xf32>
    %196 = tpu.matmul %192, %195, %cst_56 {dimension_numbers = #tpu.dot_dimension_numbers<[1], [0], [0], [1], [0, 0, 1, 1], [], []>} : vector<16x384xbf16>, vector<384x768xbf16>, vector<16x768xf32> -> vector<16x768xf32>
    %197 = arith.index_cast %arg1 : i32 to index
    %c0_57 = arith.constant 0 : index
    %c0_58 = arith.constant 0 : index
    %198 = vector.load %arg13[%197, %c0_57, %c0_58] : memref<3x1x768xf32, #tpu.memory_space<vmem>>, vector<1x1x768xf32>
    %199 = vector.shape_cast %198 : vector<1x1x768xf32> to vector<1x768xf32>
    %200 = vector.broadcast %199 : vector<1x768xf32> to vector<16x768xf32>
    %201 = arith.addf %196, %200 : vector<16x768xf32>
    %cst_59 = arith.constant 5.000000e-01 : f32
    %202 = vector.broadcast %cst_59 : f32 to vector<16x768xf32>
    %203 = arith.mulf %201, %202 : vector<16x768xf32>
    %cst_60 = arith.constant 1.41421354 : f32
    %204 = vector.broadcast %cst_60 : f32 to vector<16x768xf32>
    %205 = arith.divf %201, %204 : vector<16x768xf32>
    %206 = math.erf %205 : vector<16x768xf32>
    %cst_61 = arith.constant 1.000000e+00 : f32
    %207 = vector.broadcast %cst_61 : f32 to vector<16x768xf32>
    %208 = arith.addf %207, %206 : vector<16x768xf32>
    %209 = arith.mulf %203, %208 : vector<16x768xf32>
    %210 = arith.truncf %209 : vector<16x768xf32> to vector<16x768xbf16>
    %211 = arith.index_cast %arg1 : i32 to index
    %c0_62 = arith.constant 0 : index
    %c0_63 = arith.constant 0 : index
    %212 = vector.load %arg14[%211, %c0_62, %c0_63] : memref<3x768x384xbf16, #tpu.memory_space<vmem>>, vector<1x768x384xbf16>
    %213 = vector.shape_cast %212 : vector<1x768x384xbf16> to vector<768x384xbf16>
    %cst_64 = arith.constant dense<0.000000e+00> : vector<16x384xf32>
    %214 = tpu.matmul %210, %213, %cst_64 {dimension_numbers = #tpu.dot_dimension_numbers<[1], [0], [0], [1], [0, 0, 1, 1], [], []>} : vector<16x768xbf16>, vector<768x384xbf16>, vector<16x384xf32> -> vector<16x384xf32>
    %215 = arith.index_cast %arg1 : i32 to index
    %c0_65 = arith.constant 0 : index
    %c0_66 = arith.constant 0 : index
    %216 = vector.load %arg15[%215, %c0_65, %c0_66] : memref<3x1x384xf32, #tpu.memory_space<vmem>>, vector<1x1x384xf32>
    %217 = vector.shape_cast %216 : vector<1x1x384xf32> to vector<1x384xf32>
    %218 = vector.broadcast %217 : vector<1x384xf32> to vector<16x384xf32>
    %219 = arith.addf %214, %218 : vector<16x384xf32>
    %220 = arith.addf %219, %191 : vector<16x384xf32>
    %221 = arith.index_cast %arg1 : i32 to index
    %c0_67 = arith.constant 0 : index
    %c0_68 = arith.constant 0 : index
    %222 = vector.load %arg16[%221, %c0_67, %c0_68] : memref<3x1x384xf32, #tpu.memory_space<vmem>>, vector<1x1x384xf32>
    %223 = vector.shape_cast %222 : vector<1x1x384xf32> to vector<1x384xf32>
    %224 = arith.index_cast %arg1 : i32 to index
    %c0_69 = arith.constant 0 : index
    %c0_70 = arith.constant 0 : index
    %225 = vector.load %arg17[%224, %c0_69, %c0_70] : memref<3x1x384xf32, #tpu.memory_space<vmem>>, vector<1x1x384xf32>
    %226 = vector.shape_cast %225 : vector<1x1x384xf32> to vector<1x384xf32>
    %cst_71 = arith.constant dense<0.000000e+00> : vector<16xf32>
    %227 = vector.multi_reduction <add>, %220, %cst_71 [1] : vector<16x384xf32> to vector<16xf32>
    %228 = vector.shape_cast %227 : vector<16xf32> to vector<16x1xf32>
    %cst_72 = arith.constant 3.840000e+02 : f32
    %229 = vector.broadcast %cst_72 : f32 to vector<16x1xf32>
    %230 = arith.divf %228, %229 : vector<16x1xf32>
    %231 = vector.broadcast %230 : vector<16x1xf32> to vector<16x384xf32>
    %232 = arith.subf %220, %231 : vector<16x384xf32>
    %233 = arith.mulf %232, %232 : vector<16x384xf32>
    %cst_73 = arith.constant dense<0.000000e+00> : vector<16xf32>
    %234 = vector.multi_reduction <add>, %233, %cst_73 [1] : vector<16x384xf32> to vector<16xf32>
    %235 = vector.shape_cast %234 : vector<16xf32> to vector<16x1xf32>
    %cst_74 = arith.constant 3.840000e+02 : f32
    %236 = vector.broadcast %cst_74 : f32 to vector<16x1xf32>
    %237 = arith.divf %235, %236 : vector<16x1xf32>
    %238 = vector.broadcast %230 : vector<16x1xf32> to vector<16x384xf32>
    %239 = arith.subf %220, %238 : vector<16x384xf32>
    %cst_75 = arith.constant 9.99999996E-13 : f32
    %240 = vector.broadcast %cst_75 : f32 to vector<16x1xf32>
    %241 = arith.addf %237, %240 : vector<16x1xf32>
    %242 = math.rsqrt %241 : vector<16x1xf32>
    %243 = vector.broadcast %242 : vector<16x1xf32> to vector<16x384xf32>
    %244 = arith.mulf %239, %243 : vector<16x384xf32>
    %245 = vector.broadcast %223 : vector<1x384xf32> to vector<16x384xf32>
    %246 = arith.mulf %244, %245 : vector<16x384xf32>
    %247 = vector.broadcast %226 : vector<1x384xf32> to vector<16x384xf32>
    %248 = arith.addf %246, %247 : vector<16x384xf32>
    %249 = vector.shape_cast %248 : vector<16x384xf32> to vector<2x8x384xf32>
    %c0_76 = arith.constant 0 : index
    %c0_77 = arith.constant 0 : index
    %c0_78 = arith.constant 0 : index
    %250 = vector.load %arg23[%c0_76, %c0_77, %c0_78] : memref<2x8x384xf32, #tpu.memory_space<vmem>>, vector<2x8x384xf32>
    tpu.vector_store %arg23[%c0_76, %c0_77, %c0_78], %249 {strides = array<i32>} : memref<2x8x384xf32, #tpu.memory_space<vmem>>, vector<2x8x384xf32>,
    %c2_i32 = arith.constant 2 : i32
    %251 = arith.cmpi eq, %arg1, %c2_i32 : i32
    %252 = arith.extui %251 : i1 to i32
    %c0_i32_79 = arith.constant 0 : i32
    %253 = arith.cmpi ne, %252, %c0_i32_79 : i32
    scf.if %253 {
      %254 = vector.extract_strided_slice %249 {offsets = [0, 0, 0], sizes = [2, 1, 384], strides = [1, 1, 1]} : vector<2x8x384xf32> to vector<2x1x384xf32>
      %255 = vector.shape_cast %254 : vector<2x1x384xf32> to vector<2x384xf32>
      %256 = arith.truncf %255 : vector<2x384xf32> to vector<2x384xbf16>
      %c0_80 = arith.constant 0 : index
      %c0_81 = arith.constant 0 : index
      %257 = vector.load %arg18[%c0_80, %c0_81] : memref<384x128xbf16, #tpu.memory_space<vmem>>, vector<384x128xbf16>
      %cst_82 = arith.constant dense<0.000000e+00> : vector<2x128xf32>
      %258 = tpu.matmul %256, %257, %cst_82 {dimension_numbers = #tpu.dot_dimension_numbers<[1], [0], [0], [1], [0, 0, 1, 1], [], []>} : vector<2x384xbf16>, vector<384x128xbf16>, vector<2x128xf32> -> vector<2x128xf32>
      %c0_83 = arith.constant 0 : index
      %c0_84 = arith.constant 0 : index
      %259 = vector.load %arg19[%c0_83, %c0_84] : memref<1x128xf32, #tpu.memory_space<vmem>>, vector<1x128xf32>
      %260 = vector.broadcast %259 : vector<1x128xf32> to vector<2x128xf32>
      %261 = arith.addf %258, %260 : vector<2x128xf32>
      %cst_85 = arith.constant 0.000000e+00 : f32
      %262 = vector.broadcast %cst_85 : f32 to vector<2x128xf32>
      %263 = arith.maximumf %261, %262 : vector<2x128xf32>
      %264 = arith.truncf %263 : vector<2x128xf32> to vector<2x128xbf16>
      %c0_86 = arith.constant 0 : index
      %c0_87 = arith.constant 0 : index
      %265 = vector.load %arg20[%c0_86, %c0_87] : memref<128x128xbf16, #tpu.memory_space<vmem>>, vector<128x128xbf16>
      %cst_88 = arith.constant dense<0.000000e+00> : vector<2x128xf32>
      %266 = tpu.matmul %264, %265, %cst_88 {dimension_numbers = #tpu.dot_dimension_numbers<[1], [0], [0], [1], [0, 0, 1, 1], [], []>} : vector<2x128xbf16>, vector<128x128xbf16>, vector<2x128xf32> -> vector<2x128xf32>
      %c0_89 = arith.constant 0 : index
      %c0_90 = arith.constant 0 : index
      %267 = vector.load %arg21[%c0_89, %c0_90] : memref<1x128xf32, #tpu.memory_space<vmem>>, vector<1x128xf32>
      %268 = vector.broadcast %267 : vector<1x128xf32> to vector<2x128xf32>
      %269 = arith.addf %266, %268 : vector<2x128xf32>
      %c0_91 = arith.constant 0 : index
      %c0_92 = arith.constant 0 : index
      %270 = vector.load %arg22[%c0_91, %c0_92] : memref<2x128xf32, #tpu.memory_space<vmem>>, vector<2x128xf32>
      tpu.vector_store %arg22[%c0_91, %c0_92], %269 {strides = array<i32>} : memref<2x128xf32, #tpu.memory_space<vmem>>, vector<2x128xf32>,
    } else {
    }
    return
  }
  func.func @transform_0(%arg0: i32, %arg1: i32) -> (i32, i32, i32) {
    %c0_i32 = arith.constant 0 : i32
    %c0_i32_0 = arith.constant 0 : i32
    %c0_i32_1 = arith.constant 0 : i32
    return %arg0, %c0_i32, %c0_i32_0 : i32, i32, i32
  }
  func.func @transform_1(%arg0: i32, %arg1: i32) -> (i32, i32, i32) {
    %c0_i32 = arith.constant 0 : i32
    %c0_i32_0 = arith.constant 0 : i32
    %c0_i32_1 = arith.constant 0 : i32
    return %arg0, %c0_i32, %c0_i32_0 : i32, i32, i32
  }
  func.func @transform_2(%arg0: i32, %arg1: i32) -> (i32, i32, i32) {
    %c0_i32 = arith.constant 0 : i32
    %c0_i32_0 = arith.constant 0 : i32
    %c0_i32_1 = arith.constant 0 : i32
    %c0_i32_2 = arith.constant 0 : i32
    return %c0_i32, %c0_i32_0, %c0_i32_1 : i32, i32, i32
  }
  func.func @transform_3(%arg0: i32, %arg1: i32) -> (i32, i32, i32) {
    %c0_i32 = arith.constant 0 : i32
    %c0_i32_0 = arith.constant 0 : i32
    %c0_i32_1 = arith.constant 0 : i32
    %c0_i32_2 = arith.constant 0 : i32
    return %c0_i32, %c0_i32_0, %c0_i32_1 : i32, i32, i32
  }
  func.func @transform_4(%arg0: i32, %arg1: i32) -> (i32, i32, i32) {
    %c0_i32 = arith.constant 0 : i32
    %c0_i32_0 = arith.constant 0 : i32
    %c0_i32_1 = arith.constant 0 : i32
    %c0_i32_2 = arith.constant 0 : i32
    return %c0_i32, %c0_i32_0, %c0_i32_1 : i32, i32, i32
  }
  func.func @transform_5(%arg0: i32, %arg1: i32) -> (i32, i32, i32) {
    %c0_i32 = arith.constant 0 : i32
    %c0_i32_0 = arith.constant 0 : i32
    %c0_i32_1 = arith.constant 0 : i32
    %c0_i32_2 = arith.constant 0 : i32
    return %c0_i32, %c0_i32_0, %c0_i32_1 : i32, i32, i32
  }
  func.func @transform_6(%arg0: i32, %arg1: i32) -> (i32, i32, i32) {
    %c0_i32 = arith.constant 0 : i32
    %c0_i32_0 = arith.constant 0 : i32
    %c0_i32_1 = arith.constant 0 : i32
    %c0_i32_2 = arith.constant 0 : i32
    return %c0_i32, %c0_i32_0, %c0_i32_1 : i32, i32, i32
  }
  func.func @transform_7(%arg0: i32, %arg1: i32) -> (i32, i32, i32) {
    %c0_i32 = arith.constant 0 : i32
    %c0_i32_0 = arith.constant 0 : i32
    %c0_i32_1 = arith.constant 0 : i32
    %c0_i32_2 = arith.constant 0 : i32
    return %c0_i32, %c0_i32_0, %c0_i32_1 : i32, i32, i32
  }
  func.func @transform_8(%arg0: i32, %arg1: i32) -> (i32, i32, i32) {
    %c0_i32 = arith.constant 0 : i32
    %c0_i32_0 = arith.constant 0 : i32
    %c0_i32_1 = arith.constant 0 : i32
    %c0_i32_2 = arith.constant 0 : i32
    return %c0_i32, %c0_i32_0, %c0_i32_1 : i32, i32, i32
  }
  func.func @transform_9(%arg0: i32, %arg1: i32) -> (i32, i32, i32) {
    %c0_i32 = arith.constant 0 : i32
    %c0_i32_0 = arith.constant 0 : i32
    %c0_i32_1 = arith.constant 0 : i32
    %c0_i32_2 = arith.constant 0 : i32
    return %c0_i32, %c0_i32_0, %c0_i32_1 : i32, i32, i32
  }
  func.func @transform_10(%arg0: i32, %arg1: i32) -> (i32, i32, i32) {
    %c0_i32 = arith.constant 0 : i32
    %c0_i32_0 = arith.constant 0 : i32
    %c0_i32_1 = arith.constant 0 : i32
    %c0_i32_2 = arith.constant 0 : i32
    return %c0_i32, %c0_i32_0, %c0_i32_1 : i32, i32, i32
  }
  func.func @transform_11(%arg0: i32, %arg1: i32) -> (i32, i32, i32) {
    %c0_i32 = arith.constant 0 : i32
    %c0_i32_0 = arith.constant 0 : i32
    %c0_i32_1 = arith.constant 0 : i32
    %c0_i32_2 = arith.constant 0 : i32
    return %c0_i32, %c0_i32_0, %c0_i32_1 : i32, i32, i32
  }
  func.func @transform_12(%arg0: i32, %arg1: i32) -> (i32, i32, i32) {
    %c0_i32 = arith.constant 0 : i32
    %c0_i32_0 = arith.constant 0 : i32
    %c0_i32_1 = arith.constant 0 : i32
    %c0_i32_2 = arith.constant 0 : i32
    return %c0_i32, %c0_i32_0, %c0_i32_1 : i32, i32, i32
  }
  func.func @transform_13(%arg0: i32, %arg1: i32) -> (i32, i32, i32) {
    %c0_i32 = arith.constant 0 : i32
    %c0_i32_0 = arith.constant 0 : i32
    %c0_i32_1 = arith.constant 0 : i32
    %c0_i32_2 = arith.constant 0 : i32
    return %c0_i32, %c0_i32_0, %c0_i32_1 : i32, i32, i32
  }
  func.func @transform_14(%arg0: i32, %arg1: i32) -> (i32, i32, i32) {
    %c0_i32 = arith.constant 0 : i32
    %c0_i32_0 = arith.constant 0 : i32
    %c0_i32_1 = arith.constant 0 : i32
    %c0_i32_2 = arith.constant 0 : i32
    return %c0_i32, %c0_i32_0, %c0_i32_1 : i32, i32, i32
  }
  func.func @transform_15(%arg0: i32, %arg1: i32) -> (i32, i32, i32) {
    %c0_i32 = arith.constant 0 : i32
    %c0_i32_0 = arith.constant 0 : i32
    %c0_i32_1 = arith.constant 0 : i32
    %c0_i32_2 = arith.constant 0 : i32
    return %c0_i32, %c0_i32_0, %c0_i32_1 : i32, i32, i32
  }
  func.func @transform_16(%arg0: i32, %arg1: i32) -> (i32, i32) {
    %c0_i32 = arith.constant 0 : i32
    %c0_i32_0 = arith.constant 0 : i32
    %c0_i32_1 = arith.constant 0 : i32
    return %c0_i32, %c0_i32_0 : i32, i32
  }
  func.func @transform_17(%arg0: i32, %arg1: i32) -> (i32, i32) {
    %c0_i32 = arith.constant 0 : i32
    %c0_i32_0 = arith.constant 0 : i32
    %c0_i32_1 = arith.constant 0 : i32
    return %c0_i32, %c0_i32_0 : i32, i32
  }
  func.func @transform_18(%arg0: i32, %arg1: i32) -> (i32, i32) {
    %c0_i32 = arith.constant 0 : i32
    %c0_i32_0 = arith.constant 0 : i32
    %c0_i32_1 = arith.constant 0 : i32
    return %c0_i32, %c0_i32_0 : i32, i32
  }
  func.func @transform_19(%arg0: i32, %arg1: i32) -> (i32, i32) {
    %c0_i32 = arith.constant 0 : i32
    %c0_i32_0 = arith.constant 0 : i32
    %c0_i32_1 = arith.constant 0 : i32
    return %c0_i32, %c0_i32_0 : i32, i32
  }
  func.func @transform_20(%arg0: i32, %arg1: i32) -> (i32, i32) {
    %c0_i32 = arith.constant 0 : i32
    %c0_i32_0 = arith.constant 0 : i32
    return %arg0, %c0_i32 : i32, i32
  }
}

</mosaic_0001>

<bundles_post_ra>
// kernel: tpu_custom_call.1
= control target key start
LH: loop header
LB: loop body
LE: loop exit
PB: predicated region body
PF: predicated region fallthrough
CT: control target
= control target key end

     0   :  { %s14667_s0 = inlined_call_operand.hbm [shape: f32[2,8,384], index: 0, kind: input, shape index: {}]   ;;  %s14668_s1 = inlined_call_operand.hbm [shape: f32[2,1,8], index: 1, kind: input, shape index: {}]   ;;  %s14669_s2 = inlined_call_operand.hbm [shape: f32[1,1,384], index: 2, kind: input, shape index: {}]   ;;  %s14670_s3 = inlined_call_operand.hbm [shape: f32[1,1,384], index: 3, kind: input, shape index: {}]   ;;  %s14671_s4 = inlined_call_operand.hbm [shape: bf16[3,384,1152], index: 4, kind: input, shape index: {}]   ;;  %s14672_s5 = inlined_call_operand.hbm [shape: f32[3,1,1152], index: 5, kind: input, shape index: {}]   ;;  %s14673_s6 = inlined_call_operand.hbm [shape: bf16[3,384,384], index: 6, kind: input, shape index: {}]   ;;  %s14674_s7 = inlined_call_operand.hbm [shape: f32[3,1,384], index: 7, kind: input, shape index: {}]   ;;  %s14675_s8 = inlined_call_operand.hbm [shape: f32[3,1,384], index: 8, kind: input, shape index: {}]   ;;  %s14676_s9 = inlined_call_operand.hbm [shape: f32[3,1,384], index: 9, kind: input, shape index: {}]   ;;  %s14677_s10 = inlined_call_operand.hbm [shape: bf16[3,384,768], index: 10, kind: input, shape index: {}]   ;;  %s14678_s11 = inlined_call_operand.hbm [shape: f32[3,1,768], index: 11, kind: input, shape index: {}]   ;;  %s14679_s12 = inlined_call_operand.hbm [shape: bf16[3,768,384], index: 12, kind: input, shape index: {}]   ;;  %s14680_s13 = inlined_call_operand.hbm [shape: f32[3,1,384], index: 13, kind: input, shape index: {}]   ;;  %s14681_s14 = inlined_call_operand.hbm [shape: f32[3,1,384], index: 14, kind: input, shape index: {}]   ;;  %s14682_s15 = inlined_call_operand.hbm [shape: f32[3,1,384], index: 15, kind: input, shape index: {}]   ;;  %s14683_s16 = inlined_call_operand.hbm [shape: bf16[384,128], index: 16, kind: input, shape index: {}]   ;;  %s14684_s17 = inlined_call_operand.hbm [shape: f32[1,128], index: 17, kind: input, shape index: {}]   ;;  %s14685_s18 = inlined_call_operand.hbm [shape: bf16[128,128], index: 18, kind: input, shape index: {}]   ;;  %s14686_s19 = inlined_call_operand.hbm [shape: f32[1,128], index: 19, kind: input, shape index: {}]   ;;  %s14687_s20 = inlined_call_operand.hbm [shape: f32[2,128], index: 20, kind: output, shape index: {}]  }
   0x1   :  { %14699 = sst [smem:[#allocation52_spill]] %s14667_s0 }
   0x2   :  { %14700 = sst [smem:[#allocation53_spill]] %s14668_s1 }
   0x3   :  { %14701 = sst [smem:[#allocation54_spill]] %s14669_s2 }
   0x4   :  { %14702 = sst [smem:[#allocation55_spill]] %s14670_s3 }
   0x5   :  { %14703 = sst [smem:[#allocation56_spill]] %s14671_s4 }
   0x6   :  { %14704 = sst [smem:[#allocation57_spill]] %s14672_s5 }
   0x7   :  { %14705 = sst [smem:[#allocation58_spill]] %s14673_s6 }
   0x8   :  { %14706 = sst [smem:[#allocation59_spill]] %s14674_s7 }
   0x9   :  { %14707 = sst [smem:[#allocation60_spill]] %s14675_s8 }
   0xa   :  { %14708 = sst [smem:[#allocation61_spill]] %s14676_s9 }
   0xb   :  { %14709 = sst [smem:[#allocation62_spill]] %s14686_s19 }
   0xc   :  { %14710 = sst [smem:[#allocation63_spill]] %s14687_s20 }
   0xd   :  { %25 = vsyncpa [#allocation4], 0 }
   0xe   :  { %26 = vsyncpa [#allocation7], 0 }
   0xf   :  { %27 = vsyncpa [#allocation10], 0 }
  0x10   :  { %28 = vsyncpa [#allocation13], 0 }
  0x11   :  { %29 = vsyncpa [#allocation16], 0 }
  0x12   :  { %30 = vsyncpa [#allocation19], 0 }
  0x13   :  { %31 = vsyncpa [#allocation22], 0 }
  0x14   :  { %32 = vsyncpa [#allocation25], 0 }
  0x15   :  { %33 = vsyncpa [#allocation28], 0 }
  0x16   :  { %34 = vsyncpa [#allocation31], 0 }
  0x17   :  { %35 = vsyncpa [#allocation34], 0 }
  0x18   :  { %36 = vsyncpa [#allocation5], 0  ;;  %s12192_s1 = smov 0   ;;  %s12194_s22 = smov 0  }
  0x19   :  { %s12196_s23 = smov 0  }
  0x1a LB: > { %14711 = sst [smem:[#allocation48_spill]] %s12037_s1  ;;  %s14688_s26 = sadd.s32 4294967295, %s12045_s23   ;;  %s12045_s23 = sphi %s12196_s23, %s42_s23   ;;  %s12041_s22 = sphi %s12194_s22, %s14775_s22   ;;  %s12037_s1 = sphi %s12192_s1, %s14774_s1  }
  0x1b   : > { %14712 = sst [smem:[#allocation49_spill]] %s12045_s23  ;;  %p7857_p0 = scmp.ge.s32.totalorder %s12045_s23, 1 }
  0x1c   : > { %s14713_s25 = sld [smem:[#allocation53_spill]]  ;;  %p515_p1 = scmp.lt.s32.totalorder %s12045_s23, 4 }
  0x1d   : > { %p12215_p2 = scmp.eq.s32.totalorder %s14688_s26, 0  ;;  %s12047_s4 = smov [#allocation6]  }
  0x1e   : > { %p12219_p3 = pnand %p7857_p0, %p515_p1  ;;  %s548_s29 = sshll.u32 %s12047_s4, 4  ;;  %s549_s29 = int_to_ptr.vmem [resolvable:$true] %s548_s29 }
  0x1f   : > { %s14714_s27 = scalar_select %p12215_p2, 1, 0 }
  0x20   : > { %s14716_s28 = scalar_select %p12219_p3, 1, 0 }
  0x21   : > { %14715 = sst [smem:[#allocation50_spill]] %s14714_s27  ;;  %p11079_p4 = pneg %p12219_p3 }
  0x22   : > { %s546_s3 = sshll.u32 %s14713_s25, 4  ;;  %14717 = sst [smem:[#allocation51_spill]] %s14716_s28  ;;  %s547_s3 = int_to_ptr.hbm [resolvable:$true] %s546_s3 }
  0x23   : > { %s14718_s21 = sld [smem:[#allocation55_spill]]  ;;  %p12230_p5 = pnand %p12215_p2, %p11079_p4 }
  0x24   : > { %s12048_s25 = smov [#allocation9]   ;;  %s14720_s5 = sld [smem:[#allocation57_spill]] }
  0x25   : > { %s575_s26 = sshll.u32 %s12048_s25, 4  ;;  %s12049_s1 = smov 16   ;;  %s576_s26 = int_to_ptr.vmem [resolvable:$true] %s575_s26 }
  0x26   : > { %s12050_s28 = smov 1   ;;  %s12051_s30 = smov [#allocation12]  }
  0x27   : > { %11085 = dma.hbm_to_vmem [thread:$0]  (!%p12230_p5), %s547_s3, 32, %s549_s29, [#allocation7], %s12049_s1, %s12049_s1, %s12050_s28  }
  0x28   : > { %s600_s0 = sshll.u32 %s12051_s30, 4  ;;  %s12053_s27 = smov 9   ;;  %s601_s0 = int_to_ptr.vmem [resolvable:$true] %s600_s0 }
  0x29   : > { %s573_s24 = sshll.u32 %s14718_s21, 4  ;;  %s12052_s21 = smov 144   ;;  %s574_s24 = int_to_ptr.hbm [resolvable:$true] %s573_s24 }
  0x2a   : > { %s598_s23 = sshll.u32 %s14720_s5, 4  ;;  %s14721_s7 = sld [smem:[#allocation59_spill]]  ;;  %s599_s23 = int_to_ptr.hbm [resolvable:$true] %s598_s23 }
  0x2b   : > { %11091 = dma.hbm_to_vmem [thread:$0]  (!%p12230_p5), %s574_s24, 48, %s576_s26, [#allocation10]  }
  0x2c   : > { %11097 = dma.hbm_to_vmem [thread:$0]  (!%p12230_p5), %s599_s23, 432, %s601_s0, [#allocation13], %s12052_s21, %s12052_s21, %s12053_s27  }
  0x2d   : > { %s12054_s4 = smov [#allocation15]   ;;  %s14722_s9 = sld [smem:[#allocation61_spill]] }
  0x2e   : > { %s628_s5 = sshll.u32 %s12054_s4, 4  ;;  %s14694_s28 = smov 48   ;;  %s629_s5 = int_to_ptr.vmem [resolvable:$true] %s628_s5 }
  0x2f   : > { %s14696_s29 = smov 3   ;;  %s12057_s19 = smov [#allocation18]  }
  0x30   : > { %s626_s20 = sshll.u32 %s14721_s7, 4  ;;  %s656_s23 = sshll.u32 %s12057_s19, 4  ;;  %s627_s20 = int_to_ptr.hbm [resolvable:$true] %s626_s20  ;;  %s657_s23 = int_to_ptr.vmem [resolvable:$true] %s656_s23 }
  0x31   : > { %11103 = dma.hbm_to_vmem [thread:$0]  (!%p12230_p5), %s627_s20, 144, %s629_s5, [#allocation16], %s14694_s28, %s14694_s28, %s14696_s29  }
  0x32   : > { %s682_s30 = sshll.u32 %s14678_s11, 4  ;;  %s12058_s0 = smov [#allocation21]   ;;  %s683_s30 = int_to_ptr.hbm [resolvable:$true] %s682_s30 }
  0x33   : > { %s654_s26 = sshll.u32 %s14722_s9, 4  ;;  %s684_s21 = sshll.u32 %s12058_s0, 4  ;;  %s655_s26 = int_to_ptr.hbm [resolvable:$true] %s654_s26  ;;  %s685_s21 = int_to_ptr.vmem [resolvable:$true] %s684_s21 }
  0x34   : > { %11109 = dma.hbm_to_vmem [thread:$0]  (!%p12230_p5), %s655_s26, 144, %s657_s23, [#allocation19], %s14694_s28, %s14694_s28, %s14696_s29  }
  0x35   : > { %s710_s20 = sshll.u32 %s14680_s13, 4  ;;  %s12059_s4 = smov 96   ;;  %s711_s20 = int_to_ptr.hbm [resolvable:$true] %s710_s20 }
  0x36   : > { %s12060_s1 = smov 6   ;;  %s12061_s3 = smov [#allocation24]  }
  0x37   : > { %11115 = dma.hbm_to_vmem [thread:$0]  (!%p12230_p5), %s683_s30, 288, %s685_s21, [#allocation22], %s12059_s4, %s12059_s4, %s12060_s1  }
  0x38   : > { %s712_s19 = sshll.u32 %s12061_s3, 4  ;;  %s738_s26 = sshll.u32 %s14682_s15, 4  ;;  %s713_s19 = int_to_ptr.vmem [resolvable:$true] %s712_s19  ;;  %s739_s26 = int_to_ptr.hbm [resolvable:$true] %s738_s26 }
  0x39   : > { %11121 = dma.hbm_to_vmem [thread:$0]  (!%p12230_p5), %s711_s20, 144, %s713_s19, [#allocation25], %s14694_s28, %s14694_s28, %s14696_s29  }
  0x3a   : > { %s767_s30 = sshll.u32 %s14684_s17, 4  ;;  %s12062_s21 = smov [#allocation27]   ;;  %s768_s30 = int_to_ptr.hbm [resolvable:$true] %s767_s30 }
  0x3b   : > { %s740_s25 = sshll.u32 %s12062_s21, 4  ;;  %s12063_s5 = smov [#allocation30]   ;;  %s741_s25 = int_to_ptr.vmem [resolvable:$true] %s740_s25 }
  0x3c   : > { %11127 = dma.hbm_to_vmem [thread:$0]  (!%p12230_p5), %s739_s26, 144, %s741_s25, [#allocation28], %s14694_s28, %s14694_s28, %s14696_s29  }
  0x3d   : > { %s769_s4 = sshll.u32 %s12063_s5, 4  ;;  %s51_s20 = sadd.s32 1, %s12041_s22  ;;  %s770_s4 = int_to_ptr.vmem [resolvable:$true] %s769_s4 }
  0x3e   : > { %11133 = dma.hbm_to_vmem [thread:$0]  (!%p12230_p5), %s768_s30, 16, %s770_s4, [#allocation31]  }
  0x3f   : > { %s14723_s19 = sld [smem:[#allocation52_spill]]  ;;  %p52_p6 = scmp.ge.s32.totalorder %s51_s20, 3 }
  0x40   : > { %s12064_s24 = smov [#allocation3]   ;;  %s14724_s21 = sld [smem:[#allocation54_spill]] }
  0x41   : > { %s14777_s20 = smov (%p52_p6, %s51_s20), 0  ;;  %s532_s23 = sshll.u32 %s12064_s24, 4  ;;  %s533_s23 = int_to_ptr.vmem [resolvable:$true] %s532_s23 }
  0x42   : > { %s14698_s5 = smov 384   ;;  %s12066_s30 = smov 24  }
  0x43   : > { %s12067_s4 = smov [#allocation8]   ;;  %s14725_s28 = sld [smem:[#allocation56_spill]] }
  0x44   : > { %s563_s1 = sshll.u32 %s12067_s4, 4  ;;  %s12068_s26 = smov [#allocation11]   ;;  %s564_s1 = int_to_ptr.vmem [resolvable:$true] %s563_s1 }
  0x45   : > { %s530_s27 = sshll.u32 %s14723_s19, 4  ;;  %s586_s0 = sshll.u32 %s12068_s26, 4  ;;  %s531_s27 = int_to_ptr.hbm [resolvable:$true] %s530_s27  ;;  %s587_s0 = int_to_ptr.vmem [resolvable:$true] %s586_s0 }
  0x46   : > { %s561_s25 = sshll.u32 %s14724_s21, 4  ;;  %s14726_s6 = sld [smem:[#allocation58_spill]]  ;;  %s562_s25 = int_to_ptr.hbm [resolvable:$true] %s561_s25 }
  0x47   : > { %11082 = dma.hbm_to_vmem [thread:$0]  (!%p12230_p5), %s531_s27, 768, %s533_s23, [#allocation4], %s14698_s5, %s14698_s5, %s12066_s30  }
  0x48   : > { %11088 = dma.hbm_to_vmem [thread:$0]  (!%p12230_p5), %s562_s25, 48, %s564_s1, [#allocation7]  }
  0x49   : > { %s584_s24 = sshll.u32 %s14725_s28, 4  ;;  %s12069_s27 = smov 576   ;;  %s585_s24 = int_to_ptr.hbm [resolvable:$true] %s584_s24 }
  0x4a   : > { %s12070_s23 = smov 36   ;;  %s12071_s4 = smov [#allocation14]  }
  0x4b   : > { %11094 = dma.hbm_to_vmem [thread:$0]  (!%p12230_p5), %s585_s24, 82944, %s587_s0, [#allocation10], %s12069_s27, %s12069_s27, %s12070_s23  }
  0x4c   : > { %s612_s7 = sshll.u32 %s14726_s6, 4  ;;  %s614_s28 = sshll.u32 %s12071_s4, 4  ;;  %s613_s7 = int_to_ptr.hbm [resolvable:$true] %s612_s7  ;;  %s615_s28 = int_to_ptr.vmem [resolvable:$true] %s614_s28 }
  0x4d   : > { %s12072_s3 = smov 192   ;;  %s12073_s19 = smov 12  }
  0x4e   : > { %11100 = dma.hbm_to_vmem [thread:$0]  (!%p12230_p5), %s613_s7, 27648, %s615_s28, [#allocation13], %s12072_s3, %s12072_s3, %s12073_s19  }
  0x4f   : > { %s14727_s8 = sld [smem:[#allocation60_spill]]  ;;  %s12074_s29 = smov [#allocation17]  }
  0x50   : > { %s642_s21 = sshll.u32 %s12074_s29, 4  ;;  %s668_s0 = sshll.u32 %s14677_s10, 4  ;;  %s643_s21 = int_to_ptr.vmem [resolvable:$true] %s642_s21  ;;  %s669_s0 = int_to_ptr.hbm [resolvable:$true] %s668_s0 }
  0x51   : > { %s14728_s27 = smov 3   ;;  %s14729_s23 = smov 48  }
  0x52   : > { %s12075_s7 = smov [#allocation20]   ;;  %s696_s1 = sshll.u32 %s14679_s12, 4  ;;  %s697_s1 = int_to_ptr.hbm [resolvable:$true] %s696_s1 }
  0x53   : > { %s670_s4 = sshll.u32 %s12075_s7, 4  ;;  %s14730_s29 = smov 384   ;;  %s671_s4 = int_to_ptr.vmem [resolvable:$true] %s670_s4 }
  0x54   : > { %11112 = dma.hbm_to_vmem [thread:$0]  (!%p12230_p5), %s669_s0, 55296, %s671_s4, [#allocation19], %s14730_s29, %s14730_s29, %s12066_s30  }
  0x55   : > { %s640_s26 = sshll.u32 %s14727_s8, 4  ;;  %s724_s6 = sshll.u32 %s14681_s14, 4  ;;  %s641_s26 = int_to_ptr.hbm [resolvable:$true] %s640_s26  ;;  %s725_s6 = int_to_ptr.hbm [resolvable:$true] %s724_s6 }
  0x56   : > { %11106 = dma.hbm_to_vmem [thread:$0]  (!%p12230_p5), %s641_s26, 144, %s643_s21, [#allocation16], %s14729_s23, %s14729_s23, %s14728_s27  }
  0x57   : > { %s12076_s26 = smov [#allocation23]   ;;  %s12077_s7 = smov [#allocation26]  }
  0x58   : > { %s698_s21 = sshll.u32 %s12076_s26, 4  ;;  %s726_s28 = sshll.u32 %s12077_s7, 4  ;;  %s699_s21 = int_to_ptr.vmem [resolvable:$true] %s698_s21  ;;  %s727_s28 = int_to_ptr.vmem [resolvable:$true] %s726_s28 }
  0x59   : > { %11118 = dma.hbm_to_vmem [thread:$0]  (!%p12230_p5), %s697_s1, 55296, %s699_s21, [#allocation22], %s12072_s3, %s12072_s3, %s12073_s19  }
  0x5a   : > { %s752_s9 = sshll.u32 %s14683_s16, 4  ;;  %s12078_s30 = smov [#allocation29]   ;;  %s753_s9 = int_to_ptr.hbm [resolvable:$true] %s752_s9 }
  0x5b   : > { %11124 = dma.hbm_to_vmem [thread:$0]  (!%p12230_p5), %s725_s6, 144, %s727_s28, [#allocation25], %s14729_s23, %s14729_s23, %s14728_s27  }
  0x5c   : > { %s754_s0 = sshll.u32 %s12078_s30, 4  ;;  %s778_s19 = sshll.u32 %s14685_s18, 4  ;;  %s755_s0 = int_to_ptr.vmem [resolvable:$true] %s754_s0  ;;  %s779_s19 = int_to_ptr.hbm [resolvable:$true] %s778_s19 }
  0x5d   : > { %s12079_s1 = smov 64   ;;  %s12080_s29 = smov 4  }
  0x5e   : > { %11130 = dma.hbm_to_vmem [thread:$0]  (!%p12230_p5), %s753_s9, 3072, %s755_s0, [#allocation28], %s12079_s1, %s12079_s1, %s12080_s29  }
  0x5f   : > { %s12081_s8 = smov [#allocation32]   ;;  %s14731_s21 = sld [smem:[#allocation62_spill]] }
  0x60   : > { %s780_s5 = sshll.u32 %s12081_s8, 4  ;;  %s12082_s6 = smov [#allocation33]   ;;  %s781_s5 = int_to_ptr.vmem [resolvable:$true] %s780_s5 }
  0x61   : > { %11136 = dma.hbm_to_vmem [thread:$0]  (!%p12230_p5), %s779_s19, 1024, %s781_s5, [#allocation31], %s12079_s1, %s12079_s1, %s12080_s29  }
  0x62   : > { %s795_s27 = sshll.u32 %s12082_s6, 4  ;;  %808 = sbr.rel (%p12219_p3) target bundleno = 3583 (0xdff), region = 100  ;;  %s796_s27 = int_to_ptr.vmem [resolvable:$true] %s795_s27 }
  0x65   : > { %s793_s7 = sshll.u32 %s14731_s21, 4  ;;  %s794_s7 = int_to_ptr.hbm [resolvable:$true] %s793_s7 }
  0x66   : > { %11139 = dma.hbm_to_vmem [thread:$0]  (!%p12230_p5), %s794_s7, 16, %s796_s27, [#allocation34]  }
  0x67   : > { %11988 = dma.done.wait (%p12215_p2), [#allocation4], 768  }
  0x68   : > { %11990 = vsyncadd (%p12215_p2), [#allocation4], 4294966528 }
  0x69   : > { %11992 = dma.done.wait (%p12215_p2), [#allocation7], 80  }
  0x6a   : > { %11994 = vsyncadd (%p12215_p2), [#allocation7], 4294967216 }
  0x6b   : > { %11996 = dma.done.wait (%p12215_p2), [#allocation10], 82992  }
  0x6c   : > { %11998 = vsyncadd (%p12215_p2), [#allocation10], 4294884304 }
  0x6d   : > { %12000 = dma.done.wait (%p12215_p2), [#allocation13], 28080  }
  0x6e   : > { %12002 = vsyncadd (%p12215_p2), [#allocation13], 4294939216 }
  0x6f   : > { %12004 = dma.done.wait (%p12215_p2), [#allocation16], 288  }
  0x70   : > { %12006 = vsyncadd (%p12215_p2), [#allocation16], 4294967008 }
  0x71   : > { %12008 = dma.done.wait (%p12215_p2), [#allocation19], 55440  }
  0x72   : > { %12010 = vsyncadd (%p12215_p2), [#allocation19], 4294911856 }
  0x73   : > { %12012 = dma.done.wait (%p12215_p2), [#allocation22], 55584  }
  0x74   : > { %12014 = vsyncadd (%p12215_p2), [#allocation22], 4294911712 }
  0x75   : > { %12016 = dma.done.wait (%p12215_p2), [#allocation25], 288  }
  0x76   : > { %12018 = vsyncadd (%p12215_p2), [#allocation25], 4294967008 }
  0x77   : > { %12020 = dma.done.wait (%p12215_p2), [#allocation28], 3216  }
  0x78   : > { %12022 = vsyncadd (%p12215_p2), [#allocation28], 4294964080 }
  0x79   : > { %12024 = dma.done.wait (%p12215_p2), [#allocation31], 1040  }
  0x7a   : > { %12026 = vsyncadd (%p12215_p2), [#allocation31], 4294966256 }
  0x7b   : > { %12028 = dma.done.wait (%p12215_p2), [#allocation34], 16  }
  0x7c   : > { %12030 = vsyncadd (%p12215_p2), [#allocation34], 4294967280  ;;  %s14734_s2 = sld [smem:[#allocation48_spill]] }
  0x82   : > { %p7899_p7 = scmp.ne.s32.totalorder %s14734_s2, 0 }
  0x84   : > { %957 = sbr.rel (%p7899_p7) target bundleno = 423 (0x1a7), region = 184 }
  0x89   : > { %v958_v0 = vld [vmem:[#allocation3] sm:$0xff]  ;;  %v959_v1 = vld [vmem:[#allocation3 + $0x8] sm:$0xff]  ;;  %v960_v2 = vld [vmem:[#allocation3 + $0x10] sm:$0xff]  ;;  %v12083_v10 = vmov 384.0  }
  0x8a   : > { %v966_v3 = vadd.f32 %v959_v1, %v958_v0  ;;  %v961_v4 = vld [vmem:[#allocation3 + $0x18] sm:$0xff]  ;;  %v962_v5 = vld [vmem:[#allocation3 + $0x20] sm:$0xff]  ;;  %v963_v8 = vld [vmem:[#allocation3 + $0x28] sm:$0xff]  ;;  %11246 = vrcp.f32 %v12083_v10 }
  0x8b   : > { %v970_v7 = vadd.f32 %v962_v5, %v961_v4  ;;  %v964_v47 = vld [vmem:[#allocation8] sm:$0x7]  ;;  %v965_v50 = vld [vmem:[#allocation9] sm:$0x7] }
  0x8c   : > { %v967_v6 = vadd.f32 %v966_v3, %v960_v2  ;;  %v1034_v53 = vperm.slane %v964_v47, 0  ;;  %v1035_v54 = vperm.slane %v964_v47, 1  ;;  %v1036_v55 = vperm.slane %v964_v47, 2 }
  0x8d   : > { %v971_v9 = vadd.f32 %v970_v7, %v963_v8  ;;  %v1047_v56 = vperm.slane %v965_v50, 0  ;;  %v1048_v57 = vperm.slane %v965_v50, 1  ;;  %v1049_v60 = vperm.slane %v965_v50, 2 }
  0x8e   : > { %968 = vadd.xlane.f32.xlu0 %v967_v6 }
  0x90   : > { %v11247_v11 = vpop.eup %11246 }
  0x91   : > { %v975_v12 = vmul.f32 384.0, %v11247_v11  ;;  %vm979_vm0 = vweird.f32 %v11247_v11 }
  0x93   : > { %v976_v13 = vsub.f32 1.0, %v975_v12 }
  0x95   : > { %v977_v14 = vmul.f32 %v11247_v11, %v976_v13 }
  0x96   : > { %972 = vadd.xlane.f32.xlu0 %v971_v9 }
  0x97   : > { %v978_v15 = vadd.f32 %v11247_v11, %v977_v14 }
  0x99   : > { %v980_v16 = vsel %vm979_vm0, %v11247_v11, %v978_v15 }
 0x101   : > { %v969_v17 = vpop.xlane.xlu0 %968 }
 0x102   : > { %v981_v18 = vmul.f32 %v980_v16, %v969_v17 }
 0x104   : > { %v983_v19 = vsub.f32 %v958_v0, %v981_v18  ;;  %v984_v20 = vsub.f32 %v959_v1, %v981_v18  ;;  %v985_v21 = vsub.f32 %v960_v2, %v981_v18 }
 0x106   : > { %v989_v22 = vmul.f32 %v983_v19, %v983_v19  ;;  %v990_v23 = vmul.f32 %v984_v20, %v984_v20  ;;  %v991_v24 = vmul.f32 %v985_v21, %v985_v21 }
 0x108   : > { %v995_v25 = vadd.f32 %v990_v23, %v989_v22 }
 0x109   : > { %v973_v26 = vpop.xlane.xlu0 %972 }
 0x10a   : > { %v982_v27 = vmul.f32 %v980_v16, %v973_v26  ;;  %v996_v28 = vadd.f32 %v995_v25, %v991_v24 }
 0x10c   : > { %v986_v29 = vsub.f32 %v961_v4, %v982_v27  ;;  %v987_v30 = vsub.f32 %v962_v5, %v982_v27  ;;  %v988_v31 = vsub.f32 %v963_v8, %v982_v27  ;;  %997 = vadd.xlane.f32.xlu1 %v996_v28 }
 0x10e   : > { %v992_v32 = vmul.f32 %v986_v29, %v986_v29  ;;  %v993_v33 = vmul.f32 %v987_v30, %v987_v30  ;;  %v994_v34 = vmul.f32 %v988_v31, %v988_v31 }
 0x110   : > { %v999_v35 = vadd.f32 %v993_v33, %v992_v32 }
 0x112   : > { %v1000_v36 = vadd.f32 %v999_v35, %v994_v34 }
 0x114   : > { %1001 = vadd.xlane.f32.xlu1 %v1000_v36 }
 0x17f   : > { %v998_v37 = vpop.xlane.xlu1 %997 }
 0x180   : > { %v1003_v38 = vmul.f32 %v998_v37, %v980_v16 }
 0x182   : > { %v1005_v39 = vadd.f32 1e-12, %v1003_v38 }
 0x184   : > { %11248 = vrsqrt.f32 %v1005_v39  ;;  %vm1013_vm2 = vweird.f32 %v1005_v39 }
 0x187   : > { %v1002_v40 = vpop.xlane.xlu1 %1001 }
 0x188   : > { %v1004_v41 = vmul.f32 %v1002_v40, %v980_v16 }
 0x18a   : > { %v11249_v42 = vpop.eup %11248  ;;  %v1006_v43 = vadd.f32 1e-12, %v1004_v41 }
 0x18b   : > { %v1008_v44 = vmul.f32 %v11249_v42, %v1005_v39  ;;  %vm1014_vm1 = vweird.f32 %v11249_v42 }
 0x18c   : > { %11250 = vrsqrt.f32 %v1006_v43  ;;  %vm1015_vm3 = vmor %vm1013_vm2, %vm1014_vm1  ;;  %vm1023_vm5 = vweird.f32 %v1006_v43 }
 0x18d   : > { %v1009_v45 = vmul.f32 %v11249_v42, %v1008_v44 }
 0x18f   : > { %v1010_v46 = vmul.f32 0.5, %v1009_v45 }
 0x191   : > { %v1011_v48 = vsub.f32 1.5, %v1010_v46 }
 0x192   : > { %v11251_v49 = vpop.eup %11250 }
 0x193   : > { %v1012_v51 = vmul.f32 %v11249_v42, %v1011_v48  ;;  %v1018_v52 = vmul.f32 %v11251_v49, %v1006_v43  ;;  %vm1024_vm4 = vweird.f32 %v11251_v49 }
 0x194   : > { %vm1025_vm6 = vmor %vm1023_vm5, %vm1024_vm4 }
 0x195   : > { %v1016_v58 = vsel %vm1015_vm3, %v11249_v42, %v1012_v51  ;;  %v1019_v59 = vmul.f32 %v11251_v49, %v1018_v52 }
 0x196   : > { %v1027_v61 = vmul.f32 %v1016_v58, %v983_v19  ;;  %v1028_v62 = vmul.f32 %v1016_v58, %v984_v20  ;;  %v1029_v63 = vmul.f32 %v1016_v58, %v985_v21 }
 0x197   : > { %v1020_v0 = vmul.f32 0.5, %v1019_v59 }
 0x198   : > { %v1040_v1 = vmul.f32 %v1034_v53, %v1027_v61  ;;  %v1041_v2 = vmul.f32 %v1035_v54, %v1028_v62  ;;  %v1042_v3 = vmul.f32 %v1036_v55, %v1029_v63 }
 0x199   : > { %v1021_v4 = vsub.f32 1.5, %v1020_v0 }
 0x19a   : > { %v1053_v5 = vadd.f32 %v1047_v56, %v1040_v1  ;;  %v1054_v6 = vadd.f32 %v1048_v57, %v1041_v2  ;;  %v1055_v7 = vadd.f32 %v1049_v60, %v1042_v3 }
 0x19b   : > { %v1022_v8 = vmul.f32 %v11251_v49, %v1021_v4 }
 0x19c   : > { %1059 = vst [vmem:[#allocation2 + $0x28] sm:$0xff] %v1053_v5 }
 0x19d   : > { %1060 = vst [vmem:[#allocation2 + $0x10] sm:$0xff] %v1054_v6  ;;  %v1026_v9 = vsel %vm1025_vm6, %v11251_v49, %v1022_v8 }
 0x19e   : > { %1061 = vst [vmem:[#allocation2 + $0x8] sm:$0xff] %v1055_v7  ;;  %v1030_v10 = vmul.f32 %v1026_v9, %v986_v29  ;;  %v1031_v11 = vmul.f32 %v1026_v9, %v987_v30  ;;  %v1032_v12 = vmul.f32 %v1026_v9, %v988_v31 }
 0x1a0   : > { %v1043_v13 = vmul.f32 %v1034_v53, %v1030_v10  ;;  %v1044_v14 = vmul.f32 %v1035_v54, %v1031_v11  ;;  %v1045_v15 = vmul.f32 %v1036_v55, %v1032_v12 }
 0x1a2   : > { %v1056_v16 = vadd.f32 %v1047_v56, %v1043_v13  ;;  %v1057_v17 = vadd.f32 %v1048_v57, %v1044_v14  ;;  %v1058_v18 = vadd.f32 %v1049_v60, %v1045_v15 }
 0x1a4   : > { %1062 = vst [vmem:[#allocation2] sm:$0xff] %v1056_v16 }
 0x1a5   : > { %1063 = vst [vmem:[#allocation2 + $0x18] sm:$0xff] %v1057_v17 }
 0x1a6   : > { %1064 = vst [vmem:[#allocation2 + $0x20] sm:$0xff] %v1058_v18 }
 0x1a7 PF: > { %s14735_s28 = sld [smem:[#allocation48_spill]]  ;;  %vm2920_vm9 = vcmask 64512  }
 0x1ad   : > { %s10383_s25 = smul.u32 1728, %s14735_s28  ;;  %p10250_p8 = scmp.ne.s32.totalorder %s14735_s28, 2 }
 0x1ae   : > { %s1317_s0 = smul.u32 9, %s14735_s28 }
 0x1af   : > { %s12403_s30 = scalar_lea.vmem [#allocation11], %s10383_s25  ;;  %s10600_s3 = smul.u32 576, %s14735_s28 }
 0x1b0   : > { %v8155_v19 = vld [vmem:[%s12403_s30 + $0x1f8] sm:$0xf]  ;;  %v10451_v20 = vld [vmem:[%s12403_s30 + $0x218] sm:$0xf0]  ;;  %v8157_v29 = vld [vmem:[%s12403_s30 + $0x21c] sm:$0xf0] }
 0x1b1   : > { %v8443_v21 = vld [vmem:[%s12403_s30 + $0x438] sm:$0xf]  ;;  %v8156_v22 = vor.u32 %v10451_v20, %v8155_v19  ;;  %v10523_v23 = vld [vmem:[%s12403_s30 + $0x458] sm:$0xf0]  ;;  %v8119_v30 = vld [vmem:[%s12403_s30 + $0x1b0] sm:$0xf] }
 0x1b2   : > { %v8731_v24 = vld [vmem:[%s12403_s30 + $0x678] sm:$0xf]  ;;  %v10595_v25 = vld [vmem:[%s12403_s30 + $0x698] sm:$0xf0]  ;;  %v8444_v26 = vor.u32 %v10523_v23, %v8443_v21  ;;  %v10442_v32 = vld [vmem:[%s12403_s30 + $0x1d0] sm:$0xf0] }
 0x1b3   : > { %v8732_v27 = vor.u32 %v10595_v25, %v8731_v24  ;;  %v10447_v28 = vld [vmem:[%s12403_s30 + $0x1fc] sm:$0xf]  ;;  %2445 = vmatpush.bf16.msra.mxu0 %v8156_v22  ;;  %v8407_v33 = vld [vmem:[%s12403_s30 + $0x3f0] sm:$0xf]  ;;  %v10514_v34 = vld [vmem:[%s12403_s30 + $0x410] sm:$0xf0]  ;;  %v8120_v35 = vor.u32 %v10442_v32, %v8119_v30 }
 0x1b4   : > { %v8160_v31 = vor.u32 %v10447_v28, %v8157_v29  ;;  %2459 = vmatpush.bf16.msra.mxu1 %v8444_v26  ;;  %v8408_v36 = vor.u32 %v10514_v34, %v8407_v33  ;;  %v8695_v37 = vld [vmem:[%s12403_s30 + $0x630] sm:$0xf]  ;;  %v10586_v38 = vld [vmem:[%s12403_s30 + $0x650] sm:$0xf0]  ;;  %v8121_v41 = vld [vmem:[%s12403_s30 + $0x1d4] sm:$0xf0] }
 0x1b5   : > { %2473 = vmatpush.bf16.msra.mxu2 %v8732_v27  ;;  %v10438_v39 = vld [vmem:[%s12403_s30 + $0x1b4] sm:$0xf]  ;;  %v8696_v40 = vor.u32 %v10586_v38, %v8695_v37  ;;  %v8083_v42 = vld [vmem:[%s12403_s30 + $0x168] sm:$0xf]  ;;  %v10433_v43 = vld [vmem:[%s12403_s30 + $0x188] sm:$0xf0] }
 0x1b6   : > { %2487 = vmatpush.bf16.msra.mxu3 %v8160_v31  ;;  %v8124_v44 = vor.u32 %v10438_v39, %v8121_v41  ;;  %v8371_v45 = vld [vmem:[%s12403_s30 + $0x3a8] sm:$0xf]  ;;  %v10505_v46 = vld [vmem:[%s12403_s30 + $0x3c8] sm:$0xf0]  ;;  %v8084_v48 = vor.u32 %v10433_v43, %v8083_v42  ;;  %v8085_v51 = vld [vmem:[%s12403_s30 + $0x18c] sm:$0xf0] }
 0x1b7   : > { %v8659_v47 = vld [vmem:[%s12403_s30 + $0x5e8] sm:$0xf]  ;;  %2446 = vmatpush.bf16.msra.mxu0 %v8120_v35  ;;  %v10577_v49 = vld [vmem:[%s12403_s30 + $0x608] sm:$0xf0]  ;;  %v8372_v52 = vor.u32 %v10505_v46, %v8371_v45  ;;  %v8047_v54 = vld [vmem:[%s12403_s30 + $0x120] sm:$0xf] }
 0x1b8   : > { %v10429_v50 = vld [vmem:[%s12403_s30 + $0x16c] sm:$0xf]  ;;  %2460 = vmatpush.bf16.msra.mxu1 %v8408_v36  ;;  %v8660_v53 = vor.u32 %v10577_v49, %v8659_v47  ;;  %v10424_v55 = vld [vmem:[%s12403_s30 + $0x140] sm:$0xf0]  ;;  %v8335_v56 = vld [vmem:[%s12403_s30 + $0x360] sm:$0xf] }
 0x1b9   : > { %2474 = vmatpush.bf16.msra.mxu2 %v8696_v40  ;;  %v8088_v57 = vor.u32 %v10429_v50, %v8085_v51  ;;  %v10496_v58 = vld [vmem:[%s12403_s30 + $0x380] sm:$0xf0]  ;;  %v8623_v59 = vld [vmem:[%s12403_s30 + $0x5a0] sm:$0xf]  ;;  %v8049_v62 = vld [vmem:[%s12403_s30 + $0x144] sm:$0xf0]  ;;  %v8048_v63 = vor.u32 %v10424_v55, %v8047_v54 }
 0x1ba   : > { %2488 = vmatpush.bf16.msra.mxu3 %v8124_v44  ;;  %v10568_v60 = vld [vmem:[%s12403_s30 + $0x5c0] sm:$0xf0]  ;;  %v8336_v0 = vor.u32 %v10496_v58, %v8335_v56  ;;  %v8011_v2 = vld [vmem:[%s12403_s30 + $0xd8] sm:$0xf]  ;;  %v10415_v3 = vld [vmem:[%s12403_s30 + $0xf8] sm:$0xf0] }
 0x1bb   : > { %v10420_v61 = vld [vmem:[%s12403_s30 + $0x124] sm:$0xf]  ;;  %2447 = vmatpush.bf16.msra.mxu0 %v8084_v48  ;;  %v8624_v1 = vor.u32 %v10568_v60, %v8623_v59  ;;  %v8299_v4 = vld [vmem:[%s12403_s30 + $0x318] sm:$0xf]  ;;  %v10487_v6 = vld [vmem:[%s12403_s30 + $0x338] sm:$0xf0]  ;;  %v8012_v11 = vor.u32 %v10415_v3, %v8011_v2 }
 0x1bc   : > { %2461 = vmatpush.bf16.msra.mxu1 %v8372_v52  ;;  %v8052_v5 = vor.u32 %v10420_v61, %v8049_v62  ;;  %v8587_v7 = vld [vmem:[%s12403_s30 + $0x558] sm:$0xf]  ;;  %v10559_v8 = vld [vmem:[%s12403_s30 + $0x578] sm:$0xf0]  ;;  %v8013_v10 = vld [vmem:[%s12403_s30 + $0xfc] sm:$0xf0]  ;;  %v8300_v12 = vor.u32 %v10487_v6, %v8299_v4 }
 0x1bd   : > { %2475 = vmatpush.bf16.msra.mxu2 %v8660_v53  ;;  %v10411_v9 = vld [vmem:[%s12403_s30 + $0xdc] sm:$0xf]  ;;  %v8588_v13 = vor.u32 %v10559_v8, %v8587_v7  ;;  %v7975_v14 = vld [vmem:[%s12403_s30 + $0x90] sm:$0xf]  ;;  %v10406_v15 = vld [vmem:[%s12403_s30 + $0xb0] sm:$0xf0] }
 0x1be   : > { %2489 = vmatpush.bf16.msra.mxu3 %v8088_v57  ;;  %v8263_v16 = vld [vmem:[%s12403_s30 + $0x2d0] sm:$0xf]  ;;  %v8016_v17 = vor.u32 %v10411_v9, %v8013_v10  ;;  %v10478_v18 = vld [vmem:[%s12403_s30 + $0x2f0] sm:$0xf0]  ;;  %v7977_v22 = vld [vmem:[%s12403_s30 + $0xb4] sm:$0xf0]  ;;  %v7976_v23 = vor.u32 %v10406_v15, %v7975_v14 }
 0x1bf   : > { %2448 = vmatpush.bf16.msra.mxu0 %v8048_v63  ;;  %v8551_v19 = vld [vmem:[%s12403_s30 + $0x510] sm:$0xf]  ;;  %v10550_v20 = vld [vmem:[%s12403_s30 + $0x530] sm:$0xf0]  ;;  %v8264_v24 = vor.u32 %v10478_v18, %v8263_v16  ;;  %v7939_v26 = vld [vmem:[%s12403_s30 + $0x48] sm:$0xf] }
 0x1c0   : > { %2462 = vmatpush.bf16.msra.mxu1 %v8336_v0  ;;  %v10402_v21 = vld [vmem:[%s12403_s30 + $0x94] sm:$0xf]  ;;  %v8552_v25 = vor.u32 %v10550_v20, %v8551_v19  ;;  %v10397_v27 = vld [vmem:[%s12403_s30 + $0x68] sm:$0xf0]  ;;  %v8227_v28 = vld [vmem:[%s12403_s30 + $0x288] sm:$0xf] }
 0x1c1   : > { %2476 = vmatpush.bf16.msra.mxu2 %v8624_v1  ;;  %v7980_v29 = vor.u32 %v10402_v21, %v7977_v22  ;;  %v10469_v30 = vld [vmem:[%s12403_s30 + $0x2a8] sm:$0xf0]  ;;  %v8515_v31 = vld [vmem:[%s12403_s30 + $0x4c8] sm:$0xf]  ;;  %v7941_v34 = vld [vmem:[%s12403_s30 + $0x6c] sm:$0xf0]  ;;  %v7940_v35 = vor.u32 %v10397_v27, %v7939_v26 }
 0x1c2   : > { %2490 = vmatpush.bf16.msra.mxu3 %v8052_v5  ;;  %v10541_v32 = vld [vmem:[%s12403_s30 + $0x4e8] sm:$0xf0]  ;;  %v7903_v36 = vld [vmem:[%s12403_s30] sm:$0xf]  ;;  %v10388_v37 = vld [vmem:[%s12403_s30 + $0x20] sm:$0xf0]  ;;  %v8228_v38 = vor.u32 %v10469_v30, %v8227_v28 }
 0x1c3   : > { %2449 = vmatpush.bf16.msra.mxu0 %v8012_v11  ;;  %v10393_v33 = vld [vmem:[%s12403_s30 + $0x4c] sm:$0xf]  ;;  %v8516_v39 = vor.u32 %v10541_v32, %v8515_v31  ;;  %v8191_v40 = vld [vmem:[%s12403_s30 + $0x240] sm:$0xf]  ;;  %v10460_v41 = vld [vmem:[%s12403_s30 + $0x260] sm:$0xf0]  ;;  %v7904_v50 = vor.u32 %v10388_v37, %v7903_v36 }
 0x1c4   : > { %2463 = vmatpush.bf16.msra.mxu1 %v8300_v12  ;;  %v8479_v42 = vld [vmem:[%s12403_s30 + $0x480] sm:$0xf]  ;;  %v7944_v43 = vor.u32 %v10393_v33, %v7941_v34  ;;  %v10532_v44 = vld [vmem:[%s12403_s30 + $0x4a0] sm:$0xf0]  ;;  %v7905_v46 = vld [vmem:[%s12403_s30 + $0x24] sm:$0xf0]  ;;  %v8192_v54 = vor.u32 %v10460_v41, %v8191_v40 }
 0x1c5   : > { %2477 = vmatpush.bf16.msra.mxu2 %v8588_v13  ;;  %v10384_v45 = vld [vmem:[%s12403_s30 + $0x4] sm:$0xf]  ;;  %v10519_v47 = vld [vmem:[%s12403_s30 + $0x43c] sm:$0xf]  ;;  %v8445_v48 = vld [vmem:[%s12403_s30 + $0x45c] sm:$0xf0]  ;;  %v8480_v55 = vor.u32 %v10532_v44, %v8479_v42 }
 0x1c6   : > { %2491 = vmatpush.bf16.msra.mxu3 %v8016_v17  ;;  %v10591_v49 = vld [vmem:[%s12403_s30 + $0x67c] sm:$0xf]  ;;  %v8733_v51 = vld [vmem:[%s12403_s30 + $0x69c] sm:$0xf0]  ;;  %v10452_v53 = vld [vmem:[%s12403_s30 + $0x220] sm:$0xf0]  ;;  %v7908_v58 = vor.u32 %v10384_v45, %v7905_v46  ;;  %v8448_v59 = vor.u32 %v10519_v47, %v8445_v48 }
 0x1c7   : > { %2450 = vmatpush.bf16.msra.mxu0 %v7976_v23  ;;  %v8163_v52 = vld [vmem:[%s12403_s30 + $0x200] sm:$0xf]  ;;  %v10524_v57 = vld [vmem:[%s12403_s30 + $0x460] sm:$0xf0]  ;;  %v10510_v60 = vld [vmem:[%s12403_s30 + $0x3f4] sm:$0xf]  ;;  %v8736_v61 = vor.u32 %v10591_v49, %v8733_v51 }
 0x1c8   : > { %2464 = vmatpush.bf16.msra.mxu1 %v8264_v24  ;;  %v8451_v56 = vld [vmem:[%s12403_s30 + $0x440] sm:$0xf]  ;;  %v8164_v62 = vor.u32 %v10452_v53, %v8163_v52  ;;  %v8409_v63 = vld [vmem:[%s12403_s30 + $0x414] sm:$0xf0]  ;;  %v10582_v0 = vld [vmem:[%s12403_s30 + $0x634] sm:$0xf] }
 0x1c9   : > { %2478 = vmatpush.bf16.msra.mxu2 %v8552_v25  ;;  %v8697_v1 = vld [vmem:[%s12403_s30 + $0x654] sm:$0xf0]  ;;  %v8452_v2 = vor.u32 %v10524_v57, %v8451_v56  ;;  %v10443_v4 = vld [vmem:[%s12403_s30 + $0x1d8] sm:$0xf0]  ;;  %v1065_v7 = vld [vmem:[#allocation2 + $0x28] sm:$0xff]  ;;  %v8412_v9 = vor.u32 %v10510_v60, %v8409_v63  ;;  %s12582_s4 = scalar_lea.vmem [#allocation12], %s1317_s0 }
 0x1ca   : > { %2492 = vmatpush.bf16.msra.mxu3 %v7980_v29  ;;  %v8127_v3 = vld [vmem:[%s12403_s30 + $0x1b8] sm:$0xf]  ;;  %v10515_v6 = vld [vmem:[%s12403_s30 + $0x418] sm:$0xf0]  ;;  %v1068_v8 = vld [vmem:[#allocation2] sm:$0xff]  ;;  %v8700_v14 = vor.u32 %v10582_v0, %v8697_v1  ;;  %s13080_s19 = scalar_lea.vmem [#allocation14], %s10600_s3 }
 0x1cb   : > { %2451 = vmatpush.bf16.msra.mxu0 %v7940_v35  ;;  %v8415_v5 = vld [vmem:[%s12403_s30 + $0x3f8] sm:$0xf]  ;;  %v10501_v10 = vld [vmem:[%s12403_s30 + $0x3ac] sm:$0xf]  ;;  %v8373_v11 = vld [vmem:[%s12403_s30 + $0x3cc] sm:$0xf0]  ;;  %v12488_v13 = vpack.c.bf16 %v1068_v8, %v1065_v7  ;;  %v8128_v15 = vor.u32 %v10443_v4, %v8127_v3 }
 0x1cc   : > { %2465 = vmatpush.bf16.msra.mxu1 %v8228_v38  ;;  %v10573_v12 = vld [vmem:[%s12403_s30 + $0x5ec] sm:$0xf]  ;;  %v8661_v16 = vld [vmem:[%s12403_s30 + $0x60c] sm:$0xf0]  ;;  %v10434_v18 = vld [vmem:[%s12403_s30 + $0x190] sm:$0xf0]  ;;  %v8416_v19 = vor.u32 %v10515_v6, %v8415_v5  ;;  %v8376_v27 = vor.u32 %v10501_v10, %v8373_v11 }
 0x1cd   : > { %2479 = vmatpush.bf16.msra.mxu2 %v8516_v39  ;;  %v8091_v17 = vld [vmem:[%s12403_s30 + $0x170] sm:$0xf]  ;;  %v1069_v22 = vld [vmem:[#allocation2 + $0x18] sm:$0xff]  ;;  %v10506_v23 = vld [vmem:[%s12403_s30 + $0x3d0] sm:$0xf0]  ;;  %v8664_v29 = vor.u32 %v10573_v12, %v8661_v16  ;;  %s13279_s1 = smul.u32 3, %s14735_s28 }
 0x1ce   : > { %2493 = vmatpush.bf16.msra.mxu3 %v7944_v43  ;;  %v8379_v20 = vld [vmem:[%s12403_s30 + $0x3b0] sm:$0xf]  ;;  %v1067_v25 = vld [vmem:[#allocation2 + $0x8] sm:$0xff]  ;;  %v1070_v26 = vld [vmem:[#allocation2 + $0x20] sm:$0xff]  ;;  %v8092_v30 = vor.u32 %v10434_v18, %v8091_v17  ;;  %s10673_s8 = smul.u32 1152, %s14735_s28 }
 0x1cf   : > { %2452 = vmatpush.bf16.msra.mxu0 %v7904_v50  ;;  %v1066_v21 = vld [vmem:[#allocation2 + $0x10] sm:$0xff]  ;;  %v12499_v28 = vpack.c.bf16 %v1070_v26, %v1067_v25  ;;  %v10492_v31 = vld [vmem:[%s12403_s30 + $0x364] sm:$0xf]  ;;  %v8337_v32 = vld [vmem:[%s12403_s30 + $0x384] sm:$0xf0]  ;;  %v8380_v34 = vor.u32 %v10506_v23, %v8379_v20  ;;  %s3606_s29 = scalar_lea.vmem [#allocation15], %s13279_s1 }
 0x1d0   : > { %2466 = vmatpush.bf16.msra.mxu1 %v8192_v54  ;;  %v12496_v24 = vpack.c.bf16 %v1069_v22, %v1066_v21  ;;  %v10564_v33 = vld [vmem:[%s12403_s30 + $0x5a4] sm:$0xf]  ;;  %v8625_v35 = vld [vmem:[%s12403_s30 + $0x5c4] sm:$0xf0]  ;;  %v10425_v37 = vld [vmem:[%s12403_s30 + $0x148] sm:$0xf0]  ;;  %v8340_v40 = vor.u32 %v10492_v31, %v8337_v32 }
 0x1d1   : > { %2480 = vmatpush.bf16.msra.mxu2 %v8480_v55  ;;  %v8055_v36 = vld [vmem:[%s12403_s30 + $0x128] sm:$0xf]  ;;  %v10497_v39 = vld [vmem:[%s12403_s30 + $0x388] sm:$0xf0]  ;;  %v8628_v41 = vor.u32 %v10564_v33, %v8625_v35  ;;  %v10483_v43 = vld [vmem:[%s12403_s30 + $0x31c] sm:$0xf] }
 0x1d2   : > { %2494 = vmatpush.bf16.msra.mxu3 %v7908_v58  ;;  %2453 = vmatmul.bf16.vlgmr.msra.gmra.mxu0 %v12488_v13  ;;  %v8343_v38 = vld [vmem:[%s12403_s30 + $0x368] sm:$0xf]  ;;  %v8056_v42 = vor.u32 %v10425_v37, %v8055_v36  ;;  %v8301_v44 = vld [vmem:[%s12403_s30 + $0x33c] sm:$0xf0]  ;;  %v10555_v45 = vld [vmem:[%s12403_s30 + $0x55c] sm:$0xf] }
 0x1d3   : > { %2501 = vmatpush.bf16.msrb.mxu0 %v8448_v59  ;;  %2467 = vmatmul.bf16.vlgmr.msra.gmra.mxu1 %v12496_v24  ;;  %v8344_v46 = vor.u32 %v10497_v39, %v8343_v38  ;;  %v8589_v47 = vld [vmem:[%s12403_s30 + $0x57c] sm:$0xf0]  ;;  %v10416_v49 = vld [vmem:[%s12403_s30 + $0x100] sm:$0xf0]  ;;  %v8304_v52 = vor.u32 %v10483_v43, %v8301_v44  ;;  %v10474_v55 = vld [vmem:[%s12403_s30 + $0x2d4] sm:$0xf] }
 0x1d4   : > { %2515 = vmatpush.bf16.msrb.mxu1 %v8736_v61  ;;  %2481 = vmatmul.bf16.vlgmr.msra.gmra.mxu2 %v12499_v28  ;;  %v8019_v48 = vld [vmem:[%s12403_s30 + $0xe0] sm:$0xf]  ;;  %v10488_v51 = vld [vmem:[%s12403_s30 + $0x340] sm:$0xf0]  ;;  %v8592_v53 = vor.u32 %v10555_v45, %v8589_v47  ;;  %v8265_v56 = vld [vmem:[%s12403_s30 + $0x2f4] sm:$0xf0] }
 0x1d5   : > { %2529 = vmatpush.bf16.msrb.mxu2 %v8164_v62  ;;  %2495 = vmatmul.bf16.vlgmr.msra.gmra.mxu3 %v12488_v13  ;;  %v8307_v50 = vld [vmem:[%s12403_s30 + $0x320] sm:$0xf]  ;;  %v8020_v54 = vor.u32 %v10416_v49, %v8019_v48  ;;  %v10546_v57 = vld [vmem:[%s12403_s30 + $0x514] sm:$0xf]  ;;  %v8553_v59 = vld [vmem:[%s12403_s30 + $0x534] sm:$0xf0]  ;;  %v8268_v0 = vor.u32 %v10474_v55, %v8265_v56 }
 0x1d6   : > { %2543 = vmatpush.bf16.msrb.mxu3 %v8452_v2  ;;  %v8308_v58 = vor.u32 %v10488_v51, %v8307_v50  ;;  %v7983_v60 = vld [vmem:[%s12403_s30 + $0x98] sm:$0xf]  ;;  %v10407_v61 = vld [vmem:[%s12403_s30 + $0xb8] sm:$0xf0]  ;;  %v8556_v1 = vor.u32 %v10546_v57, %v8553_v59  ;;  %v10465_v3 = vld [vmem:[%s12403_s30 + $0x28c] sm:$0xf] }
 0x1d7   : > { %2502 = vmatpush.bf16.msrb.mxu0 %v8412_v9  ;;  %v8271_v62 = vld [vmem:[%s12403_s30 + $0x2d8] sm:$0xf]  ;;  %v10479_v63 = vld [vmem:[%s12403_s30 + $0x2f8] sm:$0xf0]  ;;  %v7984_v2 = vor.u32 %v10407_v61, %v7983_v60  ;;  %v8229_v4 = vld [vmem:[%s12403_s30 + $0x2ac] sm:$0xf0] }
 0x1d8   : > { %2516 = vmatpush.bf16.msrb.mxu1 %v8700_v14  ;;  %v10537_v5 = vld [vmem:[%s12403_s30 + $0x4cc] sm:$0xf]  ;;  %v8272_v6 = vor.u32 %v10479_v63, %v8271_v62  ;;  %v8517_v7 = vld [vmem:[%s12403_s30 + $0x4ec] sm:$0xf0]  ;;  %v10398_v9 = vld [vmem:[%s12403_s30 + $0x70] sm:$0xf0]  ;;  %v8232_v12 = vor.u32 %v10465_v3, %v8229_v4 }
 0x1d9   : > { %2530 = vmatpush.bf16.msrb.mxu2 %v8128_v15  ;;  %v7947_v8 = vld [vmem:[%s12403_s30 + $0x50] sm:$0xf]  ;;  %v10470_v11 = vld [vmem:[%s12403_s30 + $0x2b0] sm:$0xf0]  ;;  %v10456_v14 = vld [vmem:[%s12403_s30 + $0x244] sm:$0xf]  ;;  %v8520_v16 = vor.u32 %v10537_v5, %v8517_v7 }
 0x1da   : > { %2544 = vmatpush.bf16.msrb.mxu3 %v8416_v19  ;;  %v8235_v10 = vld [vmem:[%s12403_s30 + $0x290] sm:$0xf]  ;;  %v8193_v15 = vld [vmem:[%s12403_s30 + $0x264] sm:$0xf0]  ;;  %v7948_v17 = vor.u32 %v10398_v9, %v7947_v8  ;;  %v10528_v18 = vld [vmem:[%s12403_s30 + $0x484] sm:$0xf] }
 0x1db   : > { %2503 = vmatpush.bf16.msrb.mxu0 %v8376_v27  ;;  %v8481_v19 = vld [vmem:[%s12403_s30 + $0x4a4] sm:$0xf0]  ;;  %v8236_v21 = vor.u32 %v10470_v11, %v8235_v10  ;;  %v10389_v22 = vld [vmem:[%s12403_s30 + $0x28] sm:$0xf0]  ;;  %v8739_v26 = vld [vmem:[%s12403_s30 + $0x680] sm:$0xf] }
 0x1dc   : > { %2517 = vmatpush.bf16.msrb.mxu1 %v8664_v29  ;;  %v7911_v20 = vld [vmem:[%s12403_s30 + $0x8] sm:$0xf]  ;;  %v10461_v25 = vld [vmem:[%s12403_s30 + $0x268] sm:$0xf0]  ;;  %v10596_v27 = vld [vmem:[%s12403_s30 + $0x6a0] sm:$0xf0] }
 0x1dd   : > { %2531 = vmatpush.bf16.msrb.mxu2 %v8092_v30  ;;  %v8199_v23 = vld [vmem:[%s12403_s30 + $0x248] sm:$0xf]  ;;  %v10448_v29 = vld [vmem:[%s12403_s30 + $0x204] sm:$0xf]  ;;  %v8196_v30 = vor.u32 %v10456_v14, %v8193_v15  ;;  %v7912_v35 = vor.u32 %v10389_v22, %v7911_v20  ;;  %v8740_v39 = vor.u32 %v10596_v27, %v8739_v26  ;;  %v10587_v43 = vld [vmem:[%s12403_s30 + $0x658] sm:$0xf0] }
 0x1de   : > { %2545 = vmatpush.bf16.msrb.mxu3 %v8380_v34  ;;  %v8165_v31 = vld [vmem:[%s12403_s30 + $0x224] sm:$0xf0]  ;;  %v10520_v32 = vld [vmem:[%s12403_s30 + $0x444] sm:$0xf]  ;;  %v8484_v34 = vor.u32 %v10528_v18, %v8481_v19  ;;  %v8200_v38 = vor.u32 %v10461_v25, %v8199_v23  ;;  %v10439_v44 = vld [vmem:[%s12403_s30 + $0x1bc] sm:$0xf] }
 0x1df   : > { %2504 = vmatpush.bf16.msrb.mxu0 %v8340_v40  ;;  %v8453_v33 = vld [vmem:[%s12403_s30 + $0x464] sm:$0xf0]  ;;  %v10592_v36 = vld [vmem:[%s12403_s30 + $0x684] sm:$0xf]  ;;  %v8168_v40 = vor.u32 %v10448_v29, %v8165_v31  ;;  %v10511_v47 = vld [vmem:[%s12403_s30 + $0x3fc] sm:$0xf] }
 0x1e0   : > { %2518 = vmatpush.bf16.msrb.mxu1 %v8628_v41  ;;  %v8741_v37 = vld [vmem:[%s12403_s30 + $0x6a4] sm:$0xf0]  ;;  %v8456_v41 = vor.u32 %v10520_v32, %v8453_v33  ;;  %v8417_v48 = vld [vmem:[%s12403_s30 + $0x41c] sm:$0xf0]  ;;  %v10583_v49 = vld [vmem:[%s12403_s30 + $0x63c] sm:$0xf] }
 0x1e1   : > { %2532 = vmatpush.bf16.msrb.mxu2 %v8056_v42  ;;  %v8703_v42 = vld [vmem:[%s12403_s30 + $0x638] sm:$0xf]  ;;  %v8744_v45 = vor.u32 %v10592_v36, %v8741_v37  ;;  %v8705_v50 = vld [vmem:[%s12403_s30 + $0x65c] sm:$0xf0]  ;;  %v10578_v55 = vld [vmem:[%s12403_s30 + $0x610] sm:$0xf0] }
 0x1e2   : > { %2546 = vmatpush.bf16.msrb.mxu3 %v8344_v46  ;;  %v8129_v46 = vld [vmem:[%s12403_s30 + $0x1dc] sm:$0xf0]  ;;  %v8704_v51 = vor.u32 %v10587_v43, %v8703_v42  ;;  %v10430_v56 = vld [vmem:[%s12403_s30 + $0x174] sm:$0xf]  ;;  %v8708_v57 = vor.u32 %v10583_v49, %v8705_v50  ;;  %v8381_v60 = vld [vmem:[%s12403_s30 + $0x3d4] sm:$0xf0] }
 0x1e3   : > { %2505 = vmatpush.bf16.msrb.mxu0 %v8304_v52  ;;  %v8132_v52 = vor.u32 %v10439_v44, %v8129_v46  ;;  %v10502_v59 = vld [vmem:[%s12403_s30 + $0x3b4] sm:$0xf]  ;;  %v8669_v62 = vld [vmem:[%s12403_s30 + $0x614] sm:$0xf0]  ;;  %v10569_v3 = vld [vmem:[%s12403_s30 + $0x5c8] sm:$0xf0] }
 0x1e4   : > { %2519 = vmatpush.bf16.msrb.mxu1 %v8592_v53  ;;  %v8420_v53 = vor.u32 %v10511_v47, %v8417_v48  ;;  %v10574_v61 = vld [vmem:[%s12403_s30 + $0x5f4] sm:$0xf]  ;;  %v10421_v4 = vld [vmem:[%s12403_s30 + $0x12c] sm:$0xf]  ;;  %v8345_v8 = vld [vmem:[%s12403_s30 + $0x38c] sm:$0xf0] }
 0x1e5   : > { %2533 = vmatpush.bf16.msrb.mxu2 %v8020_v54  ;;  %v8667_v54 = vld [vmem:[%s12403_s30 + $0x5f0] sm:$0xf]  ;;  %v8672_v5 = vor.u32 %v10574_v61, %v8669_v62  ;;  %v10493_v7 = vld [vmem:[%s12403_s30 + $0x36c] sm:$0xf]  ;;  %v8595_v15 = vld [vmem:[%s12403_s30 + $0x560] sm:$0xf] }
 0x1e6   : > { %2547 = vmatpush.bf16.msrb.mxu3 %v8308_v58  ;;  %v8093_v58 = vld [vmem:[%s12403_s30 + $0x194] sm:$0xf0]  ;;  %v8668_v63 = vor.u32 %v10578_v55, %v8667_v54  ;;  %v10565_v9 = vld [vmem:[%s12403_s30 + $0x5ac] sm:$0xf]  ;;  %v8633_v10 = vld [vmem:[%s12403_s30 + $0x5cc] sm:$0xf0]  ;;  %v8348_v14 = vor.u32 %v10493_v7, %v8345_v8 }
 0x1e7   : > { %2506 = vmatpush.bf16.msrb.mxu0 %v8268_v0  ;;  %v8096_v0 = vor.u32 %v10430_v56, %v8093_v58  ;;  %v8636_v18 = vor.u32 %v10565_v9, %v8633_v10  ;;  %v8021_v19 = vld [vmem:[%s12403_s30 + $0x104] sm:$0xf0]  ;;  %v10484_v20 = vld [vmem:[%s12403_s30 + $0x324] sm:$0xf]  ;;  %v8559_v29 = vld [vmem:[%s12403_s30 + $0x518] sm:$0xf] }
 0x1e8   : > { %2520 = vmatpush.bf16.msrb.mxu1 %v8556_v1  ;;  %v8384_v1 = vor.u32 %v10502_v59, %v8381_v60  ;;  %v10556_v22 = vld [vmem:[%s12403_s30 + $0x564] sm:$0xf]  ;;  %v8597_v23 = vld [vmem:[%s12403_s30 + $0x584] sm:$0xf0]  ;;  %v10403_v31 = vld [vmem:[%s12403_s30 + $0x9c] sm:$0xf] }
 0x1e9   : > { %2534 = vmatpush.bf16.msrb.mxu2 %v7984_v2  ;;  %v8631_v2 = vld [vmem:[%s12403_s30 + $0x5a8] sm:$0xf]  ;;  %v8600_v32 = vor.u32 %v10556_v22, %v8597_v23  ;;  %v7985_v33 = vld [vmem:[%s12403_s30 + $0xbc] sm:$0xf0]  ;;  %v10547_v36 = vld [vmem:[%s12403_s30 + $0x51c] sm:$0xf] }
 0x1ea   : > { %2548 = vmatpush.bf16.msrb.mxu3 %v8272_v6  ;;  %v8057_v6 = vld [vmem:[%s12403_s30 + $0x14c] sm:$0xf0]  ;;  %v8632_v11 = vor.u32 %v10569_v3, %v8631_v2  ;;  %v8561_v37 = vld [vmem:[%s12403_s30 + $0x53c] sm:$0xf0]  ;;  %v10542_v42 = vld [vmem:[%s12403_s30 + $0x4f0] sm:$0xf0] }
 0x1eb   : > { %2507 = vmatpush.bf16.msrb.mxu0 %v8232_v12  ;;  %v8060_v12 = vor.u32 %v10421_v4, %v8057_v6  ;;  %v10394_v43 = vld [vmem:[%s12403_s30 + $0x54] sm:$0xf]  ;;  %v8564_v44 = vor.u32 %v10547_v36, %v8561_v37  ;;  %v8237_v47 = vld [vmem:[%s12403_s30 + $0x2b4] sm:$0xf0]  ;;  %v10533_v54 = vld [vmem:[%s12403_s30 + $0x4a8] sm:$0xf0] }
 0x1ec   : > { %2521 = vmatpush.bf16.msrb.mxu1 %v8520_v16  ;;  %v10560_v16 = vld [vmem:[%s12403_s30 + $0x580] sm:$0xf0]  ;;  %v10466_v46 = vld [vmem:[%s12403_s30 + $0x294] sm:$0xf]  ;;  %v8525_v49 = vld [vmem:[%s12403_s30 + $0x4f4] sm:$0xf0] }
 0x1ed   : > { %2535 = vmatpush.bf16.msrb.mxu2 %v7948_v17  ;;  %v10412_v17 = vld [vmem:[%s12403_s30 + $0xe4] sm:$0xf]  ;;  %v8596_v25 = vor.u32 %v10560_v16, %v8595_v15  ;;  %v10538_v48 = vld [vmem:[%s12403_s30 + $0x4d4] sm:$0xf]  ;;  %v10385_v55 = vld [vmem:[%s12403_s30 + $0xc] sm:$0xf] }
 0x1ee   : > { %2549 = vmatpush.bf16.msrb.mxu3 %v8236_v21  ;;  %v8309_v21 = vld [vmem:[%s12403_s30 + $0x344] sm:$0xf0]  ;;  %v8024_v26 = vor.u32 %v10412_v17, %v8021_v19  ;;  %v7913_v56 = vld [vmem:[%s12403_s30 + $0x2c] sm:$0xf0]  ;;  %v10457_v58 = vld [vmem:[%s12403_s30 + $0x24c] sm:$0xf] }
 0x1ef   : > { %2508 = vmatpush.bf16.msrb.mxu0 %v8196_v30  ;;  %v8312_v27 = vor.u32 %v10484_v20, %v8309_v21  ;;  %v10551_v30 = vld [vmem:[%s12403_s30 + $0x538] sm:$0xf0]  ;;  %v8201_v59 = vld [vmem:[%s12403_s30 + $0x26c] sm:$0xf0]  ;;  %v10529_v60 = vld [vmem:[%s12403_s30 + $0x48c] sm:$0xf]  ;;  %v7916_v3 = vor.u32 %v10385_v55, %v7913_v56 }
 0x1f0   : > { %2522 = vmatpush.bf16.msrb.mxu1 %v8484_v34  ;;  %v10475_v34 = vld [vmem:[%s12403_s30 + $0x2dc] sm:$0xf]  ;;  %v8489_v61 = vld [vmem:[%s12403_s30 + $0x4ac] sm:$0xf0]  ;;  %v8171_v62 = vld [vmem:[%s12403_s30 + $0x208] sm:$0xf]  ;;  %v8204_v4 = vor.u32 %v10457_v58, %v8201_v59 }
 0x1f1   : > { %2536 = vmatpush.bf16.msrb.mxu2 %v7912_v35  ;;  %v8273_v35 = vld [vmem:[%s12403_s30 + $0x2fc] sm:$0xf0]  ;;  %v10525_v2 = vld [vmem:[%s12403_s30 + $0x468] sm:$0xf0]  ;;  %v8747_v8 = vld [vmem:[%s12403_s30 + $0x688] sm:$0xf] }
 0x1f2   : > { %2550 = vmatpush.bf16.msrb.mxu3 %v8200_v38  ;;  %2509 = vmatmul.bf16.vlgmr.msrb.gmra.mxu0 %v12496_v24  ;;  %v8560_v38 = vor.u32 %v10551_v30, %v8559_v29  ;;  %v8135_v7 = vld [vmem:[%s12403_s30 + $0x1c0] sm:$0xf]  ;;  %v10597_v9 = vld [vmem:[%s12403_s30 + $0x6a8] sm:$0xf0]  ;;  %v10516_v16 = vld [vmem:[%s12403_s30 + $0x420] sm:$0xf0] }
 0x1f3   : > { %2557 = vmatpush.bf16.msra.mxu0 %v8740_v39  ;;  %2523 = vmatmul.bf16.vlgmr.msrb.gmra.mxu1 %v12499_v28  ;;  %v7988_v39 = vor.u32 %v10403_v31, %v7985_v33  ;;  %v8423_v15 = vld [vmem:[%s12403_s30 + $0x400] sm:$0xf]  ;;  %v8748_v17 = vor.u32 %v10597_v9, %v8747_v8  ;;  %v8099_v19 = vld [vmem:[%s12403_s30 + $0x178] sm:$0xf]  ;;  %v10588_v22 = vld [vmem:[%s12403_s30 + $0x660] sm:$0xf0] }
 0x1f4   : > { %2571 = vmatpush.bf16.msra.mxu1 %v8168_v40  ;;  %2537 = vmatmul.bf16.vlgmr.msrb.gmra.mxu2 %v12488_v13  ;;  %v8276_v40 = vor.u32 %v10475_v34, %v8273_v35  ;;  %v8711_v21 = vld [vmem:[%s12403_s30 + $0x640] sm:$0xf]  ;;  %v8424_v23 = vor.u32 %v10516_v16, %v8423_v15  ;;  %v8387_v29 = vld [vmem:[%s12403_s30 + $0x3b8] sm:$0xf]  ;;  %v10507_v30 = vld [vmem:[%s12403_s30 + $0x3d8] sm:$0xf0] }
 0x1f5   : > { %2585 = vmatpush.bf16.msra.mxu2 %v8456_v41  ;;  %2551 = vmatmul.bf16.vlgmr.msrb.gmra.mxu3 %v12496_v24  ;;  %v8523_v41 = vld [vmem:[%s12403_s30 + $0x4d0] sm:$0xf]  ;;  %v8712_v31 = vor.u32 %v10588_v22, %v8711_v21  ;;  %v8675_v35 = vld [vmem:[%s12403_s30 + $0x5f8] sm:$0xf]  ;;  %v10579_v36 = vld [vmem:[%s12403_s30 + $0x618] sm:$0xf0]  ;;  %v8388_v37 = vor.u32 %v10507_v30, %v8387_v29 }
 0x1f6   : > { %2599 = vmatpush.bf16.msra.mxu3 %v8744_v45  ;;  %v7949_v45 = vld [vmem:[%s12403_s30 + $0x74] sm:$0xf0]  ;;  %v8524_v50 = vor.u32 %v10542_v42, %v8523_v41  ;;  %v8063_v33 = vld [vmem:[%s12403_s30 + $0x130] sm:$0xf]  ;;  %v10498_v42 = vld [vmem:[%s12403_s30 + $0x390] sm:$0xf0] }
 0x1f7   : > { %2558 = vmatpush.bf16.msra.mxu0 %v8704_v51  ;;  %v8487_v51 = vld [vmem:[%s12403_s30 + $0x488] sm:$0xf]  ;;  %v8351_v41 = vld [vmem:[%s12403_s30 + $0x370] sm:$0xf]  ;;  %v10552_v8 = vld [vmem:[%s12403_s30 + $0x540] sm:$0xf0] }
 0x1f8   : > { %2572 = vmatpush.bf16.msra.mxu1 %v8132_v52  ;;  %v7952_v52 = vor.u32 %v10394_v43, %v7949_v45  ;;  %v8676_v43 = vor.u32 %v10579_v36, %v8675_v35  ;;  %v8027_v45 = vld [vmem:[%s12403_s30 + $0xe8] sm:$0xf]  ;;  %v10471_v15 = vld [vmem:[%s12403_s30 + $0x2b8] sm:$0xf0]  ;;  %v7919_v16 = vld [vmem:[%s12403_s30 + $0x10] sm:$0xf] }
 0x1f9   : > { %2586 = vmatpush.bf16.msra.mxu2 %v8420_v53  ;;  %v8240_v53 = vor.u32 %v10466_v46, %v8237_v47  ;;  %v8639_v47 = vld [vmem:[%s12403_s30 + $0x5b0] sm:$0xf]  ;;  %v8603_v59 = vld [vmem:[%s12403_s30 + $0x568] sm:$0xf]  ;;  %v8531_v21 = vld [vmem:[%s12403_s30 + $0x4d8] sm:$0xf] }
 0x1fa   : > { %2600 = vmatpush.bf16.msra.mxu3 %v8708_v57  ;;  %v8528_v57 = vor.u32 %v10538_v48, %v8525_v49  ;;  %v10570_v48 = vld [vmem:[%s12403_s30 + $0x5d0] sm:$0xf0]  ;;  %v8352_v49 = vor.u32 %v10498_v42, %v8351_v41  ;;  %v10543_v22 = vld [vmem:[%s12403_s30 + $0x4f8] sm:$0xf0]  ;;  %v8461_v29 = vld [vmem:[%s12403_s30 + $0x46c] sm:$0xf0] }
 0x1fb   : > { %2559 = vmatpush.bf16.msra.mxu0 %v8668_v63  ;;  %v10453_v63 = vld [vmem:[%s12403_s30 + $0x228] sm:$0xf0]  ;;  %v8640_v55 = vor.u32 %v10570_v48, %v8639_v47  ;;  %v8207_v30 = vld [vmem:[%s12403_s30 + $0x250] sm:$0xf]  ;;  %v10512_v36 = vld [vmem:[%s12403_s30 + $0x404] sm:$0xf] }
 0x1fc   : > { %2573 = vmatpush.bf16.msra.mxu1 %v8096_v0  ;;  %v8488_v0 = vor.u32 %v10533_v54, %v8487_v51  ;;  %v8172_v6 = vor.u32 %v10453_v63, %v8171_v62  ;;  %v10422_v51 = vld [vmem:[%s12403_s30 + $0x134] sm:$0xf]  ;;  %v10489_v54 = vld [vmem:[%s12403_s30 + $0x348] sm:$0xf0]  ;;  %v10408_v62 = vld [vmem:[%s12403_s30 + $0xc0] sm:$0xf0] }
 0x1fd   : > { %2587 = vmatpush.bf16.msra.mxu2 %v8384_v1  ;;  %v8459_v1 = vld [vmem:[%s12403_s30 + $0x448] sm:$0xf]  ;;  %v10413_v63 = vld [vmem:[%s12403_s30 + $0xec] sm:$0xf]  ;;  %v8179_v47 = vld [vmem:[%s12403_s30 + $0x210] sm:$0xf] }
 0x1fe   : > { %2601 = vmatpush.bf16.msra.mxu3 %v8672_v5  ;;  %v8492_v5 = vor.u32 %v10529_v60, %v8489_v61  ;;  %v8460_v10 = vor.u32 %v10525_v2, %v8459_v1  ;;  %v10561_v60 = vld [vmem:[%s12403_s30 + $0x588] sm:$0xf0]  ;;  %v8279_v1 = vld [vmem:[%s12403_s30 + $0x2e0] sm:$0xf]  ;;  %v10480_v2 = vld [vmem:[%s12403_s30 + $0x300] sm:$0xf0] }
 0x1ff   : > { %2560 = vmatpush.bf16.msra.mxu0 %v8632_v11  ;;  %v10444_v11 = vld [vmem:[%s12403_s30 + $0x1e0] sm:$0xf0]  ;;  %v8280_v9 = vor.u32 %v10480_v2, %v8279_v1  ;;  %v8425_v42 = vld [vmem:[%s12403_s30 + $0x424] sm:$0xf0]  ;;  %v10454_v48 = vld [vmem:[%s12403_s30 + $0x230] sm:$0xf0] }
 0x200   : > { %2574 = vmatpush.bf16.msra.mxu1 %v8060_v12  ;;  %v10449_v12 = vld [vmem:[%s12403_s30 + $0x20c] sm:$0xf]  ;;  %s13303_s5 = scalar_lea.vmem [#allocation20], %s10673_s8  ;;  %s4131_s24 = scalar_lea.vmem [#allocation17], %s13279_s1 }
 0x201   : > { %2588 = vmatpush.bf16.msra.mxu2 %v8348_v14  ;;  %v8173_v14 = vld [vmem:[%s12403_s30 + $0x22c] sm:$0xf0]  ;;  %v10517_v1 = vld [vmem:[%s12403_s30 + $0x428] sm:$0xf0]  ;;  %s4133_s26 = scalar_lea.vmem [#allocation18], %s13279_s1  ;;  %s4378_s21 = smul.u32 6, %s14735_s28 }
 0x202   : > { %2602 = vmatpush.bf16.msra.mxu3 %v8636_v18  ;;  %v8136_v18 = vor.u32 %v10444_v11, %v8135_v7  ;;  %v8176_v20 = vor.u32 %v10449_v12, %v8173_v14  ;;  %v8567_v7 = vld [vmem:[%s12403_s30 + $0x520] sm:$0xf]  ;;  %v10404_v11 = vld [vmem:[%s12403_s30 + $0xa4] sm:$0xf]  ;;  %v7993_v12 = vld [vmem:[%s12403_s30 + $0xc4] sm:$0xf0] }
 0x203   : > { %2561 = vmatpush.bf16.msra.mxu0 %v8596_v25  ;;  %v10435_v25 = vld [vmem:[%s12403_s30 + $0x198] sm:$0xf0]  ;;  %v8243_v14 = vld [vmem:[%s12403_s30 + $0x298] sm:$0xf]  ;;  %s4379_s7 = scalar_lea.vmem [#allocation21], %s4378_s21  ;;  %s13716_s6 = scalar_lea.vmem [#allocation23], %s10673_s8 }
 0x204   : > { %2575 = vmatpush.bf16.msra.mxu1 %v8024_v26  ;;  %v10440_v26 = vld [vmem:[%s12403_s30 + $0x1c4] sm:$0xf]  ;;  %s6101_s27 = scalar_lea.vmem [#allocation24], %s13279_s1  ;;  %s7136_s23 = scalar_lea.vmem [#allocation26], %s13279_s1 }
 0x205   : > { %2589 = vmatpush.bf16.msra.mxu2 %v8312_v27  ;;  %v8137_v27 = vld [vmem:[%s12403_s30 + $0x1e4] sm:$0xf0]  ;;  %s7138_s9 = scalar_lea.vmem [#allocation27], %s13279_s1 }
 0x206   : > { %2603 = vmatpush.bf16.msra.mxu3 %v8600_v32  ;;  %v8100_v32 = vor.u32 %v10435_v25, %v8099_v19  ;;  %v8140_v34 = vor.u32 %v10440_v26, %v8137_v27  ;;  %v10390_v19 = vld [vmem:[%s12403_s30 + $0x30] sm:$0xf0]  ;;  %v10521_v25 = vld [vmem:[%s12403_s30 + $0x44c] sm:$0xf]  ;;  %v10395_v26 = vld [vmem:[%s12403_s30 + $0x5c] sm:$0xf] }
 0x207   : > { %2562 = vmatpush.bf16.msra.mxu0 %v8560_v38  ;;  %v10426_v38 = vld [vmem:[%s12403_s30 + $0x150] sm:$0xf0]  ;;  %v7957_v27 = vld [vmem:[%s12403_s30 + $0x7c] sm:$0xf0]  ;;  %v7920_v35 = vor.u32 %v10390_v19, %v7919_v16  ;;  %v10485_v16 = vld [vmem:[%s12403_s30 + $0x32c] sm:$0xf] }
 0x208   : > { %2576 = vmatpush.bf16.msra.mxu1 %v7988_v39  ;;  %v10431_v39 = vld [vmem:[%s12403_s30 + $0x17c] sm:$0xf] }
 0x209   : > { %2590 = vmatpush.bf16.msra.mxu2 %v8276_v40  ;;  %v8101_v40 = vld [vmem:[%s12403_s30 + $0x19c] sm:$0xf0] }
 0x20a   : > { %2604 = vmatpush.bf16.msra.mxu3 %v8564_v44  ;;  %v8064_v44 = vor.u32 %v10426_v38, %v8063_v33  ;;  %v8104_v46 = vor.u32 %v10431_v39, %v8101_v40  ;;  %v8749_v33 = vld [vmem:[%s12403_s30 + $0x6ac] sm:$0xf0]  ;;  %v10534_v39 = vld [vmem:[%s12403_s30 + $0x4b0] sm:$0xf0]  ;;  %v8464_v40 = vor.u32 %v10521_v25, %v8461_v29 }
 0x20b   : > { %2563 = vmatpush.bf16.msra.mxu0 %v8524_v50  ;;  %v10417_v50 = vld [vmem:[%s12403_s30 + $0x108] sm:$0xf0]  ;;  %v8495_v38 = vld [vmem:[%s12403_s30 + $0x490] sm:$0xf] }
 0x20c   : > { %2577 = vmatpush.bf16.msra.mxu1 %v7952_v52  ;;  %v8065_v52 = vld [vmem:[%s12403_s30 + $0x154] sm:$0xf0]  ;;  %v8028_v56 = vor.u32 %v10417_v50, %v8027_v45  ;;  %v8496_v50 = vor.u32 %v10534_v39, %v8495_v38  ;;  %v8605_v25 = vld [vmem:[%s12403_s30 + $0x58c] sm:$0xf0]  ;;  %v8569_v38 = vld [vmem:[%s12403_s30 + $0x544] sm:$0xf0] }
 0x20d   : > { %2591 = vmatpush.bf16.msra.mxu2 %v8240_v53  ;;  %v8315_v53 = vld [vmem:[%s12403_s30 + $0x328] sm:$0xf]  ;;  %v8068_v58 = vor.u32 %v10422_v51, %v8065_v52  ;;  %v8467_v51 = vld [vmem:[%s12403_s30 + $0x450] sm:$0xf]  ;;  %v10526_v52 = vld [vmem:[%s12403_s30 + $0x470] sm:$0xf0] }
 0x20e   : > { %2605 = vmatpush.bf16.msra.mxu3 %v8528_v57  ;;  %v7991_v57 = vld [vmem:[%s12403_s30 + $0xa0] sm:$0xf]  ;;  %v8316_v61 = vor.u32 %v10489_v54, %v8315_v53  ;;  %v8428_v54 = vor.u32 %v10512_v36, %v8425_v42  ;;  %v8035_v36 = vld [vmem:[%s12403_s30 + $0xf0] sm:$0xf]  ;;  %v10467_v42 = vld [vmem:[%s12403_s30 + $0x29c] sm:$0xf] }
 0x20f   : > { %2564 = vmatpush.bf16.msra.mxu0 %v8488_v0  ;;  %v8029_v0 = vld [vmem:[%s12403_s30 + $0x10c] sm:$0xf0] }
 0x210   : > { %2578 = vmatpush.bf16.msra.mxu1 %v7916_v3  ;;  %v8604_v3 = vor.u32 %v10561_v60, %v8603_v59  ;;  %v10575_v59 = vld [vmem:[%s12403_s30 + $0x5fc] sm:$0xf]  ;;  %v8468_v60 = vor.u32 %v10526_v52, %v8467_v51  ;;  %v8323_v39 = vld [vmem:[%s12403_s30 + $0x330] sm:$0xf]  ;;  %v8287_v51 = vld [vmem:[%s12403_s30 + $0x2e8] sm:$0xf] }
 0x211   : > { %2592 = vmatpush.bf16.msra.mxu2 %v8204_v4  ;;  %v7992_v4 = vor.u32 %v10408_v62, %v7991_v57  ;;  %v8180_v57 = vor.u32 %v10454_v48, %v8179_v47  ;;  %v10445_v62 = vld [vmem:[%s12403_s30 + $0x1e8] sm:$0xf0]  ;;  %v7999_v48 = vld [vmem:[%s12403_s30 + $0xa8] sm:$0xf] }
 0x212   : > { %2606 = vmatpush.bf16.msra.mxu3 %v8492_v5  ;;  %2565 = vmatmul.bf16.vlgmr.msra.gmra.mxu0 %v12499_v28  ;;  %v7955_v5 = vld [vmem:[%s12403_s30 + $0x58] sm:$0xf]  ;;  %v10481_v52 = vld [vmem:[%s12403_s30 + $0x308] sm:$0xf0] }
 0x213   : > { %2613 = vmatpush.bf16.msrb.mxu0 %v8172_v6  ;;  %2579 = vmatmul.bf16.vlgmr.msra.gmra.mxu1 %v12488_v13  ;;  %v8032_v6 = vor.u32 %v10413_v63, %v8029_v0  ;;  %v8677_v63 = vld [vmem:[%s12403_s30 + $0x61c] sm:$0xf0]  ;;  %v8431_v0 = vld [vmem:[%s12403_s30 + $0x408] sm:$0xf] }
 0x214   : > { %2627 = vmatpush.bf16.msrb.mxu1 %v8460_v10  ;;  %2593 = vmatmul.bf16.vlgmr.msra.gmra.mxu2 %v12496_v24  ;;  %v10399_v10 = vld [vmem:[%s12403_s30 + $0x78] sm:$0xf0] }
 0x215   : > { %2607 = vmatmul.bf16.vlgmr.msra.gmra.mxu3 %v12499_v28  ;;  %2641 = vmatpush.bf16.msrb.mxu2 %v8748_v17  ;;  %v8568_v17 = vor.u32 %v10552_v8, %v8567_v7  ;;  %v10566_v7 = vld [vmem:[%s12403_s30 + $0x5b4] sm:$0xf]  ;;  %v8432_v8 = vor.u32 %v10517_v1, %v8431_v0  ;;  %v8251_v1 = vld [vmem:[%s12403_s30 + $0x2a0] sm:$0xf] }
 0x216   : > { %2655 = vmatpush.bf16.msrb.mxu3 %v8176_v20  ;;  %v7996_v20 = vor.u32 %v10404_v11, %v7993_v12  ;;  %v8641_v11 = vld [vmem:[%s12403_s30 + $0x5d4] sm:$0xf0]  ;;  %v8395_v12 = vld [vmem:[%s12403_s30 + $0x3c0] sm:$0xf]  ;;  %v10598_v0 = vld [vmem:[%s12403_s30 + $0x6b0] sm:$0xf0] }
 0x217   : > { %2614 = vmatpush.bf16.msrb.mxu0 %v8136_v18  ;;  %v7956_v18 = vor.u32 %v10399_v10, %v7955_v5  ;;  %v10436_v10 = vld [vmem:[%s12403_s30 + $0x1a0] sm:$0xf0]  ;;  %v8644_v19 = vor.u32 %v10566_v7, %v8641_v11  ;;  %v8719_v7 = vld [vmem:[%s12403_s30 + $0x648] sm:$0xf]  ;;  %v7927_v11 = vld [vmem:[%s12403_s30 + $0x18] sm:$0xf] }
 0x218   : > { %2628 = vmatpush.bf16.msrb.mxu1 %v8424_v23  ;;  %v8244_v23 = vor.u32 %v10471_v15, %v8243_v14  ;;  %v10508_v14 = vld [vmem:[%s12403_s30 + $0x3e0] sm:$0xf0] }
 0x219   : > { %2642 = vmatpush.bf16.msrb.mxu2 %v8712_v31  ;;  %v10462_v31 = vld [vmem:[%s12403_s30 + $0x270] sm:$0xf0] }
 0x21a   : > { %2656 = vmatpush.bf16.msrb.mxu3 %v8140_v34  ;;  %v8532_v34 = vor.u32 %v10543_v22, %v8531_v21  ;;  %v8208_v41 = vor.u32 %v10462_v31, %v8207_v30  ;;  %v8396_v21 = vor.u32 %v10508_v14, %v8395_v12  ;;  %v8071_v22 = vld [vmem:[%s12403_s30 + $0x138] sm:$0xf]  ;;  %v10476_v30 = vld [vmem:[%s12403_s30 + $0x2e4] sm:$0xf]  ;;  %v8281_v31 = vld [vmem:[%s12403_s30 + $0x304] sm:$0xf0] }
 0x21b   : > { %2615 = vmatpush.bf16.msrb.mxu0 %v8100_v32  ;;  %v10593_v32 = vld [vmem:[%s12403_s30 + $0x68c] sm:$0xf]  ;;  %v10391_v12 = vld [vmem:[%s12403_s30 + $0x38] sm:$0xf0] }
 0x21c   : > { %2629 = vmatpush.bf16.msrb.mxu1 %v8388_v37  ;;  %v7960_v37 = vor.u32 %v10395_v26, %v7957_v27  ;;  %v8752_v45 = vor.u32 %v10593_v32, %v8749_v33  ;;  %v8359_v26 = vld [vmem:[%s12403_s30 + $0x378] sm:$0xf]  ;;  %v10499_v27 = vld [vmem:[%s12403_s30 + $0x398] sm:$0xf0] }
 0x21d   : > { %2643 = vmatpush.bf16.msrb.mxu2 %v8676_v43  ;;  %v10386_v43 = vld [vmem:[%s12403_s30 + $0x14] sm:$0xf] }
 0x21e   : > { %2657 = vmatpush.bf16.msrb.mxu3 %v8104_v46  ;;  %v10584_v46 = vld [vmem:[%s12403_s30 + $0x644] sm:$0xf] }
 0x21f   : > { %2616 = vmatpush.bf16.msrb.mxu0 %v8064_v44  ;;  %v7921_v44 = vld [vmem:[%s12403_s30 + $0x34] sm:$0xf0] }
 0x220   : > { %2630 = vmatpush.bf16.msrb.mxu1 %v8352_v49  ;;  %v8713_v49 = vld [vmem:[%s12403_s30 + $0x664] sm:$0xf0]  ;;  %v7924_v53 = vor.u32 %v10386_v43, %v7921_v44  ;;  %v8245_v43 = vld [vmem:[%s12403_s30 + $0x2bc] sm:$0xf0] }
 0x221   : > { %2644 = vmatpush.bf16.msrb.mxu2 %v8640_v55  ;;  %v10503_v55 = vld [vmem:[%s12403_s30 + $0x3bc] sm:$0xf] }
 0x222   : > { %2658 = vmatpush.bf16.msrb.mxu3 %v8068_v58  ;;  %v8716_v58 = vor.u32 %v10584_v46, %v8713_v49  ;;  %v10539_v46 = vld [vmem:[%s12403_s30 + $0x4dc] sm:$0xf]  ;;  %v10409_v49 = vld [vmem:[%s12403_s30 + $0xc8] sm:$0xf0] }
 0x223   : > { %2617 = vmatpush.bf16.msrb.mxu0 %v8028_v56  ;;  %v8389_v56 = vld [vmem:[%s12403_s30 + $0x3dc] sm:$0xf0] }
 0x224   : > { %2631 = vmatpush.bf16.msrb.mxu1 %v8316_v61  ;;  %v8143_v61 = vld [vmem:[%s12403_s30 + $0x1c8] sm:$0xf]  ;;  %v8392_v2 = vor.u32 %v10503_v55, %v8389_v56  ;;  %v8209_v55 = vld [vmem:[%s12403_s30 + $0x274] sm:$0xf0]  ;;  %v10530_v56 = vld [vmem:[%s12403_s30 + $0x494] sm:$0xf] }
 0x225   : > { %2645 = vmatpush.bf16.msrb.mxu2 %v8604_v3  ;;  %v10494_v3 = vld [vmem:[%s12403_s30 + $0x374] sm:$0xf]  ;;  %v8144_v5 = vor.u32 %v10445_v62, %v8143_v61  ;;  %v7963_v61 = vld [vmem:[%s12403_s30 + $0x60] sm:$0xf]  ;;  %v10400_v62 = vld [vmem:[%s12403_s30 + $0x80] sm:$0xf0] }
 0x226   : > { %2659 = vmatpush.bf16.msrb.mxu3 %v8032_v6  ;;  %v8680_v6 = vor.u32 %v10575_v59, %v8677_v63  ;;  %v8497_v59 = vld [vmem:[%s12403_s30 + $0x4b4] sm:$0xf0]  ;;  %v8755_v63 = vld [vmem:[%s12403_s30 + $0x690] sm:$0xf] }
 0x227   : > { %2618 = vmatpush.bf16.msrb.mxu0 %v7992_v4  ;;  %v8353_v4 = vld [vmem:[%s12403_s30 + $0x394] sm:$0xf0] }
 0x228   : > { %2632 = vmatpush.bf16.msrb.mxu1 %v8280_v9  ;;  %v8107_v9 = vld [vmem:[%s12403_s30 + $0x180] sm:$0xf]  ;;  %v8356_v15 = vor.u32 %v10494_v3, %v8353_v4  ;;  %v10450_v3 = vld [vmem:[%s12403_s30 + $0x214] sm:$0xf]  ;;  %v8181_v4 = vld [vmem:[%s12403_s30 + $0x234] sm:$0xf0] }
 0x229   : > { %2646 = vmatpush.bf16.msrb.mxu2 %v8568_v17  ;;  %v8317_v17 = vld [vmem:[%s12403_s30 + $0x34c] sm:$0xf0] }
 0x22a   : > { %2660 = vmatpush.bf16.msrb.mxu3 %v7996_v20  ;;  %v10557_v20 = vld [vmem:[%s12403_s30 + $0x56c] sm:$0xf]  ;;  %v8320_v29 = vor.u32 %v10485_v16, %v8317_v17  ;;  %v8469_v16 = vld [vmem:[%s12403_s30 + $0x474] sm:$0xf0] }
 0x22b   : > { %2619 = vmatpush.bf16.msrb.mxu0 %v7956_v18  ;;  %v8108_v18 = vor.u32 %v10436_v10, %v8107_v9  ;;  %v8608_v33 = vor.u32 %v10557_v20, %v8605_v25  ;;  %v8756_v9 = vor.u32 %v10598_v0, %v8755_v63  ;;  %v10589_v10 = vld [vmem:[%s12403_s30 + $0x668] sm:$0xf0]  ;;  %v8215_v17 = vld [vmem:[%s12403_s30 + $0x258] sm:$0xf] }
 0x22c   : > { %2633 = vmatpush.bf16.msrb.mxu1 %v8244_v23  ;;  %v10427_v23 = vld [vmem:[%s12403_s30 + $0x158] sm:$0xf0]  ;;  %v10441_v20 = vld [vmem:[%s12403_s30 + $0x1cc] sm:$0xf]  ;;  %v8757_v25 = vld [vmem:[%s12403_s30 + $0x6b4] sm:$0xf0] }
 0x22d   : > { %2647 = vmatpush.bf16.msrb.mxu2 %v8532_v34  ;;  %v8072_v32 = vor.u32 %v10427_v23, %v8071_v22  ;;  %v10548_v34 = vld [vmem:[%s12403_s30 + $0x524] sm:$0xf]  ;;  %v7928_v22 = vor.u32 %v10391_v12, %v7927_v11  ;;  %v10594_v23 = vld [vmem:[%s12403_s30 + $0x694] sm:$0xf]  ;;  %v8037_v63 = vld [vmem:[%s12403_s30 + $0x114] sm:$0xf0] }
 0x22e   : > { %2661 = vmatpush.bf16.msrb.mxu3 %v7960_v37  ;;  %v10418_v37 = vld [vmem:[%s12403_s30 + $0x110] sm:$0xf0]  ;;  %v8539_v12 = vld [vmem:[%s12403_s30 + $0x4e0] sm:$0xf] }
 0x22f   : > { %2620 = vmatpush.bf16.msrb.mxu0 %v7920_v35  ;;  %v8360_v35 = vor.u32 %v10499_v27, %v8359_v26  ;;  %v8036_v44 = vor.u32 %v10418_v37, %v8035_v36  ;;  %v8720_v26 = vor.u32 %v10589_v10, %v8719_v7  ;;  %v10432_v36 = vld [vmem:[%s12403_s30 + $0x184] sm:$0xf]  ;;  %v8109_v37 = vld [vmem:[%s12403_s30 + $0x1a4] sm:$0xf0] }
 0x230   : > { %2634 = vmatpush.bf16.msrb.mxu1 %v8208_v41  ;;  %v8284_v41 = vor.u32 %v10476_v30, %v8281_v31  ;;  %v10580_v31 = vld [vmem:[%s12403_s30 + $0x620] sm:$0xf0] }
 0x231   : > { %2648 = vmatpush.bf16.msrb.mxu2 %v8496_v50  ;;  %v8533_v50 = vld [vmem:[%s12403_s30 + $0x4fc] sm:$0xf0] }
 0x232   : > { %2621 = vmatmul.bf16.vlgmr.msrb.gmra.mxu0 %v12488_v13  ;;  %2662 = vmatpush.bf16.msrb.mxu3 %v7924_v53  ;;  %v8248_v53 = vor.u32 %v10467_v42, %v8245_v43  ;;  %v8647_v42 = vld [vmem:[%s12403_s30 + $0x5b8] sm:$0xf]  ;;  %v10571_v43 = vld [vmem:[%s12403_s30 + $0x5d8] sm:$0xf0] }
 0x233   : > { %2669 = vmatpush.bf16.msra.mxu0 %v8464_v40  ;;  %2635 = vmatmul.bf16.vlgmr.msrb.gmra.mxu1 %v12496_v24  ;;  %v10490_v40 = vld [vmem:[%s12403_s30 + $0x350] sm:$0xf0] }
 0x234   : > { %2683 = vmatpush.bf16.msra.mxu1 %v8752_v45  ;;  %2649 = vmatmul.bf16.vlgmr.msrb.gmra.mxu2 %v12499_v28  ;;  %v8572_v45 = vor.u32 %v10548_v34, %v8569_v38  ;;  %v8324_v47 = vor.u32 %v10490_v40, %v8323_v39  ;;  %v10585_v38 = vld [vmem:[%s12403_s30 + $0x64c] sm:$0xf]  ;;  %v8721_v39 = vld [vmem:[%s12403_s30 + $0x66c] sm:$0xf0] }
 0x235   : > { %2697 = vmatpush.bf16.msra.mxu2 %v8180_v57  ;;  %2663 = vmatmul.bf16.vlgmr.msrb.gmra.mxu3 %v12488_v13  ;;  %v8000_v57 = vor.u32 %v10409_v49, %v7999_v48  ;;  %v10576_v48 = vld [vmem:[%s12403_s30 + $0x604] sm:$0xf]  ;;  %v8685_v49 = vld [vmem:[%s12403_s30 + $0x624] sm:$0xf0] }
 0x236   : > { %2711 = vmatpush.bf16.msra.mxu3 %v8468_v60  ;;  %v8288_v60 = vor.u32 %v10481_v52, %v8287_v51  ;;  %v8611_v52 = vld [vmem:[%s12403_s30 + $0x570] sm:$0xf] }
 0x237   : > { %2670 = vmatpush.bf16.msra.mxu0 %v8428_v54  ;;  %v10458_v54 = vld [vmem:[%s12403_s30 + $0x254] sm:$0xf] }
 0x238   : > { %2684 = vmatpush.bf16.msra.mxu1 %v8716_v58  ;;  %v8536_v58 = vor.u32 %v10539_v46, %v8533_v50  ;;  %v8112_v46 = vor.u32 %v10432_v36, %v8109_v37  ;;  %v8648_v50 = vor.u32 %v10571_v43, %v8647_v42  ;;  %v10387_v37 = vld [vmem:[%s12403_s30 + $0x1c] sm:$0xf] }
 0x239   : > { %2698 = vmatpush.bf16.msra.mxu2 %v8144_v5  ;;  %v8212_v5 = vor.u32 %v10458_v54, %v8209_v55  ;;  %v8073_v54 = vld [vmem:[%s12403_s30 + $0x15c] sm:$0xf0]  ;;  %v10562_v55 = vld [vmem:[%s12403_s30 + $0x590] sm:$0xf0]  ;;  %v10459_v43 = vld [vmem:[%s12403_s30 + $0x25c] sm:$0xf] }
 0x23a   : > { %2712 = vmatpush.bf16.msra.mxu3 %v8432_v8  ;;  %v8500_v8 = vor.u32 %v10530_v56, %v8497_v59  ;;  %v10495_v56 = vld [vmem:[%s12403_s30 + $0x37c] sm:$0xf]  ;;  %v8688_v59 = vor.u32 %v10576_v48, %v8685_v49  ;;  %v8612_v0 = vor.u32 %v10562_v55, %v8611_v52  ;;  %v8505_v49 = vld [vmem:[%s12403_s30 + $0x4bc] sm:$0xf0] }
 0x23b   : > { %2671 = vmatpush.bf16.msra.mxu0 %v8392_v2  ;;  %v10472_v2 = vld [vmem:[%s12403_s30 + $0x2c0] sm:$0xf0]  ;;  %v10531_v48 = vld [vmem:[%s12403_s30 + $0x49c] sm:$0xf] }
 0x23c   : > { %2685 = vmatpush.bf16.msra.mxu1 %v8680_v6  ;;  %v7964_v6 = vor.u32 %v10400_v62, %v7963_v61  ;;  %v8252_v14 = vor.u32 %v10472_v2, %v8251_v1  ;;  %v8649_v61 = vld [vmem:[%s12403_s30 + $0x5dc] sm:$0xf0]  ;;  %v10414_v62 = vld [vmem:[%s12403_s30 + $0xf4] sm:$0xf]  ;;  %v8575_v2 = vld [vmem:[%s12403_s30 + $0x528] sm:$0xf] }
 0x23d   : > { %2699 = vmatpush.bf16.msra.mxu2 %v8108_v18  ;;  %v8184_v18 = vor.u32 %v10450_v3, %v8181_v4  ;;  %v10553_v3 = vld [vmem:[%s12403_s30 + $0x548] sm:$0xf0]  ;;  %v10486_v4 = vld [vmem:[%s12403_s30 + $0x334] sm:$0xf] }
 0x23e   : > { %2713 = vmatpush.bf16.msra.mxu3 %v8396_v21  ;;  %v8145_v21 = vld [vmem:[%s12403_s30 + $0x1ec] sm:$0xf0]  ;;  %v8576_v10 = vor.u32 %v10553_v3, %v8575_v2 }
 0x23f   : > { %2672 = vmatpush.bf16.msra.mxu0 %v8356_v15  ;;  %v10522_v15 = vld [vmem:[%s12403_s30 + $0x454] sm:$0xf]  ;;  %v8148_v34 = vor.u32 %v10441_v20, %v8145_v21  ;;  %v10549_v21 = vld [vmem:[%s12403_s30 + $0x52c] sm:$0xf] }
 0x240   : > { %2686 = vmatpush.bf16.msra.mxu1 %v8644_v19  ;;  %v10463_v19 = vld [vmem:[%s12403_s30 + $0x278] sm:$0xf0]  ;;  %v8472_v27 = vor.u32 %v10522_v15, %v8469_v16  ;;  %v8001_v15 = vld [vmem:[%s12403_s30 + $0xcc] sm:$0xf0]  ;;  %v10544_v16 = vld [vmem:[%s12403_s30 + $0x500] sm:$0xf0] }
 0x241   : > { %2700 = vmatpush.bf16.msra.mxu2 %v8072_v32  ;;  %v8216_v30 = vor.u32 %v10463_v19, %v8215_v17  ;;  %v10513_v32 = vld [vmem:[%s12403_s30 + $0x40c] sm:$0xf] }
 0x242   : > { %2714 = vmatpush.bf16.msra.mxu3 %v8360_v35  ;;  %v8760_v35 = vor.u32 %v10594_v23, %v8757_v25  ;;  %v10477_v17 = vld [vmem:[%s12403_s30 + $0x2ec] sm:$0xf]  ;;  %v8577_v23 = vld [vmem:[%s12403_s30 + $0x54c] sm:$0xf0]  ;;  %v10396_v25 = vld [vmem:[%s12403_s30 + $0x64] sm:$0xf] }
 0x243   : > { %2673 = vmatpush.bf16.msra.mxu0 %v8320_v29  ;;  %v8683_v29 = vld [vmem:[%s12403_s30 + $0x600] sm:$0xf]  ;;  %v8580_v36 = vor.u32 %v10549_v21, %v8577_v23  ;;  %v10419_v21 = vld [vmem:[%s12403_s30 + $0x118] sm:$0xf0] }
 0x244   : > { %2687 = vmatpush.bf16.msra.mxu1 %v8608_v33  ;;  %v8433_v33 = vld [vmem:[%s12403_s30 + $0x42c] sm:$0xf0]  ;;  %v8684_v40 = vor.u32 %v10580_v31, %v8683_v29 }
 0x245   : > { %2701 = vmatpush.bf16.msra.mxu2 %v8036_v44  ;;  %v10504_v44 = vld [vmem:[%s12403_s30 + $0x3c4] sm:$0xf] }
 0x246   : > { %2715 = vmatpush.bf16.msra.mxu3 %v8324_v47  ;;  %v8724_v47 = vor.u32 %v10585_v38, %v8721_v39  ;;  %v7929_v38 = vld [vmem:[%s12403_s30 + $0x3c] sm:$0xf0]  ;;  %v10540_v39 = vld [vmem:[%s12403_s30 + $0x4e4] sm:$0xf] }
 0x247   : > { %2674 = vmatpush.bf16.msra.mxu0 %v8284_v41  ;;  %v8436_v41 = vor.u32 %v10513_v32, %v8433_v33  ;;  %v10535_v32 = vld [vmem:[%s12403_s30 + $0x4b8] sm:$0xf0]  ;;  %v10468_v33 = vld [vmem:[%s12403_s30 + $0x2a4] sm:$0xf] }
 0x248   : > { %2688 = vmatpush.bf16.msra.mxu1 %v8572_v45  ;;  %v8397_v45 = vld [vmem:[%s12403_s30 + $0x3e4] sm:$0xf0] }
 0x249   : > { %2702 = vmatpush.bf16.msra.mxu2 %v8000_v57  ;;  %v8400_v51 = vor.u32 %v10504_v44, %v8397_v45  ;;  %v8361_v57 = vld [vmem:[%s12403_s30 + $0x39c] sm:$0xf0]  ;;  %v7932_v45 = vor.u32 %v10387_v37, %v7929_v38  ;;  %v7971_v38 = vld [vmem:[%s12403_s30 + $0x68] sm:$0xf] }
 0x24a   : > { %2716 = vmatpush.bf16.msra.mxu3 %v8288_v60  ;;  %v10567_v60 = vld [vmem:[%s12403_s30 + $0x5bc] sm:$0xf]  ;;  %v8364_v1 = vor.u32 %v10495_v56, %v8361_v57  ;;  %v8217_v44 = vld [vmem:[%s12403_s30 + $0x27c] sm:$0xf0] }
 0x24b   : > { %2675 = vmatpush.bf16.msra.mxu0 %v8248_v53  ;;  %v10423_v53 = vld [vmem:[%s12403_s30 + $0x13c] sm:$0xf]  ;;  %v8652_v7 = vor.u32 %v10567_v60, %v8649_v61 }
 0x24c   : > { %2689 = vmatpush.bf16.msra.mxu1 %v8536_v58  ;;  %v8076_v58 = vor.u32 %v10423_v53, %v8073_v54  ;;  %v8508_v53 = vor.u32 %v10531_v48, %v8505_v49  ;;  %v12829_v54 = vld [vmem:[%s12582_s4] sm:$0xff] }
 0x24d   : > { %2703 = vmatpush.bf16.msra.mxu2 %v7964_v6  ;;  %v8040_v6 = vor.u32 %v10414_v62, %v8037_v63  ;;  %v1324_v56 = vperm.slane %v12829_v54, 1  ;;  %v10392_v48 = vld [vmem:[%s12403_s30 + $0x40] sm:$0xf0] }
 0x24e   : > { %2717 = vmatpush.bf16.msra.mxu3 %v8252_v14  ;;  %v10405_v14 = vld [vmem:[%s12403_s30 + $0xac] sm:$0xf] }
 0x24f   : > { %2676 = vmatpush.bf16.msra.mxu0 %v8212_v5  ;;  %v8325_v5 = vld [vmem:[%s12403_s30 + $0x354] sm:$0xf0]  ;;  %v8004_v19 = vor.u32 %v10405_v14, %v8001_v15 }
 0x250   : > { %2690 = vmatpush.bf16.msra.mxu1 %v8500_v8  ;;  %v10558_v8 = vld [vmem:[%s12403_s30 + $0x574] sm:$0xf]  ;;  %v8328_v11 = vor.u32 %v10486_v4, %v8325_v5  ;;  %v12811_v31 = vpop.f32.mrf.mxu1  ;;  %v8187_v5 = vld [vmem:[%s12403_s30 + $0x218] sm:$0xf] }
 0x251   : > { %2704 = vmatpush.bf16.msra.mxu2 %v7928_v22  ;;  %v12805_v22 = vpop.f32.mrf.mxu0 }
 0x252   : > { %2677 = vmatmul.bf16.vlgmr.msra.gmra.mxu0 %v12496_v24  ;;  %2718 = vmatpush.bf16.msra.mxu3 %v8216_v30  ;;  %v8503_v30 = vld [vmem:[%s12403_s30 + $0x498] sm:$0xf] }
 0x253   : > { %2725 = vmatpush.bf16.msrb.mxu0 %v8756_v9  ;;  %2691 = vmatmul.bf16.vlgmr.msra.gmra.mxu1 %v12499_v28  ;;  %v8613_v9 = vld [vmem:[%s12403_s30 + $0x594] sm:$0xf0] }
 0x254   : > { %2739 = vmatpush.bf16.msrb.mxu1 %v8184_v18  ;;  %2705 = vmatmul.bf16.vlgmr.msra.gmra.mxu2 %v12488_v13  ;;  %v8289_v18 = vld [vmem:[%s12403_s30 + $0x30c] sm:$0xf0]  ;;  %v8616_v20 = vor.u32 %v10558_v8, %v8613_v9  ;;  %v10446_v9 = vld [vmem:[%s12403_s30 + $0x1f0] sm:$0xf0] }
 0x255   : > { %2753 = vmatpush.bf16.msrb.mxu2 %v8472_v27  ;;  %2719 = vmatmul.bf16.vlgmr.msra.gmra.mxu3 %v12496_v24  ;;  %v8540_v27 = vor.u32 %v10544_v16, %v8539_v12  ;;  %v8292_v29 = vor.u32 %v10477_v17, %v8289_v18  ;;  %v8151_v8 = vld [vmem:[%s12403_s30 + $0x1d0] sm:$0xf]  ;;  %v10437_v12 = vld [vmem:[%s12403_s30 + $0x1a8] sm:$0xf0]  ;;  %v8079_v16 = vld [vmem:[%s12403_s30 + $0x140] sm:$0xf] }
 0x256   : > { %2767 = vmatpush.bf16.msrb.mxu3 %v8760_v35  ;;  %v10428_v17 = vld [vmem:[%s12403_s30 + $0x160] sm:$0xf0] }
 0x257   : > { %2726 = vmatpush.bf16.msrb.mxu0 %v8720_v26  ;;  %v7965_v26 = vld [vmem:[%s12403_s30 + $0x84] sm:$0xf0] }
 0x258   : > { %2740 = vmatpush.bf16.msrb.mxu1 %v8148_v34  ;;  %v8253_v34 = vld [vmem:[%s12403_s30 + $0x2c4] sm:$0xf0]  ;;  %v7968_v35 = vor.u32 %v10396_v25, %v7965_v26  ;;  %v12831_v55 = vpop.f32.mrf.mxu1  ;;  %v1326_v25 = vperm.slane %v12829_v54, 3  ;;  %v1323_v26 = vperm.slane %v12829_v54, 0 }
 0x259   : > { %2754 = vmatpush.bf16.msrb.mxu2 %v8436_v41  ;;  %v8504_v41 = vor.u32 %v10535_v32, %v8503_v30  ;;  %v8256_v42 = vor.u32 %v10468_v33, %v8253_v34  ;;  %v12826_v52 = vpop.f32.mrf.mxu0  ;;  %v2825_v32 = vlaneseq  ;;  %v8007_v34 = vld [vmem:[%s12403_s30 + $0xb0] sm:$0xf] }
 0x25a   : > { %2768 = vmatpush.bf16.msrb.mxu3 %v8724_v47  ;;  %v2455_v33 = vadd.f32 %v12805_v22, %v1323_v26  ;;  %v2457_v49 = vadd.f32 %v12826_v52, %v1323_v26 }
 0x25b   : > { %2727 = vmatpush.bf16.msrb.mxu0 %v8684_v40  ;;  %v8541_v40 = vld [vmem:[%s12403_s30 + $0x504] sm:$0xf0] }
 0x25c   : > { %2741 = vmatpush.bf16.msrb.mxu1 %v8112_v46  ;;  %v12822_v46 = vpop.f32.mrf.mxu2  ;;  %v8544_v47 = vor.u32 %v10540_v39, %v8541_v40  ;;  %v10401_v39 = vld [vmem:[%s12403_s30 + $0x88] sm:$0xf0] }
 0x25d   : > { %2755 = vmatpush.bf16.msrb.mxu2 %v8400_v51  ;;  %v8220_v51 = vor.u32 %v10459_v43, %v8217_v44  ;;  %v2469_v43 = vadd.f32 %v12811_v31, %v2455_v33  ;;  %v7972_v44 = vor.u32 %v10401_v39, %v7971_v38  ;;  %v10572_v33 = vld [vmem:[%s12403_s30 + $0x5e0] sm:$0xf0]  ;;  %v8619_v38 = vld [vmem:[%s12403_s30 + $0x578] sm:$0xf]  ;;  %v10563_v39 = vld [vmem:[%s12403_s30 + $0x598] sm:$0xf0] }
 0x25e   : > { %2769 = vmatpush.bf16.msrb.mxu3 %v8688_v59 }
 0x25f   : > { %2728 = vmatpush.bf16.msrb.mxu0 %v8648_v50  ;;  %v2496_v50 = vpop.f32.mrf.mxu3 }
 0x260   : > { %2742 = vmatpush.bf16.msrb.mxu1 %v8076_v58  ;;  %v2497_v57 = vadd.f32 %v2496_v50, %v1324_v56  ;;  %v2483_v50 = vadd.f32 %v12822_v46, %v2469_v43 }
 0x261   : > { %2756 = vmatpush.bf16.msrb.mxu2 %v8364_v1 }
 0x262   : > { %2770 = vmatpush.bf16.msrb.mxu3 %v8652_v7 }
 0x263   : > { %2729 = vmatpush.bf16.msrb.mxu0 %v8612_v0  ;;  %v1325_v0 = vperm.slane %v12829_v54, 2 }
 0x264   : > { %2743 = vmatpush.bf16.msrb.mxu1 %v8040_v6  ;;  %v12839_v58 = vpop.f32.mrf.mxu2  ;;  %v10455_v6 = vld [vmem:[%s12403_s30 + $0x238] sm:$0xf0] }
 0x265   : > { %2757 = vmatpush.bf16.msrb.mxu2 %v8328_v11  ;;  %v8188_v7 = vor.u32 %v10455_v6, %v8187_v5  ;;  %v8115_v11 = vld [vmem:[%s12403_s30 + $0x188] sm:$0xf]  ;;  %v10599_v6 = vld [vmem:[%s12403_s30 + $0x6b8] sm:$0xf0] }
 0x266   : > { %2771 = vmatpush.bf16.msrb.mxu3 %v8616_v20  ;;  %v8116_v15 = vor.u32 %v10437_v12, %v8115_v11  ;;  %v8043_v20 = vld [vmem:[%s12403_s30 + $0xf8] sm:$0xf]  ;;  %v10590_v11 = vld [vmem:[%s12403_s30 + $0x670] sm:$0xf0] }
 0x267   : > { %2730 = vmatpush.bf16.msrb.mxu0 %v8576_v10  ;;  %v12842_v59 = vpop.f32.mrf.mxu3  ;;  %v8152_v10 = vor.u32 %v10446_v9, %v8151_v8  ;;  %v10518_v8 = vld [vmem:[%s12403_s30 + $0x430] sm:$0xf0] }
 0x268   : > { %2744 = vmatpush.bf16.msrb.mxu1 %v8004_v19  ;;  %v8080_v19 = vor.u32 %v10428_v17, %v8079_v16  ;;  %v8403_v17 = vld [vmem:[%s12403_s30 + $0x3c8] sm:$0xf] }
 0x269   : > { %2758 = vmatpush.bf16.msrb.mxu2 %v8292_v29  ;;  %v8044_v29 = vor.u32 %v10419_v21, %v8043_v20  ;;  %v8691_v21 = vld [vmem:[%s12403_s30 + $0x608] sm:$0xf] }
 0x26a   : > { %2772 = vmatpush.bf16.msrb.mxu3 %v8580_v36 }
 0x26b   : > { %2731 = vmatpush.bf16.msrb.mxu0 %v8540_v27 }
 0x26c   : > { %2745 = vmatpush.bf16.msrb.mxu1 %v7968_v35  ;;  %v10410_v35 = vld [vmem:[%s12403_s30 + $0xd0] sm:$0xf0] }
 0x26d   : > { %2759 = vmatpush.bf16.msrb.mxu2 %v8256_v42  ;;  %v8008_v37 = vor.u32 %v10410_v35, %v8007_v34  ;;  %v12874_v42 = vand.u32 127, %v2825_v32  ;;  %v8655_v32 = vld [vmem:[%s12403_s30 + $0x5c0] sm:$0xf] }
 0x26e   : > { %2773 = vmatpush.bf16.msrb.mxu3 %v8544_v47  ;;  %v7935_v47 = vld [vmem:[%s12403_s30 + $0x20] sm:$0xf]  ;;  %v8656_v35 = vor.u32 %v10572_v33, %v8655_v32 }
 0x26f   : > { %2732 = vmatpush.bf16.msrb.mxu0 %v8504_v41  ;;  %v2510_v60 = vpop.f32.mrf.mxu0  ;;  %vm2827_vm7 = vcmp.lt.s32.totalorder %v12874_v42, 64 }
 0x270   : > { %2746 = vmatpush.bf16.msrb.mxu1 %v7932_v45  ;;  %v2511_v61 = vadd.f32 %v2510_v60, %v2497_v57  ;;  %v2524_v62 = vpop.f32.mrf.mxu1  ;;  %vm12895_vm8 = vmneg %vm2827_vm7 }
 0x271   : > { %2760 = vmatpush.bf16.msrb.mxu2 %v8220_v51 }
 0x272   : > { %2733 = vmatmul.bf16.vlgmr.msrb.gmra.mxu0 %v12499_v28  ;;  %2774 = vmatpush.bf16.msrb.mxu3 %v8508_v53  ;;  %v12844_v63 = vadd.f32 %v2524_v62, %v2511_v61  ;;  %v7936_v53 = vor.u32 %v10392_v48, %v7935_v47  ;;  %v2471_v61 = vadd.f32 %v12831_v55, %v2457_v49  ;;  %v10482_v47 = vld [vmem:[%s12403_s30 + $0x310] sm:$0xf0]  ;;  %v1328_v48 = vperm.slane %v12829_v54, 5 }
 0x273   : > { %2747 = vmatmul.bf16.vlgmr.msrb.gmra.mxu1 %v12488_v13  ;;  %2781 = vmatpush.bf16.msra.mxu0 %v8188_v7  ;;  %v8439_v7 = vld [vmem:[%s12403_s30 + $0x410] sm:$0xf] }
 0x274   : > { %2761 = vmatmul.bf16.vlgmr.msrb.gmra.mxu2 %v12496_v24  ;;  %v2485_v46 = vadd.f32 %v12839_v58, %v2471_v61  ;;  %v10527_v58 = vld [vmem:[%s12403_s30 + $0x478] sm:$0xf0]  ;;  %v8440_v12 = vor.u32 %v10518_v8, %v8439_v7 }
 0x275   : > { %2775 = vmatmul.bf16.vlgmr.msrb.gmra.mxu3 %v12499_v28 }
 0x277   : > { %v2538_v1 = vpop.f32.mrf.mxu2  ;;  %2782 = vmatpush.bf16.msra.mxu0 %v8152_v10  ;;  %v12882_v51 = vpop.f32.mrf.mxu0  ;;  %v8727_v10 = vld [vmem:[%s12403_s30 + $0x650] sm:$0xf] }
 0x278   : > { %v2539_v2 = vadd.f32 %v2538_v1, %v1325_v0  ;;  %v2552_v3 = vpop.f32.mrf.mxu3  ;;  %v12857_v14 = vpop.f32.mrf.mxu1  ;;  %v8728_v16 = vor.u32 %v10590_v11, %v8727_v10 }
 0x27a   : > { %v12849_v4 = vadd.f32 %v2552_v3, %v2539_v2  ;;  %v8763_v3 = vld [vmem:[%s12403_s30 + $0x698] sm:$0xf] }
 0x27b   : > { %2783 = vmatpush.bf16.msra.mxu0 %v8116_v15  ;;  %v8764_v9 = vor.u32 %v10599_v6, %v8763_v3  ;;  %v8223_v3 = vld [vmem:[%s12403_s30 + $0x260] sm:$0xf] }
 0x27d   : > { %2809 = vmatpush.bf16.msra.mxu2 %v8764_v9 }
 0x27f   : > { %v12861_v18 = vpop.f32.mrf.mxu2  ;;  %2784 = vmatpush.bf16.msra.mxu0 %v8080_v19  ;;  %v10509_v19 = vld [vmem:[%s12403_s30 + $0x3e8] sm:$0xf0] }
 0x280   : > { %v12865_v23 = vpop.f32.mrf.mxu3  ;;  %v8404_v26 = vor.u32 %v10509_v19, %v8403_v17 }
 0x281   : > { %2810 = vmatpush.bf16.msra.mxu2 %v8728_v16  ;;  %v10536_v16 = vld [vmem:[%s12403_s30 + $0x4c0] sm:$0xf0] }
 0x283   : > { %2785 = vmatpush.bf16.msra.mxu0 %v8044_v29  ;;  %v8367_v29 = vld [vmem:[%s12403_s30 + $0x380] sm:$0xf] }
 0x287   : > { %2786 = vmatpush.bf16.msra.mxu0 %v8008_v37  ;;  %v10491_v37 = vld [vmem:[%s12403_s30 + $0x358] sm:$0xf0] }
 0x28b   : > { %2787 = vmatpush.bf16.msra.mxu0 %v7972_v44  ;;  %v8620_v44 = vor.u32 %v10563_v39, %v8619_v38 }
 0x28f   : > { %2788 = vmatpush.bf16.msra.mxu0 %v7936_v53  ;;  %v12889_v1 = vpop.f32.mrf.mxu0 }
 0x290   : > { %v2580_v27 = vpop.f32.mrf.mxu1  ;;  %v12949_v11 = vadd.f32 %v12889_v1, %v12849_v4  ;;  %v1329_v1 = vperm.slane %v12829_v54, 6 }
 0x291   : > { %v2581_v30 = vadd.f32 %v2580_v27, %v1326_v25 }
 0x292   : > { %2789 = vmatmul.bf16.vlgmr.msra.gmra.mxu0 %v12488_v13  ;;  %v8475_v13 = vld [vmem:[%s12403_s30 + $0x458] sm:$0xf] }
 0x293   : > { %v8476_v5 = vor.u32 %v10527_v58, %v8475_v13 }
 0x295   : > { %2795 = vmatpush.bf16.msra.mxu1 %v8476_v5  ;;  %v10464_v5 = vld [vmem:[%s12403_s30 + $0x280] sm:$0xf0] }
 0x296   : > { %v8224_v10 = vor.u32 %v10464_v5, %v8223_v3 }
 0x297   : > { %v2594_v36 = vpop.f32.mrf.mxu2  ;;  %v12899_v2 = vpop.f32.mrf.mxu0 }
 0x298   : > { %v2595_v40 = vadd.f32 %v2594_v36, %v2581_v30  ;;  %v2608_v41 = vpop.f32.mrf.mxu3  ;;  %v2582_v22 = vpop.f32.mrf.mxu1  ;;  %v10500_v30 = vld [vmem:[%s12403_s30 + $0x3a0] sm:$0xf0]  ;;  %v8331_v36 = vld [vmem:[%s12403_s30 + $0x338] sm:$0xf] }
 0x299   : > { %v2583_v57 = vadd.f32 %v2582_v22, %v1326_v25  ;;  %v10581_v25 = vld [vmem:[%s12403_s30 + $0x628] sm:$0xf0]  ;;  %2796 = vmatpush.bf16.msra.mxu1 %v8440_v12  ;;  %v8368_v34 = vor.u32 %v10500_v30, %v8367_v29  ;;  %v8332_v43 = vor.u32 %v10491_v37, %v8331_v36  ;;  %v8511_v12 = vld [vmem:[%s12403_s30 + $0x4a0] sm:$0xf] }
 0x29a   : > { %v2609_v45 = vadd.f32 %v2608_v41, %v2595_v40  ;;  %v8692_v27 = vor.u32 %v10581_v25, %v8691_v21  ;;  %v8512_v19 = vor.u32 %v10536_v16, %v8511_v12  ;;  %v1327_v25 = vperm.slane %v12829_v54, 4 }
 0x29c   : > { %2855 = vmatpush.xpose.msra.mxu3 %v2609_v45  ;;  %2811 = vmatpush.bf16.msra.mxu2 %v8692_v27 }
 0x29d   : > { %2797 = vmatpush.bf16.msra.mxu1 %v8404_v26 }
 0x29f   : > { %v2596_v60 = vpop.f32.mrf.mxu2  ;;  %8765 = vmatmul.msk.f32.vlgmr.msra.gmra.mxu3 %vm2827_vm7, %v2483_v50 }
 0x2a0   : > { %v2597_v31 = vadd.f32 %v2596_v60, %v2583_v57  ;;  %v2610_v62 = vpop.f32.mrf.mxu3  ;;  %2812 = vmatpush.bf16.msra.mxu2 %v8656_v35  ;;  %v8583_v57 = vld [vmem:[%s12403_s30 + $0x530] sm:$0xf]  ;;  %v10554_v60 = vld [vmem:[%s12403_s30 + $0x550] sm:$0xf0] }
 0x2a1   : > { %2798 = vmatpush.bf16.msra.mxu1 %v8368_v34  ;;  %v8584_v61 = vor.u32 %v10554_v60, %v8583_v57 }
 0x2a2   : > { %v2611_v52 = vadd.f32 %v2610_v62, %v2597_v31  ;;  %v8259_v31 = vld [vmem:[%s12403_s30 + $0x2a8] sm:$0xf]  ;;  %v10473_v62 = vld [vmem:[%s12403_s30 + $0x2c8] sm:$0xf0] }
 0x2a3   : > { %v8260_v58 = vor.u32 %v10473_v62, %v8259_v31 }
 0x2a4   : > { %2875 = vmatpush.xpose.msrb.mxu3 %v2611_v52  ;;  %2813 = vmatpush.bf16.msra.mxu2 %v8620_v44 }
 0x2a5   : > { %2799 = vmatpush.bf16.msra.mxu1 %v8332_v43 }
 0x2a7   : > { %8766 = vmatmul.msk.f32.vlgmr.msrb.gmra.mxu3 %vm2827_vm7, %v2485_v46 }
 0x2a8   : > { %2895 = vmatpush.xpose.msra.mxu3 %v2609_v45  ;;  %v8295_v45 = vld [vmem:[%s12403_s30 + $0x2f0] sm:$0xf]  ;;  %2814 = vmatpush.bf16.msra.mxu2 %v8584_v61 }
 0x2a9   : > { %v8296_v49 = vor.u32 %v10482_v47, %v8295_v45  ;;  %v12977_v47 = vld [vmem:[#allocation6] ss:$0 sm:$0xff] }
 0x2ab   : > { %2800 = vmatpush.bf16.msra.mxu1 %v8296_v49 }
 0x2ac   : > { %2915 = vmatpush.xpose.msrb.mxu3 %v2611_v52  ;;  %v8547_v52 = vld [vmem:[%s12403_s30 + $0x4e8] sm:$0xf] }
 0x2af   : > { %8768 = vmatmul.msk.f32.vlgmr.msra.gmra.mxu3 %vm12895_vm8, %v2483_v50  ;;  %v12913_v15 = vpop.f32.mrf.mxu0  ;;  %2801 = vmatpush.bf16.msra.mxu1 %v8260_v58 }
 0x2b0   : > { %v12917_v20 = vpop.f32.mrf.mxu1  ;;  %v2623_v27 = vadd.f32 %v12913_v15, %v1327_v25 }
 0x2b2   : > { %v2637_v32 = vadd.f32 %v12917_v20, %v2623_v27 }
 0x2b3   : > { %2802 = vmatpush.bf16.msra.mxu1 %v8224_v10 }
 0x2b6   : > { %2803 = vmatmul.bf16.vlgmr.msra.gmra.mxu1 %v12496_v24 }
 0x2b7   : > { %8770 = vmatmul.msk.f32.vlgmr.msrb.gmra.mxu3 %vm12895_vm8, %v2485_v46  ;;  %v2624_v40 = vpop.f32.mrf.mxu0  ;;  %v2650_v53 = vpop.f32.mrf.mxu2  ;;  %v10545_v46 = vld [vmem:[%s12403_s30 + $0x508] sm:$0xf0] }
 0x2b8   : > { %v12929_v41 = vpop.f32.mrf.mxu1  ;;  %v2664_v22 = vpop.f32.mrf.mxu3  ;;  %v8548_v8 = vor.u32 %v10545_v46, %v8547_v52  ;;  %v2625_v24 = vadd.f32 %v2624_v40, %v1327_v25  ;;  %v12966_v35 = vadd.f32 %v2650_v53, %v2637_v32 }
 0x2b9   : > { %v2665_v50 = vadd.f32 %v2664_v22, %v1328_v48 }
 0x2ba   : > { %2815 = vmatpush.bf16.msra.mxu2 %v8548_v8  ;;  %v2639_v39 = vadd.f32 %v12929_v41, %v2625_v24 }
 0x2be   : > { %2816 = vmatpush.bf16.msra.mxu2 %v8512_v19 }
 0x2bf   : > { %v2652_v17 = vpop.f32.mrf.mxu2 }
 0x2c0   : > { %v12957_v21 = vpop.f32.mrf.mxu3  ;;  %v12970_v43 = vadd.f32 %v2652_v17, %v2639_v39  ;;  %v12994_v39 = vld [vmem:[%s12582_s4 + $0x8] ss:$0 sm:$0xff] }
 0x2c1   : > { %2817 = vmatmul.bf16.vlgmr.msra.gmra.mxu2 %v12499_v28 }
 0x2cf   : > { %v2678_v13 = vpop.f32.mrf.mxu0 }
 0x2d0   : > { %v2679_v6 = vadd.f32 %v2678_v13, %v2665_v50  ;;  %v2692_v7 = vpop.f32.mrf.mxu1  ;;  %v12981_v50 = vld [vmem:[#allocation6 + $0x1] ss:$0 sm:$0xff] }
 0x2d2   : > { %v12944_v9 = vadd.f32 %v2692_v7, %v2679_v6 }
 0x2d4   : > { %3300 = vmatpush.xpose.msrb.mxu0 %v12944_v9 }
 0x2d7   : > { %8785 = vmatmul.msk.f32.vlgmr.msrb.gmra.mxu0 %vm2827_vm7, %v12949_v11  ;;  %v2706_v4 = vpop.f32.mrf.mxu2  ;;  %v12962_v26 = vpop.f32.mrf.mxu0 }
 0x2d8   : > { %v2720_v29 = vpop.f32.mrf.mxu3  ;;  %v2707_v30 = vadd.f32 %v2706_v4, %v1329_v1  ;;  %v2694_v24 = vpop.f32.mrf.mxu1 }
 0x2da   : > { %v2721_v33 = vadd.f32 %v2720_v29, %v2707_v30 }
 0x2df   : > { %v2708_v34 = vpop.f32.mrf.mxu2 }
 0x2e0   : > { %v2709_v37 = vadd.f32 %v2708_v34, %v1329_v1  ;;  %v2722_v38 = vpop.f32.mrf.mxu3 }
 0x2e2   : > { %v2723_v15 = vadd.f32 %v2722_v38, %v2709_v37 }
 0x2ef   : > { %v2734_v36 = vpop.f32.mrf.mxu0 }
 0x2f0   : > { %v2735_v28 = vadd.f32 %v2734_v36, %v2721_v33  ;;  %v2748_v36 = vpop.f32.mrf.mxu1 }
 0x2f2   : > { %2983 = vmatpush.msrb.mxu1 %v2735_v28  ;;  %3029 = vmatpush.msrb.mxu2 %v2735_v28 }
 0x2f4   : > { %3078 = vmatpush.xpose.msra.mxu2 %v12966_v35 }
 0x2f7   : > { %v2736_v44 = vpop.f32.mrf.mxu0  ;;  %v2762_v28 = vpop.f32.mrf.mxu2 }
 0x2f8   : > { %v2737_v20 = vadd.f32 %v2736_v44, %v2723_v15  ;;  %v12973_v40 = vpop.f32.mrf.mxu3  ;;  %v2750_v38 = vpop.f32.mrf.mxu1  ;;  %v1330_v15 = vperm.slane %v12829_v54, 7 }
 0x2fa   : > { %3006 = vmatpush.msra.mxu1 %v2737_v20  ;;  %3052 = vmatpush.msra.mxu3 %v2737_v20 }
 0x2fc   : > { %3138 = vmatpush.xpose.msrb.mxu3 %v12970_v43 }
 0x2ff   : > { %v2764_v44 = vpop.f32.mrf.mxu2 }
 0x300   : > { %v12975_v45 = vpop.f32.mrf.mxu3 }
 0x322   : > { %v2857_v22 = vpop.f32.mrf.mxu3 }
 0x323   : > { %v2858_v41 = vadd.f32 %v12977_v47, %v2857_v22  ;;  %v2790_v22 = vpop.f32.mrf.mxu0 }
 0x325   : > { %v2921_v49 = vsel %vm2920_vm9, %v2858_v41, -inf }
 0x326   : > { %2922 = vmax.xlane.f32.xlu1 %v2921_v49 }
 0x32a   : > { %v2877_v53 = vpop.f32.mrf.mxu3 }
 0x32b   : > { %v2878_v57 = vadd.f32 %v12981_v50, %v2877_v53 }
 0x32d   : > { %v2924_v60 = vsel %vm2920_vm9, %v2878_v57, -inf }
 0x32e   : > { %2925 = vmax.xlane.f32.xlu1 %v2924_v60 }
 0x332   : > { %v2897_v31 = vpop.f32.mrf.mxu3 }
 0x333   : > { %v2898_v61 = vadd.f32 %v12977_v47, %v2897_v31  ;;  %v2804_v60 = vpop.f32.mrf.mxu1 }
 0x335   : > { %v2943_v62 = vsel %vm2920_vm9, %v2898_v61, -inf }
 0x336   : > { %2944 = vmax.xlane.f32.xlu0 %v2943_v62 }
 0x33a   : > { %v2917_v52 = vpop.f32.mrf.mxu3 }
 0x33b   : > { %v2918_v46 = vadd.f32 %v12981_v50, %v2917_v52 }
 0x33d   : > { %v2946_v13 = vsel %vm2920_vm9, %v2918_v46, -inf }
 0x33e   : > { %2947 = vmax.xlane.f32.xlu0 %v2946_v13  ;;  %v2499_v13 = vadd.f32 %v12842_v59, %v1324_v56 }
 0x344   : > { %v2818_v62 = vpop.f32.mrf.mxu2 }
 0x399   : > { %v2923_v58 = vpop.xlane.xlu1 %2922 }
 0x39a   : > { %v2927_v3 = vsub.f32 %v2858_v41, %v2923_v58  ;;  %v2791_v41 = vadd.f32 %v12994_v39, %v2790_v22 }
 0x39c   : > { %v2929_v5 = vmul.f32 1.442695, %v2927_v3  ;;  %v2805_v31 = vadd.f32 %v2804_v60, %v2791_v41 }
 0x39e   : > { %11255 = vpow2.f32 %v2929_v5  ;;  %v13000_v52 = vadd.f32 %v2818_v62, %v2805_v31  ;;  %v2667_v5 = vadd.f32 %v12957_v21, %v1328_v48  ;;  %v2792_v62 = vpop.f32.mrf.mxu0 }
 0x3a0   : > { %3427 = vmatpush.msra.mxu0 %v13000_v52 }
 0x3a1   : > { %v2926_v6 = vpop.xlane.xlu1 %2925 }
 0x3a2   : > { %v2928_v7 = vsub.f32 %v2878_v57, %v2926_v6  ;;  %v2751_v57 = vadd.f32 %v2750_v38, %v1330_v15  ;;  %v2513_v6 = vadd.f32 %v12882_v51, %v2499_v13 }
 0x3a4   : > { %v11256_v8 = vpop.eup %11255  ;;  %v2931_v10 = vmul.f32 1.442695, %v2928_v7  ;;  %v2681_v7 = vadd.f32 %v12962_v26, %v2667_v5  ;;  %v2527_v56 = vadd.f32 %v12857_v14, %v2513_v6  ;;  %v13032_v26 = vpop.f32.mrf.mxu1 }
 0x3a5   : > { %v2933_v12 = vsel %vm2920_vm9, %v11256_v8, 0.0 }
 0x3a6   : > { %11257 = vpow2.f32 %v2931_v10  ;;  %2934 = vadd.xlane.f32.xlu0 %v2933_v12  ;;  %v13014_v12 = vadd.f32 %v2694_v24, %v2681_v7  ;;  %v3302_v7 = vpop.f32.mrf.mxu0 }
 0x3a9   : > { %v2945_v16 = vpop.xlane.xlu0 %2944 }
 0x3aa   : > { %v2949_v17 = vsub.f32 %v2898_v61, %v2945_v16  ;;  %v2765_v61 = vadd.f32 %v2764_v44, %v2751_v57  ;;  %v2749_v16 = vadd.f32 %v2748_v36, %v1330_v15 }
 0x3ac   : > { %v11258_v19 = vpop.eup %11257  ;;  %v2951_v25 = vmul.f32 1.442695, %v2949_v17  ;;  %v2763_v51 = vadd.f32 %v2762_v28, %v2749_v16 }
 0x3ad   : > { %v2936_v4 = vsel %vm2920_vm9, %v11258_v19, 0.0 }
 0x3ae   : > { %11259 = vpow2.f32 %v2951_v25  ;;  %2937 = vadd.xlane.f32.xlu1 %v2936_v4  ;;  %v2777_v14 = vadd.f32 %v12973_v40, %v2763_v51 }
 0x3b1   : > { %v2948_v1 = vpop.xlane.xlu0 %2947 }
 0x3b2   : > { %v2950_v27 = vsub.f32 %v2918_v46, %v2948_v1 }
 0x3b4   : > { %v11260_v29 = vpop.eup %11259  ;;  %v2953_v30 = vmul.f32 1.442695, %v2950_v27 }
 0x3b5   : > { %v2955_v32 = vsel %vm2920_vm9, %v11260_v29, 0.0 }
 0x3b6   : > { %11261 = vpow2.f32 %v2953_v30  ;;  %2956 = vadd.xlane.f32.xlu2 %v2955_v32 }
 0x3bc   : > { %v11262_v33 = vpop.eup %11261 }
 0x3bd   : > { %v2958_v34 = vsel %vm2920_vm9, %v11262_v33, 0.0 }
 0x3be   : > { %2959 = vadd.xlane.f32.xlu2 %v2958_v34 }
 0x419   : > { %v2935_v37 = vpop.xlane.xlu0 %2934 }
 0x41a   : > { %11263 = vrcp.f32 %v2935_v37 }
 0x420   : > { %v11264_v20 = vpop.eup %11263 }
 0x421   : > { %v2941_v49 = vmul.f32 %v11264_v20, %v11256_v8  ;;  %v2938_v53 = vpop.xlane.xlu1 %2937 }
 0x422   : > { %11265 = vrcp.f32 %v2938_v53 }
 0x423   : > { %8771 = vmatmul.msk.f32.vlgmr.msrb.gmra.mxu1 %vm2920_vm9, %v2941_v49 }
 0x424   : > { %3098 = vmatpush.xpose.msrb.mxu1 %v12970_v43  ;;  %v2779_v43 = vadd.f32 %v12975_v45, %v2765_v61 }
 0x428   : > { %v11266_v46 = vpop.eup %11265 }
 0x429   : > { %v2942_v58 = vmul.f32 %v11266_v46, %v11258_v19  ;;  %v2957_v3 = vpop.xlane.xlu2 %2956 }
 0x42a   : > { %11267 = vrcp.f32 %v2957_v3 }
 0x42b   : > { %8772 = vmatmul.msk.f32.vlgmr.msra.gmra.mxu1 %vm2920_vm9, %v2942_v58 }
 0x42c   : > { %3228 = vmatpush.msra.mxu1 %v2779_v43 }
 0x430   : > { %v11268_v8 = vpop.eup %11267 }
 0x431   : > { %v2963_v59 = vmul.f32 %v11268_v8, %v11260_v29  ;;  %v2960_v10 = vpop.xlane.xlu2 %2959 }
 0x432   : > { %11269 = vrcp.f32 %v2960_v10 }
 0x433   : > { %8773 = vmatmul.msk.f32.vlgmr.msrb.gmra.mxu2 %vm2920_vm9, %v2963_v59  ;;  %8776 = vmatmul.msk.f32.vlgmr.msrb.gmra.mxu1 %vm2827_vm7, %v2527_v56 }
 0x434   : > { %3118 = vmatpush.xpose.msrb.mxu2 %v12966_v35  ;;  %3320 = vmatpush.xpose.msrb.mxu1 %v13014_v12  ;;  %v13034_v35 = vpop.f32.mrf.mxu2 }
 0x438   : > { %v11270_v48 = vpop.eup %11269 }
 0x439   : > { %v2964_v21 = vmul.f32 %v11270_v48, %v11262_v33 }
 0x43b   : > { %8774 = vmatmul.msk.f32.vlgmr.msra.gmra.mxu3 %vm2920_vm9, %v2964_v21  ;;  %8775 = vmatmul.msk.f32.vlgmr.msra.gmra.mxu2 %vm2827_vm7, %v12844_v63 }
 0x43c   : > { %3205 = vmatpush.msra.mxu3 %v2777_v14  ;;  %3251 = vmatpush.msra.mxu2 %v2777_v14  ;;  %v2793_v14 = vadd.f32 %v12994_v39, %v2792_v62  ;;  %v2541_v39 = vadd.f32 %v12861_v18, %v1325_v0  ;;  %v8882_v0 = vld [vmem:[%s13080_s19 + $0xa8] sm:$0xf]  ;;  %v10623_v18 = vld [vmem:[%s13080_s19 + $0xb0] sm:$0xf0] }
 0x443   : > { %8778 = vmatmul.msk.f32.vlgmr.msrb.gmra.mxu2 %vm12895_vm8, %v12844_v63  ;;  %8780 = vmatmul.msk.f32.vlgmr.msrb.gmra.mxu3 %vm12895_vm8, %v2527_v56  ;;  %v3303_v56 = vadd.f32 %v12977_v47, %v3302_v7  ;;  %v10602_v7 = vld [vmem:[%s13080_s19 + $0x8] sm:$0xf0] }
 0x444   : > { %3274 = vmatpush.msrb.mxu3 %v2779_v43  ;;  %3340 = vmatpush.xpose.msrb.mxu2 %v12944_v9 }
 0x445   : > { %v3365_v59 = vsel %vm2920_vm9, %v3303_v56, -inf }
 0x4a0   : > { %v2985_v40 = vpop.f32.mrf.mxu1 }
 0x4a8   : > { %v3008_v19 = vpop.f32.mrf.mxu1 }
 0x4b0   : > { %v3100_v29 = vpop.f32.mrf.mxu1 }
 0x4b1   : > { %v3101_v30 = vadd.f32 %v12981_v50, %v3100_v29 }
 0x4b3   : > { %v3146_v37 = vsel %vm2920_vm9, %v3101_v30, -inf }
 0x4b6   : > { %v3031_v45 = vpop.f32.mrf.mxu2 }
 0x4b7   : > { %v3057_v17 = vsel %vm2827_vm7, %v2985_v40, %v3031_v45  ;;  %v2807_v45 = vadd.f32 %v13032_v26, %v2793_v14 }
 0x4be   : > { %v3054_v25 = vpop.f32.mrf.mxu3  ;;  %v3080_v4 = vpop.f32.mrf.mxu2 }
 0x4bf   : > { %v3058_v63 = vsel %vm2827_vm7, %v3008_v19, %v3054_v25  ;;  %v3081_v1 = vadd.f32 %v12977_v47, %v3080_v4 }
 0x4c0   : > { %v13041_v27 = vpack.c.bf16 %v3058_v63, %v3057_v17 }
 0x4c1   : > { %v3143_v9 = vsel %vm2920_vm9, %v3081_v1, -inf }
 0x4c2   : > { %3144 = vmax.xlane.f32.xlu2 %v3143_v9 }
 0x4c6   : > { %v3120_v32 = vpop.f32.mrf.mxu2  ;;  %v3140_v33 = vpop.f32.mrf.mxu3 }
 0x4c7   : > { %v3121_v34 = vadd.f32 %v12977_v47, %v3120_v32  ;;  %v3141_v24 = vadd.f32 %v12981_v50, %v3140_v33 }
 0x4c9   : > { %v3165_v36 = vsel %vm2920_vm9, %v3121_v34, -inf  ;;  %v3168_v28 = vsel %vm2920_vm9, %v3141_v24, -inf }
 0x4ca   : > { %3166 = vmax.xlane.f32.xlu0 %v3165_v36  ;;  %3169 = vmax.xlane.f32.xlu1 %v3168_v28 }
 0x4cb   : > { %3147 = vmax.xlane.f32.xlu2 %v3146_v37 }
 0x535   : > { %v3145_v38 = vpop.xlane.xlu2 %3144 }
 0x536   : > { %v3149_v15 = vsub.f32 %v3081_v1, %v3145_v38  ;;  %v2821_v1 = vadd.f32 %v13034_v35, %v2807_v45 }
 0x538   : > { %v3151_v44 = vmul.f32 1.442695, %v3149_v15 }
 0x53a   : > { %11271 = vpow2.f32 %v3151_v44  ;;  %v8870_v44 = vld [vmem:[%s13080_s19 + $0x90] sm:$0xf] }
 0x53d   : > { %v3167_v20 = vpop.xlane.xlu0 %3166  ;;  %v3170_v22 = vpop.xlane.xlu1 %3169 }
 0x53e   : > { %v3171_v41 = vsub.f32 %v3121_v34, %v3167_v20  ;;  %v3148_v49 = vpop.xlane.xlu2 %3147  ;;  %v3172_v53 = vsub.f32 %v3141_v24, %v3170_v22  ;;  %v10620_v20 = vld [vmem:[%s13080_s19 + $0x98] sm:$0xf0] }
 0x53f   : > { %v3150_v57 = vsub.f32 %v3101_v30, %v3148_v49  ;;  %v8871_v22 = vor.u32 %v10620_v20, %v8870_v44  ;;  %v8966_v44 = vld [vmem:[%s13080_s19 + $0x150] sm:$0xf]  ;;  %v10644_v20 = vld [vmem:[%s13080_s19 + $0x158] sm:$0xf0] }
 0x540   : > { %v11272_v60 = vpop.eup %11271  ;;  %v3173_v31 = vmul.f32 1.442695, %v3171_v41  ;;  %v3175_v61 = vmul.f32 1.442695, %v3172_v53  ;;  %v8858_v41 = vld [vmem:[%s13080_s19 + $0x78] sm:$0xf] }
 0x541   : > { %v3153_v46 = vmul.f32 1.442695, %v3150_v57  ;;  %v3155_v13 = vsel %vm2920_vm9, %v11272_v60, 0.0  ;;  %v8846_v53 = vld [vmem:[%s13080_s19 + $0x60] sm:$0xf] }
 0x542   : > { %11273 = vpow2.f32 %v3173_v31  ;;  %3156 = vadd.xlane.f32.xlu0 %v3155_v13  ;;  %v10614_v57 = vld [vmem:[%s13080_s19 + $0x68] sm:$0xf0]  ;;  %v8834_v31 = vld [vmem:[%s13080_s19 + $0x48] sm:$0xf]  ;;  %v10608_v13 = vld [vmem:[%s13080_s19 + $0x38] sm:$0xf0] }
 0x543   : > { %11275 = vpow2.f32 %v3153_v46  ;;  %v8822_v46 = vld [vmem:[%s13080_s19 + $0x30] sm:$0xf] }
 0x544   : > { %11277 = vpow2.f32 %v3175_v61  ;;  %v10611_v61 = vld [vmem:[%s13080_s19 + $0x50] sm:$0xf0] }
 0x545   : > { %v8835_v62 = vor.u32 %v10611_v61, %v8834_v31  ;;  %v10634_v61 = vld [vmem:[%s13080_s19 + $0x10c] sm:$0xf] }
 0x548   : > { %v11274_v58 = vpop.eup %11273 }
 0x549   : > { %v11276_v3 = vpop.eup %11275  ;;  %v3177_v5 = vsel %vm2920_vm9, %v11274_v58, 0.0 }
 0x54a   : > { %v11278_v43 = vpop.eup %11277  ;;  %3178 = vadd.xlane.f32.xlu1 %v3177_v5  ;;  %v3158_v6 = vsel %vm2920_vm9, %v11276_v3, 0.0  ;;  %v10605_v5 = vld [vmem:[%s13080_s19 + $0x20] sm:$0xf0] }
 0x54b   : > { %3159 = vadd.xlane.f32.xlu0 %v3158_v6  ;;  %v3180_v8 = vsel %vm2920_vm9, %v11278_v43, 0.0  ;;  %v8798_v6 = vld [vmem:[%s13080_s19] sm:$0xf] }
 0x54c   : > { %3181 = vadd.xlane.f32.xlu2 %v3180_v8  ;;  %v8799_v8 = vor.u32 %v10602_v7, %v8798_v6 }
 0x553   : > { %3366 = vmax.xlane.f32.xlu0 %v3365_v59 }
 0x5b5   : > { %v3157_v10 = vpop.xlane.xlu0 %3156 }
 0x5b6   : > { %11279 = vrcp.f32 %v3157_v10 }
 0x5bc   : > { %v11280_v16 = vpop.eup %11279 }
 0x5bd   : > { %v3163_v51 = vmul.f32 %v11280_v16, %v11272_v60  ;;  %v3179_v48 = vpop.xlane.xlu1 %3178  ;;  %v8847_v60 = vor.u32 %v10614_v57, %v8846_v53  ;;  %v10613_v57 = vld [vmem:[%s13080_s19 + $0x64] sm:$0xf] }
 0x5be   : > { %v3160_v21 = vpop.xlane.xlu0 %3159  ;;  %11281 = vrcp.f32 %v3179_v48 }
 0x5bf   : > { %11283 = vrcp.f32 %v3160_v21  ;;  %v3182_v40 = vpop.xlane.xlu2 %3181  ;;  %8781 = vmatmul.msk.f32.vlgmr.msra.gmra.mxu3 %vm2920_vm9, %v3163_v51 }
 0x5c0   : > { %11285 = vrcp.f32 %v3182_v40  ;;  %3360 = vmatpush.xpose.msra.mxu3 %v13014_v12  ;;  %v2555_v12 = vadd.f32 %v12865_v23, %v2541_v39  ;;  %v8883_v23 = vor.u32 %v10623_v18, %v8882_v0  ;;  %v8980_v39 = vld [vmem:[%s13080_s19 + $0x174] sm:$0xf0]  ;;  %v10643_v18 = vld [vmem:[%s13080_s19 + $0x154] sm:$0xf] }
 0x5c2   : > { %v2569_v26 = vadd.f32 %v12899_v2, %v2555_v12  ;;  %3999 = vmatpush.bf16.msrb.mxu0 %v8883_v23  ;;  %v8968_v23 = vld [vmem:[%s13080_s19 + $0x15c] sm:$0xf0] }
 0x5c4   : > { %v11282_v17 = vpop.eup %11281 }
 0x5c5   : > { %v11284_v19 = vpop.eup %11283  ;;  %v3185_v25 = vmul.f32 %v11282_v17, %v11274_v58  ;;  %v8823_v58 = vor.u32 %v10608_v13, %v8822_v46  ;;  %v10610_v13 = vld [vmem:[%s13080_s19 + $0x4c] sm:$0xf] }
 0x5c6   : > { %v11286_v4 = vpop.eup %11285  ;;  %v3164_v63 = vmul.f32 %v11284_v19, %v11276_v3  ;;  %v3367_v35 = vpop.xlane.xlu0 %3366  ;;  %4000 = vmatpush.bf16.msrb.mxu0 %v8871_v22  ;;  %v8810_v3 = vld [vmem:[%s13080_s19 + $0x18] sm:$0xf] }
 0x5c7   : > { %v3186_v9 = vmul.f32 %v11286_v4, %v11278_v43  ;;  %8783 = vmatmul.msk.f32.vlgmr.msra.gmra.mxu2 %vm2920_vm9, %v3185_v25  ;;  %v3371_v30 = vsub.f32 %v3303_v56, %v3367_v35  ;;  %v8811_v43 = vor.u32 %v10605_v5, %v8810_v3  ;;  %v10622_v35 = vld [vmem:[%s13080_s19 + $0xac] sm:$0xf]  ;;  %v10631_v5 = vld [vmem:[%s13080_s19 + $0xf4] sm:$0xf] }
 0x5c8   : > { %8782 = vmatmul.msk.f32.vlgmr.msra.gmra.mxu1 %vm2920_vm9, %v3164_v63  ;;  %3473 = vmatpush.msra.mxu2 %v13000_v52 }
 0x5c9   : > { %8784 = vmatmul.msk.f32.vlgmr.msrb.gmra.mxu3 %vm2920_vm9, %v3186_v9  ;;  %3450 = vmatpush.msra.mxu1 %v2821_v1  ;;  %v3373_v28 = vmul.f32 1.442695, %v3371_v30  ;;  %v10646_v9 = vld [vmem:[%s13080_s19 + $0x16c] sm:$0xf]  ;;  %v8971_v30 = vor.u32 %v10643_v18, %v8968_v23  ;;  %v8930_v23 = vld [vmem:[%s13080_s19 + $0x108] sm:$0xf] }
 0x5ca   : > { %3496 = vmatpush.msrb.mxu3 %v2821_v1 }
 0x5cb   : > { %11287 = vpow2.f32 %v3373_v28 }
 0x5cf   : > { %8788 = vmatmul.msk.f32.vlgmr.msrb.gmra.mxu2 %vm12895_vm8, %v12949_v11 }
 0x5d0   : > { %8786 = vmatmul.msk.f32.vlgmr.msrb.gmra.mxu1 %vm2827_vm7, %v2569_v26 }
 0x5d1   : > { %8790 = vmatmul.msk.f32.vlgmr.msra.gmra.mxu3 %vm12895_vm8, %v2569_v26  ;;  %v11288_v38 = vpop.eup %11287  ;;  %v8983_v26 = vor.u32 %v10646_v9, %v8980_v39  ;;  %v8812_v9 = vld [vmem:[%s13080_s19 + $0x24] sm:$0xf0]  ;;  %v10638_v39 = vld [vmem:[%s13080_s19 + $0x128] sm:$0xf0] }
 0x5d2   : > { %v3377_v15 = vsel %vm2920_vm9, %v11288_v38, 0.0 }
 0x642   : > { %v13078_v54 = vpop.f32.mrf.mxu3 }
 0x645   : > { %v13086_v11 = vpop.f32.mrf.mxu1 }
 0x64a   : > { %v13084_v2 = vpop.f32.mrf.mxu2 }
 0x64c   : > { %v13088_v52 = vpop.f32.mrf.mxu3 }
 0x64d   : > { %v3322_v24 = vpop.f32.mrf.mxu1 }
 0x64e   : > { %v3323_v37 = vadd.f32 %v12981_v50, %v3322_v24  ;;  %v8956_v24 = vld [vmem:[%s13080_s19 + $0x144] sm:$0xf0] }
 0x652   : > { %v3342_v55 = vpop.f32.mrf.mxu2 }
 0x653   : > { %v3343_v29 = vadd.f32 %v12977_v47, %v3342_v55  ;;  %v3368_v47 = vsel %vm2920_vm9, %v3323_v37, -inf  ;;  %v8884_v55 = vld [vmem:[%s13080_s19 + $0xb4] sm:$0xf0] }
 0x654   : > { %v3362_v32 = vpop.f32.mrf.mxu3 }
 0x655   : > { %v3363_v33 = vadd.f32 %v12981_v50, %v3362_v32  ;;  %v3387_v34 = vsel %vm2920_vm9, %v3343_v29, -inf  ;;  %v10617_v50 = vld [vmem:[%s13080_s19 + $0x80] sm:$0xf0]  ;;  %v8887_v32 = vor.u32 %v10622_v35, %v8884_v55  ;;  %v10635_v35 = vld [vmem:[%s13080_s19 + $0x110] sm:$0xf0] }
 0x656   : > { %3388 = vmax.xlane.f32.xlu1 %v3387_v34  ;;  %v8859_v49 = vor.u32 %v10617_v50, %v8858_v41  ;;  %v10640_v34 = vld [vmem:[%s13080_s19 + $0x13c] sm:$0xf]  ;;  %v10637_v41 = vld [vmem:[%s13080_s19 + $0x124] sm:$0xf]  ;;  %v8944_v50 = vld [vmem:[%s13080_s19 + $0x12c] sm:$0xf0]  ;;  %v8931_v55 = vor.u32 %v10635_v35, %v8930_v23 }
 0x657   : > { %v3390_v36 = vsel %vm2920_vm9, %v3363_v33, -inf  ;;  %4041 = vmatpush.bf16.msra.mxu3 %v8887_v32  ;;  %v8959_v22 = vor.u32 %v10640_v34, %v8956_v24  ;;  %v8947_v31 = vor.u32 %v10637_v41, %v8944_v50  ;;  %v10629_v34 = vld [vmem:[%s13080_s19 + $0xe0] sm:$0xf0] }
 0x658   : > { %3391 = vmax.xlane.f32.xlu2 %v3390_v36  ;;  %4001 = vmatpush.bf16.msrb.mxu0 %v8859_v49  ;;  %v8978_v36 = vld [vmem:[%s13080_s19 + $0x168] sm:$0xf]  ;;  %v8967_v49 = vor.u32 %v10644_v20, %v8966_v44  ;;  %v10648_v44 = vld [vmem:[%s13080_s19 + $0x178] sm:$0xf0]  ;;  %v10669_v23 = vld [vmem:[%s13080_s19 + $0x220] sm:$0xf0] }
 0x65c   : > { %4002 = vmatpush.bf16.msrb.mxu0 %v8847_v60  ;;  %v8848_v60 = vld [vmem:[%s13080_s19 + $0x6c] sm:$0xf0] }
 0x65d   : > { %v8851_v46 = vor.u32 %v10613_v57, %v8848_v60  ;;  %v8974_v57 = vld [vmem:[%s13080_s19 + $0x158] sm:$0xf]  ;;  %v10645_v60 = vld [vmem:[%s13080_s19 + $0x160] sm:$0xf0] }
 0x65e   : > { %3369 = vmax.xlane.f32.xlu1 %v3368_v47  ;;  %v10647_v47 = vld [vmem:[%s13080_s19 + $0x170] sm:$0xf0] }
 0x660   : > { %4003 = vmatpush.bf16.msrb.mxu0 %v8835_v62  ;;  %v8932_v62 = vld [vmem:[%s13080_s19 + $0x114] sm:$0xf0] }
 0x661   : > { %v8935_v3 = vor.u32 %v10634_v61, %v8932_v62  ;;  %v8962_v61 = vld [vmem:[%s13080_s19 + $0x140] sm:$0xf] }
 0x664   : > { %4004 = vmatpush.bf16.msrb.mxu0 %v8823_v58  ;;  %v8836_v58 = vld [vmem:[%s13080_s19 + $0x54] sm:$0xf0] }
 0x665   : > { %v8839_v6 = vor.u32 %v10610_v13, %v8836_v58  ;;  %v10639_v58 = vld [vmem:[%s13080_s19 + $0x130] sm:$0xf0] }
 0x666   : > { %3378 = vadd.xlane.f32.xlu1 %v3377_v15  ;;  %v8979_v15 = vor.u32 %v10647_v47, %v8978_v36  ;;  %v8894_v36 = vld [vmem:[%s13080_s19 + $0xc0] sm:$0xf] }
 0x668   : > { %4005 = vmatpush.bf16.msrb.mxu0 %v8811_v43  ;;  %4013 = vmatpush.bf16.msrb.mxu1 %v8979_v15  ;;  %v8920_v43 = vld [vmem:[%s13080_s19 + $0xfc] sm:$0xf0]  ;;  %v8986_v15 = vld [vmem:[%s13080_s19 + $0x170] sm:$0xf] }
 0x669   : > { %v8923_v7 = vor.u32 %v10631_v5, %v8920_v43  ;;  %v8938_v5 = vld [vmem:[%s13080_s19 + $0x110] sm:$0xf]  ;;  %v10636_v43 = vld [vmem:[%s13080_s19 + $0x118] sm:$0xf0] }
 0x66c   : > { %4006 = vmatpush.bf16.msrb.mxu0 %v8799_v8  ;;  %4014 = vmatpush.bf16.msrb.mxu1 %v8967_v49  ;;  %v10628_v8 = vld [vmem:[%s13080_s19 + $0xdc] sm:$0xf]  ;;  %v8987_v49 = vor.u32 %v10648_v44, %v8986_v15  ;;  %v10661_v44 = vld [vmem:[%s13080_s19 + $0x1e4] sm:$0xf] }
 0x6c9   : > { %v3389_v56 = vpop.xlane.xlu1 %3388 }
 0x6ca   : > { %v3393_v59 = vsub.f32 %v3343_v29, %v3389_v56  ;;  %v10619_v29 = vld [vmem:[%s13080_s19 + $0x94] sm:$0xf]  ;;  %v8908_v56 = vld [vmem:[%s13080_s19 + $0xe4] sm:$0xf0] }
 0x6cb   : > { %v3392_v10 = vpop.xlane.xlu2 %3391 }
 0x6cc   : > { %v3394_v16 = vsub.f32 %v3363_v33, %v3392_v10  ;;  %v3395_v51 = vmul.f32 1.442695, %v3393_v59  ;;  %v8872_v33 = vld [vmem:[%s13080_s19 + $0x9c] sm:$0xf0]  ;;  %v8911_v59 = vor.u32 %v10628_v8, %v8908_v56  ;;  %v10625_v10 = vld [vmem:[%s13080_s19 + $0xc4] sm:$0xf] }
 0x6cd   : > { %v8875_v28 = vor.u32 %v10619_v29, %v8872_v33  ;;  %v8918_v29 = vld [vmem:[%s13080_s19 + $0xf0] sm:$0xf]  ;;  %v8906_v33 = vld [vmem:[%s13080_s19 + $0xd8] sm:$0xf]  ;;  %v8914_v56 = vld [vmem:[%s13080_s19 + $0xe0] sm:$0xf] }
 0x6ce   : > { %v3397_v48 = vmul.f32 1.442695, %v3394_v16  ;;  %11289 = vpow2.f32 %v3395_v51  ;;  %v8896_v16 = vld [vmem:[%s13080_s19 + $0xcc] sm:$0xf0]  ;;  %v8907_v24 = vor.u32 %v10629_v34, %v8906_v33  ;;  %v10664_v33 = vld [vmem:[%s13080_s19 + $0x1fc] sm:$0xf] }
 0x6cf   : > { %4042 = vmatpush.bf16.msra.mxu3 %v8875_v28  ;;  %v8899_v51 = vor.u32 %v10625_v10, %v8896_v16  ;;  %v10626_v28 = vld [vmem:[%s13080_s19 + $0xc8] sm:$0xf0]  ;;  %v9074_v10 = vld [vmem:[%s13080_s19 + $0x228] sm:$0xf]  ;;  %v10671_v16 = vld [vmem:[%s13080_s19 + $0x230] sm:$0xf0] }
 0x6d0   : > { %11291 = vpow2.f32 %v3397_v48  ;;  %v3279_v48 = vsel %vm2827_vm7, %v13078_v54, %v13084_v2  ;;  %v10641_v54 = vld [vmem:[%s13080_s19 + $0x140] sm:$0xf0]  ;;  %v9052_v34 = vld [vmem:[%s13080_s19 + $0x204] sm:$0xf0] }
 0x6d1   : > { %v3370_v21 = vpop.xlane.xlu1 %3369 }
 0x6d2   : > { %v3372_v14 = vsub.f32 %v3323_v37, %v3370_v21  ;;  %v10616_v37 = vld [vmem:[%s13080_s19 + $0x7c] sm:$0xf]  ;;  %v3280_v21 = vsel %vm2827_vm7, %v13086_v11, %v13088_v52  ;;  %v8942_v52 = vld [vmem:[%s13080_s19 + $0x120] sm:$0xf] }
 0x6d4   : > { %v13111_v40 = vpop.eup %11289  ;;  %v3375_v45 = vmul.f32 1.442695, %v3372_v14  ;;  %v13163_v14 = vpack.c.bf16 %v3280_v21, %v3279_v48  ;;  %v9075_v48 = vor.u32 %v10671_v16, %v9074_v10  ;;  %v10668_v21 = vld [vmem:[%s13080_s19 + $0x218] sm:$0xf0]  ;;  %v9004_v16 = vld [vmem:[%s13080_s19 + $0x1a4] sm:$0xf0] }
 0x6d5   : > { %v3399_v17 = vsel %vm2920_vm9, %v13111_v40, 0.0  ;;  %v10652_v10 = vld [vmem:[%s13080_s19 + $0x19c] sm:$0xf] }
 0x6d6   : > { %v13115_v19 = vpop.eup %11291  ;;  %11293 = vpow2.f32 %v3375_v45  ;;  %3400 = vadd.xlane.f32.xlu2 %v3399_v17  ;;  %v10607_v45 = vld [vmem:[%s13080_s19 + $0x34] sm:$0xf]  ;;  %v8824_v17 = vld [vmem:[%s13080_s19 + $0x3c] sm:$0xf0]  ;;  %4027 = vmatpush.bf16.msrb.mxu2 %v9075_v48 }
 0x6d7   : > { %v3402_v25 = vsel %vm2920_vm9, %v13115_v19, 0.0  ;;  %v9010_v48 = vld [vmem:[%s13080_s19 + $0x1a0] sm:$0xf] }
 0x6d8   : > { %3403 = vadd.xlane.f32.xlu0 %v3402_v25  ;;  %v8827_v25 = vor.u32 %v10607_v45, %v8824_v17  ;;  %v8902_v17 = vld [vmem:[%s13080_s19 + $0xc8] sm:$0xf] }
 0x6d9   : > { %v3379_v4 = vpop.xlane.xlu1 %3378 }
 0x6da   : > { %11295 = vrcp.f32 %v3379_v4  ;;  %v8954_v4 = vld [vmem:[%s13080_s19 + $0x138] sm:$0xf] }
 0x6db   : > { %v8955_v2 = vor.u32 %v10641_v54, %v8954_v4  ;;  %v10670_v4 = vld [vmem:[%s13080_s19 + $0x22c] sm:$0xf] }
 0x6dc   : > { %v13119_v63 = vpop.eup %11293 }
 0x6dd   : > { %v3380_v1 = vsel %vm2920_vm9, %v13119_v63, 0.0  ;;  %4015 = vmatpush.bf16.msrb.mxu1 %v8955_v2  ;;  %v9076_v2 = vld [vmem:[%s13080_s19 + $0x234] sm:$0xf0] }
 0x6de   : > { %3381 = vadd.xlane.f32.xlu2 %v3380_v1  ;;  %v10604_v1 = vld [vmem:[%s13080_s19 + $0x1c] sm:$0xf] }
 0x6df   : > { %v8815_v11 = vor.u32 %v10604_v1, %v8812_v9  ;;  %v9082_v1 = vld [vmem:[%s13080_s19 + $0x230] sm:$0xf]  ;;  %v10672_v9 = vld [vmem:[%s13080_s19 + $0x238] sm:$0xf0] }
 0x6e0   : > { %v11296_v12 = vpop.eup %11295 }
 0x6e1   : > { %v3385_v0 = vmul.f32 %v11296_v12, %v11288_v38  ;;  %v8860_v38 = vld [vmem:[%s13080_s19 + $0x84] sm:$0xf0]  ;;  %v8943_v12 = vor.u32 %v10638_v39, %v8942_v52  ;;  %v10665_v52 = vld [vmem:[%s13080_s19 + $0x200] sm:$0xf0]  ;;  %v9079_v39 = vor.u32 %v10670_v4, %v9076_v2 }
 0x6e2   : > { %v8863_v53 = vor.u32 %v10616_v37, %v8860_v38  ;;  %v8895_v37 = vor.u32 %v10626_v28, %v8894_v36  ;;  %v9058_v36 = vld [vmem:[%s13080_s19 + $0x200] sm:$0xf]  ;;  %v10666_v28 = vld [vmem:[%s13080_s19 + $0x208] sm:$0xf0] }
 0x6e3   : > { %8791 = vmatmul.msk.f32.vlgmr.msra.gmra.mxu0 %vm2920_vm9, %v3385_v0  ;;  %v8800_v0 = vld [vmem:[%s13080_s19 + $0xc] sm:$0xf0]  ;;  %4016 = vmatpush.bf16.msrb.mxu1 %v8943_v12  ;;  %v9083_v12 = vor.u32 %v10672_v9, %v9082_v1  ;;  %v9059_v15 = vor.u32 %v10666_v28, %v9058_v36  ;;  %v8878_v1 = vld [vmem:[%s13080_s19 + $0x98] sm:$0xf]  ;;  %v10621_v9 = vld [vmem:[%s13080_s19 + $0xa0] sm:$0xf0] }
 0x6e4   : > { %4055 = vmatpush.bf16.msra.mxu0 %v8983_v26  ;;  %4043 = vmatpush.bf16.msra.mxu3 %v8863_v53  ;;  %v10601_v26 = vld [vmem:[%s13080_s19 + $0x4] sm:$0xf]  ;;  %v8830_v36 = vld [vmem:[%s13080_s19 + $0x38] sm:$0xf] }
 0x6e5   : > { %v8803_v18 = vor.u32 %v10601_v26, %v8800_v0  ;;  %v10667_v26 = vld [vmem:[%s13080_s19 + $0x214] sm:$0xf]  ;;  %v9064_v0 = vld [vmem:[%s13080_s19 + $0x21c] sm:$0xf0]  ;;  %v10609_v28 = vld [vmem:[%s13080_s19 + $0x40] sm:$0xf0] }
 0x6e7   : > { %4017 = vmatpush.bf16.msrb.mxu1 %v8931_v55  ;;  %v9067_v55 = vor.u32 %v10667_v26, %v9064_v0  ;;  %v10649_v26 = vld [vmem:[%s13080_s19 + $0x184] sm:$0xf]  ;;  %v8992_v0 = vld [vmem:[%s13080_s19 + $0x18c] sm:$0xf0] }
 0x6e8   : > { %4056 = vmatpush.bf16.msra.mxu0 %v8971_v30  ;;  %4044 = vmatpush.bf16.msra.mxu3 %v8851_v46  ;;  %v10632_v30 = vld [vmem:[%s13080_s19 + $0xf8] sm:$0xf0] }
 0x6e9   : > { %v8919_v32 = vor.u32 %v10632_v30, %v8918_v29  ;;  %v9038_v30 = vld [vmem:[%s13080_s19 + $0x1e0] sm:$0xf] }
 0x6eb   : > { %4007 = vmatmul.bf16.vlgmr.msrb.gmra.mxu0 %v13041_v27  ;;  %4018 = vmatpush.bf16.msrb.mxu1 %v8919_v32 }
 0x6ec   : > { %4057 = vmatpush.bf16.msra.mxu0 %v8959_v22  ;;  %4045 = vmatpush.bf16.msra.mxu3 %v8839_v6  ;;  %v8926_v6 = vld [vmem:[%s13080_s19 + $0xf8] sm:$0xf] }
 0x6ef   : > { %4019 = vmatpush.bf16.msrb.mxu1 %v8907_v24  ;;  %v10662_v24 = vld [vmem:[%s13080_s19 + $0x1e8] sm:$0xf0] }
 0x6f0   : > { %4058 = vmatpush.bf16.msra.mxu0 %v8947_v31  ;;  %4046 = vmatpush.bf16.msra.mxu3 %v8827_v25  ;;  %v8975_v31 = vor.u32 %v10645_v60, %v8974_v57  ;;  %v10627_v25 = vld [vmem:[%s13080_s19 + $0xd0] sm:$0xf0]  ;;  %v9014_v57 = vld [vmem:[%s13080_s19 + $0x1b0] sm:$0xf] }
 0x6f1   : > { %v8903_v35 = vor.u32 %v10627_v25, %v8902_v17  ;;  %v10624_v17 = vld [vmem:[%s13080_s19 + $0xb8] sm:$0xf0]  ;;  %v9007_v25 = vor.u32 %v10652_v10, %v9004_v16 }
 0x6f3   : > { %4020 = vmatpush.bf16.msrb.mxu1 %v8895_v37  ;;  %v9055_v37 = vor.u32 %v10664_v33, %v9052_v34  ;;  %v8842_v33 = vld [vmem:[%s13080_s19 + $0x50] sm:$0xf]  ;;  %v10612_v34 = vld [vmem:[%s13080_s19 + $0x58] sm:$0xf0] }
 0x6f4   : > { %4059 = vmatpush.bf16.msra.mxu0 %v8935_v3  ;;  %4047 = vmatpush.bf16.msra.mxu3 %v8815_v11  ;;  %v9050_v11 = vld [vmem:[%s13080_s19 + $0x1f8] sm:$0xf] }
 0x6f5   : > { %v9051_v29 = vor.u32 %v10665_v52, %v9050_v11  ;;  %v8879_v11 = vor.u32 %v10621_v9, %v8878_v1  ;;  %v8866_v52 = vld [vmem:[%s13080_s19 + $0x80] sm:$0xf]  ;;  %v11340_v9 = vld [vmem:[#allocation2 + $0x10] sm:$0xff] }
 0x6f8   : > { %4060 = vmatpush.bf16.msra.mxu0 %v8923_v7  ;;  %4048 = vmatpush.bf16.msra.mxu3 %v8803_v18  ;;  %v10633_v7 = vld [vmem:[%s13080_s19 + $0x100] sm:$0xf0]  ;;  %v9070_v18 = vld [vmem:[%s13080_s19 + $0x218] sm:$0xf] }
 0x6f9   : > { %v8927_v8 = vor.u32 %v10633_v7, %v8926_v6  ;;  %v9071_v32 = vor.u32 %v10669_v23, %v9070_v18  ;;  %v10657_v6 = vld [vmem:[%s13080_s19 + $0x1c0] sm:$0xf0]  ;;  %v8854_v18 = vld [vmem:[%s13080_s19 + $0x68] sm:$0xf]  ;;  %v8995_v23 = vor.u32 %v10649_v26, %v8992_v0 }
 0x6fa   : > { %v11341_v0 = vld [vmem:[#allocation2 + $0x8] sm:$0xff] }
 0x6fc   : > { %4061 = vmatpush.bf16.msra.mxu0 %v8911_v59  ;;  %v10630_v59 = vld [vmem:[%s13080_s19 + $0xe8] sm:$0xf0] }
 0x6fd   : > { %v8915_v45 = vor.u32 %v10630_v59, %v8914_v56  ;;  %v8990_v56 = vld [vmem:[%s13080_s19 + $0x180] sm:$0xf] }
 0x700   : > { %4062 = vmatpush.bf16.msra.mxu0 %v8899_v51  ;;  %v9062_v51 = vld [vmem:[%s13080_s19 + $0x210] sm:$0xf] }
 0x701   : > { %v9063_v54 = vor.u32 %v10668_v21, %v9062_v51  ;;  %v10650_v51 = vld [vmem:[%s13080_s19 + $0x188] sm:$0xf0] }
 0x702   : > { %v10654_v21 = vld [vmem:[%s13080_s19 + $0x1a8] sm:$0xf0]  ;;  %v8991_v4 = vor.u32 %v10650_v51, %v8990_v56 }
 0x703   : > { %4063 = vmatmul.bf16.vlgmr.msra.gmra.mxu0 %v13163_v14  ;;  %4028 = vmatpush.bf16.msrb.mxu2 %v9063_v54  ;;  %v9011_v54 = vor.u32 %v10654_v21, %v9010_v48 }
 0x704   : > { %4111 = vmatpush.bf16.msrb.mxu0 %v9083_v12 }
 0x707   : > { %4029 = vmatpush.bf16.msrb.mxu2 %v9051_v29  ;;  %v10651_v29 = vld [vmem:[%s13080_s19 + $0x190] sm:$0xf0] }
 0x708   : > { %4112 = vmatpush.bf16.msrb.mxu0 %v9071_v32 }
 0x70c   : > { %4113 = vmatpush.bf16.msrb.mxu0 %v9059_v15 }
 0x749   : > { %v3401_v47 = vpop.xlane.xlu2 %3400 }
 0x74a   : > { %11297 = vrcp.f32 %v3401_v47  ;;  %v9039_v47 = vor.u32 %v10662_v24, %v9038_v30  ;;  %v8843_v24 = vor.u32 %v10612_v34, %v8842_v33  ;;  %v11342_v33 = vld [vmem:[#allocation2] sm:$0xff] }
 0x74b   : > { %v3404_v38 = vpop.xlane.xlu0 %3403 }
 0x74c   : > { %11299 = vrcp.f32 %v3404_v38  ;;  %v9026_v38 = vld [vmem:[%s13080_s19 + $0x1c8] sm:$0xf]  ;;  %4030 = vmatpush.bf16.msrb.mxu2 %v9039_v47  ;;  %v8818_v47 = vld [vmem:[%s13080_s19 + $0x20] sm:$0xf] }
 0x750   : > { %v11298_v20 = vpop.eup %11297 }
 0x751   : > { %v3407_v22 = vmul.f32 %v11298_v20, %v13111_v40  ;;  %v3382_v41 = vpop.xlane.xlu2 %3381  ;;  %v10642_v40 = vld [vmem:[%s13080_s19 + $0x148] sm:$0xf0]  ;;  %v9040_v20 = vld [vmem:[%s13080_s19 + $0x1ec] sm:$0xf0] }
 0x752   : > { %v11300_v50 = vpop.eup %11299  ;;  %11301 = vrcp.f32 %v3382_v41  ;;  %v8963_v13 = vor.u32 %v10642_v40, %v8962_v61  ;;  %v9046_v41 = vld [vmem:[%s13080_s19 + $0x1e8] sm:$0xf]  ;;  %v9028_v61 = vld [vmem:[%s13080_s19 + $0x1d4] sm:$0xf0]  ;;  %v10656_v40 = vld [vmem:[%s13080_s19 + $0x1b8] sm:$0xf0] }
 0x753   : > { %v3408_v53 = vmul.f32 %v11300_v50, %v13115_v19  ;;  %8793 = vmatmul.msk.f32.vlgmr.msra.gmra.mxu2 %vm2920_vm9, %v3407_v22  ;;  %v8950_v19 = vld [vmem:[%s13080_s19 + $0x128] sm:$0xf]  ;;  %v10659_v22 = vld [vmem:[%s13080_s19 + $0x1d0] sm:$0xf0] }
 0x754   : > { %v8951_v3 = vor.u32 %v10639_v58, %v8950_v19  ;;  %v10663_v50 = vld [vmem:[%s13080_s19 + $0x1f0] sm:$0xf0]  ;;  %v9002_v19 = vld [vmem:[%s13080_s19 + $0x198] sm:$0xf] }
 0x755   : > { %8794 = vmatmul.msk.f32.vlgmr.msrb.gmra.mxu3 %vm2920_vm9, %v3408_v53  ;;  %v9027_v53 = vor.u32 %v10659_v22, %v9026_v38  ;;  %v9047_v60 = vor.u32 %v10663_v50, %v9046_v41  ;;  %v10606_v38 = vld [vmem:[%s13080_s19 + $0x28] sm:$0xf0] }
 0x756   : > { %4097 = vmatpush.bf16.msrb.mxu3 %v8987_v49  ;;  %v9043_v49 = vor.u32 %v10661_v44, %v9040_v20  ;;  %v8819_v15 = vor.u32 %v10606_v38, %v8818_v47  ;;  %v8806_v44 = vld [vmem:[%s13080_s19 + $0x8] sm:$0xf]  ;;  %v10603_v20 = vld [vmem:[%s13080_s19 + $0x10] sm:$0xf0]  ;;  %v11344_v38 = vld [vmem:[#allocation2 + $0x20] sm:$0xff] }
 0x757   : > { %4031 = vmatpush.bf16.msrb.mxu2 %v9027_v53  ;;  %4114 = vmatpush.bf16.msrb.mxu0 %v9047_v60  ;;  %v8807_v22 = vor.u32 %v10603_v20, %v8806_v44 }
 0x758   : > { %v11302_v62 = vpop.eup %11301 }
 0x759   : > { %v3386_v46 = vmul.f32 %v11302_v62, %v13119_v63  ;;  %v8939_v63 = vor.u32 %v10636_v43, %v8938_v5  ;;  %v9034_v62 = vld [vmem:[%s13080_s19 + $0x1d0] sm:$0xf]  ;;  %v9016_v5 = vld [vmem:[%s13080_s19 + $0x1bc] sm:$0xf0]  ;;  %v10653_v43 = vld [vmem:[%s13080_s19 + $0x1a0] sm:$0xf0] }
 0x75a   : > { %4098 = vmatpush.bf16.msrb.mxu3 %v8975_v31  ;;  %v10658_v31 = vld [vmem:[%s13080_s19 + $0x1cc] sm:$0xf] }
 0x75b   : > { %8792 = vmatmul.msk.f32.vlgmr.msra.gmra.mxu1 %vm2920_vm9, %v3386_v46  ;;  %v10660_v46 = vld [vmem:[%s13080_s19 + $0x1d8] sm:$0xf0] }
 0x75c   : > { %4069 = vmatpush.bf16.msra.mxu1 %v9079_v39  ;;  %v9035_v58 = vor.u32 %v10660_v46, %v9034_v62  ;;  %v10618_v39 = vld [vmem:[%s13080_s19 + $0x88] sm:$0xf0] }
 0x75d   : > { %4049 = vmatmul.bf16.vlgmr.msra.gmra.mxu3 %v13041_v27  ;;  %v8867_v12 = vor.u32 %v10618_v39, %v8866_v52 }
 0x75e   : > { %4099 = vmatpush.bf16.msrb.mxu3 %v8963_v13  ;;  %v9015_v13 = vor.u32 %v10656_v40, %v9014_v57  ;;  %4115 = vmatpush.bf16.msrb.mxu0 %v9035_v58 }
 0x760   : > { %4070 = vmatpush.bf16.msra.mxu1 %v9067_v55  ;;  %4032 = vmatpush.bf16.msrb.mxu2 %v9015_v13  ;;  %v8998_v55 = vld [vmem:[%s13080_s19 + $0x188] sm:$0xf]  ;;  %v3429_v50 = vpop.f32.mrf.mxu0 }
 0x761   : > { %v8999_v32 = vor.u32 %v10651_v29, %v8998_v55 }
 0x762   : > { %4100 = vmatpush.bf16.msrb.mxu3 %v8951_v3  ;;  %v10655_v3 = vld [vmem:[%s13080_s19 + $0x1b4] sm:$0xf] }
 0x763   : > { %4021 = vmatmul.bf16.vlgmr.msrb.gmra.mxu1 %v13163_v14  ;;  %v9019_v7 = vor.u32 %v10655_v3, %v9016_v5 }
 0x764   : > { %4071 = vmatpush.bf16.msra.mxu1 %v9055_v37  ;;  %v8831_v37 = vor.u32 %v10609_v28, %v8830_v36  ;;  %v11343_v28 = vld [vmem:[#allocation2 + $0x18] sm:$0xff] }
 0x766   : > { %4101 = vmatpush.bf16.msrb.mxu3 %v8939_v63  ;;  %v9022_v63 = vld [vmem:[%s13080_s19 + $0x1b8] sm:$0xf] }
 0x767   : > { %v9023_v59 = vor.u32 %v10657_v6, %v9022_v63 }
 0x768   : > { %4072 = vmatpush.bf16.msra.mxu1 %v9043_v49 }
 0x769   : > { %4116 = vmatpush.bf16.msrb.mxu0 %v9023_v59 }
 0x76a   : > { %4102 = vmatpush.bf16.msrb.mxu3 %v8927_v8  ;;  %v9003_v8 = vor.u32 %v10653_v43, %v9002_v19  ;;  %v3607_v19 = vld [vmem:[%s3606_s29] sm:$0x7] }
 0x76b   : > { %v3609_v42 = vperm.slane %v3607_v19, 0  ;;  %v3610_v3 = vperm.slane %v3607_v19, 1  ;;  %v3611_v56 = vperm.slane %v3607_v19, 2  ;;  %v9257_v19 = vld [vmem:[%s13303_s5 + $0x168] sm:$0xf0] }
 0x76c   : > { %4033 = vmatpush.bf16.msrb.mxu2 %v9003_v8 }
 0x76d   : > { %4117 = vmatpush.bf16.msrb.mxu0 %v9011_v54 }
 0x76e   : > { %4103 = vmatpush.bf16.msrb.mxu3 %v8915_v45  ;;  %v8890_v45 = vld [vmem:[%s13080_s19 + $0xb0] sm:$0xf] }
 0x76f   : > { %v8891_v2 = vor.u32 %v10624_v17, %v8890_v45 }
 0x770   : > { %4034 = vmatpush.bf16.msrb.mxu2 %v8991_v4  ;;  %v11339_v4 = vld [vmem:[#allocation2 + $0x28] sm:$0xff] }
 0x771   : > { %4118 = vmatpush.bf16.msrb.mxu0 %v8999_v32 }
 0x772   : > { %4104 = vmatpush.bf16.msrb.mxu3 %v8903_v35  ;;  %v10615_v35 = vld [vmem:[%s13080_s19 + $0x70] sm:$0xf0] }
 0x773   : > { %v8855_v30 = vor.u32 %v10615_v35, %v8854_v18 }
 0x774   : > { %4083 = vmatpush.bf16.msra.mxu2 %v8891_v2 }
 0x775   : > { %4105 = vmatmul.bf16.vlgmr.msrb.gmra.mxu3 %v13163_v14  ;;  %v9031_v14 = vor.u32 %v10658_v31, %v9028_v61  ;;  %v4008_v61 = vpop.f32.mrf.mxu0 }
 0x776   : > { %v4009_v6 = vadd.f32 %v4008_v61, %v3609_v42  ;;  %v10767_v61 = vld [vmem:[%s13303_s5 + $0x2e4] sm:$0xf0] }
 0x777   : > { %4073 = vmatpush.bf16.msra.mxu1 %v9031_v14 }
 0x778   : > { %4084 = vmatpush.bf16.msra.mxu2 %v8879_v11 }
 0x77b   : > { %4074 = vmatpush.bf16.msra.mxu1 %v9019_v7 }
 0x77c   : > { %4085 = vmatpush.bf16.msra.mxu2 %v8867_v12 }
 0x77d   : > { %v4010_v40 = vpop.f32.mrf.mxu0 }
 0x77e   : > { %v4011_v17 = vadd.f32 %v4010_v40, %v3609_v42  ;;  %v9639_v40 = vld [vmem:[%s13303_s5 + $0x450] sm:$0xf] }
 0x77f   : > { %4075 = vmatpush.bf16.msra.mxu1 %v9007_v25 }
 0x780   : > { %4086 = vmatpush.bf16.msra.mxu2 %v8855_v30 }
 0x783   : > { %4076 = vmatpush.bf16.msra.mxu1 %v8995_v23 }
 0x784   : > { %4087 = vmatpush.bf16.msra.mxu2 %v8843_v24 }
 0x785   : > { %v4064_v14 = vpop.f32.mrf.mxu0 }
 0x788   : > { %4088 = vmatpush.bf16.msra.mxu2 %v8831_v37 }
 0x78c   : > { %4089 = vmatpush.bf16.msra.mxu2 %v8819_v15 }
 0x78d   : > { %v4066_v63 = vpop.f32.mrf.mxu0 }
 0x790   : > { %4090 = vmatpush.bf16.msra.mxu2 %v8807_v22  ;;  %v12084_v22 = vmov 384.0  }
 0x791   : > { %11303 = vrcp.f32 %v12084_v22  ;;  %v9543_v22 = vld [vmem:[%s13303_s5 + $0x390] sm:$0xf] }
 0x7d6   : > { %v3475_v41 = vpop.f32.mrf.mxu2 }
 0x7d7   : > { %v3501_v57 = vsel %vm2827_vm7, %v3429_v50, %v3475_v41  ;;  %v11304_v41 = vpop.eup %11303 }
 0x7d8   : > { %v3498_v49 = vpop.f32.mrf.mxu3  ;;  %v3452_v53 = vpop.f32.mrf.mxu1  ;;  %v4144_v50 = vmul.f32 384.0, %v11304_v41  ;;  %vm4148_vm10 = vweird.f32 %v11304_v41 }
 0x7d9   : > { %v3502_v60 = vsel %vm2827_vm7, %v3452_v53, %v3498_v49  ;;  %v9255_v53 = vld [vmem:[%s13303_s5 + $0x150] sm:$0xf] }
 0x7da   : > { %v3505_v31 = vpack.c.bf16 %v3502_v60, %v3501_v57  ;;  %v4145_v49 = vsub.f32 1.0, %v4144_v50  ;;  %v10719_v57 = vld [vmem:[%s13303_s5 + $0x164] sm:$0xf0]  ;;  %v9447_v60 = vld [vmem:[%s13303_s5 + $0x2d0] sm:$0xf] }
 0x7db   : > { %v10791_v50 = vld [vmem:[%s13303_s5 + $0x3a4] sm:$0xf0] }
 0x7dc   : > { %4035 = vmatmul.bf16.vlgmr.msrb.gmra.mxu2 %v3505_v31  ;;  %4077 = vmatmul.bf16.vlgmr.msra.gmra.mxu1 %v3505_v31  ;;  %v4146_v42 = vmul.f32 %v11304_v41, %v4145_v49 }
 0x7dd   : > { %4119 = vmatmul.bf16.vlgmr.msrb.gmra.mxu0 %v3505_v31  ;;  %v9256_v31 = vor.u32 %v10719_v57, %v9255_v53  ;;  %v10692_v57 = vld [vmem:[%s13303_s5 + $0x94] sm:$0xf] }
 0x7df   : > { %5114 = vmatpush.bf16.msrb.mxu1 %v9256_v31 }
 0x7e0   : > { %v4022_v62 = vpop.f32.mrf.mxu1  ;;  %v4050_v46 = vpop.f32.mrf.mxu3 }
 0x7e1   : > { %v4051_v7 = vadd.f32 %v4050_v46, %v3610_v3  ;;  %v4023_v8 = vadd.f32 %v4022_v62, %v4009_v6  ;;  %v10815_v62 = vld [vmem:[%s13303_s5 + $0x464] sm:$0xf0]  ;;  %v9448_v46 = vor.u32 %v10767_v61, %v9447_v60  ;;  %v9161_v60 = vld [vmem:[%s13303_s5 + $0xa8] sm:$0xf0] }
 0x7e3   : > { %v4065_v59 = vadd.f32 %v4064_v14, %v4051_v7  ;;  %v9640_v14 = vor.u32 %v10815_v62, %v9639_v40  ;;  %5128 = vmatpush.bf16.msrb.mxu2 %v9448_v46  ;;  %v9544_v40 = vor.u32 %v10791_v50, %v9543_v22  ;;  %v9089_v22 = vld [vmem:[%s13303_s5 + $0x18] sm:$0xf0]  ;;  %v10764_v50 = vld [vmem:[%s13303_s5 + $0x2d4] sm:$0xf] }
 0x7e5   : > { %5142 = vmatpush.bf16.msra.mxu3 %v9640_v14 }
 0x7e8   : > { %v4024_v58 = vpop.f32.mrf.mxu1  ;;  %v4052_v5 = vpop.f32.mrf.mxu3 }
 0x7e9   : > { %v4053_v25 = vadd.f32 %v4052_v5, %v3610_v3  ;;  %v4025_v1 = vadd.f32 %v4024_v58, %v4011_v17  ;;  %v9231_v58 = vld [vmem:[%s13303_s5 + $0x120] sm:$0xf]  ;;  %v10713_v5 = vld [vmem:[%s13303_s5 + $0x134] sm:$0xf0]  ;;  %v9591_v17 = vld [vmem:[%s13303_s5 + $0x3f0] sm:$0xf] }
 0x7ea   : > { %v9232_v6 = vor.u32 %v10713_v5, %v9231_v58 }
 0x7eb   : > { %v4067_v12 = vadd.f32 %v4066_v63, %v4053_v25  ;;  %v10761_v63 = vld [vmem:[%s13303_s5 + $0x2b4] sm:$0xf0]  ;;  %v4147_v25 = vadd.f32 %v11304_v41, %v4146_v42 }
 0x7ec   : > { %4091 = vmatmul.bf16.vlgmr.msra.gmra.mxu2 %v13041_v27  ;;  %5115 = vmatpush.bf16.msrb.mxu1 %v9232_v6 }
 0x7f8   : > { %v4106_v16 = vpop.f32.mrf.mxu3 }
 0x800   : > { %v4108_v32 = vpop.f32.mrf.mxu3 }
 0x859   : > { %v4078_v27 = vpop.f32.mrf.mxu1 }
 0x85a   : > { %v4079_v48 = vadd.f32 %v4078_v27, %v4065_v59  ;;  %v4120_v45 = vpop.f32.mrf.mxu0  ;;  %v9615_v27 = vld [vmem:[%s13303_s5 + $0x420] sm:$0xf] }
 0x85c   : > { %v13284_v11 = vadd.f32 %v11340_v9, %v4079_v48  ;;  %v9209_v9 = vld [vmem:[%s13303_s5 + $0x108] sm:$0xf0] }
 0x85f   : > { %v4036_v13 = vpop.f32.mrf.mxu2 }
 0x860   : > { %v4037_v10 = vadd.f32 %v4036_v13, %v4023_v8  ;;  %v10716_v13 = vld [vmem:[%s13303_s5 + $0x154] sm:$0xf]  ;;  %v10809_v8 = vld [vmem:[%s13303_s5 + $0x434] sm:$0xf0] }
 0x861   : > { %v4080_v39 = vpop.f32.mrf.mxu1  ;;  %v9260_v3 = vor.u32 %v10716_v13, %v9257_v19  ;;  %v9616_v59 = vor.u32 %v10809_v8, %v9615_v27  ;;  %v9164_v13 = vor.u32 %v10692_v57, %v9161_v60  ;;  %v9641_v57 = vld [vmem:[%s13303_s5 + $0x468] sm:$0xf0] }
 0x862   : > { %v13282_v54 = vadd.f32 %v11339_v4, %v4037_v10  ;;  %v4081_v55 = vadd.f32 %v4080_v39, %v4067_v12  ;;  %v4122_v36 = vpop.f32.mrf.mxu0  ;;  %v9233_v10 = vld [vmem:[%s13303_s5 + $0x138] sm:$0xf0]  ;;  %v9183_v12 = vld [vmem:[%s13303_s5 + $0xc0] sm:$0xf] }
 0x863   : > { %5156 = vmatpush.bf16.msra.mxu0 %v9260_v3  ;;  %5143 = vmatpush.bf16.msra.mxu3 %v9616_v59 }
 0x864   : > { %v4135_v23 = vadd.f32 %v13284_v11, %v13282_v54  ;;  %v13293_v37 = vadd.f32 %v11343_v28, %v4081_v55  ;;  %v9567_v55 = vld [vmem:[%s13303_s5 + $0x3c0] sm:$0xf]  ;;  %v10695_v28 = vld [vmem:[%s13303_s5 + $0xa4] sm:$0xf0] }
 0x867   : > { %v4038_v43 = vpop.f32.mrf.mxu2 }
 0x868   : > { %v4039_v26 = vadd.f32 %v4038_v43, %v4025_v1  ;;  %v9423_v43 = vld [vmem:[%s13303_s5 + $0x2a0] sm:$0xf]  ;;  %v10704_v1 = vld [vmem:[%s13303_s5 + $0xf4] sm:$0xf] }
 0x869   : > { %v9424_v7 = vor.u32 %v10761_v63, %v9423_v43 }
 0x86a   : > { %v13291_v34 = vadd.f32 %v11342_v33, %v4039_v26  ;;  %v10701_v26 = vld [vmem:[%s13303_s5 + $0xd4] sm:$0xf0]  ;;  %v13337_v33 = vsel %vm4148_vm10, %v11304_v41, %v4147_v25 }
 0x86b   : > { %5129 = vmatpush.bf16.msrb.mxu2 %v9424_v7 }
 0x86c   : > { %v4139_v44 = vadd.f32 %v13293_v37, %v13291_v34 }
 0x86f   : > { %v4092_v51 = vpop.f32.mrf.mxu2 }
 0x870   : > { %v4093_v21 = vadd.f32 %v4092_v51, %v3611_v56  ;;  %v10707_v51 = vld [vmem:[%s13303_s5 + $0x104] sm:$0xf0] }
 0x872   : > { %v4107_v2 = vadd.f32 %v4106_v16, %v4093_v21  ;;  %v9207_v16 = vld [vmem:[%s13303_s5 + $0xf0] sm:$0xf] }
 0x873   : > { %v9399_v21 = vld [vmem:[%s13303_s5 + $0x270] sm:$0xf]  ;;  %v9208_v4 = vor.u32 %v10707_v51, %v9207_v16  ;;  %v9519_v16 = vld [vmem:[%s13303_s5 + $0x360] sm:$0xf]  ;;  %v10785_v51 = vld [vmem:[%s13303_s5 + $0x374] sm:$0xf0] }
 0x874   : > { %v4121_v52 = vadd.f32 %v4120_v45, %v4107_v2  ;;  %v10755_v45 = vld [vmem:[%s13303_s5 + $0x284] sm:$0xf0] }
 0x875   : > { %v10803_v2 = vld [vmem:[%s13303_s5 + $0x404] sm:$0xf0]  ;;  %5116 = vmatpush.bf16.msrb.mxu1 %v9208_v4  ;;  %v9111_v4 = vld [vmem:[%s13303_s5 + $0x30] sm:$0xf] }
 0x876   : > { %v13286_v18 = vadd.f32 %v11341_v0, %v4121_v52  ;;  %v9400_v52 = vor.u32 %v10755_v45, %v9399_v21  ;;  %v9592_v39 = vor.u32 %v10803_v2, %v9591_v17  ;;  %v9375_v0 = vld [vmem:[%s13303_s5 + $0x240] sm:$0xf]  ;;  %v9520_v21 = vor.u32 %v10785_v51, %v9519_v16  ;;  %v10686_v45 = vld [vmem:[%s13303_s5 + $0x64] sm:$0xf]  ;;  %v9137_v17 = vld [vmem:[%s13303_s5 + $0x78] sm:$0xf0] }
 0x877   : > { %v4094_v35 = vpop.f32.mrf.mxu2  ;;  %v9140_v25 = vor.u32 %v10686_v45, %v9137_v17  ;;  %v10683_v2 = vld [vmem:[%s13303_s5 + $0x44] sm:$0xf0]  ;;  %v10800_v16 = vld [vmem:[%s13303_s5 + $0x3f4] sm:$0xf]  ;;  %v10708_v45 = vld [vmem:[%s13303_s5 + $0x10c] sm:$0xf0] }
 0x878   : > { %v4095_v29 = vadd.f32 %v4094_v35, %v3611_v56  ;;  %v4136_v30 = vadd.f32 %v4135_v23, %v13286_v18  ;;  %v10710_v56 = vld [vmem:[%s13303_s5 + $0x124] sm:$0xf]  ;;  %v9212_v23 = vor.u32 %v10704_v1, %v9209_v9  ;;  %v10749_v35 = vld [vmem:[%s13303_s5 + $0x254] sm:$0xf0]  ;;  %5130 = vmatpush.bf16.msrb.mxu2 %v9400_v52  ;;  %5144 = vmatpush.bf16.msra.mxu3 %v9592_v39  ;;  %v9303_v1 = vld [vmem:[%s13303_s5 + $0x1b0] sm:$0xf] }
 0x879   : > { %v9236_v48 = vor.u32 %v10710_v56, %v9233_v10  ;;  %v9327_v56 = vld [vmem:[%s13303_s5 + $0x1e0] sm:$0xf]  ;;  %v10737_v10 = vld [vmem:[%s13303_s5 + $0x1f4] sm:$0xf0]  ;;  %v9112_v9 = vor.u32 %v10683_v2, %v9111_v4  ;;  %v10731_v52 = vld [vmem:[%s13303_s5 + $0x1c4] sm:$0xf0] }
 0x87a   : > { %v4109_v24 = vadd.f32 %v4108_v32, %v4095_v29  ;;  %4137 = vadd.xlane.f32.xlu0 %v4136_v30  ;;  %v10797_v29 = vld [vmem:[%s13303_s5 + $0x3d4] sm:$0xf0]  ;;  %v10698_v30 = vld [vmem:[%s13303_s5 + $0xc4] sm:$0xf]  ;;  %v9185_v32 = vld [vmem:[%s13303_s5 + $0xd8] sm:$0xf0] }
 0x87b   : > { %5157 = vmatpush.bf16.msra.mxu0 %v9236_v48  ;;  %v9188_v53 = vor.u32 %v10698_v30, %v9185_v32  ;;  %v9328_v48 = vor.u32 %v10737_v10, %v9327_v56  ;;  %v9495_v39 = vld [vmem:[%s13303_s5 + $0x330] sm:$0xf]  ;;  %v10677_v30 = vld [vmem:[%s13303_s5 + $0x14] sm:$0xf0]  ;;  %v9279_v32 = vld [vmem:[%s13303_s5 + $0x180] sm:$0xf] }
 0x87c   : > { %v4123_v47 = vadd.f32 %v4122_v36, %v4109_v24  ;;  %v9184_v24 = vor.u32 %v10701_v26, %v9183_v12  ;;  %v9159_v36 = vld [vmem:[%s13303_s5 + $0x90] sm:$0xf]  ;;  %v10779_v12 = vld [vmem:[%s13303_s5 + $0x344] sm:$0xf0]  ;;  %v9304_v26 = vor.u32 %v10731_v52, %v9303_v1  ;;  %v9401_v10 = vld [vmem:[%s13303_s5 + $0x288] sm:$0xf0] }
 0x87d   : > { %v9160_v31 = vor.u32 %v10695_v28, %v9159_v36  ;;  %v10725_v36 = vld [vmem:[%s13303_s5 + $0x194] sm:$0xf0]  ;;  %v9471_v28 = vld [vmem:[%s13303_s5 + $0x300] sm:$0xf]  ;;  %v10756_v2 = vld [vmem:[%s13303_s5 + $0x28c] sm:$0xf0] }
 0x87e   : > { %v13295_v15 = vadd.f32 %v11344_v38, %v4123_v47  ;;  %v9351_v47 = vld [vmem:[%s13303_s5 + $0x210] sm:$0xf]  ;;  %v9376_v38 = vor.u32 %v10749_v35, %v9375_v0  ;;  %5117 = vmatpush.bf16.msrb.mxu1 %v9184_v24  ;;  %v9496_v0 = vor.u32 %v10779_v12, %v9495_v39  ;;  %v9113_v35 = vld [vmem:[%s13303_s5 + $0x48] sm:$0xf0]  ;;  %v9407_v4 = vld [vmem:[%s13303_s5 + $0x278] sm:$0xf] }
 0x87f   : > { %5158 = vmatpush.bf16.msra.mxu0 %v9212_v23  ;;  %v10680_v23 = vld [vmem:[%s13303_s5 + $0x34] sm:$0xf]  ;;  %v9408_v1 = vor.u32 %v10756_v2, %v9407_v4  ;;  %v9377_v52 = vld [vmem:[%s13303_s5 + $0x258] sm:$0xf0]  ;;  %v10794_v39 = vld [vmem:[%s13303_s5 + $0x3c4] sm:$0xf] }
 0x880   : > { %v4140_v20 = vadd.f32 %v4139_v44, %v13295_v15  ;;  %v9568_v44 = vor.u32 %v10797_v29, %v9567_v55  ;;  %5131 = vmatpush.bf16.msrb.mxu2 %v9376_v38  ;;  %v9116_v55 = vor.u32 %v10680_v23, %v9113_v35  ;;  %v9087_v29 = vld [vmem:[%s13303_s5] sm:$0xf]  ;;  %v9280_v38 = vor.u32 %v10725_v36, %v9279_v32  ;;  %v9353_v36 = vld [vmem:[%s13303_s5 + $0x228] sm:$0xf0]  ;;  %v9473_v4 = vld [vmem:[%s13303_s5 + $0x318] sm:$0xf0] }
 0x881   : > { %v9088_v24 = vor.u32 %v10677_v30, %v9087_v29  ;;  %v10702_v23 = vld [vmem:[%s13303_s5 + $0xdc] sm:$0xf0]  ;;  %v9383_v29 = vld [vmem:[%s13303_s5 + $0x248] sm:$0xf] }
 0x882   : > { %4141 = vadd.xlane.f32.xlu1 %v4140_v20  ;;  %v10743_v20 = vld [vmem:[%s13303_s5 + $0x224] sm:$0xf0]  ;;  %5145 = vmatpush.bf16.msra.mxu3 %v9568_v44  ;;  %v10750_v30 = vld [vmem:[%s13303_s5 + $0x25c] sm:$0xf0] }
 0x883   : > { %v9352_v61 = vor.u32 %v10743_v20, %v9351_v47  ;;  %5159 = vmatpush.bf16.msra.mxu0 %v9188_v53  ;;  %5118 = vmatpush.bf16.msrb.mxu1 %v9160_v31  ;;  %v10773_v47 = vld [vmem:[%s13303_s5 + $0x314] sm:$0xf0]  ;;  %v10674_v20 = vld [vmem:[%s13303_s5 + $0x4] sm:$0xf]  ;;  %v9449_v53 = vld [vmem:[%s13303_s5 + $0x2e8] sm:$0xf0]  ;;  %v9384_v32 = vor.u32 %v10750_v30, %v9383_v29 }
 0x884   : > { %v9472_v44 = vor.u32 %v10773_v47, %v9471_v28  ;;  %v9452_v60 = vor.u32 %v10764_v50, %v9449_v53  ;;  %v10788_v28 = vld [vmem:[%s13303_s5 + $0x394] sm:$0xf]  ;;  %v10744_v53 = vld [vmem:[%s13303_s5 + $0x22c] sm:$0xf0]  ;;  %v9095_v2 = vld [vmem:[%s13303_s5 + $0x8] sm:$0xf] }
 0x885   : > { %5132 = vmatpush.bf16.msrb.mxu2 %v9352_v61  ;;  %v9263_v61 = vld [vmem:[%s13303_s5 + $0x158] sm:$0xf] }
 0x886   : > { %5146 = vmatpush.bf16.msra.mxu3 %v9544_v40  ;;  %v10720_v40 = vld [vmem:[%s13303_s5 + $0x16c] sm:$0xf0] }
 0x887   : > { %5160 = vmatpush.bf16.msra.mxu0 %v9164_v13  ;;  %v9455_v13 = vld [vmem:[%s13303_s5 + $0x2d8] sm:$0xf] }
 0x889   : > { %5133 = vmatpush.bf16.msrb.mxu2 %v9328_v48  ;;  %v9593_v48 = vld [vmem:[%s13303_s5 + $0x408] sm:$0xf0] }
 0x88a   : > { %5147 = vmatpush.bf16.msra.mxu3 %v9520_v21  ;;  %v9215_v21 = vld [vmem:[%s13303_s5 + $0xf8] sm:$0xf]  ;;  %v9596_v17 = vor.u32 %v10800_v16, %v9593_v48 }
 0x88b   : > { %5161 = vmatpush.bf16.msra.mxu0 %v9140_v25  ;;  %v9216_v25 = vor.u32 %v10708_v45, %v9215_v21  ;;  %v9311_v16 = vld [vmem:[%s13303_s5 + $0x1b8] sm:$0xf]  ;;  %v10722_v45 = vld [vmem:[%s13303_s5 + $0x184] sm:$0xf] }
 0x88d   : > { %5134 = vmatpush.bf16.msrb.mxu2 %v9304_v26  ;;  %v9569_v26 = vld [vmem:[%s13303_s5 + $0x3d8] sm:$0xf0] }
 0x88e   : > { %5148 = vmatpush.bf16.msra.mxu3 %v9496_v0  ;;  %v9191_v0 = vld [vmem:[%s13303_s5 + $0xc8] sm:$0xf]  ;;  %v9572_v35 = vor.u32 %v10794_v39, %v9569_v26 }
 0x88f   : > { %5162 = vmatpush.bf16.msra.mxu0 %v9116_v55  ;;  %v9192_v55 = vor.u32 %v10702_v23, %v9191_v0  ;;  %v9287_v39 = vld [vmem:[%s13303_s5 + $0x188] sm:$0xf] }
 0x891   : > { %5135 = vmatpush.bf16.msrb.mxu2 %v9280_v38  ;;  %v9545_v38 = vld [vmem:[%s13303_s5 + $0x3a8] sm:$0xf0] }
 0x892   : > { %5149 = vmatpush.bf16.msra.mxu3 %v9472_v44  ;;  %v9167_v44 = vld [vmem:[%s13303_s5 + $0x98] sm:$0xf] }
 0x8ed   : > { %v4138_v49 = vpop.xlane.xlu0 %4137 }
 0x8ee   : > { %v4150_v41 = vmul.f32 %v13337_v33, %v4138_v49  ;;  %v9092_v49 = vor.u32 %v10674_v20, %v9089_v22  ;;  %v10696_v20 = vld [vmem:[%s13303_s5 + $0xac] sm:$0xf0]  ;;  %v9548_v22 = vor.u32 %v10788_v28, %v9545_v38 }
 0x8ef   : > { %v9168_v50 = vor.u32 %v10696_v20, %v9167_v44  ;;  %v4132_v44 = vld [vmem:[%s4131_s24] sm:$0x7] }
 0x8f0   : > { %v13349_v62 = vsub.f32 %v13282_v54, %v4150_v41  ;;  %v13352_v46 = vsub.f32 %v13284_v11, %v4150_v41  ;;  %v13355_v14 = vsub.f32 %v13286_v18, %v4150_v41  ;;  %v10812_v41 = vld [vmem:[%s13303_s5 + $0x454] sm:$0xf]  ;;  %5163 = vmatpush.bf16.msra.mxu0 %v9092_v49  ;;  %v9359_v49 = vld [vmem:[%s13303_s5 + $0x218] sm:$0xf] }
 0x8f1   : > { %v9644_v31 = vor.u32 %v10812_v41, %v9641_v57  ;;  %v9360_v41 = vor.u32 %v10744_v53, %v9359_v49  ;;  %v10734_v57 = vld [vmem:[%s13303_s5 + $0x1e4] sm:$0xf]  ;;  %v4203_v49 = vperm.slane %v4132_v44, 0  ;;  %v4204_v53 = vperm.slane %v4132_v44, 1 }
 0x8f2   : > { %v4158_v19 = vmul.f32 %v13349_v62, %v13349_v62  ;;  %v4159_v58 = vmul.f32 %v13352_v46, %v13352_v46  ;;  %v4160_v54 = vmul.f32 %v13355_v14, %v13355_v14 }
 0x8f3   : > { %5184 = vmatpush.bf16.msra.mxu2 %v9644_v31  ;;  %v10782_v31 = vld [vmem:[%s13303_s5 + $0x364] sm:$0xf] }
 0x8f4   : > { %v4164_v42 = vadd.f32 %v4159_v58, %v4158_v19  ;;  %v9264_v19 = vor.u32 %v10720_v40, %v9263_v61  ;;  %v10768_v58 = vld [vmem:[%s13303_s5 + $0x2ec] sm:$0xf0]  ;;  %v9521_v40 = vld [vmem:[%s13303_s5 + $0x378] sm:$0xf0] }
 0x8f5   : > { %v4142_v11 = vpop.xlane.xlu1 %4141 }
 0x8f6   : > { %v4151_v18 = vmul.f32 %v13337_v33, %v4142_v11  ;;  %v4165_v3 = vadd.f32 %v4164_v42, %v4160_v54  ;;  %v10758_v54 = vld [vmem:[%s13303_s5 + $0x2a4] sm:$0xf]  ;;  %v9425_v42 = vld [vmem:[%s13303_s5 + $0x2b8] sm:$0xf0]  ;;  %v9456_v11 = vor.u32 %v10768_v58, %v9455_v13  ;;  %5198 = vmatpush.bf16.msrb.mxu3 %v9264_v19  ;;  %v9143_v13 = vld [vmem:[%s13303_s5 + $0x68] sm:$0xf] }
 0x8f7   : > { %v10690_v19 = vld [vmem:[%s13303_s5 + $0x7c] sm:$0xf0] }
 0x8f8   : > { %v13365_v5 = vsub.f32 %v13291_v34, %v4151_v18  ;;  %v13368_v43 = vsub.f32 %v13293_v37, %v4151_v18  ;;  %v13371_v63 = vsub.f32 %v13295_v15, %v4151_v18  ;;  %4166 = vadd.xlane.f32.xlu2 %v4165_v3  ;;  %v9135_v37 = vld [vmem:[%s13303_s5 + $0x60] sm:$0xf]  ;;  %v10689_v15 = vld [vmem:[%s13303_s5 + $0x74] sm:$0xf0]  ;;  %v9428_v18 = vor.u32 %v10758_v54, %v9425_v42  ;;  %v10806_v3 = vld [vmem:[%s13303_s5 + $0x424] sm:$0xf] }
 0x8f9   : > { %v9136_v59 = vor.u32 %v10689_v15, %v9135_v37  ;;  %v10762_v37 = vld [vmem:[%s13303_s5 + $0x2bc] sm:$0xf0]  ;;  %5212 = vmatpush.bf16.msrb.mxu0 %v9456_v11  ;;  %v9524_v54 = vor.u32 %v10782_v31, %v9521_v40  ;;  %v9144_v42 = vor.u32 %v10690_v19, %v9143_v13  ;;  %v9335_v11 = vld [vmem:[%s13303_s5 + $0x1e8] sm:$0xf] }
 0x8fa   : > { %v4161_v6 = vmul.f32 %v13365_v5, %v13365_v5  ;;  %v4162_v7 = vmul.f32 %v13368_v43, %v13368_v43  ;;  %v4163_v34 = vmul.f32 %v13371_v63, %v13371_v63 }
 0x8fb   : > { %5119 = vmatpush.bf16.msrb.mxu1 %v9136_v59  ;;  %v10752_v59 = vld [vmem:[%s13303_s5 + $0x274] sm:$0xf] }
 0x8fc   : > { %v4168_v27 = vadd.f32 %v4162_v7, %v4161_v6  ;;  %v9617_v6 = vld [vmem:[%s13303_s5 + $0x438] sm:$0xf0]  ;;  %v9239_v7 = vld [vmem:[%s13303_s5 + $0x128] sm:$0xf]  ;;  %v9404_v51 = vor.u32 %v10752_v59, %v9401_v10  ;;  %v10684_v10 = vld [vmem:[%s13303_s5 + $0x4c] sm:$0xf0] }
 0x8fe   : > { %v4169_v8 = vadd.f32 %v4168_v27, %v4163_v34  ;;  %v9620_v34 = vor.u32 %v10806_v3, %v9617_v6  ;;  %v10714_v27 = vld [vmem:[%s13303_s5 + $0x13c] sm:$0xf0] }
 0x8ff   : > { %5120 = vmatpush.bf16.msrb.mxu1 %v9112_v9  ;;  %v9240_v15 = vor.u32 %v10714_v27, %v9239_v7  ;;  %v10746_v9 = vld [vmem:[%s13303_s5 + $0x244] sm:$0xf]  ;;  %v10728_v7 = vld [vmem:[%s13303_s5 + $0x1b4] sm:$0xf] }
 0x900   : > { %4170 = vadd.xlane.f32.xlu0 %v4169_v8  ;;  %v9431_v8 = vld [vmem:[%s13303_s5 + $0x2a8] sm:$0xf]  ;;  %5185 = vmatpush.bf16.msra.mxu2 %v9620_v34  ;;  %v9380_v12 = vor.u32 %v10746_v9, %v9377_v52  ;;  %v9305_v34 = vld [vmem:[%s13303_s5 + $0x1c8] sm:$0xf0]  ;;  %v10776_v27 = vld [vmem:[%s13303_s5 + $0x334] sm:$0xf] }
 0x901   : > { %v9432_v56 = vor.u32 %v10762_v37, %v9431_v8  ;;  %5199 = vmatpush.bf16.msrb.mxu3 %v9240_v15  ;;  %v9308_v37 = vor.u32 %v10728_v7, %v9305_v34  ;;  %v9497_v15 = vld [vmem:[%s13303_s5 + $0x348] sm:$0xf0] }
 0x902   : > { %v9500_v59 = vor.u32 %v10776_v27, %v9497_v15  ;;  %v9647_v27 = vld [vmem:[%s13303_s5 + $0x458] sm:$0xf] }
 0x903   : > { %5121 = vmatpush.bf16.msrb.mxu1 %v9088_v24  ;;  %5213 = vmatpush.bf16.msrb.mxu0 %v9432_v56  ;;  %v10740_v24 = vld [vmem:[%s13303_s5 + $0x214] sm:$0xf]  ;;  %v9119_v56 = vld [vmem:[%s13303_s5 + $0x38] sm:$0xf] }
 0x904   : > { %5186 = vmatpush.bf16.msra.mxu2 %v9596_v17  ;;  %v9356_v47 = vor.u32 %v10740_v24, %v9353_v36  ;;  %v9120_v48 = vor.u32 %v10684_v10, %v9119_v56  ;;  %v9281_v17 = vld [vmem:[%s13303_s5 + $0x198] sm:$0xf0] }
 0x905   : > { %5200 = vmatpush.bf16.msrb.mxu3 %v9216_v25  ;;  %v10770_v25 = vld [vmem:[%s13303_s5 + $0x304] sm:$0xf]  ;;  %v9284_v9 = vor.u32 %v10722_v45, %v9281_v17  ;;  %v10717_v56 = vld [vmem:[%s13303_s5 + $0x15c] sm:$0xf] }
 0x906   : > { %v9476_v52 = vor.u32 %v10770_v25, %v9473_v4 }
 0x907   : > { %5170 = vmatpush.bf16.msra.mxu1 %v9452_v60  ;;  %5214 = vmatpush.bf16.msrb.mxu0 %v9408_v1  ;;  %v9329_v60 = vld [vmem:[%s13303_s5 + $0x1f8] sm:$0xf0]  ;;  %v10678_v1 = vld [vmem:[%s13303_s5 + $0x1c] sm:$0xf0] }
 0x908   : > { %5187 = vmatpush.bf16.msra.mxu2 %v9572_v35  ;;  %v9332_v61 = vor.u32 %v10734_v57, %v9329_v60  ;;  %v9096_v0 = vor.u32 %v10678_v1, %v9095_v2  ;;  %v9623_v1 = vld [vmem:[%s13303_s5 + $0x428] sm:$0xf] }
 0x909   : > { %5201 = vmatpush.bf16.msrb.mxu3 %v9192_v55 }
 0x90b   : > { %5171 = vmatpush.bf16.msra.mxu1 %v9428_v18  ;;  %5215 = vmatpush.bf16.msrb.mxu0 %v9384_v32  ;;  %v10738_v18 = vld [vmem:[%s13303_s5 + $0x1fc] sm:$0xf0] }
 0x90c   : > { %5188 = vmatpush.bf16.msra.mxu2 %v9548_v22  ;;  %v9336_v6 = vor.u32 %v10738_v18, %v9335_v11 }
 0x90d   : > { %5202 = vmatpush.bf16.msrb.mxu3 %v9168_v50 }
 0x90f   : > { %5172 = vmatpush.bf16.msra.mxu1 %v9404_v51  ;;  %5216 = vmatpush.bf16.msrb.mxu0 %v9360_v41  ;;  %v10732_v51 = vld [vmem:[%s13303_s5 + $0x1cc] sm:$0xf0]  ;;  %v4134_v41 = vld [vmem:[%s4133_s26] sm:$0x7] }
 0x910   : > { %5189 = vmatpush.bf16.msra.mxu2 %v9524_v54  ;;  %v9312_v21 = vor.u32 %v10732_v51, %v9311_v16  ;;  %v4216_v19 = vperm.slane %v4134_v41, 0  ;;  %v4218_v54 = vperm.slane %v4134_v41, 2  ;;  %v9457_v51 = vld [vmem:[%s13303_s5 + $0x2f0] sm:$0xf0] }
 0x911   : > { %5203 = vmatpush.bf16.msrb.mxu3 %v9144_v42 }
 0x913   : > { %5173 = vmatpush.bf16.msra.mxu1 %v9380_v12  ;;  %5217 = vmatpush.bf16.msrb.mxu0 %v9336_v6  ;;  %v10726_v12 = vld [vmem:[%s13303_s5 + $0x19c] sm:$0xf0] }
 0x914   : > { %5190 = vmatpush.bf16.msra.mxu2 %v9500_v59  ;;  %v9288_v35 = vor.u32 %v10726_v12, %v9287_v39  ;;  %v10765_v59 = vld [vmem:[%s13303_s5 + $0x2dc] sm:$0xf]  ;;  %v10711_v12 = vld [vmem:[%s13303_s5 + $0x12c] sm:$0xf] }
 0x915   : > { %5204 = vmatpush.bf16.msrb.mxu3 %v9120_v48  ;;  %v10813_v48 = vld [vmem:[%s13303_s5 + $0x45c] sm:$0xf] }
 0x917   : > { %5174 = vmatpush.bf16.msra.mxu1 %v9356_v47  ;;  %5218 = vmatpush.bf16.msrb.mxu0 %v9312_v21  ;;  %v9649_v21 = vld [vmem:[%s13303_s5 + $0x470] sm:$0xf0] }
 0x918   : > { %5191 = vmatpush.bf16.msra.mxu2 %v9476_v52  ;;  %v9460_v52 = vor.u32 %v10765_v59, %v9457_v51  ;;  %v9652_v39 = vor.u32 %v10813_v48, %v9649_v21  ;;  %v9527_v59 = vld [vmem:[%s13303_s5 + $0x368] sm:$0xf]  ;;  %v10786_v51 = vld [vmem:[%s13303_s5 + $0x37c] sm:$0xf0] }
 0x919   : > { %5205 = vmatpush.bf16.msrb.mxu3 %v9096_v0  ;;  %v10759_v0 = vld [vmem:[%s13303_s5 + $0x2ac] sm:$0xf] }
 0x91b   : > { %5175 = vmatpush.bf16.msra.mxu1 %v9332_v61  ;;  %5219 = vmatpush.bf16.msrb.mxu0 %v9288_v35  ;;  %v4205_v61 = vperm.slane %v4132_v44, 2  ;;  %v10807_v35 = vld [vmem:[%s13303_s5 + $0x42c] sm:$0xf]  ;;  %v10753_v44 = vld [vmem:[%s13303_s5 + $0x27c] sm:$0xf] }
 0x91f   : > { %5176 = vmatpush.bf16.msra.mxu1 %v9308_v37 }
 0x923   : > { %5177 = vmatpush.bf16.msra.mxu1 %v9284_v9  ;;  %v10810_v9 = vld [vmem:[%s13303_s5 + $0x43c] sm:$0xf0] }
 0x96b   : > { %v4167_v58 = vpop.xlane.xlu2 %4166 }
 0x96c   : > { %v4172_v3 = vmul.f32 %v4167_v58, %v13337_v33  ;;  %v4217_v58 = vperm.slane %v4134_v41, 1  ;;  %v9575_v41 = vld [vmem:[%s13303_s5 + $0x3c8] sm:$0xf] }
 0x96e   : > { %v4174_v8 = vadd.f32 1e-12, %v4172_v3 }
 0x970   : > { %11305 = vrsqrt.f32 %v4174_v8  ;;  %vm4182_vm12 = vweird.f32 %v4174_v8 }
 0x973   : > { %v4171_v26 = vpop.xlane.xlu0 %4170 }
 0x974   : > { %v4173_v23 = vmul.f32 %v4171_v26, %v13337_v33  ;;  %v9241_v26 = vld [vmem:[%s13303_s5 + $0x140] sm:$0xf0] }
 0x976   : > { %v11306_v55 = vpop.eup %11305  ;;  %v4175_v29 = vadd.f32 1e-12, %v4173_v23  ;;  %v9433_v23 = vld [vmem:[%s13303_s5 + $0x2c0] sm:$0xf0] }
 0x977   : > { %v4177_v30 = vmul.f32 %v11306_v55, %v4174_v8  ;;  %vm4183_vm11 = vweird.f32 %v11306_v55  ;;  %v10816_v8 = vld [vmem:[%s13303_s5 + $0x46c] sm:$0xf0] }
 0x978   : > { %11307 = vrsqrt.f32 %v4175_v29  ;;  %vm4184_vm13 = vmor %vm4182_vm12, %vm4183_vm11  ;;  %vm4192_vm15 = vweird.f32 %v4175_v29  ;;  %v9648_v45 = vor.u32 %v10816_v8, %v9647_v27  ;;  %v10789_v27 = vld [vmem:[%s13303_s5 + $0x39c] sm:$0xf]  ;;  %v9553_v8 = vld [vmem:[%s13303_s5 + $0x3b0] sm:$0xf0] }
 0x979   : > { %v4178_v32 = vmul.f32 %v11306_v55, %v4177_v30  ;;  %v9244_v30 = vor.u32 %v10711_v12, %v9241_v26  ;;  %v9556_v21 = vor.u32 %v10789_v27, %v9553_v8  ;;  %v9528_v12 = vor.u32 %v10786_v51, %v9527_v59  ;;  %v9631_v59 = vld [vmem:[%s13303_s5 + $0x430] sm:$0xf]  ;;  %v10811_v51 = vld [vmem:[%s13303_s5 + $0x444] sm:$0xf0] }
 0x97b   : > { %v4179_v24 = vmul.f32 0.5, %v4178_v32  ;;  %v9599_v32 = vld [vmem:[%s13303_s5 + $0x3f8] sm:$0xf] }
 0x97d   : > { %v4180_v36 = vsub.f32 1.5, %v4179_v24  ;;  %v10804_v24 = vld [vmem:[%s13303_s5 + $0x40c] sm:$0xf0] }
 0x97e   : > { %v11308_v28 = vpop.eup %11307 }
 0x97f   : > { %v4181_v47 = vmul.f32 %v11306_v55, %v4180_v36  ;;  %v4187_v38 = vmul.f32 %v11308_v28, %v4175_v29  ;;  %vm4193_vm14 = vweird.f32 %v11308_v28  ;;  %v9624_v29 = vor.u32 %v10810_v9, %v9623_v1  ;;  %v10735_v1 = vld [vmem:[%s13303_s5 + $0x1ec] sm:$0xf]  ;;  %v9337_v9 = vld [vmem:[%s13303_s5 + $0x200] sm:$0xf0] }
 0x980   : > { %vm4194_vm0 = vmor %vm4192_vm15, %vm4193_vm14  ;;  %v9436_v36 = vor.u32 %v10759_v0, %v9433_v23  ;;  %v9503_v0 = vld [vmem:[%s13303_s5 + $0x338] sm:$0xf]  ;;  %v10780_v23 = vld [vmem:[%s13303_s5 + $0x34c] sm:$0xf0] }
 0x981   : > { %v4188_v20 = vmul.f32 %v11308_v28, %v4187_v38  ;;  %v4185_v22 = vsel %vm4184_vm13, %v11306_v55, %v4181_v47  ;;  %v9625_v55 = vld [vmem:[%s13303_s5 + $0x440] sm:$0xf0]  ;;  %v10705_v47 = vld [vmem:[%s13303_s5 + $0xfc] sm:$0xf]  ;;  %v9217_v38 = vld [vmem:[%s13303_s5 + $0x110] sm:$0xf0] }
 0x982   : > { %v4196_v57 = vmul.f32 %v4185_v22, %v13349_v62  ;;  %v4197_v60 = vmul.f32 %v4185_v22, %v13352_v46  ;;  %v4198_v40 = vmul.f32 %v4185_v22, %v13355_v14  ;;  %v10801_v22 = vld [vmem:[%s13303_s5 + $0x3fc] sm:$0xf] }
 0x983   : > { %v4189_v50 = vmul.f32 0.5, %v4188_v20  ;;  %v9409_v20 = vld [vmem:[%s13303_s5 + $0x290] sm:$0xf0] }
 0x984   : > { %v4209_v42 = vmul.f32 %v4203_v49, %v4196_v57  ;;  %v4210_v62 = vmul.f32 %v4204_v53, %v4197_v60  ;;  %v4211_v46 = vmul.f32 %v4205_v61, %v4198_v40  ;;  %v10798_v57 = vld [vmem:[%s13303_s5 + $0x3dc] sm:$0xf0]  ;;  %v9412_v60 = vor.u32 %v10753_v44, %v9409_v20  ;;  %v9193_v40 = vld [vmem:[%s13303_s5 + $0xe0] sm:$0xf0] }
 0x985   : > { %v4190_v31 = vsub.f32 1.5, %v4189_v50  ;;  %v9601_v50 = vld [vmem:[%s13303_s5 + $0x410] sm:$0xf0]  ;;  %v10774_v20 = vld [vmem:[%s13303_s5 + $0x31c] sm:$0xf0] }
 0x986   : > { %v13479_v37 = vadd.f32 %v4216_v19, %v4209_v42  ;;  %v13481_v15 = vadd.f32 %v4217_v58, %v4210_v62  ;;  %v9576_v42 = vor.u32 %v10798_v57, %v9575_v41  ;;  %v10723_v41 = vld [vmem:[%s13303_s5 + $0x18c] sm:$0xf]  ;;  %v9289_v57 = vld [vmem:[%s13303_s5 + $0x1a0] sm:$0xf0] }
 0x987   : > { %v4191_v13 = vmul.f32 %v11308_v28, %v4190_v31  ;;  %v9604_v31 = vor.u32 %v10801_v22, %v9601_v50  ;;  %v10675_v22 = vld [vmem:[%s13303_s5 + $0xc] sm:$0xf]  ;;  %v9097_v50 = vld [vmem:[%s13303_s5 + $0x20] sm:$0xf0] }
 0x989   : > { %v4195_v11 = vsel %vm4194_vm0, %v11308_v28, %v4191_v13  ;;  %v9628_v28 = vor.u32 %v10807_v35, %v9625_v55  ;;  %v10747_v13 = vld [vmem:[%s13303_s5 + $0x24c] sm:$0xf]  ;;  %v9340_v35 = vor.u32 %v10735_v1, %v9337_v9  ;;  %v9223_v1 = vld [vmem:[%s13303_s5 + $0x100] sm:$0xf]  ;;  %v10709_v9 = vld [vmem:[%s13303_s5 + $0x114] sm:$0xf0] }
 0x98a   : > { %v4199_v18 = vmul.f32 %v4195_v11, %v13365_v5  ;;  %v4200_v3 = vmul.f32 %v4195_v11, %v13368_v43  ;;  %v4201_v14 = vmul.f32 %v4195_v11, %v13371_v63  ;;  %v9265_v5 = vld [vmem:[%s13303_s5 + $0x170] sm:$0xf0]  ;;  %v13486_v43 = vadd.f32 %v4218_v54, %v4211_v46  ;;  %v9551_v11 = vld [vmem:[%s13303_s5 + $0x398] sm:$0xf]  ;;  %v10792_v46 = vld [vmem:[%s13303_s5 + $0x3ac] sm:$0xf0] }
 0x98b   : > { %v9268_v2 = vor.u32 %v10717_v56, %v9265_v5  ;;  %v9552_v56 = vor.u32 %v10792_v46, %v9551_v11  ;;  %v10718_v11 = vld [vmem:[%s13303_s5 + $0x164] sm:$0xf]  ;;  %v9273_v46 = vld [vmem:[%s13303_s5 + $0x178] sm:$0xf0] }
 0x98c   : > { %v4212_v6 = vmul.f32 %v4203_v49, %v4199_v18  ;;  %v4213_v7 = vmul.f32 %v4204_v53, %v4200_v3  ;;  %v4214_v34 = vmul.f32 %v4205_v61, %v4201_v14  ;;  %v9600_v49 = vor.u32 %v10804_v24, %v9599_v32  ;;  %v10699_v61 = vld [vmem:[%s13303_s5 + $0xcc] sm:$0xf]  ;;  %v10693_v14 = vld [vmem:[%s13303_s5 + $0x9c] sm:$0xf]  ;;  %v9313_v24 = vld [vmem:[%s13303_s5 + $0x1d0] sm:$0xf0] }
 0x98d   : > { %v9220_v53 = vor.u32 %v10705_v47, %v9217_v38  ;;  %v9196_v62 = vor.u32 %v10699_v61, %v9193_v40  ;;  %v10729_v32 = vld [vmem:[%s13303_s5 + $0x1bc] sm:$0xf]  ;;  %v9479_v47 = vld [vmem:[%s13303_s5 + $0x308] sm:$0xf]  ;;  %v9504_v38 = vor.u32 %v10780_v23, %v9503_v0  ;;  %v9271_v61 = vld [vmem:[%s13303_s5 + $0x160] sm:$0xf]  ;;  %v9276_v8 = vor.u32 %v10718_v11, %v9273_v46 }
 0x98e   : > { %v13488_v63 = vadd.f32 %v4216_v19, %v4212_v6  ;;  %v13490_v10 = vadd.f32 %v4217_v58, %v4213_v7  ;;  %v13492_v16 = vadd.f32 %v4218_v54, %v4214_v34  ;;  %v9385_v19 = vld [vmem:[%s13303_s5 + $0x260] sm:$0xf0]  ;;  %v10795_v58 = vld [vmem:[%s13303_s5 + $0x3cc] sm:$0xf]  ;;  %v9169_v6 = vld [vmem:[%s13303_s5 + $0xb0] sm:$0xf0] }
 0x98f   : > { %v9577_v54 = vld [vmem:[%s13303_s5 + $0x3e0] sm:$0xf0]  ;;  %v9388_v18 = vor.u32 %v10747_v13, %v9385_v19  ;;  %v10741_v7 = vld [vmem:[%s13303_s5 + $0x21c] sm:$0xf]  ;;  %v9361_v34 = vld [vmem:[%s13303_s5 + $0x230] sm:$0xf0]  ;;  %v9172_v5 = vor.u32 %v10693_v14, %v9169_v6 }
 0x990   : > { %v13499_v17 = vpack.c.bf16 %v13488_v63, %v13479_v37  ;;  %v13503_v25 = vpack.c.bf16 %v13490_v10, %v13481_v15  ;;  %v13507_v4 = vpack.c.bf16 %v13492_v16, %v13486_v43  ;;  %v9580_v3 = vor.u32 %v10795_v58, %v9577_v54  ;;  %v10721_v40 = vld [vmem:[%s13303_s5 + $0x174] sm:$0xf0]  ;;  %v9463_v13 = vld [vmem:[%s13303_s5 + $0x2e0] sm:$0xf]  ;;  %v9151_v11 = vld [vmem:[%s13303_s5 + $0x70] sm:$0xf] }
 0x991   : > { %v9364_v48 = vor.u32 %v10741_v7, %v9361_v34  ;;  %v10769_v19 = vld [vmem:[%s13303_s5 + $0x2f4] sm:$0xf0]  ;;  %v9655_v58 = vld [vmem:[%s13303_s5 + $0x460] sm:$0xf]  ;;  %v9480_v54 = vor.u32 %v10774_v20, %v9479_v47  ;;  %v9272_v14 = vor.u32 %v10721_v40, %v9271_v61  ;;  %v9247_v7 = vld [vmem:[%s13303_s5 + $0x130] sm:$0xf] }
 0x992   : > { %5122 = vmatmul.bf16.vlgmr.msrb.gmra.mxu1 %v13499_v17  ;;  %5136 = vmatmul.bf16.vlgmr.msrb.gmra.mxu2 %v13503_v25  ;;  %v9464_v6 = vor.u32 %v10769_v19, %v9463_v13  ;;  %v10715_v34 = vld [vmem:[%s13303_s5 + $0x144] sm:$0xf0]  ;;  %v9607_v0 = vld [vmem:[%s13303_s5 + $0x400] sm:$0xf]  ;;  %v10805_v23 = vld [vmem:[%s13303_s5 + $0x414] sm:$0xf0] }
 0x993   : > { %5150 = vmatmul.bf16.vlgmr.msra.gmra.mxu3 %v13507_v4  ;;  %5164 = vmatmul.bf16.vlgmr.msra.gmra.mxu0 %v13499_v17  ;;  %v9391_v47 = vld [vmem:[%s13303_s5 + $0x250] sm:$0xf]  ;;  %v10799_v20 = vld [vmem:[%s13303_s5 + $0x3e4] sm:$0xf0]  ;;  %v9367_v61 = vld [vmem:[%s13303_s5 + $0x220] sm:$0xf] }
 0x994   : > { %5226 = vmatpush.bf16.msrb.mxu1 %v9648_v45  ;;  %5240 = vmatpush.bf16.msrb.mxu2 %v9268_v2  ;;  %v10687_v45 = vld [vmem:[%s13303_s5 + $0x6c] sm:$0xf]  ;;  %v9145_v2 = vld [vmem:[%s13303_s5 + $0x80] sm:$0xf0]  ;;  %v10745_v40 = vld [vmem:[%s13303_s5 + $0x234] sm:$0xf0] }
 0x995   : > { %5254 = vmatpush.bf16.msra.mxu3 %v9460_v52  ;;  %5268 = vmatpush.bf16.msra.mxu0 %v9652_v39  ;;  %v10783_v52 = vld [vmem:[%s13303_s5 + $0x36c] sm:$0xf]  ;;  %v9529_v39 = vld [vmem:[%s13303_s5 + $0x380] sm:$0xf0]  ;;  %v9148_v26 = vor.u32 %v10687_v45, %v9145_v2  ;;  %v9248_v45 = vor.u32 %v10715_v34, %v9247_v7  ;;  %v9559_v13 = vld [vmem:[%s13303_s5 + $0x3a0] sm:$0xf] }
 0x996   : > { %v9532_v55 = vor.u32 %v10783_v52, %v9529_v39  ;;  %v9632_v52 = vor.u32 %v10811_v51, %v9631_v59  ;;  %v10793_v19 = vld [vmem:[%s13303_s5 + $0x3b4] sm:$0xf0]  ;;  %v10691_v46 = vld [vmem:[%s13303_s5 + $0x84] sm:$0xf0]  ;;  %v9535_v7 = vld [vmem:[%s13303_s5 + $0x370] sm:$0xf] }
 0x997   : > { %v10787_v34 = vld [vmem:[%s13303_s5 + $0x384] sm:$0xf0]  ;;  %v9127_v59 = vld [vmem:[%s13303_s5 + $0x40] sm:$0xf]  ;;  %v10685_v51 = vld [vmem:[%s13303_s5 + $0x54] sm:$0xf0] }
 0x998   : > { %5227 = vmatpush.bf16.msrb.mxu1 %v9624_v29  ;;  %5241 = vmatpush.bf16.msrb.mxu2 %v9244_v30  ;;  %v10681_v29 = vld [vmem:[%s13303_s5 + $0x3c] sm:$0xf]  ;;  %v9121_v30 = vld [vmem:[%s13303_s5 + $0x50] sm:$0xf0] }
 0x999   : > { %5255 = vmatpush.bf16.msra.mxu3 %v9436_v36  ;;  %5269 = vmatpush.bf16.msra.mxu0 %v9628_v28  ;;  %v10777_v36 = vld [vmem:[%s13303_s5 + $0x33c] sm:$0xf]  ;;  %v9505_v28 = vld [vmem:[%s13303_s5 + $0x350] sm:$0xf0]  ;;  %v9124_v44 = vor.u32 %v10681_v29, %v9121_v30  ;;  %v9224_v29 = vor.u32 %v10709_v9, %v9223_v1  ;;  %v9511_v1 = vld [vmem:[%s13303_s5 + $0x340] sm:$0xf] }
 0x99a   : > { %v10781_v9 = vld [vmem:[%s13303_s5 + $0x354] sm:$0xf0] }
 0x99c   : > { %5228 = vmatpush.bf16.msrb.mxu1 %v9600_v49  ;;  %5242 = vmatpush.bf16.msrb.mxu2 %v9220_v53  ;;  %v9316_v49 = vor.u32 %v10729_v32, %v9313_v24  ;;  %v9508_v53 = vor.u32 %v10777_v36, %v9505_v28  ;;  %v9199_v32 = vld [vmem:[%s13303_s5 + $0xd0] sm:$0xf]  ;;  %v10703_v24 = vld [vmem:[%s13303_s5 + $0xe4] sm:$0xf0]  ;;  %v9608_v36 = vor.u32 %v10805_v23, %v9607_v0 }
 0x99d   : > { %5256 = vmatpush.bf16.msra.mxu3 %v9412_v60  ;;  %5270 = vmatpush.bf16.msra.mxu0 %v9604_v31  ;;  %v10771_v60 = vld [vmem:[%s13303_s5 + $0x30c] sm:$0xf]  ;;  %v9481_v31 = vld [vmem:[%s13303_s5 + $0x320] sm:$0xf0]  ;;  %v9103_v0 = vld [vmem:[%s13303_s5 + $0x10] sm:$0xf] }
 0x99e   : > { %v10679_v23 = vld [vmem:[%s13303_s5 + $0x24] sm:$0xf0] }
 0x9a0   : > { %5229 = vmatpush.bf16.msrb.mxu1 %v9576_v42  ;;  %5243 = vmatpush.bf16.msrb.mxu2 %v9196_v62  ;;  %v9100_v42 = vor.u32 %v10675_v22, %v9097_v50  ;;  %v10817_v62 = vld [vmem:[%s13303_s5 + $0x474] sm:$0xf0]  ;;  %v10700_v22 = vld [vmem:[%s13303_s5 + $0xd4] sm:$0xf]  ;;  %v9201_v50 = vld [vmem:[%s13303_s5 + $0xe8] sm:$0xf0] }
 0x9a1   : > { %5257 = vmatpush.bf16.msra.mxu3 %v9388_v18  ;;  %5271 = vmatpush.bf16.msra.mxu0 %v9580_v3  ;;  %v9292_v18 = vor.u32 %v10723_v41, %v9289_v57  ;;  %v9484_v3 = vor.u32 %v10771_v60, %v9481_v31  ;;  %v9656_v27 = vor.u32 %v10817_v62, %v9655_v58  ;;  %v9175_v41 = vld [vmem:[%s13303_s5 + $0xa0] sm:$0xf]  ;;  %v10697_v57 = vld [vmem:[%s13303_s5 + $0xb4] sm:$0xf0]  ;;  %v10694_v58 = vld [vmem:[%s13303_s5 + $0xa4] sm:$0xf] }
 0x9a2   : > { %5178 = vmatmul.bf16.vlgmr.msra.gmra.mxu1 %v13503_v25  ;;  %5192 = vmatmul.bf16.vlgmr.msra.gmra.mxu2 %v13507_v4  ;;  %v9204_v31 = vor.u32 %v10700_v22, %v9201_v50  ;;  %v9368_v62 = vor.u32 %v10745_v40, %v9367_v61  ;;  %v9104_v22 = vor.u32 %v10679_v23, %v9103_v0  ;;  %v10808_v61 = vld [vmem:[%s13303_s5 + $0x434] sm:$0xf]  ;;  %v9633_v40 = vld [vmem:[%s13303_s5 + $0x448] sm:$0xf0] }
 0x9a3   : > { %5206 = vmatmul.bf16.vlgmr.msrb.gmra.mxu3 %v13499_v17  ;;  %5220 = vmatmul.bf16.vlgmr.msrb.gmra.mxu0 %v13503_v25  ;;  %v10724_v23 = vld [vmem:[%s13303_s5 + $0x194] sm:$0xf] }
 0x9a4   : > { %5230 = vmatpush.bf16.msrb.mxu1 %v9552_v56  ;;  %5244 = vmatpush.bf16.msrb.mxu2 %v9172_v5  ;;  %v9439_v56 = vld [vmem:[%s13303_s5 + $0x2b0] sm:$0xf]  ;;  %v10763_v5 = vld [vmem:[%s13303_s5 + $0x2c4] sm:$0xf0] }
 0x9a5   : > { %5258 = vmatpush.bf16.msra.mxu3 %v9364_v48  ;;  %5272 = vmatpush.bf16.msra.mxu0 %v9556_v21  ;;  %v10712_v48 = vld [vmem:[%s13303_s5 + $0x134] sm:$0xf]  ;;  %v9249_v21 = vld [vmem:[%s13303_s5 + $0x148] sm:$0xf0]  ;;  %v9440_v2 = vor.u32 %v10763_v5, %v9439_v56  ;;  %v9152_v56 = vor.u32 %v10691_v46, %v9151_v11 }
 0x9a6   : > { %v9252_v39 = vor.u32 %v10712_v48, %v9249_v21  ;;  %v9536_v48 = vor.u32 %v10787_v34, %v9535_v7 }
 0x9a8   : > { %5231 = vmatpush.bf16.msrb.mxu1 %v9528_v12  ;;  %5245 = vmatpush.bf16.msrb.mxu2 %v9148_v26  ;;  %v9415_v12 = vld [vmem:[%s13303_s5 + $0x280] sm:$0xf]  ;;  %v10757_v26 = vld [vmem:[%s13303_s5 + $0x294] sm:$0xf0] }
 0x9a9   : > { %5259 = vmatpush.bf16.msra.mxu3 %v9340_v35  ;;  %5273 = vmatpush.bf16.msra.mxu0 %v9532_v55  ;;  %v10706_v35 = vld [vmem:[%s13303_s5 + $0x104] sm:$0xf]  ;;  %v9225_v55 = vld [vmem:[%s13303_s5 + $0x118] sm:$0xf0]  ;;  %v9416_v30 = vor.u32 %v10757_v26, %v9415_v12  ;;  %v9128_v12 = vor.u32 %v10685_v51, %v9127_v59  ;;  %v10736_v51 = vld [vmem:[%s13303_s5 + $0x1f4] sm:$0xf] }
 0x9aa   : > { %v9228_v28 = vor.u32 %v10706_v35, %v9225_v55  ;;  %v9295_v35 = vld [vmem:[%s13303_s5 + $0x190] sm:$0xf]  ;;  %v9512_v55 = vor.u32 %v10781_v9, %v9511_v1  ;;  %v10730_v9 = vld [vmem:[%s13303_s5 + $0x1c4] sm:$0xf] }
 0x9ac   : > { %5232 = vmatpush.bf16.msrb.mxu1 %v9504_v38  ;;  %5246 = vmatpush.bf16.msrb.mxu2 %v9124_v44  ;;  %v10751_v38 = vld [vmem:[%s13303_s5 + $0x264] sm:$0xf0]  ;;  %v9583_v44 = vld [vmem:[%s13303_s5 + $0x3d0] sm:$0xf] }
 0x9ad   : > { %5260 = vmatpush.bf16.msra.mxu3 %v9316_v49  ;;  %5274 = vmatpush.bf16.msra.mxu0 %v9508_v53  ;;  %v9200_v49 = vor.u32 %v10703_v24, %v9199_v32  ;;  %v9392_v53 = vor.u32 %v10751_v38, %v9391_v47  ;;  %v9584_v60 = vor.u32 %v10799_v20, %v9583_v44  ;;  %v9487_v32 = vld [vmem:[%s13303_s5 + $0x310] sm:$0xf]  ;;  %v10775_v24 = vld [vmem:[%s13303_s5 + $0x324] sm:$0xf0]  ;;  %v10766_v47 = vld [vmem:[%s13303_s5 + $0x2e4] sm:$0xf] }
 0x9ae   : > { %v9465_v38 = vld [vmem:[%s13303_s5 + $0x2f8] sm:$0xf0]  ;;  %v10814_v44 = vld [vmem:[%s13303_s5 + $0x464] sm:$0xf] }
 0x9af   : > { %v9657_v20 = vld [vmem:[%s13303_s5 + $0x478] sm:$0xf0] }
 0x9b0   : > { %5233 = vmatpush.bf16.msrb.mxu1 %v9480_v54  ;;  %5247 = vmatpush.bf16.msrb.mxu2 %v9100_v42  ;;  %v9177_v54 = vld [vmem:[%s13303_s5 + $0xb8] sm:$0xf0]  ;;  %v9176_v42 = vor.u32 %v10697_v57, %v9175_v41  ;;  %v9468_v41 = vor.u32 %v10766_v47, %v9465_v38  ;;  %v9660_v57 = vor.u32 %v10814_v44, %v9657_v20  ;;  %v13680_v38 = vld [vmem:[%s4379_s7] sm:$0x3f] }
 0x9b1   : > { %5261 = vmatpush.bf16.msra.mxu3 %v9292_v18  ;;  %5275 = vmatpush.bf16.msra.mxu0 %v9484_v3  ;;  %v9560_v18 = vor.u32 %v10793_v19, %v9559_v13  ;;  %v9180_v3 = vor.u32 %v10694_v58, %v9177_v54  ;;  %v9636_v19 = vor.u32 %v10808_v61, %v9633_v40  ;;  %v10754_v58 = vld [vmem:[%s13303_s5 + $0x284] sm:$0xf]  ;;  %v9417_v54 = vld [vmem:[%s13303_s5 + $0x298] sm:$0xf0] }
 0x9b2   : > { %v9420_v11 = vor.u32 %v10754_v58, %v9417_v54  ;;  %v4383_v58 = vperm.slane %v13680_v38, 1 }
 0x9b3   : > { %5234 = vmatmul.bf16.vlgmr.msrb.gmra.mxu1 %v13507_v4  ;;  %5248 = vmatmul.bf16.vlgmr.msrb.gmra.mxu2 %v13499_v17 }
 0x9b4   : > { %5282 = vmatpush.bf16.msra.mxu1 %v9272_v14  ;;  %5296 = vmatpush.bf16.msra.mxu2 %v9464_v6  ;;  %v9343_v14 = vld [vmem:[%s13303_s5 + $0x1f0] sm:$0xf]  ;;  %v10739_v6 = vld [vmem:[%s13303_s5 + $0x204] sm:$0xf0] }
 0x9b5   : > { %5310 = vmatpush.bf16.msrb.mxu3 %v9656_v27  ;;  %5324 = vmatpush.bf16.msrb.mxu0 %v9276_v8  ;;  %v10688_v27 = vld [vmem:[%s13303_s5 + $0x74] sm:$0xf]  ;;  %v9153_v8 = vld [vmem:[%s13303_s5 + $0x88] sm:$0xf0]  ;;  %v9344_v5 = vor.u32 %v10739_v6, %v9343_v14 }
 0x9b6   : > { %5262 = vmatmul.bf16.vlgmr.msra.gmra.mxu3 %v13503_v25  ;;  %5276 = vmatmul.bf16.vlgmr.msra.gmra.mxu0 %v13507_v4  ;;  %v9156_v21 = vor.u32 %v10688_v27, %v9153_v8  ;;  %v10796_v14 = vld [vmem:[%s13303_s5 + $0x3d4] sm:$0xf]  ;;  %v9585_v6 = vld [vmem:[%s13303_s5 + $0x3e8] sm:$0xf0]  ;;  %v10742_v27 = vld [vmem:[%s13303_s5 + $0x224] sm:$0xf] }
 0x9b7   : > { %v9588_v34 = vor.u32 %v10796_v14, %v9585_v6  ;;  %v10790_v8 = vld [vmem:[%s13303_s5 + $0x3a4] sm:$0xf] }
 0x9b8   : > { %5283 = vmatpush.bf16.msra.mxu1 %v9248_v45  ;;  %5297 = vmatpush.bf16.msra.mxu2 %v9440_v2  ;;  %v9319_v45 = vld [vmem:[%s13303_s5 + $0x1c0] sm:$0xf]  ;;  %v10733_v2 = vld [vmem:[%s13303_s5 + $0x1d4] sm:$0xf0] }
 0x9b9   : > { %5311 = vmatpush.bf16.msrb.mxu3 %v9632_v52  ;;  %5325 = vmatpush.bf16.msrb.mxu0 %v9252_v39  ;;  %v10682_v52 = vld [vmem:[%s13303_s5 + $0x44] sm:$0xf]  ;;  %v9129_v39 = vld [vmem:[%s13303_s5 + $0x58] sm:$0xf0]  ;;  %v9320_v26 = vor.u32 %v10733_v2, %v9319_v45  ;;  %v9537_v45 = vld [vmem:[%s13303_s5 + $0x388] sm:$0xf0] }
 0x9bc   : > { %5284 = vmatpush.bf16.msra.mxu1 %v9224_v29  ;;  %5298 = vmatpush.bf16.msra.mxu2 %v9416_v30  ;;  %v9132_v29 = vor.u32 %v10682_v52, %v9129_v39  ;;  %v10727_v30 = vld [vmem:[%s13303_s5 + $0x1a4] sm:$0xf0]  ;;  %v9321_v52 = vld [vmem:[%s13303_s5 + $0x1d8] sm:$0xf0]  ;;  %v10778_v39 = vld [vmem:[%s13303_s5 + $0x344] sm:$0xf] }
 0x9bd   : > { %5312 = vmatpush.bf16.msrb.mxu3 %v9608_v36  ;;  %5326 = vmatpush.bf16.msrb.mxu0 %v9228_v28  ;;  %v10676_v36 = vld [vmem:[%s13303_s5 + $0x14] sm:$0xf]  ;;  %v9105_v28 = vld [vmem:[%s13303_s5 + $0x28] sm:$0xf0]  ;;  %v9296_v50 = vor.u32 %v10727_v30, %v9295_v35 }
 0x9be   : > { %v9297_v35 = vld [vmem:[%s13303_s5 + $0x1a8] sm:$0xf0] }
 0x9bf   : > { %v9300_v30 = vor.u32 %v10724_v23, %v9297_v35  ;;  %v10889_v23 = vld [vmem:[%s13716_s6 + $0x230] sm:$0xf0] }
 0x9c0   : > { %5285 = vmatpush.bf16.msra.mxu1 %v9200_v49  ;;  %5299 = vmatpush.bf16.msra.mxu2 %v9392_v53  ;;  %v9488_v49 = vor.u32 %v10775_v24, %v9487_v32  ;;  %v9108_v53 = vor.u32 %v10676_v36, %v9105_v28  ;;  %v12085_v24 = vmov 1.4142135  }
 0x9c1   : > { %5313 = vmatpush.bf16.msrb.mxu3 %v9584_v60  ;;  %5327 = vmatpush.bf16.msrb.mxu0 %v9204_v31  ;;  %v10760_v60 = vld [vmem:[%s13303_s5 + $0x2b4] sm:$0xf]  ;;  %v9441_v31 = vld [vmem:[%s13303_s5 + $0x2c8] sm:$0xf0]  ;;  %11309 = vrcp.f32 %v12085_v24 }
 0x9c2   : > { %v9444_v13 = vor.u32 %v10760_v60, %v9441_v31 }
 0x9c4   : > { %5286 = vmatpush.bf16.msra.mxu1 %v9176_v42  ;;  %5300 = vmatpush.bf16.msra.mxu2 %v9368_v62  ;;  %v10802_v42 = vld [vmem:[%s13303_s5 + $0x404] sm:$0xf]  ;;  %v9609_v62 = vld [vmem:[%s13303_s5 + $0x418] sm:$0xf0] }
 0x9c5   : > { %5314 = vmatpush.bf16.msrb.mxu3 %v9560_v18  ;;  %5328 = vmatpush.bf16.msrb.mxu0 %v9180_v3  ;;  %v9612_v46 = vor.u32 %v10802_v42, %v9609_v62  ;;  %v10748_v18 = vld [vmem:[%s13303_s5 + $0x254] sm:$0xf]  ;;  %v9393_v3 = vld [vmem:[%s13303_s5 + $0x268] sm:$0xf0] }
 0x9c6   : > { %v9396_v7 = vor.u32 %v10748_v18, %v9393_v3 }
 0x9c7   : > { %v11310_v36 = vpop.eup %11309 }
 0x9c8   : > { %5287 = vmatpush.bf16.msra.mxu1 %v9152_v56  ;;  %5301 = vmatpush.bf16.msra.mxu2 %v9344_v5  ;;  %v9561_v56 = vld [vmem:[%s13303_s5 + $0x3b8] sm:$0xf0]  ;;  %v5379_v28 = vmul.f32 1.4142135, %v11310_v36  ;;  %vm5383_vm1 = vweird.f32 %v11310_v36 }
 0x9c9   : > { %5315 = vmatpush.bf16.msrb.mxu3 %v9536_v48  ;;  %5329 = vmatpush.bf16.msrb.mxu0 %v9156_v21  ;;  %v9564_v59 = vor.u32 %v10790_v8, %v9561_v56  ;;  %v9345_v48 = vld [vmem:[%s13303_s5 + $0x208] sm:$0xf0]  ;;  %v10784_v21 = vld [vmem:[%s13303_s5 + $0x374] sm:$0xf] }
 0x9ca   : > { %v9348_v2 = vor.u32 %v10736_v51, %v9345_v48  ;;  %v9540_v1 = vor.u32 %v10784_v21, %v9537_v45  ;;  %v5380_v47 = vsub.f32 1.0, %v5379_v28 }
 0x9cc   : > { %5288 = vmatpush.bf16.msra.mxu1 %v9128_v12  ;;  %5302 = vmatpush.bf16.msra.mxu2 %v9320_v26  ;;  %v9513_v12 = vld [vmem:[%s13303_s5 + $0x358] sm:$0xf0]  ;;  %v9324_v26 = vor.u32 %v10730_v9, %v9321_v52  ;;  %v5381_v20 = vmul.f32 %v11310_v36, %v5380_v47 }
 0x9cd   : > { %5316 = vmatpush.bf16.msrb.mxu3 %v9512_v55  ;;  %5330 = vmatpush.bf16.msrb.mxu0 %v9132_v29  ;;  %v9516_v0 = vor.u32 %v10778_v39, %v9513_v12  ;;  %v10772_v55 = vld [vmem:[%s13303_s5 + $0x314] sm:$0xf]  ;;  %v9489_v29 = vld [vmem:[%s13303_s5 + $0x328] sm:$0xf0]  ;;  %v9952_v12 = vld [vmem:[%s13716_s6 + $0x228] sm:$0xf] }
 0x9ce   : > { %v9492_v32 = vor.u32 %v10772_v55, %v9489_v29 }
 0x9d0   : > { %5289 = vmatpush.bf16.msra.mxu1 %v9104_v22  ;;  %5303 = vmatpush.bf16.msra.mxu2 %v9296_v50  ;;  %v4382_v22 = vperm.slane %v13680_v38, 0  ;;  %v5382_v50 = vadd.f32 %v11310_v36, %v5381_v20 }
 0x9d1   : > { %5317 = vmatpush.bf16.msrb.mxu3 %v9488_v49  ;;  %5331 = vmatpush.bf16.msrb.mxu0 %v9108_v53 }
 0x9d3   : > { %5290 = vmatmul.bf16.vlgmr.msra.gmra.mxu1 %v13499_v17  ;;  %5304 = vmatmul.bf16.vlgmr.msra.gmra.mxu2 %v13503_v25 }
 0x9d4   : > { %5338 = vmatpush.bf16.msrb.mxu1 %v9468_v41  ;;  %5352 = vmatpush.bf16.msrb.mxu2 %v9660_v57 }
 0x9d5   : > { %5318 = vmatmul.bf16.vlgmr.msrb.gmra.mxu3 %v13507_v4  ;;  %5332 = vmatmul.bf16.vlgmr.msrb.gmra.mxu0 %v13499_v17  ;;  %v9369_v17 = vld [vmem:[%s13303_s5 + $0x238] sm:$0xf0] }
 0x9d6   : > { %v9372_v5 = vor.u32 %v10742_v27, %v9369_v17 }
 0x9d8   : > { %5339 = vmatpush.bf16.msrb.mxu1 %v9444_v13  ;;  %5353 = vmatpush.bf16.msrb.mxu2 %v9636_v19 }
 0x9dc   : > { %5340 = vmatpush.bf16.msrb.mxu1 %v9420_v11  ;;  %5354 = vmatpush.bf16.msrb.mxu2 %v9612_v46 }
 0x9e0   : > { %5341 = vmatpush.bf16.msrb.mxu1 %v9396_v7  ;;  %5355 = vmatpush.bf16.msrb.mxu2 %v9588_v34 }
 0x9e4   : > { %5342 = vmatpush.bf16.msrb.mxu1 %v9372_v5  ;;  %5356 = vmatpush.bf16.msrb.mxu2 %v9564_v59 }
 0x9e8   : > { %5343 = vmatpush.bf16.msrb.mxu1 %v9348_v2  ;;  %5357 = vmatpush.bf16.msrb.mxu2 %v9540_v1 }
 0x9ec   : > { %5344 = vmatpush.bf16.msrb.mxu1 %v9324_v26  ;;  %5358 = vmatpush.bf16.msrb.mxu2 %v9516_v0  ;;  %v4384_v0 = vperm.slane %v13680_v38, 2 }
 0x9f0   : > { %5345 = vmatpush.bf16.msrb.mxu1 %v9300_v30  ;;  %5359 = vmatpush.bf16.msrb.mxu2 %v9492_v32  ;;  %v9953_v32 = vor.u32 %v10889_v23, %v9952_v12 }
 0x9f3   : > { %5346 = vmatmul.bf16.vlgmr.msrb.gmra.mxu1 %v13503_v25  ;;  %5360 = vmatmul.bf16.vlgmr.msrb.gmra.mxu2 %v13507_v4  ;;  %v13683_v4 = vsel %vm5383_vm1, %v11310_v36, %v5382_v50 }
 0x9f4   : > { %6906 = vmatpush.bf16.msra.mxu1 %v9953_v32 }
 0xa0f   : > { %v5123_v44 = vpop.f32.mrf.mxu1 }
 0xa10   : > { %v5124_v49 = vadd.f32 %v5123_v44, %v4382_v22  ;;  %v5165_v13 = vpop.f32.mrf.mxu0 }
 0xa11   : > { %v5166_v14 = vadd.f32 %v5165_v13, %v4383_v58 }
 0xa15   : > { %v5137_v53 = vpop.f32.mrf.mxu2 }
 0xa16   : > { %v5138_v25 = vadd.f32 %v5137_v53, %v5124_v49  ;;  %v5151_v41 = vpop.f32.mrf.mxu3 }
 0xa17   : > { %v5125_v57 = vpop.f32.mrf.mxu1 }
 0xa18   : > { %v13685_v60 = vadd.f32 %v5151_v41, %v5138_v25  ;;  %v5126_v40 = vadd.f32 %v5125_v57, %v4382_v22  ;;  %v5167_v45 = vpop.f32.mrf.mxu0 }
 0xa19   : > { %v5168_v55 = vadd.f32 %v5167_v45, %v4383_v58 }
 0xa1a   : > { %v13689_v31 = vmul.f32 %v13683_v4, %v13685_v60 }
 0xa1c   : > { %v5397_v61 = vmul.f32 %v13689_v31, %v13689_v31 }
 0xa1d   : > { %v5139_v19 = vpop.f32.mrf.mxu2 }
 0xa1e   : > { %v13694_v54 = vmin.f32 %v5397_v61, 16.0  ;;  %v5140_v42 = vadd.f32 %v5139_v19, %v5126_v40  ;;  %v5153_v62 = vpop.f32.mrf.mxu3 }
 0xa1f   : > { %v5179_v11 = vpop.f32.mrf.mxu1 }
 0xa20   : > { %v5399_v46 = vmul.f32 2.1237322e-06, %v13694_v54  ;;  %v5410_v18 = vmul.f32 3.8918573e-05, %v13694_v54  ;;  %v13698_v3 = vadd.f32 %v5153_v62, %v5140_v42  ;;  %v5180_v56 = vadd.f32 %v5179_v11, %v5166_v14  ;;  %v5221_v11 = vpop.f32.mrf.mxu0 }
 0xa22   : > { %v5400_v6 = vadd.f32 0.00028619796, %v5399_v46  ;;  %v5411_v7 = vadd.f32 0.001143296, %v5410_v18  ;;  %v13702_v34 = vmul.f32 %v13683_v4, %v13698_v3  ;;  %v13751_v45 = vmul.f32 0.5, %v13698_v3 }
 0xa24   : > { %v5401_v27 = vmul.f32 %v5400_v6, %v13694_v54  ;;  %v5412_v17 = vmul.f32 %v5411_v7, %v13694_v54  ;;  %v5637_v8 = vmul.f32 %v13702_v34, %v13702_v34 }
 0xa25   : > { %v5193_v5 = vpop.f32.mrf.mxu2 }
 0xa26   : > { %v5402_v59 = vadd.f32 0.0036580483, %v5401_v27  ;;  %v5413_v51 = vadd.f32 0.014752088, %v5412_v17  ;;  %v13708_v48 = vmin.f32 %v5637_v8, 16.0  ;;  %v5194_v21 = vadd.f32 %v5193_v5, %v5180_v56  ;;  %v5207_v30 = vpop.f32.mrf.mxu3 }
 0xa27   : > { %v5181_v2 = vpop.f32.mrf.mxu1  ;;  %v5208_v41 = vadd.f32 %v5207_v30, %v4384_v0 }
 0xa28   : > { %v5403_v1 = vmul.f32 %v5402_v59, %v13694_v54  ;;  %v5414_v9 = vmul.f32 %v5413_v51, %v13694_v54  ;;  %v5639_v52 = vmul.f32 2.1237322e-06, %v13708_v48  ;;  %v5650_v39 = vmul.f32 3.8918573e-05, %v13708_v48 }
 0xa29   : > { %v13720_v26 = vmul.f32 %v13683_v4, %v5194_v21  ;;  %v5182_v20 = vadd.f32 %v5181_v2, %v5168_v55  ;;  %v5222_v17 = vadd.f32 %v5221_v11, %v5208_v41  ;;  %v13747_v51 = vmul.f32 0.5, %v13685_v60 }
 0xa2a   : > { %v5415_v35 = vadd.f32 0.112945676, %v5414_v9  ;;  %v5640_v29 = vadd.f32 0.00028619796, %v5639_v52  ;;  %v5651_v24 = vadd.f32 0.001143296, %v5650_v39 }
 0xa2b   : > { %v5437_v36 = vmul.f32 %v13720_v26, %v13720_v26  ;;  %v5404_v28 = vadd.f32 0.05243302, %v5403_v1  ;;  %v13757_v23 = vmul.f32 0.5, %v5194_v21  ;;  %v4385_v60 = vperm.slane %v13680_v38, 3 }
 0xa2c   : > { %v5416_v47 = vmul.f32 %v5415_v35, %v13694_v54  ;;  %v5641_v44 = vmul.f32 %v5640_v29, %v13708_v48  ;;  %v5652_v22 = vmul.f32 %v5651_v24, %v13708_v48 }
 0xa2d   : > { %v13729_v50 = vmin.f32 %v5437_v36, 16.0  ;;  %v5195_v49 = vpop.f32.mrf.mxu2  ;;  %v5405_v19 = vmul.f32 %v5404_v28, %v13694_v54 }
 0xa2e   : > { %v5417_v53 = vadd.f32 0.4994258, %v5416_v47  ;;  %v5642_v25 = vadd.f32 0.0036580483, %v5641_v44  ;;  %v5196_v57 = vadd.f32 %v5195_v49, %v5182_v20  ;;  %v5653_v61 = vadd.f32 0.014752088, %v5652_v22  ;;  %v5209_v2 = vpop.f32.mrf.mxu3 }
 0xa2f   : > { %v5439_v40 = vmul.f32 2.1237322e-06, %v13729_v50  ;;  %v5450_v13 = vmul.f32 3.8918573e-05, %v13729_v50  ;;  %v5406_v9 = vadd.f32 0.18741608, %v5405_v19  ;;  %v13763_v32 = vadd.f32 %v5209_v2, %v4384_v0 }
 0xa30   : > { %v5418_v58 = vmul.f32 %v5417_v53, %v13694_v54  ;;  %v5643_v42 = vmul.f32 %v5642_v25, %v13708_v48  ;;  %v5654_v62 = vmul.f32 %v5653_v61, %v13708_v48  ;;  %v13738_v14 = vmul.f32 %v13683_v4, %v5196_v57  ;;  %v5235_v6 = vpop.f32.mrf.mxu1 }
 0xa31   : > { %v5440_v46 = vadd.f32 0.00028619796, %v5439_v40  ;;  %v5451_v18 = vadd.f32 0.001143296, %v5450_v13  ;;  %v13753_v1 = vadd.f32 %v5235_v6, %v5222_v17  ;;  %v5407_v47 = vmul.f32 %v5406_v9, %v13694_v54 }
 0xa32   : > { %v13740_v7 = vadd.f32 1.0, %v5418_v58  ;;  %v5644_v27 = vadd.f32 0.05243302, %v5643_v42  ;;  %v5655_v8 = vadd.f32 0.112945676, %v5654_v62  ;;  %v5677_v59 = vmul.f32 %v13738_v14, %v13738_v14 }
 0xa33   : > { %v5441_v56 = vmul.f32 %v5440_v46, %v13729_v50  ;;  %v5452_v5 = vmul.f32 %v5451_v18, %v13729_v50  ;;  %v13770_v21 = vmul.f32 %v13683_v4, %v13753_v1  ;;  %v13774_v22 = vmul.f32 0.5, %v5196_v57 }
 0xa34   : > { %11311 = vrcp.f32 %v13740_v7  ;;  %v5645_v52 = vmul.f32 %v5644_v27, %v13708_v48  ;;  %v5656_v39 = vmul.f32 %v5655_v8, %v13708_v48  ;;  %v13759_v55 = vmin.f32 %v5677_v59, 16.0  ;;  %v13792_v8 = vpop.f32.mrf.mxu0 }
 0xa35   : > { %v5442_v12 = vadd.f32 0.0036580483, %v5441_v56  ;;  %v5453_v35 = vadd.f32 0.014752088, %v5452_v5  ;;  %v5477_v41 = vmul.f32 %v13770_v21, %v13770_v21  ;;  %v5429_v40 = vand.u32 2147483647, %v13740_v7 }
 0xa36   : > { %v5646_v29 = vadd.f32 0.18741608, %v5645_v52  ;;  %v5657_v30 = vadd.f32 0.4994258, %v5656_v39  ;;  %v5679_v36 = vmul.f32 2.1237322e-06, %v13759_v55  ;;  %vm5425_vm2 = vweird.f32 %v13740_v7  ;;  %v5249_v46 = vpop.f32.mrf.mxu2 }
 0xa37   : > { %v5443_v3 = vmul.f32 %v5442_v12, %v13729_v50  ;;  %v5454_v24 = vmul.f32 %v5453_v35, %v13729_v50  ;;  %v5690_v28 = vmul.f32 3.8918573e-05, %v13759_v55  ;;  %v5408_v62 = vadd.f32 1.1283791, %v5407_v47 }
 0xa38   : > { %v5658_v44 = vmul.f32 %v5657_v30, %v13708_v48  ;;  %v5680_v53 = vadd.f32 0.00028619796, %v5679_v36  ;;  %v5647_v13 = vmul.f32 %v5646_v29, %v13708_v48  ;;  %v5431_v48 = vand.u32 2147483648, %v13740_v7 }
 0xa39   : > { %v5444_v20 = vadd.f32 0.05243302, %v5443_v3  ;;  %v5455_v0 = vadd.f32 0.112945676, %v5454_v24  ;;  %v5691_v25 = vadd.f32 0.001143296, %v5690_v28  ;;  %v5250_v52 = vadd.f32 %v5249_v46, %v4385_v60 }
 0xa3a   : > { %v11312_v49 = vpop.eup %11311  ;;  %v13781_v19 = vadd.f32 1.0, %v5658_v44  ;;  %v5681_v58 = vmul.f32 %v5680_v53, %v13759_v55  ;;  %v13790_v6 = vmin.f32 %v5477_v41, 16.0  ;;  %vm13794_vm4 = vcmp.eq.f32.partialorder %v5429_v40, 8.507059e+37 }
 0xa3b   : > { %v5421_v61 = vmul.f32 %v11312_v49, %v13740_v7  ;;  %v5445_v54 = vmul.f32 %v5444_v20, %v13729_v50  ;;  %v5456_v57 = vmul.f32 %v5455_v0, %v13729_v50  ;;  %v5692_v42 = vmul.f32 %v5691_v25, %v13759_v55 }
 0xa3c   : > { %11313 = vrcp.f32 %v13781_v19  ;;  %vm5426_vm3 = vweird.f32 %v11312_v49  ;;  %v5682_v56 = vadd.f32 0.0036580483, %v5681_v58  ;;  %v5648_v2 = vadd.f32 1.1283791, %v5647_v13 }
 0xa3d   : > { %v5422_v11 = vsub.f32 1.0, %v5421_v61  ;;  %v5446_v18 = vadd.f32 0.18741608, %v5445_v54  ;;  %v5457_v17 = vadd.f32 0.4994258, %v5456_v57  ;;  %vm5427_vm5 = vmor %vm5425_vm2, %vm5426_vm3  ;;  %v5432_v30 = vor.u32 1.1754944e-38, %v5431_v48 }
 0xa3e   : > { %v5693_v5 = vadd.f32 0.014752088, %v5692_v42  ;;  %v5479_v9 = vmul.f32 2.1237322e-06, %v13790_v6  ;;  %v5683_v35 = vmul.f32 %v5682_v56, %v13759_v55  ;;  %v5490_v36 = vmul.f32 3.8918573e-05, %v13790_v6 }
 0xa3f   : > { %v5423_v27 = vmul.f32 %v11312_v49, %v5422_v11  ;;  %v5458_v12 = vmul.f32 %v5457_v17, %v13729_v50  ;;  %v5447_v3 = vmul.f32 %v5446_v18, %v13729_v50  ;;  %v5409_v53 = vmul.f32 %v5408_v62, %v13689_v31  ;;  %v5263_v50 = vpop.f32.mrf.mxu3  ;;  %v5277_v17 = vpop.f32.mrf.mxu0 }
 0xa40   : > { %v5694_v29 = vmul.f32 %v5693_v5, %v13759_v55  ;;  %v5480_v24 = vadd.f32 0.00028619796, %v5479_v9  ;;  %v5684_v20 = vadd.f32 0.05243302, %v5683_v35  ;;  %v13816_v41 = vmul.f32 0.5, %v13753_v1 }
 0xa41   : > { %v5424_v39 = vadd.f32 %v11312_v49, %v5423_v27  ;;  %v13809_v44 = vadd.f32 1.0, %v5458_v12  ;;  %v5649_v61 = vmul.f32 %v5648_v2, %v13702_v34  ;;  %v5669_v40 = vand.u32 2147483647, %v13781_v19 }
 0xa42   : > { %v11314_v28 = vpop.eup %11313  ;;  %v5695_v0 = vadd.f32 0.112945676, %v5694_v29  ;;  %v5685_v31 = vmul.f32 %v5684_v20, %v13759_v55  ;;  %v5671_v58 = vand.u32 2147483648, %v13781_v19  ;;  %v5448_v42 = vadd.f32 1.1283791, %v5447_v3 }
 0xa43   : > { %v5428_v47 = vsel %vm5427_vm5, %v11312_v49, %v5424_v39  ;;  %v5661_v7 = vmul.f32 %v11314_v28, %v13781_v19  ;;  %11315 = vrcp.f32 %v13809_v44  ;;  %v5264_v49 = vadd.f32 %v5263_v50, %v5250_v52 }
 0xa44   : > { %v5433_v25 = vsel %vm13794_vm4, %v5432_v30, %v5428_v47  ;;  %v5696_v57 = vmul.f32 %v5695_v0, %v13759_v55  ;;  %v5481_v1 = vmul.f32 %v5480_v24, %v13790_v6  ;;  %v5491_v62 = vadd.f32 0.001143296, %v5490_v36 }
 0xa45   : > { %v5434_v13 = vmul.f32 %v5433_v25, %v5409_v53  ;;  %v5662_v54 = vsub.f32 1.0, %v5661_v7  ;;  %vm5666_vm6 = vweird.f32 %v11314_v28  ;;  %v5686_v34 = vadd.f32 0.18741608, %v5685_v31  ;;  %v5237_v25 = vpop.f32.mrf.mxu1  ;;  %v9928_v31 = vld [vmem:[%s13716_s6 + $0x1f8] sm:$0xf] }
 0xa46   : > { %v5697_v46 = vadd.f32 0.4994258, %v5696_v57  ;;  %vm5665_vm7 = vweird.f32 %v13781_v19  ;;  %vm13826_vm8 = vcmp.eq.f32.partialorder %v5669_v40, 8.507059e+37  ;;  %v5482_v18 = vadd.f32 0.0036580483, %v5481_v1 }
 0xa47   : > { %v5663_v11 = vmul.f32 %v11314_v28, %v5662_v54  ;;  %v5492_v27 = vmul.f32 %v5491_v62, %v13790_v6  ;;  %v9661_v56 = vclamps-f32 %v5434_v13, 1.0  ;;  %v5278_v2 = vadd.f32 %v5277_v17, %v5264_v49  ;;  %vm5667_vm9 = vmor %vm5665_vm7, %vm5666_vm6  ;;  %v9760_v13 = vld [vmem:[%s13716_s6 + $0xa8] sm:$0xf]  ;;  %v10841_v54 = vld [vmem:[%s13716_s6 + $0xb0] sm:$0xf0]  ;;  %v5251_v62 = vpop.f32.mrf.mxu2 }
 0xa48   : > { %v5698_v59 = vmul.f32 %v5697_v46, %v13759_v55  ;;  %v5672_v52 = vor.u32 1.1754944e-38, %v5671_v58  ;;  %v13833_v39 = vmul.f32 %v5448_v42, %v13720_v26  ;;  %v5483_v19 = vmul.f32 %v5482_v18, %v13790_v6 }
 0xa49   : > { %v5664_v5 = vadd.f32 %v11314_v28, %v5663_v11  ;;  %v11316_v9 = vpop.eup %11315  ;;  %v5493_v12 = vadd.f32 0.014752088, %v5492_v27  ;;  %v5469_v30 = vand.u32 2147483647, %v13809_v44  ;;  %v5687_v3 = vmul.f32 %v5686_v34, %v13759_v55 }
 0xa4a   : > { %v5461_v29 = vmul.f32 %v11316_v9, %v13809_v44  ;;  %v13841_v36 = vadd.f32 1.0, %v5698_v59  ;;  %v5484_v47 = vadd.f32 0.05243302, %v5483_v19  ;;  %v5877_v20 = vadd.f32 1.0, %v9661_v56 }
 0xa4b   : > { %v5668_v35 = vsel %vm5667_vm9, %v11314_v28, %v5664_v5  ;;  %v5494_v26 = vmul.f32 %v5493_v12, %v13790_v6  ;;  %v5471_v28 = vand.u32 2147483648, %v13809_v44  ;;  %v13846_v53 = vmul.f32 %v13683_v4, %v5278_v2  ;;  %v10886_v12 = vld [vmem:[%s13716_s6 + $0x218] sm:$0xf0] }
 0xa4c   : > { %v5673_v24 = vsel %vm13826_vm8, %v5672_v52, %v5668_v35  ;;  %v5462_v0 = vsub.f32 1.0, %v5461_v29  ;;  %vm5465_vm10 = vweird.f32 %v13809_v44  ;;  %vm5466_vm11 = vweird.f32 %v11316_v9  ;;  %v9940_v44 = vld [vmem:[%s13716_s6 + $0x210] sm:$0xf] }
 0xa4d   : > { %11317 = vrcp.f32 %v13841_v36  ;;  %v5224_v55 = vadd.f32 %v13792_v8, %v13763_v32  ;;  %v5674_v7 = vmul.f32 %v5673_v24, %v5649_v61  ;;  %v5485_v40 = vmul.f32 %v5484_v47, %v13790_v6  ;;  %vm13870_vm13 = vmor %vm5465_vm10, %vm5466_vm11 }
 0xa4e   : > { %v5463_v50 = vmul.f32 %v11316_v9, %v5462_v0  ;;  %v5495_v49 = vadd.f32 0.112945676, %v5494_v26  ;;  %vm13855_vm12 = vcmp.eq.f32.partialorder %v5469_v30, 8.507059e+37  ;;  %v5688_v57 = vadd.f32 1.1283791, %v5687_v3 }
 0xa4f   : > { %v5517_v58 = vmul.f32 %v13846_v53, %v13846_v53  ;;  %v13861_v42 = vadd.f32 %v5237_v25, %v5224_v55  ;;  %v13864_v32 = vmul.f32 %v5877_v20, %v13747_v51  ;;  %v5472_v61 = vor.u32 1.1754944e-38, %v5471_v28 }
 0xa50   : > { %v5464_v8 = vadd.f32 %v11316_v9, %v5463_v50  ;;  %v5496_v1 = vmul.f32 %v5495_v49, %v13790_v6  ;;  %v5486_v11 = vadd.f32 0.18741608, %v5485_v40  ;;  %v9761_v51 = vor.u32 %v10841_v54, %v9760_v13  ;;  %v10838_v13 = vld [vmem:[%s13716_s6 + $0x98] sm:$0xf0] }
 0xa51   : > { %v13874_v34 = vmin.f32 %v5517_v58, 16.0  ;;  %v13878_v46 = vmul.f32 %v13683_v4, %v13861_v42  ;;  %v9667_v48 = vclamps-f32 %v5674_v7, 1.0  ;;  %v13882_v17 = vmul.f32 0.5, %v5278_v2 }
 0xa52   : > { %v5468_v18 = vsel %vm13870_vm13, %v11316_v9, %v5464_v8  ;;  %v5497_v27 = vadd.f32 0.4994258, %v5496_v1  ;;  %v13886_v5 = vmul.f32 %v5688_v57, %v13738_v14  ;;  %6878 = vmatpush.bf16.msra.mxu3 %v9761_v51  ;;  %v5709_v35 = vand.u32 2147483647, %v13841_v36  ;;  %v10883_v57 = vld [vmem:[%s13716_s6 + $0x200] sm:$0xf0] }
 0xa53   : > { %v11318_v56 = vpop.eup %11317  ;;  %v5519_v59 = vmul.f32 2.1237322e-06, %v13874_v34  ;;  %v5530_v52 = vmul.f32 3.8918573e-05, %v13874_v34  ;;  %v5717_v19 = vmul.f32 %v13878_v46, %v13878_v46  ;;  %v5473_v9 = vsel %vm13855_vm12, %v5472_v61, %v5468_v18 }
 0xa54   : > { %v5701_v2 = vmul.f32 %v11318_v56, %v13841_v36  ;;  %v5711_v14 = vand.u32 2147483648, %v13841_v36  ;;  %v5487_v29 = vmul.f32 %v5486_v11, %v13790_v6  ;;  %v5498_v30 = vmul.f32 %v5497_v27, %v13790_v6  ;;  %v9748_v6 = vld [vmem:[%s13716_s6 + $0x90] sm:$0xf] }
 0xa55   : > { %v5520_v3 = vadd.f32 0.00028619796, %v5519_v59  ;;  %v5531_v24 = vadd.f32 0.001143296, %v5530_v52  ;;  %v5883_v47 = vadd.f32 1.0, %v9667_v48  ;;  %v13900_v20 = vmin.f32 %v5717_v19, 16.0 }
 0xa56   : > { %v5702_v26 = vsub.f32 1.0, %v5701_v2  ;;  %v9941_v0 = vor.u32 %v10886_v12, %v9940_v44  ;;  %v13903_v28 = vmul.f32 %v5473_v9, %v13833_v39  ;;  %v13905_v25 = vadd.f32 1.0, %v5498_v30  ;;  %v9736_v52 = vld [vmem:[%s13716_s6 + $0x78] sm:$0xf]  ;;  %v10835_v19 = vld [vmem:[%s13716_s6 + $0x80] sm:$0xf0] }
 0xa57   : > { %v5521_v55 = vmul.f32 %v5520_v3, %v13874_v34  ;;  %v5532_v7 = vmul.f32 %v5531_v24, %v13874_v34  ;;  %vm5706_vm14 = vweird.f32 %v11318_v56  ;;  %v5719_v40 = vmul.f32 2.1237322e-06, %v13900_v20  ;;  %v9916_v3 = vld [vmem:[%s13716_s6 + $0x1e0] sm:$0xf] }
 0xa58   : > { %v5703_v50 = vmul.f32 %v11318_v56, %v5702_v26  ;;  %v5730_v49 = vmul.f32 3.8918573e-05, %v13900_v20  ;;  %6907 = vmatpush.bf16.msra.mxu1 %v9941_v0  ;;  %vm5705_vm15 = vweird.f32 %v13841_v36  ;;  %vm13914_vm0 = vcmp.eq.f32.partialorder %v5709_v35, 8.507059e+37 }
 0xa59   : > { %v5488_v54 = vadd.f32 1.1283791, %v5487_v29  ;;  %11319 = vrcp.f32 %v13905_v25  ;;  %v5712_v8 = vor.u32 1.1754944e-38, %v5711_v14  ;;  %v5522_v61 = vadd.f32 0.0036580483, %v5521_v55  ;;  %vm5707_vm1 = vmor %vm5705_vm15, %vm5706_vm14  ;;  %v5265_v29 = vpop.f32.mrf.mxu3 }
 0xa5a   : > { %v5704_v58 = vadd.f32 %v11318_v56, %v5703_v50  ;;  %v5533_v1 = vadd.f32 0.014752088, %v5532_v7  ;;  %v13922_v11 = vmul.f32 %v5883_v47, %v13751_v45  ;;  %v9662_v36 = vclamps-f32 %v13903_v28, 1.0  ;;  %v10880_v55 = vld [vmem:[%s13716_s6 + $0x1e8] sm:$0xf0] }
 0xa5b   : > { %v5720_v51 = vadd.f32 0.00028619796, %v5719_v40  ;;  %v5731_v48 = vadd.f32 0.001143296, %v5730_v49  ;;  %v5523_v27 = vmul.f32 %v5522_v61, %v13874_v34  ;;  %v9749_v59 = vor.u32 %v10838_v13, %v9748_v6  ;;  %v5279_v40 = vpop.f32.mrf.mxu0 }
 0xa5c   : > { %v5708_v18 = vsel %vm5707_vm1, %v11318_v56, %v5704_v58  ;;  %v5534_v44 = vmul.f32 %v5533_v1, %v13874_v34  ;;  %v13931_v12 = vmul.f32 %v5488_v54, %v13770_v21  ;;  %v5252_v2 = vadd.f32 %v5251_v62, %v4385_v60  ;;  %v10832_v1 = vld [vmem:[%s13716_s6 + $0x68] sm:$0xf0] }
 0xa5d   : > { %v5721_v45 = vmul.f32 %v5720_v51, %v13900_v20  ;;  %v5732_v9 = vmul.f32 %v5731_v48, %v13900_v20  ;;  %v5713_v56 = vsel %vm13914_vm0, %v5712_v8, %v5708_v18  ;;  %v5524_v35 = vadd.f32 0.05243302, %v5523_v27  ;;  %6879 = vmatpush.bf16.msra.mxu3 %v9749_v59 }
 0xa5e   : > { %v5535_v14 = vadd.f32 0.112945676, %v5534_v44  ;;  %v9929_v30 = vor.u32 %v10883_v57, %v9928_v31  ;;  %v5266_v26 = vadd.f32 %v5265_v29, %v5252_v2  ;;  %v9737_v0 = vor.u32 %v10835_v19, %v9736_v52  ;;  %v9724_v31 = vld [vmem:[%s13716_s6 + $0x60] sm:$0xf]  ;;  %v9904_v44 = vld [vmem:[%s13716_s6 + $0x1c8] sm:$0xf] }
 0xa5f   : > { %v11320_v24 = vpop.eup %11319  ;;  %v5722_v21 = vadd.f32 0.0036580483, %v5721_v45  ;;  %v5733_v47 = vadd.f32 0.014752088, %v5732_v9  ;;  %v5509_v60 = vand.u32 2147483647, %v13905_v25  ;;  %v5525_v50 = vmul.f32 %v5524_v35, %v13874_v34 }
 0xa60   : > { %v5501_v7 = vmul.f32 %v11320_v24, %v13905_v25  ;;  %v5511_v6 = vand.u32 2147483648, %v13905_v25  ;;  %6908 = vmatpush.bf16.msra.mxu1 %v9929_v30  ;;  %v5536_v49 = vmul.f32 %v5535_v14, %v13874_v34  ;;  %v13948_v54 = vadd.f32 %v5279_v40, %v5266_v26  ;;  %v10877_v9 = vld [vmem:[%s13716_s6 + $0x1d0] sm:$0xf0]  ;;  %v9856_v2 = vld [vmem:[%s13716_s6 + $0x168] sm:$0xf] }
 0xa61   : > { %v5723_v13 = vmul.f32 %v5722_v21, %v13900_v20  ;;  %v5734_v39 = vmul.f32 %v5733_v47, %v13900_v20  ;;  %v5714_v57 = vmul.f32 %v5713_v56, %v13886_v5  ;;  %v5526_v8 = vadd.f32 0.18741608, %v5525_v50  ;;  %6880 = vmatpush.bf16.msra.mxu3 %v9737_v0  ;;  %v10865_v56 = vld [vmem:[%s13716_s6 + $0x170] sm:$0xf0]  ;;  %v10048_v40 = vld [vmem:[%s13716_s6 + $0x2e8] sm:$0xf] }
 0xa62   : > { %v5502_v58 = vsub.f32 1.0, %v5501_v7  ;;  %v9917_v61 = vor.u32 %v10880_v55, %v9916_v3  ;;  %v5537_v62 = vadd.f32 0.4994258, %v5536_v49  ;;  %v13955_v18 = vmul.f32 %v13683_v4, %v13948_v54  ;;  %v10829_v50 = vld [vmem:[%s13716_s6 + $0x50] sm:$0xf0] }
 0xa63   : > { %v5724_v51 = vadd.f32 0.05243302, %v5723_v13  ;;  %v5735_v48 = vadd.f32 0.112945676, %v5734_v39  ;;  %vm5505_vm2 = vweird.f32 %v13905_v25  ;;  %vm5506_vm3 = vweird.f32 %v11320_v24  ;;  %v10913_v49 = vld [vmem:[%s13716_s6 + $0x2f0] sm:$0xf0] }
 0xa64   : > { %v5503_v27 = vmul.f32 %v11320_v24, %v5502_v58  ;;  %vm13958_vm4 = vcmp.eq.f32.partialorder %v5509_v60, 8.507059e+37  ;;  %6909 = vmatpush.bf16.msra.mxu1 %v9917_v61  ;;  %v5538_v59 = vmul.f32 %v5537_v62, %v13874_v34  ;;  %v5757_v45 = vmul.f32 %v13955_v18, %v13955_v18  ;;  %vm5507_vm5 = vmor %vm5505_vm2, %vm5506_vm3 }
 0xa65   : > { %v5725_v52 = vmul.f32 %v5724_v51, %v13900_v20  ;;  %v5736_v19 = vmul.f32 %v5735_v48, %v13900_v20  ;;  %v9668_v35 = vclamps-f32 %v5714_v57, 1.0  ;;  %v5512_v29 = vor.u32 1.1754944e-38, %v5511_v6  ;;  %v9712_v6 = vld [vmem:[%s13716_s6 + $0x48] sm:$0xf]  ;;  %v10874_v57 = vld [vmem:[%s13716_s6 + $0x1b8] sm:$0xf0] }
 0xa66   : > { %v5504_v14 = vadd.f32 %v11320_v24, %v5503_v27  ;;  %v9725_v30 = vor.u32 %v10832_v1, %v9724_v31  ;;  %v5527_v3 = vmul.f32 %v5526_v8, %v13874_v34  ;;  %v13975_v21 = vadd.f32 1.0, %v5538_v59  ;;  %v9844_v1 = vld [vmem:[%s13716_s6 + $0x150] sm:$0xf]  ;;  %v10862_v51 = vld [vmem:[%s13716_s6 + $0x158] sm:$0xf0] }
 0xa67   : > { %v5737_v47 = vadd.f32 0.4994258, %v5736_v19  ;;  %v13977_v26 = vmin.f32 %v5757_v45, 16.0  ;;  %v5726_v55 = vadd.f32 0.18741608, %v5725_v52  ;;  %v9905_v7 = vor.u32 %v10877_v9, %v9904_v44 }
 0xa68   : > { %v5508_v0 = vsel %vm5507_vm5, %v11320_v24, %v5504_v14  ;;  %6881 = vmatpush.bf16.msra.mxu3 %v9725_v30  ;;  %v9857_v60 = vor.u32 %v10865_v56, %v9856_v2  ;;  %v13983_v25 = vpack.c.bf16 %v13922_v11, %v13864_v32  ;;  %11321 = vrcp.f32 %v13975_v21  ;;  %v9892_v11 = vld [vmem:[%s13716_s6 + $0x1b0] sm:$0xf]  ;;  %v10826_v45 = vld [vmem:[%s13716_s6 + $0x38] sm:$0xf0]  ;;  %v9880_v14 = vld [vmem:[%s13716_s6 + $0x198] sm:$0xf] }
 0xa69   : > { %v5513_v34 = vsel %vm13958_vm4, %v5512_v29, %v5508_v0  ;;  %v13989_v24 = vmul.f32 0.5, %v13861_v42  ;;  %v5878_v13 = vadd.f32 1.0, %v9662_v36  ;;  %v5884_v39 = vadd.f32 1.0, %v9668_v35  ;;  %6910 = vmatpush.bf16.msra.mxu1 %v9905_v7  ;;  %v9700_v59 = vld [vmem:[%s13716_s6 + $0x30] sm:$0xf] }
 0xa6a   : > { %v5514_v31 = vmul.f32 %v5513_v34, %v13931_v12  ;;  %v5738_v32 = vmul.f32 %v5737_v47, %v13900_v20  ;;  %6892 = vmatpush.bf16.msra.mxu0 %v9857_v60  ;;  %v5528_v58 = vadd.f32 1.1283791, %v5527_v3  ;;  %v5759_v42 = vmul.f32 2.1237322e-06, %v13977_v26  ;;  %v10036_v9 = vld [vmem:[%s13716_s6 + $0x2d0] sm:$0xf] }
 0xa6b   : > { %v5770_v8 = vmul.f32 3.8918573e-05, %v13977_v26  ;;  %v9713_v61 = vor.u32 %v10829_v50, %v9712_v6  ;;  %v5551_v36 = vand.u32 2147483648, %v13975_v21  ;;  %v5727_v12 = vmul.f32 %v5726_v55, %v13900_v20  ;;  %v10871_v29 = vld [vmem:[%s13716_s6 + $0x1a0] sm:$0xf0]  ;;  %v5291_v50 = vpop.f32.mrf.mxu1 }
 0xa6c   : > { %v9663_v28 = vclamps-f32 %v5514_v31, 1.0  ;;  %v14004_v62 = vadd.f32 1.0, %v5738_v32  ;;  %v5760_v48 = vadd.f32 0.00028619796, %v5759_v42  ;;  %v10049_v5 = vor.u32 %v10913_v49, %v10048_v40  ;;  %v9832_v47 = vld [vmem:[%s13716_s6 + $0x138] sm:$0xf] }
 0xa6d   : > { %v5771_v27 = vadd.f32 0.001143296, %v5770_v8  ;;  %6882 = vmatpush.bf16.msra.mxu3 %v9713_v61  ;;  %v9893_v44 = vor.u32 %v10874_v57, %v9892_v11  ;;  %v14009_v52 = vmul.f32 %v5878_v13, %v13757_v23  ;;  %v14012_v19 = vmul.f32 %v5884_v39, %v13774_v22  ;;  %v10910_v22 = vld [vmem:[%s13716_s6 + $0x2d8] sm:$0xf0]  ;;  %v10859_v0 = vld [vmem:[%s13716_s6 + $0x140] sm:$0xf0] }
 0xa6e   : > { %v5549_v20 = vand.u32 2147483647, %v13975_v21  ;;  %11323 = vrcp.f32 %v14004_v62  ;;  %v14018_v2 = vpop.eup %11321  ;;  %v14021_v56 = vmul.f32 %v5528_v58, %v13846_v53  ;;  %v5761_v35 = vmul.f32 %v5760_v48, %v13977_v26  ;;  %6920 = vmatpush.bf16.msra.mxu2 %v10049_v5  ;;  %v9688_v34 = vld [vmem:[%s13716_s6 + $0x18] sm:$0xf]  ;;  %v10823_v40 = vld [vmem:[%s13716_s6 + $0x20] sm:$0xf0] }
 0xa6f   : > { %v5772_v23 = vmul.f32 %v5771_v27, %v13977_v26  ;;  %6911 = vmatpush.bf16.msra.mxu1 %v9893_v44  ;;  %v5541_v30 = vmul.f32 %v14018_v2, %v13975_v21  ;;  %vm5545_vm6 = vweird.f32 %v13975_v21  ;;  %v14031_v3 = vadd.f32 1.1283791, %v5727_v12  ;;  %v10024_v49 = vld [vmem:[%s13716_s6 + $0x2b8] sm:$0xf]  ;;  %v10907_v57 = vld [vmem:[%s13716_s6 + $0x2c0] sm:$0xf0] }
 0xa70   : > { %v9845_v53 = vor.u32 %v10862_v51, %v9844_v1  ;;  %v14035_v55 = vadd.f32 1.0, %v9663_v28  ;;  %v14037_v7 = vor.u32 1.1754944e-38, %v5551_v36  ;;  %v5762_v60 = vadd.f32 0.0036580483, %v5761_v35  ;;  %v5305_v1 = vpop.f32.mrf.mxu2  ;;  %v9868_v28 = vld [vmem:[%s13716_s6 + $0x180] sm:$0xf] }
 0xa71   : > { %v5773_v6 = vadd.f32 0.014752088, %v5772_v23  ;;  %v5542_v13 = vsub.f32 1.0, %v5541_v30  ;;  %vm14042_vm7 = vcmp.eq.f32.partialorder %v5549_v20, 8.507059e+37  ;;  %v5749_v31 = vand.u32 2147483647, %v14004_v62 }
 0xa72   : > { %6893 = vmatpush.bf16.msra.mxu0 %v9845_v53  ;;  %v4386_v32 = vperm.slane %v13680_v38, 4  ;;  %v9701_v11 = vor.u32 %v10826_v45, %v9700_v59  ;;  %v5763_v58 = vmul.f32 %v5762_v60, %v13977_v26  ;;  %v10037_v8 = vor.u32 %v10910_v22, %v10036_v9  ;;  %v10868_v36 = vld [vmem:[%s13716_s6 + $0x188] sm:$0xf0]  ;;  %v9820_v12 = vld [vmem:[%s13716_s6 + $0x120] sm:$0xf] }
 0xa73   : > { %v5774_v42 = vmul.f32 %v5773_v6, %v13977_v26  ;;  %v9881_v61 = vor.u32 %v10871_v29, %v9880_v14  ;;  %v5543_v48 = vmul.f32 %v14018_v2, %v5542_v13  ;;  %vm5546_vm8 = vweird.f32 %v14018_v2  ;;  %v10856_v44 = vld [vmem:[%s13716_s6 + $0x128] sm:$0xf0]  ;;  %v9762_v20 = vld [vmem:[%s13716_s6 + $0xb4] sm:$0xf0]  ;;  %v5319_v6 = vpop.f32.mrf.mxu3  ;;  %v9676_v13 = vld [vmem:[%s13716_s6] sm:$0xf]  ;;  %v5293_v39 = vpop.f32.mrf.mxu1 }
 0xa74   : > { %v14054_v51 = vpop.eup %11323  ;;  %v5292_v27 = vadd.f32 %v5291_v50, %v4386_v32  ;;  %6883 = vmatpush.bf16.msra.mxu3 %v9701_v11  ;;  %v9833_v5 = vor.u32 %v10859_v0, %v9832_v47  ;;  %v10840_v59 = vld [vmem:[%s13716_s6 + $0xac] sm:$0xf]  ;;  %v5751_v9 = vand.u32 2147483648, %v14004_v62  ;;  %v5764_v35 = vadd.f32 0.05243302, %v5763_v58  ;;  %6921 = vmatpush.bf16.msra.mxu2 %v10037_v8  ;;  %vm14071_vm9 = vmor %vm5545_vm6, %vm5546_vm8 }
 0xa75   : > { %v5741_v45 = vmul.f32 %v14054_v51, %v14004_v62  ;;  %v5775_v23 = vadd.f32 0.112945676, %v5774_v42  ;;  %6912 = vmatpush.bf16.msra.mxu1 %v9881_v61  ;;  %v5544_v22 = vadd.f32 %v14018_v2, %v5543_v48  ;;  %v9689_v14 = vor.u32 %v10823_v40, %v9688_v34  ;;  %v10820_v11 = vld [vmem:[%s13716_s6 + $0x8] sm:$0xf0]  ;;  %v10837_v48 = vld [vmem:[%s13716_s6 + $0x94] sm:$0xf] }
 0xa76   : > { %6894 = vmatpush.bf16.msra.mxu0 %v9833_v5  ;;  %v10025_v29 = vor.u32 %v10907_v57, %v10024_v49  ;;  %v5306_v30 = vadd.f32 %v5305_v1, %v5292_v27  ;;  %v5765_v0 = vmul.f32 %v5764_v35, %v13977_v26  ;;  %v9869_v50 = vor.u32 %v10868_v36, %v9868_v28  ;;  %v10012_v57 = vld [vmem:[%s13716_s6 + $0x2a0] sm:$0xf]  ;;  %v9808_v36 = vld [vmem:[%s13716_s6 + $0x108] sm:$0xf] }
 0xa77   : > { %v5742_v47 = vsub.f32 1.0, %v5741_v45  ;;  %v5776_v60 = vmul.f32 %v5775_v23, %v13977_v26  ;;  %v5548_v34 = vsel %vm14071_vm9, %v14018_v2, %v5544_v22  ;;  %v9821_v21 = vor.u32 %v10856_v44, %v9820_v12  ;;  %v10904_v2 = vld [vmem:[%s13716_s6 + $0x2a8] sm:$0xf0]  ;;  %v10853_v12 = vld [vmem:[%s13716_s6 + $0x110] sm:$0xf0] }
 0xa78   : > { %6884 = vmatpush.bf16.msra.mxu3 %v9689_v14  ;;  %v14080_v40 = vadd.f32 %v5319_v6, %v5306_v30  ;;  %v9765_v49 = vor.u32 %v10840_v59, %v9762_v20  ;;  %vm5746_vm10 = vweird.f32 %v14054_v51  ;;  %v5766_v42 = vadd.f32 0.18741608, %v5765_v0  ;;  %6922 = vmatpush.bf16.msra.mxu2 %v10025_v29  ;;  %v9750_v27 = vld [vmem:[%s13716_s6 + $0x9c] sm:$0xf0]  ;;  %v10000_v45 = vld [vmem:[%s13716_s6 + $0x288] sm:$0xf]  ;;  %v5307_v0 = vpop.f32.mrf.mxu2 }
 0xa79   : > { %v5743_v58 = vmul.f32 %v14054_v51, %v5742_v47  ;;  %v5777_v8 = vadd.f32 0.4994258, %v5776_v60  ;;  %6913 = vmatpush.bf16.msra.mxu1 %v9869_v50  ;;  %v5729_v61 = vmul.f32 %v14031_v3, %v13878_v46  ;;  %vm5745_vm11 = vweird.f32 %v14004_v62  ;;  %v10937_v29 = vld [vmem:[%s13716_s6 + $0x3b0] sm:$0xf0]  ;;  %v9796_v60 = vld [vmem:[%s13716_s6 + $0xf0] sm:$0xf] }
 0xa7a   : > { %vm14091_vm12 = vcmp.eq.f32.partialorder %v5749_v31, 8.507059e+37  ;;  %v14097_v28 = vmul.f32 %v13683_v4, %v14080_v40  ;;  %6895 = vmatpush.bf16.msra.mxu0 %v9821_v21  ;;  %v5553_v46 = vsel %vm14042_vm7, %v14037_v7, %v5548_v34  ;;  %v5752_v3 = vor.u32 1.1754944e-38, %v5751_v9  ;;  %vm14110_vm13 = vmor %vm5745_vm11, %vm5746_vm10  ;;  %v10901_v9 = vld [vmem:[%s13716_s6 + $0x290] sm:$0xf0]  ;;  %v10850_v6 = vld [vmem:[%s13716_s6 + $0xf8] sm:$0xf0] }
 0xa7b   : > { %v5744_v62 = vadd.f32 %v14054_v51, %v5743_v58  ;;  %v5778_v31 = vmul.f32 %v5777_v8, %v13977_v26  ;;  %v5767_v44 = vmul.f32 %v5766_v42, %v13977_v26  ;;  %v9677_v59 = vor.u32 %v10820_v11, %v9676_v13  ;;  %v10144_v26 = vld [vmem:[%s13716_s6 + $0x3a8] sm:$0xf]  ;;  %v10834_v21 = vld [vmem:[%s13716_s6 + $0x7c] sm:$0xf]  ;;  %v9988_v13 = vld [vmem:[%s13716_s6 + $0x270] sm:$0xf] }
 0xa7c   : > { %v5557_v7 = vmul.f32 %v14097_v28, %v14097_v28  ;;  %v10013_v20 = vor.u32 %v10904_v2, %v10012_v57  ;;  %v4387_v22 = vperm.slane %v13680_v38, 5  ;;  %v9809_v14 = vor.u32 %v10853_v12, %v9808_v36  ;;  %v10898_v11 = vld [vmem:[%s13716_s6 + $0x278] sm:$0xf0]  ;;  %v10132_v57 = vld [vmem:[%s13716_s6 + $0x390] sm:$0xf] }
 0xa7d   : > { %6962 = vmatpush.bf16.msrb.mxu1 %v9765_v49  ;;  %v5748_v35 = vsel %vm14110_vm13, %v14054_v51, %v5744_v62  ;;  %v14122_v23 = vadd.f32 1.0, %v5778_v31  ;;  %v14128_v30 = vmul.f32 %v5553_v46, %v14021_v56  ;;  %6885 = vmatpush.bf16.msra.mxu3 %v9677_v59  ;;  %v9753_v51 = vor.u32 %v10837_v48, %v9750_v27  ;;  %v5333_v56 = vpop.f32.mrf.mxu0  ;;  %v9738_v49 = vld [vmem:[%s13716_s6 + $0x84] sm:$0xf0]  ;;  %v5321_v62 = vpop.f32.mrf.mxu3  ;;  %v10831_v31 = vld [vmem:[%s13716_s6 + $0x64] sm:$0xf] }
 0xa7e   : > { %v5753_v53 = vsel %vm14091_vm12, %v5752_v3, %v5748_v35  ;;  %v14132_v47 = vmin.f32 %v5557_v7, 16.0  ;;  %6923 = vmatpush.bf16.msra.mxu2 %v10013_v20  ;;  %v5294_v34 = vadd.f32 %v5293_v39, %v4386_v32  ;;  %6896 = vmatpush.bf16.msra.mxu0 %v9809_v14  ;;  %v14146_v58 = vpack.c.bf16 %v14012_v19, %v14009_v52  ;;  %v10934_v32 = vld [vmem:[%s13716_s6 + $0x398] sm:$0xf0]  ;;  %v9784_v52 = vld [vmem:[%s13716_s6 + $0xd8] sm:$0xf] }
 0xa7f   : > { %v5754_v50 = vmul.f32 %v5753_v53, %v5729_v61  ;;  %11325 = vrcp.f32 %v14122_v23  ;;  %v5891_v42 = vmul.f32 %v14035_v55, %v13816_v41  ;;  %v5768_v8 = vadd.f32 1.1283791, %v5767_v44  ;;  %v10847_v19 = vld [vmem:[%s13716_s6 + $0xe0] sm:$0xf0]  ;;  %v9726_v48 = vld [vmem:[%s13716_s6 + $0x6c] sm:$0xf0] }
 0xa80   : > { %v5559_v2 = vmul.f32 2.1237322e-06, %v14132_v47  ;;  %v5570_v1 = vmul.f32 3.8918573e-05, %v14132_v47  ;;  %6886 = vmatmul.bf16.vlgmr.msra.gmra.mxu3 %v13983_v25  ;;  %v10001_v36 = vor.u32 %v10901_v9, %v10000_v45  ;;  %v5308_v12 = vadd.f32 %v5307_v0, %v5294_v34  ;;  %v9976_v39 = vld [vmem:[%s13716_s6 + $0x258] sm:$0xf] }
 0xa81   : > { %6963 = vmatpush.bf16.msrb.mxu1 %v9753_v51  ;;  %v9669_v61 = vclamps-f32 %v5754_v50, 1.0  ;;  %v9664_v41 = vclamps-f32 %v14128_v30, 1.0  ;;  %v14159_v55 = vadd.f32 %v5333_v56, %v4387_v22  ;;  %v10145_v3 = vor.u32 %v10937_v29, %v10144_v26  ;;  %v10895_v59 = vld [vmem:[%s13716_s6 + $0x260] sm:$0xf0]  ;;  %v10120_v14 = vld [vmem:[%s13716_s6 + $0x378] sm:$0xf] }
 0xa82   : > { %v5560_v46 = vadd.f32 0.00028619796, %v5559_v2  ;;  %v5571_v5 = vadd.f32 0.001143296, %v5570_v1  ;;  %6924 = vmatpush.bf16.msra.mxu2 %v10001_v36  ;;  %v14163_v44 = vadd.f32 %v5321_v62, %v5308_v12  ;;  %v9797_v7 = vor.u32 %v10850_v6, %v9796_v60  ;;  %v10931_v26 = vld [vmem:[%s13716_s6 + $0x380] sm:$0xf0] }
 0xa83   : > { %v5885_v27 = vadd.f32 1.0, %v9669_v61  ;;  %6934 = vmatpush.bf16.msrb.mxu3 %v10145_v3  ;;  %v9741_v45 = vor.u32 %v10834_v21, %v9738_v49  ;;  %v9989_v9 = vor.u32 %v10898_v11, %v9988_v13  ;;  %v10133_v35 = vor.u32 %v10934_v32, %v10132_v57  ;;  %v9772_v29 = vld [vmem:[%s13716_s6 + $0xc0] sm:$0xf]  ;;  %v10844_v50 = vld [vmem:[%s13716_s6 + $0xc8] sm:$0xf0] }
 0xa84   : > { %v5561_v20 = vmul.f32 %v5560_v46, %v14132_v47  ;;  %v14175_v0 = vmul.f32 %v5768_v8, %v13955_v18  ;;  %v5572_v60 = vmul.f32 %v5571_v5, %v14132_v47  ;;  %v14180_v6 = vmul.f32 %v13683_v4, %v14163_v44  ;;  %6897 = vmatpush.bf16.msra.mxu0 %v9797_v7  ;;  %v10828_v56 = vld [vmem:[%s13716_s6 + $0x4c] sm:$0xf]  ;;  %v9714_v34 = vld [vmem:[%s13716_s6 + $0x54] sm:$0xf0]  ;;  %v9964_v13 = vld [vmem:[%s13716_s6 + $0x240] sm:$0xf] }
 0xa85   : > { %v14171_v53 = vpop.eup %11325  ;;  %v5897_v51 = vmul.f32 %v5885_v27, %v13989_v24  ;;  %v5791_v24 = vand.u32 2147483648, %v14122_v23  ;;  %6964 = vmatpush.bf16.msrb.mxu1 %v9741_v45  ;;  %v9785_v18 = vor.u32 %v10847_v19, %v9784_v52  ;;  %v9729_v2 = vor.u32 %v10831_v31, %v9726_v48  ;;  %v10892_v32 = vld [vmem:[%s13716_s6 + $0x248] sm:$0xf0]  ;;  %v10108_v61 = vld [vmem:[%s13716_s6 + $0x360] sm:$0xf] }
 0xa86   : > { %v5781_v21 = vmul.f32 %v14171_v53, %v14122_v23  ;;  %v5562_v49 = vadd.f32 0.0036580483, %v5561_v20  ;;  %v5573_v57 = vadd.f32 0.014752088, %v5572_v60  ;;  %v5797_v8 = vmul.f32 %v14180_v6, %v14180_v6  ;;  %6925 = vmatpush.bf16.msra.mxu2 %v9989_v9  ;;  %v10928_v52 = vld [vmem:[%s13716_s6 + $0x368] sm:$0xf0]  ;;  %v5347_v60 = vpop.f32.mrf.mxu1 }
 0xa87   : > { %v14189_v11 = vpack.c.bf16 %v5897_v51, %v5891_v42  ;;  %6935 = vmatpush.bf16.msrb.mxu3 %v10133_v35  ;;  %v9977_v12 = vor.u32 %v10895_v59, %v9976_v39  ;;  %v10121_v46 = vor.u32 %v10931_v26, %v10120_v14  ;;  %v10864_v42 = vld [vmem:[%s13716_s6 + $0x16c] sm:$0xf]  ;;  %v5789_v19 = vand.u32 2147483647, %v14122_v23  ;;  %v9858_v48 = vld [vmem:[%s13716_s6 + $0x174] sm:$0xf0] }
 0xa88   : > { %v5782_v1 = vsub.f32 1.0, %v5781_v21  ;;  %v5563_v36 = vmul.f32 %v5562_v49, %v14132_v47  ;;  %v5574_v62 = vmul.f32 %v5573_v57, %v14132_v47  ;;  %v14200_v3 = vmin.f32 %v5797_v8, 16.0  ;;  %6898 = vmatpush.bf16.msra.mxu0 %v9785_v18  ;;  %v10825_v39 = vld [vmem:[%s13716_s6 + $0x34] sm:$0xf]  ;;  %v9702_v59 = vld [vmem:[%s13716_s6 + $0x3c] sm:$0xf0] }
 0xa89   : > { %v9773_v31 = vor.u32 %v10844_v50, %v9772_v29  ;;  %6914 = vmatmul.bf16.vlgmr.msra.gmra.mxu1 %v14189_v11  ;;  %vm5786_vm14 = vweird.f32 %v14171_v53  ;;  %v9717_v7 = vor.u32 %v10828_v56, %v9714_v34  ;;  %v9965_v35 = vor.u32 %v10892_v32, %v9964_v13  ;;  %v10096_v14 = vld [vmem:[%s13716_s6 + $0x348] sm:$0xf]  ;;  %v10925_v50 = vld [vmem:[%s13716_s6 + $0x350] sm:$0xf0]  ;;  %v10852_v38 = vld [vmem:[%s13716_s6 + $0x10c] sm:$0xf] }
 0xa8a   : > { %v5783_v27 = vmul.f32 %v14171_v53, %v5782_v1  ;;  %v5564_v5 = vadd.f32 0.05243302, %v5563_v36  ;;  %6965 = vmatpush.bf16.msrb.mxu1 %v9729_v2  ;;  %v5575_v20 = vadd.f32 0.112945676, %v5574_v62  ;;  %v5799_v45 = vmul.f32 2.1237322e-06, %v14200_v3  ;;  %6926 = vmatpush.bf16.msra.mxu2 %v9977_v12 }
 0xa8b   : > { %v5810_v9 = vmul.f32 3.8918573e-05, %v14200_v3  ;;  %vm5785_vm15 = vweird.f32 %v14122_v23  ;;  %v5792_v29 = vor.u32 1.1754944e-38, %v5791_v24  ;;  %6936 = vmatpush.bf16.msrb.mxu3 %v10121_v46  ;;  %v10109_v51 = vor.u32 %v10928_v52, %v10108_v61  ;;  %v10861_v56 = vld [vmem:[%s13716_s6 + $0x154] sm:$0xf]  ;;  %v5361_v61 = vpop.f32.mrf.mxu2 }
 0xa8c   : > { %v5784_v26 = vadd.f32 %v14171_v53, %v5783_v27  ;;  %vm14217_vm0 = vmor %vm5785_vm15, %vm5786_vm14  ;;  %v5576_v21 = vmul.f32 %v5575_v20, %v14132_v47  ;;  %v5800_v49 = vadd.f32 0.00028619796, %v5799_v45  ;;  %6899 = vmatpush.bf16.msra.mxu0 %v9773_v31  ;;  %v9861_v23 = vor.u32 %v10864_v42, %v9858_v48  ;;  %v9846_v24 = vld [vmem:[%s13716_s6 + $0x15c] sm:$0xf0]  ;;  %v10822_v2 = vld [vmem:[%s13716_s6 + $0x1c] sm:$0xf] }
 0xa8d   : > { %v5811_v18 = vadd.f32 0.001143296, %v5810_v9  ;;  %vm5790_vm1 = vcmp.eq.f32.partialorder %v5789_v19, 8.507059e+37  ;;  %v5565_v57 = vmul.f32 %v5564_v5, %v14132_v47  ;;  %v9705_v8 = vor.u32 %v10825_v39, %v9702_v59  ;;  %v9690_v32 = vld [vmem:[%s13716_s6 + $0x24] sm:$0xf0] }
 0xa8e   : > { %v5788_v13 = vsel %vm14217_vm0, %v14171_v53, %v5784_v26  ;;  %6966 = vmatpush.bf16.msrb.mxu1 %v9717_v7  ;;  %v5577_v36 = vadd.f32 0.4994258, %v5576_v21  ;;  %v5801_v12 = vmul.f32 %v5800_v49, %v14200_v3  ;;  %6927 = vmatpush.bf16.msra.mxu2 %v9965_v35  ;;  %v10084_v52 = vld [vmem:[%s13716_s6 + $0x330] sm:$0xf]  ;;  %v10922_v53 = vld [vmem:[%s13716_s6 + $0x338] sm:$0xf0]  ;;  %v5348_v62 = vadd.f32 %v5347_v60, %v14159_v55 }
 0xa8f   : > { %v5793_v1 = vsel %vm5790_vm1, %v5792_v29, %v5788_v13  ;;  %v5812_v46 = vmul.f32 %v5811_v18, %v14200_v3  ;;  %v5880_v42 = vadd.f32 1.0, %v9664_v41  ;;  %6900 = vmatmul.bf16.vlgmr.msra.gmra.mxu0 %v14146_v58  ;;  %6937 = vmatpush.bf16.msrb.mxu3 %v10109_v51  ;;  %v10097_v31 = vor.u32 %v10925_v50, %v10096_v14  ;;  %v10858_v48 = vld [vmem:[%s13716_s6 + $0x13c] sm:$0xf]  ;;  %v9834_v27 = vld [vmem:[%s13716_s6 + $0x144] sm:$0xf0]  ;;  %v5335_v50 = vpop.f32.mrf.mxu0 }
 0xa90   : > { %v5794_v19 = vmul.f32 %v5793_v1, %v14175_v0  ;;  %v5578_v5 = vmul.f32 %v5577_v36, %v14132_v47  ;;  %v5802_v7 = vadd.f32 0.0036580483, %v5801_v12  ;;  %v9849_v30 = vor.u32 %v10861_v56, %v9846_v24  ;;  %v10819_v41 = vld [vmem:[%s13716_s6 + $0x4] sm:$0xf]  ;;  %v9678_v45 = vld [vmem:[%s13716_s6 + $0xc] sm:$0xf0] }
 0xa91   : > { %v5813_v39 = vadd.f32 0.014752088, %v5812_v46  ;;  %v5375_v0 = vmul.f32 0.5, %v13948_v54  ;;  %v9693_v20 = vor.u32 %v10822_v2, %v9690_v32  ;;  %v14243_v55 = vadd.f32 %v5361_v61, %v5348_v62  ;;  %v10936_v9 = vld [vmem:[%s13716_s6 + $0x3ac] sm:$0xf] }
 0xa92   : > { %6976 = vmatpush.bf16.msrb.mxu2 %v9861_v23  ;;  %v9670_v59 = vclamps-f32 %v5794_v19, 1.0  ;;  %6967 = vmatpush.bf16.msrb.mxu1 %v9705_v8  ;;  %v5566_v35 = vadd.f32 0.18741608, %v5565_v57  ;;  %v14247_v14 = vadd.f32 1.0, %v5578_v5  ;;  %v5803_v26 = vmul.f32 %v5802_v7, %v14200_v3  ;;  %v10146_v51 = vld [vmem:[%s13716_s6 + $0x3b4] sm:$0xf0] }
 0xa93   : > { %v5814_v29 = vmul.f32 %v5813_v39, %v14200_v3  ;;  %v14253_v60 = vmul.f32 0.5, %v14080_v40  ;;  %6938 = vmatpush.bf16.msrb.mxu3 %v10097_v31  ;;  %v10085_v56 = vor.u32 %v10922_v53, %v10084_v52  ;;  %v14257_v34 = vmul.f32 %v13683_v4, %v14243_v55  ;;  %v10072_v21 = vld [vmem:[%s13716_s6 + $0x318] sm:$0xf]  ;;  %v10919_v49 = vld [vmem:[%s13716_s6 + $0x320] sm:$0xf0]  ;;  %v5363_v5 = vpop.f32.mrf.mxu2 }
 0xa94   : > { %v5886_v54 = vadd.f32 1.0, %v9670_v59  ;;  %v5892_v18 = vmul.f32 %v5880_v42, %v13882_v17  ;;  %11327 = vrcp.f32 %v14247_v14  ;;  %v9837_v23 = vor.u32 %v10858_v48, %v9834_v27  ;;  %v10855_v40 = vld [vmem:[%s13716_s6 + $0x124] sm:$0xf]  ;;  %v9822_v13 = vld [vmem:[%s13716_s6 + $0x12c] sm:$0xf0]  ;;  %v5349_v17 = vpop.f32.mrf.mxu1 }
 0xa95   : > { %v9681_v24 = vor.u32 %v10819_v41, %v9678_v45  ;;  %v10240_v57 = vld [vmem:[%s13716_s6 + $0x468] sm:$0xf]  ;;  %v5804_v2 = vadd.f32 0.05243302, %v5803_v26  ;;  %v5815_v32 = vadd.f32 0.112945676, %v5814_v29  ;;  %v5597_v61 = vmul.f32 %v14257_v34, %v14257_v34 }
 0xa96   : > { %6977 = vmatpush.bf16.msrb.mxu2 %v9849_v30  ;;  %v5898_v8 = vmul.f32 %v5886_v54, %v5375_v0  ;;  %6968 = vmatpush.bf16.msrb.mxu1 %v9693_v20  ;;  %v10933_v1 = vld [vmem:[%s13716_s6 + $0x394] sm:$0xf]  ;;  %v5567_v12 = vmul.f32 %v5566_v35, %v14132_v47  ;;  %v5336_v46 = vadd.f32 %v5335_v50, %v4387_v22  ;;  %v10134_v42 = vld [vmem:[%s13716_s6 + $0x39c] sm:$0xf0]  ;;  %v10916_v62 = vld [vmem:[%s13716_s6 + $0x308] sm:$0xf0]  ;;  %vm5585_vm3 = vweird.f32 %v14247_v14 }
 0xa97   : > { %v10961_v36 = vld [vmem:[%s13716_s6 + $0x470] sm:$0xf0]  ;;  %v10149_v52 = vor.u32 %v10936_v9, %v10146_v51  ;;  %v10073_v53 = vor.u32 %v10919_v49, %v10072_v21  ;;  %v14275_v19 = vld [vmem:[%s13716_s6 + $0x300] sm:$0xf]  ;;  %v5805_v48 = vmul.f32 %v5804_v2, %v14200_v3  ;;  %v5816_v27 = vmul.f32 %v5815_v32, %v14200_v3  ;;  %6939 = vmatpush.bf16.msrb.mxu3 %v10085_v56  ;;  %v9810_v22 = vld [vmem:[%s13716_s6 + $0x114] sm:$0xf0] }
 0xa98   : > { %v14278_v31 = vpack.c.bf16 %v5898_v8, %v5892_v18  ;;  %v14282_v47 = vmin.f32 %v5597_v61, 16.0  ;;  %v5350_v7 = vadd.f32 %v5349_v17, %v5336_v46  ;;  %v9825_v39 = vor.u32 %v10855_v40, %v9822_v13  ;;  %v10888_v41 = vld [vmem:[%s13716_s6 + $0x22c] sm:$0xf]  ;;  %v9954_v0 = vld [vmem:[%s13716_s6 + $0x234] sm:$0xf0] }
 0xa99   : > { %v10241_v30 = vor.u32 %v10961_v36, %v10240_v57  ;;  %v10228_v59 = vld [vmem:[%s13716_s6 + $0x450] sm:$0xf]  ;;  %v5806_v20 = vadd.f32 0.18741608, %v5805_v48  ;;  %v5817_v45 = vadd.f32 0.4994258, %v5816_v27  ;;  %v10137_v54 = vor.u32 %v10933_v1, %v10134_v42 }
 0xa9a   : > { %6978 = vmatpush.bf16.msrb.mxu2 %v9837_v23  ;;  %v5599_v9 = vmul.f32 2.1237322e-06, %v14282_v47  ;;  %6969 = vmatpush.bf16.msrb.mxu1 %v9681_v24  ;;  %v10930_v35 = vld [vmem:[%s13716_s6 + $0x37c] sm:$0xf]  ;;  %v14292_v26 = vpop.eup %11327  ;;  %v5568_v29 = vadd.f32 1.1283791, %v5567_v12  ;;  %v14295_v50 = vadd.f32 %v5363_v5, %v5350_v7  ;;  %v10061_v18 = vor.u32 %v10916_v62, %v14275_v19 }
 0xa9b   : > { %6928 = vmatmul.bf16.vlgmr.msra.gmra.mxu2 %v14278_v31  ;;  %v5610_v51 = vmul.f32 3.8918573e-05, %v14282_v47  ;;  %6948 = vmatpush.bf16.msrb.mxu0 %v10241_v30  ;;  %v10958_v56 = vld [vmem:[%s13716_s6 + $0x458] sm:$0xf0]  ;;  %v5581_v21 = vmul.f32 %v14292_v26, %v14247_v14  ;;  %v5818_v49 = vmul.f32 %v5817_v45, %v14200_v3  ;;  %v9813_v23 = vor.u32 %v10852_v38, %v9810_v22  ;;  %v10122_v24 = vld [vmem:[%s13716_s6 + $0x384] sm:$0xf0] }
 0xa9c   : > { %6940 = vmatpush.bf16.msrb.mxu3 %v10073_v53  ;;  %v10849_v40 = vld [vmem:[%s13716_s6 + $0xf4] sm:$0xf]  ;;  %v9798_v13 = vld [vmem:[%s13716_s6 + $0xfc] sm:$0xf0]  ;;  %v5600_v57 = vadd.f32 0.00028619796, %v5599_v9  ;;  %v14307_v2 = vmul.f32 %v13683_v4, %v14295_v50  ;;  %v9957_v32 = vor.u32 %v10888_v41, %v9954_v0  ;;  %v5807_v1 = vmul.f32 %v5806_v20, %v14200_v3 }
 0xa9d   : > { %v5611_v8 = vadd.f32 0.001143296, %v5610_v51  ;;  %v10885_v61 = vld [vmem:[%s13716_s6 + $0x214] sm:$0xf]  ;;  %6970 = vmatmul.bf16.vlgmr.msrb.gmra.mxu1 %v13983_v25  ;;  %v5582_v17 = vsub.f32 1.0, %v5581_v21  ;;  %v14312_v36 = vadd.f32 1.0, %v5818_v49  ;;  %v10229_v12 = vor.u32 %v10958_v56, %v10228_v59 }
 0xa9e   : > { %7018 = vmatpush.bf16.msra.mxu1 %v10149_v52  ;;  %6979 = vmatpush.bf16.msrb.mxu2 %v9825_v39  ;;  %v9942_v46 = vld [vmem:[%s13716_s6 + $0x21c] sm:$0xf0]  ;;  %v10927_v52 = vld [vmem:[%s13716_s6 + $0x364] sm:$0xf]  ;;  %v5589_v53 = vand.u32 2147483647, %v14247_v14  ;;  %v5837_v42 = vmul.f32 %v14307_v2, %v14307_v2  ;;  %v10125_v19 = vor.u32 %v10930_v35, %v10122_v24  ;;  %v14323_v3 = vmul.f32 %v5568_v29, %v14097_v28 }
 0xa9f   : > { %v5612_v4 = vmul.f32 %v5611_v8, %v14282_v47  ;;  %v10110_v62 = vld [vmem:[%s13716_s6 + $0x36c] sm:$0xf0]  ;;  %v10216_v48 = vld [vmem:[%s13716_s6 + $0x438] sm:$0xf]  ;;  %v5583_v27 = vmul.f32 %v14292_v26, %v5582_v17  ;;  %v5591_v38 = vand.u32 2147483648, %v14247_v14  ;;  %11329 = vrcp.f32 %v14312_v36  ;;  %6949 = vmatpush.bf16.msrb.mxu0 %v10229_v12 }
 0xaa0   : > { %6941 = vmatpush.bf16.msrb.mxu3 %v10061_v18  ;;  %v10955_v22 = vld [vmem:[%s13716_s6 + $0x440] sm:$0xf0]  ;;  %v10846_v5 = vld [vmem:[%s13716_s6 + $0xdc] sm:$0xf]  ;;  %vm5586_vm2 = vweird.f32 %v14292_v26  ;;  %v5601_v7 = vmul.f32 %v5600_v57, %v14282_v47  ;;  %v14332_v39 = vmin.f32 %v5837_v42, 16.0  ;;  %v9801_v28 = vor.u32 %v10849_v40, %v9798_v13 }
 0xaa1   : > { %v9786_v30 = vld [vmem:[%s13716_s6 + $0xe4] sm:$0xf0]  ;;  %v10882_v41 = vld [vmem:[%s13716_s6 + $0x1fc] sm:$0xf]  ;;  %v5584_v0 = vadd.f32 %v14292_v26, %v5583_v27  ;;  %v5808_v59 = vadd.f32 1.1283791, %v5807_v1  ;;  %v9945_v45 = vor.u32 %v10885_v61, %v9942_v46  ;;  %v10113_v51 = vor.u32 %v10927_v52, %v10110_v62  ;;  %vm14348_vm5 = vmor %vm5585_vm3, %vm5586_vm2 }
 0xaa2   : > { %7019 = vmatpush.bf16.msra.mxu1 %v10137_v54  ;;  %6980 = vmatpush.bf16.msrb.mxu2 %v9813_v23  ;;  %v5613_v20 = vadd.f32 0.014752088, %v5612_v4  ;;  %v9930_v9 = vld [vmem:[%s13716_s6 + $0x204] sm:$0xf0]  ;;  %vm14339_vm4 = vcmp.eq.f32.partialorder %v5589_v53, 8.507059e+37  ;;  %v5592_v49 = vor.u32 1.1754944e-38, %v5591_v38  ;;  %v10217_v23 = vor.u32 %v10955_v22, %v10216_v48 }
 0xaa3   : > { %v5839_v29 = vmul.f32 2.1237322e-06, %v14332_v39  ;;  %v10924_v54 = vld [vmem:[%s13716_s6 + $0x34c] sm:$0xf]  ;;  %v10098_v56 = vld [vmem:[%s13716_s6 + $0x354] sm:$0xf0]  ;;  %v5588_v40 = vsel %vm14348_vm5, %v14292_v26, %v5584_v0  ;;  %v9789_v8 = vor.u32 %v10846_v5, %v9786_v30  ;;  %v14362_v17 = vmul.f32 %v5808_v59, %v14180_v6 }
 0xaa4   : > { %6990 = vmatpush.bf16.msra.mxu3 %v9957_v32  ;;  %v5614_v14 = vmul.f32 %v5613_v20, %v14282_v47  ;;  %v5850_v18 = vmul.f32 3.8918573e-05, %v14332_v39  ;;  %v10204_v24 = vld [vmem:[%s13716_s6 + $0x420] sm:$0xf]  ;;  %v5602_v13 = vadd.f32 0.0036580483, %v5601_v7  ;;  %6950 = vmatpush.bf16.msrb.mxu0 %v10217_v23  ;;  %v9933_v46 = vor.u32 %v10882_v41, %v9930_v9 }
 0xaa5   : > { %v5840_v57 = vadd.f32 0.00028619796, %v5839_v29  ;;  %v10952_v32 = vld [vmem:[%s13716_s6 + $0x428] sm:$0xf0]  ;;  %v14359_v61 = vpop.eup %11329  ;;  %v10843_v26 = vld [vmem:[%s13716_s6 + $0xc4] sm:$0xf]  ;;  %v10101_v27 = vor.u32 %v10924_v54, %v10098_v56  ;;  %vm5825_vm6 = vweird.f32 %v14312_v36 }
 0xaa6   : > { %7020 = vmatpush.bf16.msra.mxu1 %v10125_v19  ;;  %6981 = vmatpush.bf16.msrb.mxu2 %v9801_v28  ;;  %v5615_v1 = vadd.f32 0.112945676, %v5614_v14  ;;  %v5851_v12 = vadd.f32 0.001143296, %v5850_v18  ;;  %v5821_v52 = vmul.f32 %v14359_v61, %v14312_v36  ;;  %v5829_v53 = vand.u32 2147483647, %v14312_v36 }
 0xaa7   : > { %v5831_v4 = vand.u32 2147483648, %v14312_v36  ;;  %v5841_v42 = vmul.f32 %v5840_v57, %v14332_v39  ;;  %v9774_v6 = vld [vmem:[%s13716_s6 + $0xcc] sm:$0xf0]  ;;  %v5593_v19 = vsel %vm14339_vm4, %v5592_v49, %v5588_v40  ;;  %v10879_v38 = vld [vmem:[%s13716_s6 + $0x1e4] sm:$0xf]  ;;  %v5603_v28 = vmul.f32 %v5602_v13, %v14282_v47 }
 0xaa8   : > { %6991 = vmatpush.bf16.msra.mxu3 %v9945_v45  ;;  %v5616_v62 = vmul.f32 %v5615_v1, %v14282_v47  ;;  %v5852_v48 = vmul.f32 %v5851_v12, %v14332_v39  ;;  %v9918_v22 = vld [vmem:[%s13716_s6 + $0x1ec] sm:$0xf0]  ;;  %v10960_v5 = vld [vmem:[%s13716_s6 + $0x46c] sm:$0xf]  ;;  %v5822_v7 = vsub.f32 1.0, %v5821_v52  ;;  %v10205_v41 = vor.u32 %v10952_v32, %v10204_v24 }
 0xaa9   : > { %v5842_v30 = vadd.f32 0.0036580483, %v5841_v42  ;;  %v10242_v0 = vld [vmem:[%s13716_s6 + $0x474] sm:$0xf0]  ;;  %v9777_v45 = vor.u32 %v10843_v26, %v9774_v6  ;;  %v10921_v9 = vld [vmem:[%s13716_s6 + $0x334] sm:$0xf]  ;;  %v5594_v35 = vmul.f32 %v5593_v19, %v14323_v3  ;;  %vm5826_vm7 = vweird.f32 %v14359_v61 }
 0xaaa   : > { %7021 = vmatpush.bf16.msra.mxu1 %v10113_v51  ;;  %6982 = vmatpush.bf16.msrb.mxu2 %v9789_v8  ;;  %v5617_v59 = vadd.f32 0.4994258, %v5616_v62  ;;  %v5853_v20 = vadd.f32 0.014752088, %v5852_v48  ;;  %v5823_v29 = vmul.f32 %v14359_v61, %v5822_v7  ;;  %v10086_v54 = vld [vmem:[%s13716_s6 + $0x33c] sm:$0xf0]  ;;  %v9921_v18 = vor.u32 %v10879_v38, %v9918_v22  ;;  %vm14407_vm9 = vmor %vm5825_vm6, %vm5826_vm7 }
 0xaab   : > { %v5843_v51 = vmul.f32 %v5842_v30, %v14332_v39  ;;  %6951 = vmatpush.bf16.msrb.mxu0 %v10205_v41  ;;  %v10192_v56 = vld [vmem:[%s13716_s6 + $0x408] sm:$0xf]  ;;  %v10949_v21 = vld [vmem:[%s13716_s6 + $0x410] sm:$0xf0]  ;;  %vm14389_vm8 = vcmp.eq.f32.partialorder %v5829_v53, 8.507059e+37  ;;  %v5832_v13 = vor.u32 1.1754944e-38, %v5831_v4  ;;  %v10245_v8 = vor.u32 %v10960_v5, %v10242_v0 }
 0xaac   : > { %6992 = vmatpush.bf16.msra.mxu3 %v9933_v46  ;;  %v5618_v3 = vmul.f32 %v5617_v59, %v14282_v47  ;;  %v5854_v14 = vmul.f32 %v5853_v20, %v14332_v39  ;;  %v10876_v23 = vld [vmem:[%s13716_s6 + $0x1cc] sm:$0xf]  ;;  %v9906_v24 = vld [vmem:[%s13716_s6 + $0x1d4] sm:$0xf0]  ;;  %v5824_v40 = vadd.f32 %v14359_v61, %v5823_v29  ;;  %v5604_v57 = vadd.f32 0.05243302, %v5603_v28 }
 0xaad   : > { %v10957_v32 = vld [vmem:[%s13716_s6 + $0x454] sm:$0xf]  ;;  %v10230_v1 = vld [vmem:[%s13716_s6 + $0x45c] sm:$0xf0]  ;;  %v10918_v12 = vld [vmem:[%s13716_s6 + $0x31c] sm:$0xf]  ;;  %v10089_v42 = vor.u32 %v10921_v9, %v10086_v54  ;;  %v10193_v6 = vor.u32 %v10949_v21, %v10192_v56 }
 0xaae   : > { %7022 = vmatpush.bf16.msra.mxu1 %v10101_v27  ;;  %6983 = vmatpush.bf16.msrb.mxu2 %v9777_v45  ;;  %v10074_v46 = vld [vmem:[%s13716_s6 + $0x324] sm:$0xf0]  ;;  %v10180_v26 = vld [vmem:[%s13716_s6 + $0x3f0] sm:$0xf]  ;;  %v14411_v53 = vadd.f32 1.0, %v5618_v3  ;;  %v9665_v62 = vclamps-f32 %v5594_v35, 1.0  ;;  %v5828_v48 = vsel %vm14407_vm9, %v14359_v61, %v5824_v40  ;;  %v9909_v27 = vor.u32 %v10876_v23, %v9906_v24 }
 0xaaf   : > { %v5855_v4 = vadd.f32 0.112945676, %v5854_v14  ;;  %v10946_v19 = vld [vmem:[%s13716_s6 + $0x3f8] sm:$0xf0]  ;;  %v5844_v36 = vadd.f32 0.05243302, %v5843_v51  ;;  %v5833_v7 = vsel %vm14389_vm8, %v5832_v13, %v5828_v48  ;;  %6952 = vmatpush.bf16.msrb.mxu0 %v10193_v6  ;;  %v5605_v9 = vmul.f32 %v5604_v57, %v14282_v47 }
 0xab0   : > { %6993 = vmatpush.bf16.msra.mxu3 %v9921_v18  ;;  %v10873_v38 = vld [vmem:[%s13716_s6 + $0x1b4] sm:$0xf]  ;;  %v9894_v22 = vld [vmem:[%s13716_s6 + $0x1bc] sm:$0xf0]  ;;  %v10954_v5 = vld [vmem:[%s13716_s6 + $0x43c] sm:$0xf]  ;;  %11331 = vrcp.f32 %v14411_v53  ;;  %v5834_v41 = vmul.f32 %v5833_v7, %v14362_v17  ;;  %v10233_v35 = vor.u32 %v10957_v32, %v10230_v1  ;;  %v10077_v29 = vor.u32 %v10918_v12, %v10074_v46 }
 0xab1   : > { %v10218_v28 = vld [vmem:[%s13716_s6 + $0x444] sm:$0xf0]  ;;  %v10915_v61 = vld [vmem:[%s13716_s6 + $0x304] sm:$0xf]  ;;  %v10062_v30 = vld [vmem:[%s13716_s6 + $0x30c] sm:$0xf0]  ;;  %v5856_v0 = vmul.f32 %v5855_v4, %v14332_v39  ;;  %6984 = vmatmul.bf16.vlgmr.msrb.gmra.mxu2 %v14146_v58  ;;  %v10181_v51 = vor.u32 %v10946_v19, %v10180_v26  ;;  %v5845_v3 = vmul.f32 %v5844_v36, %v14332_v39  ;;  %v9897_v23 = vor.u32 %v10873_v38, %v9894_v22 }
 0xab2   : > { %7032 = vmatpush.bf16.msra.mxu2 %v10245_v8  ;;  %7023 = vmatpush.bf16.msra.mxu1 %v10089_v42  ;;  %v10168_v59 = vld [vmem:[%s13716_s6 + $0x3d8] sm:$0xf]  ;;  %v10943_v20 = vld [vmem:[%s13716_s6 + $0x3e0] sm:$0xf0]  ;;  %v9960_v45 = vld [vmem:[%s13716_s6 + $0x230] sm:$0xf]  ;;  %v10221_v24 = vor.u32 %v10954_v5, %v10218_v28  ;;  %v10065_v40 = vor.u32 %v10915_v61, %v10062_v30  ;;  %vm5625_vm11 = vweird.f32 %v14411_v53 }
 0xab3   : > { %v10890_v54 = vld [vmem:[%s13716_s6 + $0x238] sm:$0xf0]  ;;  %v9882_v17 = vld [vmem:[%s13716_s6 + $0x1a4] sm:$0xf0]  ;;  %v5881_v21 = vadd.f32 1.0, %v9665_v62  ;;  %v9671_v49 = vclamps-f32 %v5834_v41, 1.0  ;;  %6953 = vmatpush.bf16.msrb.mxu0 %v10181_v51  ;;  %v10169_v46 = vor.u32 %v10943_v20, %v10168_v59 }
 0xab4   : > { %6994 = vmatpush.bf16.msra.mxu3 %v9909_v27  ;;  %v10870_v56 = vld [vmem:[%s13716_s6 + $0x19c] sm:$0xf]  ;;  %v5857_v14 = vadd.f32 0.4994258, %v5856_v0  ;;  %v10951_v18 = vld [vmem:[%s13716_s6 + $0x424] sm:$0xf]  ;;  %v9961_v6 = vor.u32 %v10890_v54, %v9960_v45 }
 0xab5   : > { %v10206_v13 = vld [vmem:[%s13716_s6 + $0x42c] sm:$0xf0]  ;;  %v10156_v57 = vld [vmem:[%s13716_s6 + $0x3c0] sm:$0xf]  ;;  %v10940_v8 = vld [vmem:[%s13716_s6 + $0x3c8] sm:$0xf0]  ;;  %v9885_v19 = vor.u32 %v10870_v56, %v9882_v17 }
 0xab6   : > { %7033 = vmatpush.bf16.msra.mxu2 %v10233_v35  ;;  %7024 = vmatpush.bf16.msra.mxu1 %v10077_v29  ;;  %v5376_v32 = vmul.f32 0.5, %v14163_v44  ;;  %v5887_v1 = vadd.f32 1.0, %v9671_v49  ;;  %v5858_v12 = vmul.f32 %v5857_v14, %v14332_v39  ;;  %v9948_v26 = vld [vmem:[%s13716_s6 + $0x218] sm:$0xf]  ;;  %v10887_v52 = vld [vmem:[%s13716_s6 + $0x220] sm:$0xf0]  ;;  %v14445_v4 = vpop.eup %11331  ;;  %v5893_v44 = vmul.f32 %v5881_v21, %v14253_v60 }
 0xab7   : > { %v5606_v42 = vadd.f32 0.18741608, %v5605_v9  ;;  %v10912_v62 = vld [vmem:[%s13716_s6 + $0x2ec] sm:$0xf]  ;;  %v10050_v48 = vld [vmem:[%s13716_s6 + $0x2f4] sm:$0xf0]  ;;  %v5621_v27 = vmul.f32 %v14445_v4, %v14411_v53  ;;  %v10209_v61 = vor.u32 %v10951_v18, %v10206_v13  ;;  %6954 = vmatpush.bf16.msrb.mxu0 %v10169_v46  ;;  %v10157_v0 = vor.u32 %v10940_v8, %v10156_v57 }
 0xab8   : > { %6995 = vmatpush.bf16.msra.mxu3 %v9897_v23  ;;  %v5899_v36 = vmul.f32 %v5887_v1, %v5376_v32  ;;  %v10867_v38 = vld [vmem:[%s13716_s6 + $0x184] sm:$0xf]  ;;  %v9870_v22 = vld [vmem:[%s13716_s6 + $0x18c] sm:$0xf0]  ;;  %v5846_v7 = vadd.f32 0.18741608, %v5845_v3  ;;  %v9949_v59 = vor.u32 %v10887_v52, %v9948_v26  ;;  %v10053_v35 = vor.u32 %v10912_v62, %v10050_v48 }
 0xab9   : > { %v9768_v5 = vld [vmem:[%s13716_s6 + $0xb0] sm:$0xf]  ;;  %v14455_v28 = vadd.f32 1.0, %v5858_v12  ;;  %v10842_v30 = vld [vmem:[%s13716_s6 + $0xb8] sm:$0xf0]  ;;  %v5622_v60 = vsub.f32 1.0, %v5621_v27  ;;  %v5607_v9 = vmul.f32 %v5606_v42, %v14282_v47  ;;  %v9873_v29 = vor.u32 %v10867_v38, %v9870_v22 }
 0xaba   : > { %7034 = vmatpush.bf16.msra.mxu2 %v10221_v24  ;;  %7025 = vmatpush.bf16.msra.mxu1 %v10065_v40  ;;  %v14458_v41 = vpack.c.bf16 %v5899_v36, %v5893_v44  ;;  %v10948_v20 = vld [vmem:[%s13716_s6 + $0x40c] sm:$0xf]  ;;  %v10194_v45 = vld [vmem:[%s13716_s6 + $0x414] sm:$0xf0]  ;;  %v9936_v51 = vld [vmem:[%s13716_s6 + $0x200] sm:$0xf]  ;;  %vm5626_vm10 = vweird.f32 %v14445_v4  ;;  %v9769_v47 = vor.u32 %v10842_v30, %v9768_v5  ;;  %v5847_v40 = vmul.f32 %v5846_v7, %v14332_v39 }
 0xabb   : > { %11333 = vrcp.f32 %v14455_v28  ;;  %v10884_v54 = vld [vmem:[%s13716_s6 + $0x208] sm:$0xf0]  ;;  %v5623_v56 = vmul.f32 %v14445_v4, %v5622_v60  ;;  %v5629_v17 = vand.u32 2147483647, %v14411_v53  ;;  %v10909_v21 = vld [vmem:[%s13716_s6 + $0x2d4] sm:$0xf]  ;;  %v10197_v14 = vor.u32 %v10948_v20, %v10194_v45  ;;  %6955 = vmatpush.bf16.msrb.mxu0 %v10157_v0  ;;  %vm14483_vm12 = vmor %vm5625_vm11, %vm5626_vm10 }
 0xabc   : > { %6996 = vmatpush.bf16.msra.mxu3 %v9885_v19  ;;  %v10038_v49 = vld [vmem:[%s13716_s6 + $0x2dc] sm:$0xf0]  ;;  %v5631_v3 = vand.u32 2147483648, %v14411_v53  ;;  %v9756_v18 = vld [vmem:[%s13716_s6 + $0x98] sm:$0xf]  ;;  %v9937_v13 = vor.u32 %v10884_v54, %v9936_v51  ;;  %vm5865_vm15 = vweird.f32 %v14455_v28 }
 0xabd   : > { %6942 = vmatmul.bf16.vlgmr.msrb.gmra.mxu3 %v14458_v41  ;;  %7026 = vmatmul.bf16.vlgmr.msra.gmra.mxu1 %v14458_v41  ;;  %v10839_v23 = vld [vmem:[%s13716_s6 + $0xa0] sm:$0xf0]  ;;  %v5624_v24 = vadd.f32 %v14445_v4, %v5623_v56  ;;  %v10945_v57 = vld [vmem:[%s13716_s6 + $0x3f4] sm:$0xf]  ;;  %v10182_v8 = vld [vmem:[%s13716_s6 + $0x3fc] sm:$0xf0]  ;;  %v10041_v53 = vor.u32 %v10909_v21, %v10038_v49 }
 0xabe   : > { %7074 = vmatpush.bf16.msrb.mxu1 %v9961_v6  ;;  %7035 = vmatpush.bf16.msra.mxu2 %v10209_v61  ;;  %v9924_v1 = vld [vmem:[%s13716_s6 + $0x1e8] sm:$0xf]  ;;  %v10881_v39 = vld [vmem:[%s13716_s6 + $0x1f0] sm:$0xf0]  ;;  %v5608_v12 = vadd.f32 1.1283791, %v5607_v9  ;;  %v9757_v26 = vor.u32 %v10839_v23, %v9756_v18  ;;  %v10185_v62 = vor.u32 %v10945_v57, %v10182_v8 }
 0xabf   : > { %7004 = vmatpush.bf16.msra.mxu0 %v10053_v35  ;;  %v5628_v46 = vsel %vm14483_vm12, %v14445_v4, %v5624_v24  ;;  %v10906_v52 = vld [vmem:[%s13716_s6 + $0x2bc] sm:$0xf]  ;;  %v10026_v42 = vld [vmem:[%s13716_s6 + $0x2c4] sm:$0xf0]  ;;  %vm5630_vm13 = vcmp.eq.f32.partialorder %v5629_v17, 8.507059e+37  ;;  %v5632_v19 = vor.u32 1.1754944e-38, %v5631_v3  ;;  %v9925_v27 = vor.u32 %v10881_v39, %v9924_v1 }
 0xac0   : > { %6997 = vmatpush.bf16.msra.mxu3 %v9873_v29  ;;  %v9744_v48 = vld [vmem:[%s13716_s6 + $0x80] sm:$0xf]  ;;  %v10836_v44 = vld [vmem:[%s13716_s6 + $0x88] sm:$0xf0]  ;;  %v5848_v36 = vadd.f32 1.1283791, %v5847_v40  ;;  %v10029_v7 = vor.u32 %v10906_v52, %v10026_v42  ;;  %v5609_v0 = vmul.f32 %v5608_v12, %v14257_v34 }
 0xac1   : > { %v14494_v6 = vpop.eup %11333  ;;  %v10942_v38 = vld [vmem:[%s13716_s6 + $0x3dc] sm:$0xf]  ;;  %v10170_v22 = vld [vmem:[%s13716_s6 + $0x3e4] sm:$0xf0]  ;;  %v5633_v5 = vsel %vm5630_vm13, %v5632_v19, %v5628_v46  ;;  %v9912_v61 = vld [vmem:[%s13716_s6 + $0x1d0] sm:$0xf]  ;;  %v9745_v20 = vor.u32 %v10836_v44, %v9744_v48 }
 0xac2   : > { %7075 = vmatpush.bf16.msrb.mxu1 %v9949_v59  ;;  %7036 = vmatpush.bf16.msra.mxu2 %v10197_v14  ;;  %v5861_v4 = vmul.f32 %v14494_v6, %v14455_v28  ;;  %v10878_v30 = vld [vmem:[%s13716_s6 + $0x1d8] sm:$0xf0]  ;;  %v10903_v60 = vld [vmem:[%s13716_s6 + $0x2a4] sm:$0xf]  ;;  %v10014_v45 = vld [vmem:[%s13716_s6 + $0x2ac] sm:$0xf0]  ;;  %v10173_v51 = vor.u32 %v10942_v38, %v10170_v22  ;;  %v5634_v56 = vmul.f32 %v5633_v5, %v5609_v0  ;;  %vm5866_vm14 = vweird.f32 %v14494_v6 }
 0xac3   : > { %7005 = vmatpush.bf16.msra.mxu0 %v10041_v53  ;;  %v9732_v9 = vld [vmem:[%s13716_s6 + $0x68] sm:$0xf]  ;;  %v5869_v35 = vand.u32 2147483647, %v14455_v28  ;;  %v5871_v29 = vand.u32 2147483648, %v14455_v28  ;;  %v9913_v17 = vor.u32 %v10878_v30, %v9912_v61  ;;  %v10017_v3 = vor.u32 %v10903_v60, %v10014_v45  ;;  %vm5867_vm0 = vmor %vm5865_vm15, %vm5866_vm14 }
 0xac4   : > { %7046 = vmatpush.bf16.msrb.mxu3 %v9769_v47  ;;  %v5862_v59 = vsub.f32 1.0, %v5861_v4  ;;  %v10833_v54 = vld [vmem:[%s13716_s6 + $0x70] sm:$0xf0]  ;;  %v10939_v47 = vld [vmem:[%s13716_s6 + $0x3c4] sm:$0xf]  ;;  %v5849_v8 = vmul.f32 %v5848_v36, %v14307_v2  ;;  %v9666_v28 = vclamps-f32 %v5634_v56, 1.0 }
 0xac5   : > { %v10158_v21 = vld [vmem:[%s13716_s6 + $0x3cc] sm:$0xf0]  ;;  %v10914_v14 = vld [vmem:[%s13716_s6 + $0x2f8] sm:$0xf0]  ;;  %v9900_v18 = vld [vmem:[%s13716_s6 + $0x1b8] sm:$0xf]  ;;  %v9733_v40 = vor.u32 %v10833_v54, %v9732_v9 }
 0xac6   : > { %7076 = vmatpush.bf16.msrb.mxu1 %v9937_v13  ;;  %7037 = vmatpush.bf16.msra.mxu2 %v10185_v62  ;;  %v5863_v34 = vmul.f32 %v14494_v6, %v5862_v59  ;;  %v10056_v49 = vld [vmem:[%s13716_s6 + $0x2f0] sm:$0xf]  ;;  %v10875_v23 = vld [vmem:[%s13716_s6 + $0x1c0] sm:$0xf0]  ;;  %v10900_v13 = vld [vmem:[%s13716_s6 + $0x28c] sm:$0xf]  ;;  %v10161_v53 = vor.u32 %v10939_v47, %v10158_v21 }
 0xac7   : > { %7006 = vmatpush.bf16.msra.mxu0 %v10029_v7  ;;  %v10002_v57 = vld [vmem:[%s13716_s6 + $0x294] sm:$0xf0]  ;;  %vm5870_vm1 = vcmp.eq.f32.partialorder %v5869_v35, 8.507059e+37  ;;  %v5872_v32 = vor.u32 1.1754944e-38, %v5871_v29  ;;  %v9720_v1 = vld [vmem:[%s13716_s6 + $0x50] sm:$0xf]  ;;  %v10057_v46 = vor.u32 %v10914_v14, %v10056_v49  ;;  %v9901_v2 = vor.u32 %v10875_v23, %v9900_v18 }
 0xac8   : > { %7047 = vmatpush.bf16.msrb.mxu3 %v9757_v26  ;;  %v5864_v24 = vadd.f32 %v14494_v6, %v5863_v34  ;;  %v10830_v39 = vld [vmem:[%s13716_s6 + $0x58] sm:$0xf0]  ;;  %v10044_v26 = vld [vmem:[%s13716_s6 + $0x2d8] sm:$0xf]  ;;  %v10005_v42 = vor.u32 %v10900_v13, %v10002_v57  ;;  %v10911_v19 = vld [vmem:[%s13716_s6 + $0x2e0] sm:$0xf0] }
 0xac9   : > { %v9888_v62 = vld [vmem:[%s13716_s6 + $0x1a0] sm:$0xf]  ;;  %v10872_v48 = vld [vmem:[%s13716_s6 + $0x1a8] sm:$0xf0]  ;;  %v9721_v36 = vor.u32 %v10830_v39, %v9720_v1  ;;  %v10897_v4 = vld [vmem:[%s13716_s6 + $0x274] sm:$0xf]  ;;  %v10045_v7 = vor.u32 %v10911_v19, %v10044_v26 }
 0xaca   : > { %7077 = vmatpush.bf16.msrb.mxu1 %v9925_v27  ;;  %7038 = vmatpush.bf16.msra.mxu2 %v10173_v51  ;;  %v5868_v12 = vsel %vm5867_vm0, %v14494_v6, %v5864_v24  ;;  %v9990_v27 = vld [vmem:[%s13716_s6 + $0x27c] sm:$0xf0]  ;;  %v9708_v6 = vld [vmem:[%s13716_s6 + $0x38] sm:$0xf]  ;;  %v10827_v38 = vld [vmem:[%s13716_s6 + $0x40] sm:$0xf0]  ;;  %v9889_v61 = vor.u32 %v10872_v48, %v9888_v62 }
 0xacb   : > { %v5873_v52 = vsel %vm5870_vm1, %v5872_v32, %v5868_v12  ;;  %7007 = vmatpush.bf16.msra.mxu0 %v10017_v3  ;;  %v5882_v22 = vadd.f32 1.0, %v9666_v28  ;;  %v10032_v30 = vld [vmem:[%s13716_s6 + $0x2c0] sm:$0xf]  ;;  %v10908_v60 = vld [vmem:[%s13716_s6 + $0x2c8] sm:$0xf0]  ;;  %v5371_v0 = vmul.f32 0.5, %v14243_v55  ;;  %v9993_v59 = vor.u32 %v10897_v4, %v9990_v27 }
 0xacc   : > { %7048 = vmatpush.bf16.msrb.mxu3 %v9745_v20  ;;  %v5874_v44 = vmul.f32 %v5873_v52, %v5849_v8  ;;  %v9876_v20 = vld [vmem:[%s13716_s6 + $0x188] sm:$0xf]  ;;  %v10869_v45 = vld [vmem:[%s13716_s6 + $0x190] sm:$0xf0]  ;;  %v5377_v9 = vmul.f32 0.5, %v14295_v50  ;;  %v9709_v29 = vor.u32 %v10827_v38, %v9708_v6  ;;  %v10033_v56 = vor.u32 %v10908_v60, %v10032_v30 }
 0xacd   : > { %6998 = vmatmul.bf16.vlgmr.msra.gmra.mxu3 %v14189_v11  ;;  %v10894_v51 = vld [vmem:[%s13716_s6 + $0x25c] sm:$0xf]  ;;  %v9978_v54 = vld [vmem:[%s13716_s6 + $0x264] sm:$0xf0]  ;;  %v9696_v34 = vld [vmem:[%s13716_s6 + $0x20] sm:$0xf]  ;;  %v5894_v55 = vmul.f32 %v5882_v22, %v5371_v0  ;;  %v9877_v50 = vor.u32 %v10869_v45, %v9876_v20 }
 0xace   : > { %7078 = vmatpush.bf16.msrb.mxu1 %v9913_v17  ;;  %7039 = vmatpush.bf16.msra.mxu2 %v10161_v53  ;;  %v9672_v5 = vclamps-f32 %v5874_v44, 1.0  ;;  %v10824_v17 = vld [vmem:[%s13716_s6 + $0x28] sm:$0xf0]  ;;  %v9981_v21 = vor.u32 %v10894_v51, %v9978_v54  ;;  %v10020_v49 = vld [vmem:[%s13716_s6 + $0x2a8] sm:$0xf] }
 0xacf   : > { %7008 = vmatpush.bf16.msra.mxu0 %v10005_v42  ;;  %v10905_v3 = vld [vmem:[%s13716_s6 + $0x2b0] sm:$0xf0]  ;;  %v9697_v18 = vor.u32 %v10824_v17, %v9696_v34  ;;  %v10891_v23 = vld [vmem:[%s13716_s6 + $0x244] sm:$0xf]  ;;  %v9966_v24 = vld [vmem:[%s13716_s6 + $0x24c] sm:$0xf0] }
 0xad0   : > { %7049 = vmatpush.bf16.msrb.mxu3 %v9733_v40  ;;  %v5888_v35 = vadd.f32 1.0, %v9672_v5  ;;  %v9864_v40 = vld [vmem:[%s13716_s6 + $0x170] sm:$0xf]  ;;  %v10866_v13 = vld [vmem:[%s13716_s6 + $0x178] sm:$0xf0]  ;;  %v10021_v32 = vor.u32 %v10905_v3, %v10020_v49  ;;  %v9969_v39 = vor.u32 %v10891_v23, %v9966_v24 }
 0xad1   : > { %v9684_v57 = vld [vmem:[%s13716_s6 + $0x8] sm:$0xf]  ;;  %v10821_v8 = vld [vmem:[%s13716_s6 + $0x10] sm:$0xf0]  ;;  %v10152_v53 = vld [vmem:[%s13716_s6 + $0x3b0] sm:$0xf] }
 0xad2   : > { %7088 = vmatpush.bf16.msrb.mxu2 %v10057_v46  ;;  %7079 = vmatpush.bf16.msrb.mxu1 %v9901_v2  ;;  %v5900_v47 = vmul.f32 %v5888_v35, %v5377_v9  ;;  %v10938_v1 = vld [vmem:[%s13716_s6 + $0x3b8] sm:$0xf0]  ;;  %v10008_v28 = vld [vmem:[%s13716_s6 + $0x290] sm:$0xf]  ;;  %v9865_v46 = vor.u32 %v10866_v13, %v9864_v40  ;;  %v9685_v2 = vor.u32 %v10821_v8, %v9684_v57  ;;  %v9852_v52 = vld [vmem:[%s13716_s6 + $0x158] sm:$0xf] }
 0xad3   : > { %7009 = vmatpush.bf16.msra.mxu0 %v9993_v59  ;;  %v10902_v12 = vld [vmem:[%s13716_s6 + $0x298] sm:$0xf0]  ;;  %v10153_v26 = vor.u32 %v10938_v1, %v10152_v53  ;;  %v10863_v42 = vld [vmem:[%s13716_s6 + $0x160] sm:$0xf0]  ;;  %v10140_v62 = vld [vmem:[%s13716_s6 + $0x398] sm:$0xf] }
 0xad4   : > { %7050 = vmatpush.bf16.msrb.mxu3 %v9721_v36  ;;  %v14550_v14 = vpack.c.bf16 %v5900_v47, %v5894_v55  ;;  %v10009_v19 = vor.u32 %v10902_v12, %v10008_v28  ;;  %v10935_v48 = vld [vmem:[%s13716_s6 + $0x3a0] sm:$0xf0]  ;;  %v9996_v44 = vld [vmem:[%s13716_s6 + $0x278] sm:$0xf]  ;;  %v9853_v4 = vor.u32 %v10863_v42, %v9852_v52  ;;  %v9840_v27 = vld [vmem:[%s13716_s6 + $0x140] sm:$0xf] }
 0xad5   : > { %v10899_v36 = vld [vmem:[%s13716_s6 + $0x280] sm:$0xf0]  ;;  %v10860_v6 = vld [vmem:[%s13716_s6 + $0x148] sm:$0xf0]  ;;  %v10128_v22 = vld [vmem:[%s13716_s6 + $0x380] sm:$0xf] }
 0xad6   : > { %7089 = vmatpush.bf16.msrb.mxu2 %v10045_v7  ;;  %7080 = vmatpush.bf16.msrb.mxu1 %v9889_v61  ;;  %v9997_v38 = vor.u32 %v10899_v36, %v9996_v44  ;;  %v10932_v5 = vld [vmem:[%s13716_s6 + $0x388] sm:$0xf0]  ;;  %v9984_v7 = vld [vmem:[%s13716_s6 + $0x260] sm:$0xf]  ;;  %v9841_v30 = vor.u32 %v10860_v6, %v9840_v27  ;;  %v9828_v0 = vld [vmem:[%s13716_s6 + $0x128] sm:$0xf] }
 0xad7   : > { %7010 = vmatpush.bf16.msra.mxu0 %v9981_v21  ;;  %7040 = vmatmul.bf16.vlgmr.msra.gmra.mxu2 %v14550_v14  ;;  %v10896_v61 = vld [vmem:[%s13716_s6 + $0x268] sm:$0xf0]  ;;  %v10129_v60 = vor.u32 %v10932_v5, %v10128_v22  ;;  %v10857_v59 = vld [vmem:[%s13716_s6 + $0x130] sm:$0xf0]  ;;  %v10116_v45 = vld [vmem:[%s13716_s6 + $0x368] sm:$0xf] }
 0xad8   : > { %7051 = vmatpush.bf16.msrb.mxu3 %v9709_v29  ;;  %6956 = vmatmul.bf16.vlgmr.msrb.gmra.mxu0 %v14550_v14  ;;  %v9985_v20 = vor.u32 %v10896_v61, %v9984_v7  ;;  %v10929_v9 = vld [vmem:[%s13716_s6 + $0x370] sm:$0xf0]  ;;  %v9972_v35 = vld [vmem:[%s13716_s6 + $0x248] sm:$0xf]  ;;  %v9816_v54 = vld [vmem:[%s13716_s6 + $0x110] sm:$0xf] }
 0xad9   : > { %v10893_v29 = vld [vmem:[%s13716_s6 + $0x250] sm:$0xf0]  ;;  %v10117_v51 = vor.u32 %v10929_v9, %v10116_v45  ;;  %v10104_v17 = vld [vmem:[%s13716_s6 + $0x350] sm:$0xf]  ;;  %v10926_v55 = vld [vmem:[%s13716_s6 + $0x358] sm:$0xf0] }
 0xada   : > { %7090 = vmatpush.bf16.msrb.mxu2 %v10033_v56  ;;  %7081 = vmatpush.bf16.msrb.mxu1 %v9877_v50  ;;  %v10854_v56 = vld [vmem:[%s13716_s6 + $0x118] sm:$0xf0]  ;;  %v9973_v34 = vor.u32 %v10893_v29, %v9972_v35  ;;  %v10105_v50 = vor.u32 %v10926_v55, %v10104_v17  ;;  %v9804_v21 = vld [vmem:[%s13716_s6 + $0xf8] sm:$0xf]  ;;  %v10851_v49 = vld [vmem:[%s13716_s6 + $0x100] sm:$0xf0] }
 0xadb   : > { %7011 = vmatpush.bf16.msra.mxu0 %v9969_v39  ;;  %v9817_v47 = vor.u32 %v10854_v56, %v9816_v54  ;;  %v10092_v3 = vld [vmem:[%s13716_s6 + $0x338] sm:$0xf]  ;;  %v9805_v23 = vor.u32 %v10851_v49, %v9804_v21  ;;  %v9792_v40 = vld [vmem:[%s13716_s6 + $0xe0] sm:$0xf]  ;;  %v10848_v13 = vld [vmem:[%s13716_s6 + $0xe8] sm:$0xf0] }
 0xadc   : > { %7052 = vmatpush.bf16.msrb.mxu3 %v9697_v18  ;;  %v10923_v18 = vld [vmem:[%s13716_s6 + $0x340] sm:$0xf0]  ;;  %v10080_v57 = vld [vmem:[%s13716_s6 + $0x320] sm:$0xf]  ;;  %v10920_v8 = vld [vmem:[%s13716_s6 + $0x328] sm:$0xf0] }
 0xadd   : > { %7082 = vmatmul.bf16.vlgmr.msrb.gmra.mxu1 %v14189_v11  ;;  %v10141_v11 = vor.u32 %v10935_v48, %v10140_v62  ;;  %v10093_v24 = vor.u32 %v10923_v18, %v10092_v3  ;;  %v10081_v53 = vor.u32 %v10920_v8, %v10080_v57  ;;  %v9780_v1 = vld [vmem:[%s13716_s6 + $0xc8] sm:$0xf]  ;;  %v10845_v39 = vld [vmem:[%s13716_s6 + $0xd0] sm:$0xf0]  ;;  %v10248_v28 = vld [vmem:[%s13716_s6 + $0x470] sm:$0xf] }
 0xade   : > { %7091 = vmatpush.bf16.msrb.mxu2 %v10021_v32  ;;  %v9793_v32 = vor.u32 %v10848_v13, %v9792_v40  ;;  %v10962_v12 = vld [vmem:[%s13716_s6 + $0x478] sm:$0xf0]  ;;  %v10236_v42 = vld [vmem:[%s13716_s6 + $0x458] sm:$0xf]  ;;  %v10224_v48 = vld [vmem:[%s13716_s6 + $0x440] sm:$0xf] }
 0xadf   : > { %7060 = vmatpush.bf16.msrb.mxu0 %v9865_v46  ;;  %v10917_v46 = vld [vmem:[%s13716_s6 + $0x310] sm:$0xf0]  ;;  %v10956_v44 = vld [vmem:[%s13716_s6 + $0x448] sm:$0xf0]  ;;  %v10200_v6 = vld [vmem:[%s13716_s6 + $0x410] sm:$0xf] }
 0xae0   : > { %7053 = vmatpush.bf16.msrb.mxu3 %v9685_v2  ;;  %v9781_v2 = vor.u32 %v10845_v39, %v9780_v1  ;;  %v10225_v36 = vor.u32 %v10956_v44, %v10224_v48  ;;  %v10188_v5 = vld [vmem:[%s13716_s6 + $0x3f8] sm:$0xf]  ;;  %v10947_v7 = vld [vmem:[%s13716_s6 + $0x400] sm:$0xf0]  ;;  %v10176_v61 = vld [vmem:[%s13716_s6 + $0x3e0] sm:$0xf] }
 0xae1   : > { %v6102_v13 = vld [vmem:[%s6101_s27] sm:$0x7] }
 0xae2   : > { %7092 = vmatpush.bf16.msrb.mxu2 %v10009_v19  ;;  %v10959_v19 = vld [vmem:[%s13716_s6 + $0x460] sm:$0xf0]  ;;  %v6105_v8 = vperm.slane %v6102_v13, 1  ;;  %v6106_v1 = vperm.slane %v6102_v13, 2  ;;  %v6104_v39 = vperm.slane %v6102_v13, 0 }
 0xae3   : > { %7054 = vmatmul.bf16.vlgmr.msrb.gmra.mxu3 %v13983_v25  ;;  %7061 = vmatpush.bf16.msrb.mxu0 %v9853_v4  ;;  %v9829_v25 = vor.u32 %v10857_v59, %v9828_v0  ;;  %v10237_v62 = vor.u32 %v10959_v19, %v10236_v42  ;;  %v10212_v4 = vld [vmem:[%s13716_s6 + $0x428] sm:$0xf]  ;;  %v10941_v0 = vld [vmem:[%s13716_s6 + $0x3d0] sm:$0xf0] }
 0xae4   : > { %7102 = vmatpush.bf16.msra.mxu3 %v10153_v26  ;;  %v10249_v26 = vor.u32 %v10962_v12, %v10248_v28 }
 0xae6   : > { %7093 = vmatpush.bf16.msrb.mxu2 %v9997_v38  ;;  %v10950_v38 = vld [vmem:[%s13716_s6 + $0x418] sm:$0xf0] }
 0xae7   : > { %7062 = vmatpush.bf16.msrb.mxu0 %v9841_v30  ;;  %v10201_v22 = vor.u32 %v10950_v38, %v10200_v6  ;;  %v10944_v30 = vld [vmem:[%s13716_s6 + $0x3e8] sm:$0xf0] }
 0xae8   : > { %7103 = vmatpush.bf16.msra.mxu3 %v10141_v11  ;;  %7012 = vmatmul.bf16.vlgmr.msra.gmra.mxu0 %v14278_v31  ;;  %v10953_v11 = vld [vmem:[%s13716_s6 + $0x430] sm:$0xf0] }
 0xae9   : > { %v10213_v27 = vor.u32 %v10953_v11, %v10212_v4 }
 0xaea   : > { %7094 = vmatpush.bf16.msrb.mxu2 %v9985_v20 }
 0xaeb   : > { %7063 = vmatpush.bf16.msrb.mxu0 %v9829_v25 }
 0xaec   : > { %7104 = vmatpush.bf16.msra.mxu3 %v10129_v60  ;;  %v10164_v60 = vld [vmem:[%s13716_s6 + $0x3c8] sm:$0xf] }
 0xaed   : > { %v10165_v59 = vor.u32 %v10941_v0, %v10164_v60 }
 0xaee   : > { %7095 = vmatpush.bf16.msrb.mxu2 %v9973_v34 }
 0xaef   : > { %7064 = vmatpush.bf16.msrb.mxu0 %v9817_v47 }
 0xaf0   : > { %7105 = vmatpush.bf16.msra.mxu3 %v10117_v51 }
 0xaf1   : > { %7096 = vmatmul.bf16.vlgmr.msrb.gmra.mxu2 %v14278_v31  ;;  %v10068_v31 = vld [vmem:[%s13716_s6 + $0x308] sm:$0xf] }
 0xaf2   : > { %v10069_v52 = vor.u32 %v10917_v46, %v10068_v31 }
 0xaf3   : > { %7065 = vmatpush.bf16.msrb.mxu0 %v9805_v23 }
 0xaf4   : > { %7106 = vmatpush.bf16.msra.mxu3 %v10105_v50 }
 0xaf7   : > { %7066 = vmatpush.bf16.msrb.mxu0 %v9793_v32 }
 0xaf8   : > { %7107 = vmatpush.bf16.msra.mxu3 %v10093_v24 }
 0xafb   : > { %7067 = vmatpush.bf16.msrb.mxu0 %v9781_v2 }
 0xafc   : > { %7108 = vmatpush.bf16.msra.mxu3 %v10081_v53 }
 0xafe   : > { %7068 = vmatmul.bf16.vlgmr.msrb.gmra.mxu0 %v14146_v58  ;;  %v10189_v58 = vor.u32 %v10947_v7, %v10188_v5 }
 0xaff   : > { %7116 = vmatpush.bf16.msra.mxu0 %v10249_v26 }
 0xb00   : > { %7109 = vmatpush.bf16.msra.mxu3 %v10069_v52 }
 0xb03   : > { %7110 = vmatmul.bf16.vlgmr.msra.gmra.mxu3 %v14458_v41  ;;  %7117 = vmatpush.bf16.msra.mxu0 %v10237_v62  ;;  %v10177_v41 = vor.u32 %v10944_v30, %v10176_v61  ;;  %v6887_v20 = vpop.f32.mrf.mxu3 }
 0xb04   : > { %v6888_v26 = vadd.f32 %v6887_v20, %v6104_v39 }
 0xb06   : > { %v6915_v35 = vpop.f32.mrf.mxu1 }
 0xb07   : > { %7118 = vmatpush.bf16.msra.mxu0 %v10225_v36 }
 0xb0b   : > { %7119 = vmatpush.bf16.msra.mxu0 %v10213_v27  ;;  %v6889_v9 = vpop.f32.mrf.mxu3 }
 0xb0c   : > { %v6901_v45 = vpop.f32.mrf.mxu0 }
 0xb0d   : > { %v6902_v62 = vadd.f32 %v6901_v45, %v6888_v26 }
 0xb0e   : > { %v6917_v54 = vpop.f32.mrf.mxu1 }
 0xb0f   : > { %7120 = vmatpush.bf16.msra.mxu0 %v10201_v22  ;;  %v6916_v36 = vadd.f32 %v6915_v35, %v6902_v62 }
 0xb13   : > { %7121 = vmatpush.bf16.msra.mxu0 %v10189_v58  ;;  %v6890_v58 = vadd.f32 %v6889_v9, %v6104_v39 }
 0xb14   : > { %v6903_v29 = vpop.f32.mrf.mxu0 }
 0xb15   : > { %v6904_v20 = vadd.f32 %v6903_v29, %v6890_v58 }
 0xb17   : > { %7122 = vmatpush.bf16.msra.mxu0 %v10177_v41 }
 0xb1a   : > { %v6971_v55 = vpop.f32.mrf.mxu1 }
 0xb1b   : > { %7123 = vmatpush.bf16.msra.mxu0 %v10165_v59  ;;  %v6972_v53 = vadd.f32 %v6971_v55, %v6105_v8  ;;  %v6918_v55 = vadd.f32 %v6917_v54, %v6904_v20 }
 0xb1e   : > { %7124 = vmatmul.bf16.vlgmr.msra.gmra.mxu0 %v14550_v14  ;;  %v6929_v25 = vpop.f32.mrf.mxu2 }
 0xb1f   : > { %v6930_v6 = vadd.f32 %v6929_v25, %v6916_v36 }
 0xb22   : > { %v6973_v49 = vpop.f32.mrf.mxu1 }
 0xb23   : > { %v6974_v44 = vadd.f32 %v6973_v49, %v6105_v8 }
 0xb26   : > { %v6931_v34 = vpop.f32.mrf.mxu2 }
 0xb34   : > { %v6985_v50 = vpop.f32.mrf.mxu2 }
 0xb35   : > { %v6986_v31 = vadd.f32 %v6985_v50, %v6972_v53 }
 0xb3a   : > { %v7027_v23 = vpop.f32.mrf.mxu1 }
 0xb3c   : > { %v6987_v14 = vpop.f32.mrf.mxu2 }
 0xb3d   : > { %v6988_v4 = vadd.f32 %v6987_v14, %v6974_v44 }
 0xb40   : > { %v6943_v51 = vpop.f32.mrf.mxu3 }
 0xb41   : > { %v6944_v61 = vadd.f32 %v6943_v51, %v6930_v6 }
 0xb42   : > { %v7029_v32 = vpop.f32.mrf.mxu1 }
 0xb48   : > { %v6945_v17 = vpop.f32.mrf.mxu3 }
 0xb50   : > { %v6999_v21 = vpop.f32.mrf.mxu3 }
 0xb51   : > { %v7000_v46 = vadd.f32 %v6999_v21, %v6986_v31 }
 0xb55   : > { %v6957_v56 = vpop.f32.mrf.mxu0 }
 0xb56   : > { %v6958_v45 = vadd.f32 %v6957_v56, %v6944_v61 }
 0xb58   : > { %v7001_v18 = vpop.f32.mrf.mxu3 }
 0xb59   : > { %v7002_v5 = vadd.f32 %v7001_v18, %v6988_v4  ;;  %v7130_v18 = vadd.f32 %v6958_v45, %v13479_v37 }
 0xb5a   : > { %v7041_v24 = vpop.f32.mrf.mxu2  ;;  %v7083_v48 = vpop.f32.mrf.mxu1 }
 0xb5d   : > { %v14621_v47 = vpop.f32.mrf.mxu0 }
 0xb62   : > { %v7043_v28 = vpop.f32.mrf.mxu2  ;;  %v7085_v50 = vpop.f32.mrf.mxu1 }
 0xb65   : > { %v7013_v3 = vpop.f32.mrf.mxu0 }
 0xb66   : > { %v7055_v57 = vpop.f32.mrf.mxu3  ;;  %v7014_v42 = vadd.f32 %v7013_v3, %v7000_v46  ;;  %v6932_v3 = vadd.f32 %v6931_v34, %v6918_v55 }
 0xb67   : > { %v7056_v2 = vadd.f32 %v7055_v57, %v6106_v1 }
 0xb68   : > { %v7028_v11 = vadd.f32 %v7027_v23, %v7014_v42  ;;  %v6946_v51 = vadd.f32 %v6945_v17, %v6932_v3 }
 0xb6a   : > { %v7042_v41 = vadd.f32 %v7041_v24, %v7028_v11  ;;  %v6960_v54 = vadd.f32 %v14621_v47, %v6946_v51 }
 0xb6c   : > { %v7131_v25 = vadd.f32 %v7042_v41, %v13481_v15  ;;  %v7137_v41 = vld [vmem:[%s7136_s23] sm:$0x7] }
 0xb6d   : > { %v7015_v40 = vpop.f32.mrf.mxu0  ;;  %v7201_v55 = vperm.slane %v7137_v41, 0 }
 0xb6e   : > { %v7057_v52 = vpop.f32.mrf.mxu3  ;;  %v7016_v60 = vadd.f32 %v7015_v40, %v7002_v5  ;;  %v7140_v29 = vadd.f32 %v7131_v25, %v7130_v18 }
 0xb6f   : > { %v7058_v7 = vadd.f32 %v7057_v52, %v6106_v1 }
 0xb70   : > { %v7030_v35 = vadd.f32 %v7029_v32, %v7016_v60  ;;  %v7133_v32 = vadd.f32 %v6960_v54, %v13488_v63 }
 0xb72   : > { %v7044_v24 = vadd.f32 %v7043_v28, %v7030_v35  ;;  %v7203_v35 = vperm.slane %v7137_v41, 2 }
 0xb74   : > { %v7097_v38 = vpop.f32.mrf.mxu2  ;;  %v7134_v15 = vadd.f32 %v7044_v24, %v13490_v10 }
 0xb76   : > { %v7144_v53 = vadd.f32 %v7134_v15, %v7133_v32 }
 0xb7b   : > { %v7069_v12 = vpop.f32.mrf.mxu0 }
 0xb7c   : > { %v7070_v19 = vadd.f32 %v7069_v12, %v7056_v2  ;;  %v7099_v23 = vpop.f32.mrf.mxu2 }
 0xb7e   : > { %v7084_v27 = vadd.f32 %v7083_v48, %v7070_v19 }
 0xb80   : > { %v7098_v0 = vadd.f32 %v7097_v38, %v7084_v27 }
 0xb83   : > { %v7071_v22 = vpop.f32.mrf.mxu0 }
 0xb84   : > { %v7072_v59 = vadd.f32 %v7071_v22, %v7058_v7 }
 0xb86   : > { %v7111_v30 = vpop.f32.mrf.mxu3  ;;  %v7086_v49 = vadd.f32 %v7085_v50, %v7072_v59  ;;  %v7139_v59 = vld [vmem:[%s7138_s9] sm:$0x7]  ;;  %v7202_v50 = vperm.slane %v7137_v41, 1 }
 0xb87   : > { %v7112_v21 = vadd.f32 %v7111_v30, %v7098_v0  ;;  %v7216_v3 = vperm.slane %v7139_v59, 2 }
 0xb88   : > { %v7100_v40 = vadd.f32 %v7099_v23, %v7086_v49 }
 0xb8e   : > { %v7113_v56 = vpop.f32.mrf.mxu3 }
 0xb8f   : > { %v7114_v8 = vadd.f32 %v7113_v56, %v7100_v40 }
 0xb9b   : > { %v7125_v14 = vpop.f32.mrf.mxu0 }
 0xb9c   : > { %v7126_v9 = vadd.f32 %v7125_v14, %v7112_v21  ;;  %v7215_v21 = vperm.slane %v7139_v59, 1 }
 0xb9e   : > { %v7132_v13 = vadd.f32 %v7126_v9, %v13486_v43 }
 0xba0   : > { %v7141_v57 = vadd.f32 %v7140_v29, %v7132_v13 }
 0xba2   : > { %7142 = vadd.xlane.f32.xlu1 %v7141_v57 }
 0xba3   : > { %v7127_v34 = vpop.f32.mrf.mxu0 }
 0xba4   : > { %v7128_v37 = vadd.f32 %v7127_v34, %v7114_v8 }
 0xba6   : > { %v7135_v17 = vadd.f32 %v7128_v37, %v13492_v16 }
 0xba8   : > { %v7145_v1 = vadd.f32 %v7144_v53, %v7135_v17 }
 0xbaa   : > { %7146 = vadd.xlane.f32.xlu2 %v7145_v1 }
 0xc15   : > { %v7143_v39 = vpop.xlane.xlu1 %7142 }
 0xc16   : > { %v7148_v43 = vmul.f32 %v7143_v39, %v13337_v33 }
 0xc18   : > { %v7150_v28 = vsub.f32 %v7130_v18, %v7148_v43  ;;  %v7151_v12 = vsub.f32 %v7131_v25, %v7148_v43  ;;  %v7152_v47 = vsub.f32 %v7132_v13, %v7148_v43 }
 0xc1a   : > { %v7156_v31 = vmul.f32 %v7150_v28, %v7150_v28  ;;  %v7157_v46 = vmul.f32 %v7151_v12, %v7151_v12  ;;  %v7158_v2 = vmul.f32 %v7152_v47, %v7152_v47 }
 0xc1c   : > { %v7162_v26 = vadd.f32 %v7157_v46, %v7156_v31 }
 0xc1d   : > { %v7147_v10 = vpop.xlane.xlu2 %7146 }
 0xc1e   : > { %v7149_v52 = vmul.f32 %v7147_v10, %v13337_v33  ;;  %v7163_v63 = vadd.f32 %v7162_v26, %v7158_v2 }
 0xc20   : > { %v7153_v42 = vsub.f32 %v7133_v32, %v7149_v52  ;;  %v7154_v19 = vsub.f32 %v7134_v15, %v7149_v52  ;;  %v7155_v16 = vsub.f32 %v7135_v17, %v7149_v52  ;;  %7164 = vadd.xlane.f32.xlu0 %v7163_v63 }
 0xc22   : > { %v7159_v62 = vmul.f32 %v7153_v42, %v7153_v42  ;;  %v7160_v48 = vmul.f32 %v7154_v19, %v7154_v19  ;;  %v7161_v44 = vmul.f32 %v7155_v16, %v7155_v16 }
 0xc24   : > { %v7166_v36 = vadd.f32 %v7160_v48, %v7159_v62 }
 0xc26   : > { %v7167_v4 = vadd.f32 %v7166_v36, %v7161_v44 }
 0xc28   : > { %7168 = vadd.xlane.f32.xlu1 %v7167_v4 }
 0xc93   : > { %v7165_v11 = vpop.xlane.xlu0 %7164 }
 0xc94   : > { %v7170_v27 = vmul.f32 %v7165_v11, %v13337_v33 }
 0xc96   : > { %v7172_v6 = vadd.f32 1e-12, %v7170_v27 }
 0xc98   : > { %11335 = vrsqrt.f32 %v7172_v6  ;;  %vm7180_vm3 = vweird.f32 %v7172_v6 }
 0xc9b   : > { %v7169_v38 = vpop.xlane.xlu1 %7168 }
 0xc9c   : > { %v7171_v22 = vmul.f32 %v7169_v38, %v13337_v33  ;;  %v7214_v33 = vperm.slane %v7139_v59, 0 }
 0xc9e   : > { %v11336_v5 = vpop.eup %11335  ;;  %v7173_v7 = vadd.f32 1e-12, %v7171_v22 }
 0xc9f   : > { %v7175_v58 = vmul.f32 %v11336_v5, %v7172_v6  ;;  %vm7181_vm2 = vweird.f32 %v11336_v5 }
 0xca0   : > { %11337 = vrsqrt.f32 %v7173_v7  ;;  %vm7182_vm4 = vmor %vm7180_vm3, %vm7181_vm2  ;;  %vm7190_vm6 = vweird.f32 %v7173_v7 }
 0xca1   : > { %v7176_v61 = vmul.f32 %v11336_v5, %v7175_v58 }
 0xca3   : > { %v7177_v30 = vmul.f32 0.5, %v7176_v61 }
 0xca5   : > { %v7178_v60 = vsub.f32 1.5, %v7177_v30 }
 0xca6   : > { %v11338_v0 = vpop.eup %11337 }
 0xca7   : > { %v7179_v20 = vmul.f32 %v11336_v5, %v7178_v60  ;;  %v7185_v45 = vmul.f32 %v11338_v0, %v7173_v7  ;;  %vm7191_vm5 = vweird.f32 %v11338_v0 }
 0xca8   : > { %vm7192_vm7 = vmor %vm7190_vm6, %vm7191_vm5 }
 0xca9   : > { %v7183_v49 = vsel %vm7182_vm4, %v11336_v5, %v7179_v20  ;;  %v7186_v25 = vmul.f32 %v11338_v0, %v7185_v45 }
 0xcaa   : > { %v7194_v14 = vmul.f32 %v7183_v49, %v7150_v28  ;;  %v7195_v18 = vmul.f32 %v7183_v49, %v7151_v12  ;;  %v7196_v9 = vmul.f32 %v7183_v49, %v7152_v47 }
 0xcab   : > { %v7187_v51 = vmul.f32 0.5, %v7186_v25 }
 0xcac   : > { %v7207_v23 = vmul.f32 %v7201_v55, %v7194_v14  ;;  %v7208_v24 = vmul.f32 %v7202_v50, %v7195_v18  ;;  %v7209_v40 = vmul.f32 %v7203_v35, %v7196_v9 }
 0xcad   : > { %v7188_v13 = vsub.f32 1.5, %v7187_v51 }
 0xcae   : > { %v14637_v29 = vadd.f32 %v7214_v33, %v7207_v23  ;;  %v14639_v56 = vadd.f32 %v7215_v21, %v7208_v24  ;;  %v14641_v54 = vadd.f32 %v7216_v3, %v7209_v40 }
 0xcaf   : > { %v7189_v57 = vmul.f32 %v11338_v0, %v7188_v13 }
 0xcb0   : > { %7226 = vst [vmem:[#allocation2 + $0x28] sm:$0xff] %v14637_v29 }
 0xcb1   : > { %7227 = vst [vmem:[#allocation2 + $0x10] sm:$0xff] %v14639_v56  ;;  %v7193_v8 = vsel %vm7192_vm7, %v11338_v0, %v7189_v57 }
 0xcb2   : > { %7228 = vst [vmem:[#allocation2 + $0x8] sm:$0xff] %v14641_v54  ;;  %v7197_v15 = vmul.f32 %v7193_v8, %v7153_v42  ;;  %v7198_v34 = vmul.f32 %v7193_v8, %v7154_v19  ;;  %v7199_v32 = vmul.f32 %v7193_v8, %v7155_v16 }
 0xcb4   : > { %v7210_v37 = vmul.f32 %v7201_v55, %v7197_v15  ;;  %v7211_v17 = vmul.f32 %v7202_v50, %v7198_v34  ;;  %v7212_v53 = vmul.f32 %v7203_v35, %v7199_v32 }
 0xcb6   : > { %v7223_v1 = vadd.f32 %v7214_v33, %v7210_v37  ;;  %v7224_v39 = vadd.f32 %v7215_v21, %v7211_v17  ;;  %v7225_v43 = vadd.f32 %v7216_v3, %v7212_v53  ;;  %7235 = sbr.rel (%p10250_p8) target bundleno = 3571 (0xdf3), region = 188 }
 0xcb8   : > { %7229 = vst [vmem:[#allocation2] sm:$0xff] %v7223_v1 }
 0xcb9   : > { %7230 = vst [vmem:[#allocation2 + $0x18] sm:$0xff] %v7224_v39 }
 0xcba   : > { %7231 = vst [vmem:[#allocation2 + $0x20] sm:$0xff] %v7225_v43 }
 0xcbb   : > { %v10970_v28 = vld [vmem:[#allocation29 + $0x38] sm:$0xff]  ;;  %v10969_v31 = vld [vmem:[#allocation29 + $0x30] sm:$0xff]  ;;  %v10968_v26 = vld [vmem:[#allocation29 + $0x28] sm:$0xff]  ;;  %v7239_v36 = vpack.c.bf16 %v7223_v1, %v7223_v1  ;;  %v7240_v4 = vpack.c.bf16 %v7224_v39, %v7224_v39  ;;  %v7241_v27 = vpack.c.bf16 %v7225_v43, %v7225_v43  ;;  %v7236_v5 = vpack.c.bf16 %v14637_v29, %v14637_v29 }
 0xcbc   : > { %v10978_v12 = vld [vmem:[#allocation29 + $0x78] sm:$0xff]  ;;  %7463 = vmatpush.bf16.msra.mxu0 %v10970_v28  ;;  %v10977_v46 = vld [vmem:[#allocation29 + $0x70] sm:$0xff]  ;;  %v10976_v10 = vld [vmem:[#allocation29 + $0x68] sm:$0xff]  ;;  %v7237_v58 = vpack.c.bf16 %v14639_v56, %v14639_v56  ;;  %v7238_v41 = vpack.c.bf16 %v14641_v54, %v14641_v54  ;;  %vm7307_vm8 = vcmask 1041409  }
 0xcbd   : > { %v10986_v47 = vld [vmem:[#allocation29 + $0xb8] sm:$0xff]  ;;  %7476 = vmatpush.bf16.msra.mxu1 %v10978_v12  ;;  %v10985_v2 = vld [vmem:[#allocation29 + $0xb0] sm:$0xff]  ;;  %v10984_v52 = vld [vmem:[#allocation29 + $0xa8] sm:$0xff]  ;;  %v7303_v7 = vunpack.c.l.b16 %v7239_v36  ;;  %v7304_v61 = vunpack.c.l.b16 %v7240_v4  ;;  %v7305_v60 = vunpack.c.l.b16 %v7241_v27  ;;  %v7300_v45 = vunpack.c.l.b16 %v7236_v5 }
 0xcbe   : > { %7489 = vmatpush.bf16.msra.mxu2 %v10986_v47  ;;  %v10994_v63 = vld [vmem:[#allocation32 + $0x38] sm:$0xff]  ;;  %v10993_v62 = vld [vmem:[#allocation32 + $0x30] sm:$0xff]  ;;  %v10992_v6 = vld [vmem:[#allocation32 + $0x28] sm:$0xff]  ;;  %v7301_v50 = vunpack.c.l.b16 %v7237_v58  ;;  %v7302_v21 = vunpack.c.l.b16 %v7238_v41 }
 0xcbf   : > { %v10967_v42 = vld [vmem:[#allocation29 + $0x20] sm:$0xff]  ;;  %7572 = vmatpush.bf16.msra.mxu3 %v10994_v63  ;;  %v10966_v48 = vld [vmem:[#allocation29 + $0x18] sm:$0xff]  ;;  %v10965_v38 = vld [vmem:[#allocation29 + $0x10] sm:$0xff]  ;;  %v7306_v55 = vrot.slane %v7303_v7, 7  ;;  %v7309_v35 = vrot.slane %v7304_v61, 7  ;;  %v7311_v49 = vrot.slane %v7305_v60, 7 }
 0xcc0   : > { %7464 = vmatpush.bf16.msra.mxu0 %v10969_v31  ;;  %v10975_v19 = vld [vmem:[#allocation29 + $0x60] sm:$0xff]  ;;  %v10974_v44 = vld [vmem:[#allocation29 + $0x58] sm:$0xff]  ;;  %v10973_v22 = vld [vmem:[#allocation29 + $0x50] sm:$0xff] }
 0xcc1   : > { %7477 = vmatpush.bf16.msra.mxu1 %v10977_v46  ;;  %v10983_v16 = vld [vmem:[#allocation29 + $0xa0] sm:$0xff]  ;;  %v10982_v11 = vld [vmem:[#allocation29 + $0x98] sm:$0xff]  ;;  %v10981_v30 = vld [vmem:[#allocation29 + $0x90] sm:$0xff]  ;;  %v7308_v18 = vsel %vm7307_vm8, %v7306_v55, %v7300_v45  ;;  %v7310_v9 = vsel %vm7307_vm8, %v7309_v35, %v7301_v50  ;;  %v7312_v23 = vsel %vm7307_vm8, %v7311_v49, %v7302_v21 }
 0xcc2   : > { %7490 = vmatpush.bf16.msra.mxu2 %v10985_v2  ;;  %v10991_v0 = vld [vmem:[#allocation32 + $0x20] sm:$0xff]  ;;  %v10990_v25 = vld [vmem:[#allocation32 + $0x18] sm:$0xff]  ;;  %v7313_v24 = vpack.c.b16 %v7308_v18, %v7308_v18  ;;  %v7314_v40 = vpack.c.b16 %v7310_v9, %v7310_v9  ;;  %v7315_v13 = vpack.c.b16 %v7312_v23, %v7312_v23  ;;  %v10989_v29 = vld [vmem:[#allocation32 + $0x10] sm:$0xff] }
 0xcc3   : > { %7573 = vmatpush.bf16.msra.mxu3 %v10993_v62  ;;  %v10964_v59 = vld [vmem:[#allocation29 + $0x8] sm:$0xff]  ;;  %v10963_v3 = vld [vmem:[#allocation29] sm:$0xff] }
 0xcc4   : > { %7465 = vmatpush.bf16.msra.mxu0 %v10968_v26  ;;  %v10972_v20 = vld [vmem:[#allocation29 + $0x48] sm:$0xff]  ;;  %v10971_v14 = vld [vmem:[#allocation29 + $0x40] sm:$0xff] }
 0xcc5   : > { %7478 = vmatpush.bf16.msra.mxu1 %v10976_v10  ;;  %v10980_v33 = vld [vmem:[#allocation29 + $0x88] sm:$0xff]  ;;  %v10979_v51 = vld [vmem:[#allocation29 + $0x80] sm:$0xff] }
 0xcc6   : > { %7491 = vmatpush.bf16.msra.mxu2 %v10984_v52  ;;  %v10988_v56 = vld [vmem:[#allocation32 + $0x8] sm:$0xff]  ;;  %v10987_v54 = vld [vmem:[#allocation32] sm:$0xff]  ;;  %v11345_v57 = vld [vmem:[#allocation30] ss:$0 sm:$0xff] }
 0xcc7   : > { %7574 = vmatpush.bf16.msra.mxu3 %v10992_v6  ;;  %v11346_v12 = vld [vmem:[#allocation33] ss:$0 sm:$0xff] }
 0xcc8   : > { %7466 = vmatpush.bf16.msra.mxu0 %v10967_v42 }
 0xcc9   : > { %7479 = vmatpush.bf16.msra.mxu1 %v10975_v19 }
 0xcca   : > { %7492 = vmatpush.bf16.msra.mxu2 %v10983_v16 }
 0xccb   : > { %7575 = vmatpush.bf16.msra.mxu3 %v10991_v0 }
 0xccc   : > { %7467 = vmatpush.bf16.msra.mxu0 %v10966_v48 }
 0xccd   : > { %7480 = vmatpush.bf16.msra.mxu1 %v10974_v44 }
 0xcce   : > { %7493 = vmatpush.bf16.msra.mxu2 %v10982_v11 }
 0xccf   : > { %7576 = vmatpush.bf16.msra.mxu3 %v10990_v25 }
 0xcd0   : > { %7468 = vmatpush.bf16.msra.mxu0 %v10965_v38 }
 0xcd1   : > { %7481 = vmatpush.bf16.msra.mxu1 %v10973_v22 }
 0xcd2   : > { %7494 = vmatpush.bf16.msra.mxu2 %v10981_v30 }
 0xcd3   : > { %7577 = vmatpush.bf16.msra.mxu3 %v10989_v29 }
 0xcd4   : > { %7469 = vmatpush.bf16.msra.mxu0 %v10964_v59 }
 0xcd5   : > { %7482 = vmatpush.bf16.msra.mxu1 %v10972_v20 }
 0xcd6   : > { %7495 = vmatpush.bf16.msra.mxu2 %v10980_v33 }
 0xcd7   : > { %7578 = vmatpush.bf16.msra.mxu3 %v10988_v56 }
 0xcd8   : > { %7470 = vmatpush.bf16.msra.mxu0 %v10963_v3 }
 0xcd9   : > { %7483 = vmatpush.bf16.msra.mxu1 %v10971_v14 }
 0xcda   : > { %7496 = vmatpush.bf16.msra.mxu2 %v10979_v51 }
 0xcdb   : > { %7471 = vmatmul.bf16.vlgmr.msra.gmra.mxu0 %v7313_v24  ;;  %7579 = vmatpush.bf16.msra.mxu3 %v10987_v54 }
 0xcdc   : > { %7484 = vmatmul.bf16.vlgmr.msra.gmra.mxu1 %v7314_v40 }
 0xcdd   : > { %7497 = vmatmul.bf16.vlgmr.msra.gmra.mxu2 %v7315_v13 }
 0xd58   : > { %v7472_v8 = vpop.f32.mrf.mxu0 }
 0xd59   : > { %v7485_v15 = vpop.f32.mrf.mxu1  ;;  %v7473_v34 = vadd.f32 %v11345_v57, %v7472_v8 }
 0xd5b   : > { %v7486_v32 = vadd.f32 %v7485_v15, %v7473_v34 }
 0xd60   : > { %v7498_v37 = vpop.f32.mrf.mxu2  ;;  %v7474_v53 = vpop.f32.mrf.mxu0 }
 0xd61   : > { %v7499_v17 = vadd.f32 %v7498_v37, %v7486_v32  ;;  %v7487_v1 = vpop.f32.mrf.mxu1 }
 0xd63   : > { %v7502_v39 = vmax.f32 %v7499_v17, 0.0 }
 0xd65   : > { %v7503_v43 = vpack.c.bf16 %v7502_v39, %v7502_v39 }
 0xd67   : > { %7580 = vmatmul.bf16.vlgmr.msra.gmra.mxu3 %v7503_v43 }
 0xd68   : > { %v7500_v28 = vpop.f32.mrf.mxu2 }
 0xdea   : > { %v7581_v47 = vpop.f32.mrf.mxu3 }
 0xdeb   : > { %v7582_v31 = vadd.f32 %v11346_v12, %v7581_v47 }
 0xded   : > { %7585 = vst [vmem:[#allocation35] sm:$0x3] %v7582_v31 }
 0xdf2   : > { %v7583_v46 = vpop.f32.mrf.mxu3 }
 0xdf3 PF: > { %s14770_s2 = sld [smem:[#allocation49_spill]]  ;;  %s12086_s3 = smov [#allocation35]  }
 0xdf4   : > { %s14772_s0 = sld [smem:[#allocation63_spill]]  ;;  %s7594_s19 = sshll.u32 %s12086_s3, 4  ;;  %s7595_s19 = int_to_ptr.vmem [resolvable:$true] %s7594_s19 }
 0xdf9   : > { %s14771_s28 = sadd.s32 4294967295, %s14770_s2  }
 0xdfa   : > { %p11180_p9 = scmp.eq.s32.totalorder %s14771_s28, 2  ;;  %s7596_s4 = sshll.u32 %s14772_s0, 4  ;;  %s7597_s4 = int_to_ptr.hbm [resolvable:$true] %s7596_s4 }
 0xdfc   : > { %11076 = dma.vmem_to_hbm [thread:$0]  (%p11180_p9), %s7595_s19, 32, %s7597_s4, [#allocation5]  }
 0xdfd   : > { %12032 = dma.done.wait (%p11180_p9), [#allocation5], 32  }
 0xdfe   : > { %12034 = vsyncadd (%p11180_p9), [#allocation5], 4294967264 }
 0xdff PF: > { %s14773_s1 = sld [smem:[#allocation49_spill]] }
 0xe05   : > { %s42_s23 = sadd.s32 1, %s14773_s1   ;;  %s14774_s1 = smov %s12041_s22 }
 0xe06   : > { %p39_p10 = scmp.ge.s32.totalorder %s42_s23, 5   ;;  %s14775_s22 = smov %s14777_s20 }
 0xe08   :  { %41 = sbr.rel (!%p39_p10) target bundleno = 26 (0x1a), region = 228 }
 0xe0d   :  { %7610 = vsyncpa [#allocation4], 1 }
 0xe0e   :  { %7612 = vsyncpa [#allocation4 + $0x1], 1 }
 0xe0f   :  { %7613 = vsyncpa [#allocation7], 1 }
 0xe10   :  { %7614 = vsyncpa [#allocation10], 1 }
 0xe11   :  { %7615 = vsyncpa [#allocation13], 1 }
 0xe12   :  { %7616 = vsyncpa [#allocation16], 1 }
 0xe13   :  { %7617 = vsyncpa [#allocation19], 1 }
 0xe14   :  { %7618 = vsyncpa [#allocation22], 1 }
 0xe15   :  { %7619 = vsyncpa [#allocation25], 1 }
 0xe16   :  { %7620 = vsyncpa [#allocation28], 1 }
 0xe17   :  { %7621 = vsyncpa [#allocation31], 1 }
 0xe18   :  { %7622 = vsyncpa [#allocation34], 1 }
 0xe19   :  { %7623 = vsyncpa [#allocation5], 1 }
 0xe1a   :  { %7625 = vsyncpa [#allocation5 + $0x1], 1 }

</bundles_post_ra>
